<compile_context>
chip_gen: v7x
topology: tpu7x:2x2x1
jax: 0.10.0
libtpu: 0.0.40
codegen_flags: <defaults>
</compile_context>

<pallas_src>
import math
from functools import partial

import numpy as np
import jax
import jax.numpy as jnp
from jax import lax
from jax.experimental import pallas as pl
from jax.experimental.pallas import tpu as pltpu

_VMEM_LIMIT = 64 * 1024 * 1024


def _round_up(x, m):
    return ((x + m - 1) // m) * m


# ----------------------------------------------------------------------------
# Kernel 1: K-tiled matmul, bf16 MXU operands, f32 VMEM accumulator.
# Used for the fused q/k/v/beta projection and the final o_proj.
# ----------------------------------------------------------------------------
def _matmul_kernel(x_ref, w_ref, o_ref, acc_ref):
    @pl.when(pl.program_id(2) == 0)
    def _():
        acc_ref[...] = jnp.zeros_like(acc_ref)

    acc_ref[...] += jnp.dot(
        x_ref[...].astype(jnp.bfloat16),
        w_ref[...].astype(jnp.bfloat16),
        preferred_element_type=jnp.float32)

    @pl.when(pl.program_id(2) == pl.num_programs(2) - 1)
    def _():
        o_ref[...] = acc_ref[...].astype(o_ref.dtype)


def pallas_matmul(x, w):
    """x (M, K) @ w (K, N).  Weights streamed in bf16, f32 accumulation."""
    M, K = x.shape
    Kw, N = w.shape
    assert K == Kw
    w = w.astype(jnp.bfloat16)

    # Generation-safe tile caps (v7x has only 64 MiB VMEM); pad to the tile
    # grid instead of hunting for divisors (no 8-wide fallback tiles).
    tm = min(256, _round_up(M, 8))
    tn = min(256, _round_up(N, 128))
    tk = min(512, _round_up(K, 128))
    Mp, Np, Kp = _round_up(M, tm), _round_up(N, tn), _round_up(K, tk)
    if (Mp, Kp) != (M, K):
        x = jnp.pad(x, ((0, Mp - M), (0, Kp - K)))
    if (Kp, Np) != (K, N):
        w = jnp.pad(w, ((0, Kp - K), (0, Np - N)))

    out = pl.pallas_call(
        _matmul_kernel,
        out_shape=jax.ShapeDtypeStruct((Mp, Np), x.dtype),
        grid_spec=pltpu.PrefetchScalarGridSpec(
            num_scalar_prefetch=0,
            grid=(Mp // tm, Np // tn, Kp // tk),
            in_specs=[
                pl.BlockSpec((tm, tk), lambda i, j, k: (i, k)),
                pl.BlockSpec((tk, tn), lambda i, j, k: (k, j)),
            ],
            out_specs=pl.BlockSpec((tm, tn), lambda i, j, k: (i, j)),
            scratch_shapes=[pltpu.VMEM((tm, tn), jnp.float32)],
        ),
        compiler_params=pltpu.CompilerParams(
            dimension_semantics=("parallel", "parallel", "arbitrary"),
            vmem_limit_bytes=_VMEM_LIMIT),
    )(x, w)
    if (Mp, Np) != (M, N):
        out = out[:M, :N]
    return out


# ----------------------------------------------------------------------------
# Kernel 2: causal depthwise conv1d + SiLU, channel-tiled, halo handled
# in-kernel (no wrapper-side HBM pad), rows >= valid_len zero-filled so the
# output is already chunk-padded for the delta kernel.
#   x : (B, L, C_total)   only lanes [0, n_channels) are convolved
#   w : (K, n_channels)   w[j, c] == torch conv weight[c, 0, j]
#   o : (B, out_len, n_channels)
# ----------------------------------------------------------------------------
def _causal_conv_silu_kernel(x_ref, w_ref, o_ref, *, valid_len):
    Lp, tc = o_ref.shape[1], o_ref.shape[2]
    Lin = x_ref.shape[1]
    Kc = w_ref.shape[0]

    xv = x_ref[0].astype(jnp.float32)                      # (Lin, tc)
    if Lp > Lin:                                           # fused right pad to Lp
        xv = jnp.concatenate(
            [xv, jnp.zeros((Lp - Lin, tc), jnp.float32)], axis=0)
    w = w_ref[...].astype(jnp.float32)                     # (Kc, tc)

    row = lax.broadcasted_iota(jnp.int32, (Lp, tc), 0)
    acc = xv * w[Kc - 1:Kc, :]                             # tap j = Kc-1, shift 0
    for j in range(Kc - 1):
        s = Kc - 1 - j                                     # causal shift of tap j
        # TODO(synk): this in-VMEM concat+slice shift could be a pltpu.roll on
        # the (otherwise idle) XLU slot; kept explicit for unambiguous semantics.
        shifted = jnp.concatenate(
            [jnp.zeros((s, tc), jnp.float32), xv[:Lp - s, :]], axis=0)
        acc = acc + shifted * w[j:j + 1, :]

    y = acc * jax.nn.sigmoid(acc)                          # SiLU
    o_ref[0] = jnp.where(row < valid_len, y, 0.0).astype(o_ref.dtype)


def pallas_causal_conv_silu(x, w, *, n_channels, out_len, valid_len):
    B, L, Ct = x.shape
    Kc, Cw = w.shape
    assert Cw == n_channels <= Ct
    tc = 128 if n_channels % 128 == 0 else n_channels
    kernel = partial(_causal_conv_silu_kernel, valid_len=valid_len)
    # TODO(synk): for very long sequences also tile L with a K-1 halo.
    return pl.pallas_call(
        kernel,
        out_shape=jax.ShapeDtypeStruct((B, out_len, n_channels), x.dtype),
        grid_spec=pltpu.PrefetchScalarGridSpec(
            num_scalar_prefetch=0,
            grid=(B, n_channels // tc),
            in_specs=[
                pl.BlockSpec((1, L, tc), lambda b, c: (b, 0, c)),
                pl.BlockSpec((Kc, tc), lambda b, c: (0, c)),
            ],
            out_specs=pl.BlockSpec((1, out_len, tc), lambda b, c: (b, 0, c)),
        ),
        compiler_params=pltpu.CompilerParams(
            dimension_semantics=("parallel", "parallel"),
            vmem_limit_bytes=_VMEM_LIMIT),
    )(x, w)


# ----------------------------------------------------------------------------
# Kernel 3: chunked delta rule, lane-dense (all heads on the lane axis), with
# fused sigmoid(beta), l2-normalization of q/k, 1/sqrt(D) scaling and RMSNorm.
# All matmul operands cast to bf16 (f32 accumulation); state carried in f32.
#   qkv  : (B, Lp, 3P)  block (1, C, 3P)   (P = H*head_dim)
#   beta : (B, Lp, HP)  pre-sigmoid logits, 128-lane padded (first H valid)
#   gamma: (1, D)       o_norm weight
#   out  : o (B, Lp, P) normalized per-head ; state (B, H*D, D) f32 (revisited)
# ----------------------------------------------------------------------------
def _delta_chunk_kernel(qkv_ref, b_ref, gw_ref, o_ref, s_ref, *,
                        chunk_size, num_heads, head_dim, eps):
    C, H, D = chunk_size, num_heads, head_dim
    P = H * D
    c = pl.program_id(1)

    @pl.when(c == 0)
    def _():
        # last_state is None in this forward -> zero-init the carried state.
        s_ref[...] = jnp.zeros(s_ref.shape, s_ref.dtype)

    # causal masks generated in-kernel (iota + compare; no streamed constants)
    row = lax.broadcasted_iota(jnp.int32, (C, C), 0)
    col = lax.broadcasted_iota(jnp.int32, (C, C), 1)
    tri_s = (row > col).astype(jnp.float32)          # strictly lower
    tri_c = (row >= col).astype(jnp.float32)         # lower incl. diagonal
    eye = (row == col).astype(jnp.float32)

    gamma = gw_ref[...].astype(jnp.float32)          # (1, D)
    qkv = qkv_ref[0].astype(jnp.float32)             # (C, 3P)
    beta_all = jax.nn.sigmoid(b_ref[0].astype(jnp.float32))   # (C, HP)

    scale = 1.0 / (D ** 0.5)
    # Neumann doubling: T starts at I + X (first doubling is a pure VPU add),
    # then n_extra squaring+update steps reach sum_{i<C} X^i exactly (X is
    # strictly lower triangular, hence nilpotent).
    n_extra = max(int(math.ceil(math.log2(C))) - 1, 0)
    # TODO(synk): a two-level blocked inverse (two C/2 inverses + one
    # off-diagonal correction) would cut inverse MXU MACs further.

    f32, bf16 = jnp.float32, jnp.bfloat16

    for h in range(H):
        q = qkv[:, h * D:(h + 1) * D]
        k = qkv[:, P + h * D:P + (h + 1) * D]
        v = qkv[:, 2 * P + h * D:2 * P + (h + 1) * D]
        beta = beta_all[:, h:h + 1]                  # (C, 1)

        # fused l2-normalization over head_dim + q scale.  NOTE: correctness of
        # the padded tail rows relies on the conv kernel zero-filling rows >= L
        # (then q=k=v=0 here and the pad rows never touch the state).
        qss = jnp.sum(q * q, axis=-1, keepdims=True)
        kss = jnp.sum(k * k, axis=-1, keepdims=True)
        q = q * jnp.where(qss > 0.0, lax.rsqrt(qss), 0.0) * scale
        k = k * jnp.where(kss > 0.0, lax.rsqrt(kss), 0.0)
        kb = k * beta
        vb = v * beta

        q_b, k_b = q.astype(bf16), k.astype(bf16)
        kb_b, vb_b = kb.astype(bf16), vb.astype(bf16)

        # X = -tril(kb k^T, -1)   (contract last dims -> no explicit transpose)
        X = -(lax.dot_general(kb_b, k_b, (((1,), (1,)), ((), ())),
                              preferred_element_type=f32) * tri_s)
        T = eye + X                                  # covers powers < 2 for free
        Pm = X
        for _ in range(n_extra):
            Pm = jnp.dot(Pm.astype(bf16), Pm.astype(bf16),
                         preferred_element_type=f32)
            T = T + jnp.dot(Pm.astype(bf16), T.astype(bf16),
                            preferred_element_type=f32)

        T_b = T.astype(bf16)
        W = jnp.dot(T_b, kb_b, preferred_element_type=f32)        # (C, D)
        U = jnp.dot(T_b, vb_b, preferred_element_type=f32)        # (C, D)

        S = s_ref[0, h * D:(h + 1) * D, :]                        # (D, D) f32
        S_b = S.astype(bf16)

        # UWS = U - W S^T
        UWS = U - lax.dot_general(W.astype(bf16), S_b,
                                  (((1,), (1,)), ((), ())),
                                  preferred_element_type=f32)

        # qk = tril(q k^T) ;  O = q S^T + qk @ UWS
        qk = lax.dot_general(q_b, k_b, (((1,), (1,)), ((), ())),
                             preferred_element_type=f32) * tri_c
        O = (lax.dot_general(q_b, S_b, (((1,), (1,)), ((), ())),
                             preferred_element_type=f32)
             + jnp.dot(qk.astype(bf16), UWS.astype(bf16),
                       preferred_element_type=f32))

        # fused RMSNorm (o_norm); write this head's lanes directly.
        ms = jnp.mean(O * O, axis=-1, keepdims=True)
        o_ref[0, :, h * D:(h + 1) * D] = (
            O * lax.rsqrt(ms + eps) * gamma).astype(o_ref.dtype)

        # state update: S <- S + UWS^T K  (contract chunk axis of both)
        s_ref[0, h * D:(h + 1) * D, :] = S + lax.dot_general(
            UWS.astype(bf16), k_b, (((0,), (0,)), ((), ())),
            preferred_element_type=f32)


def pallas_delta_chunk(qkv, beta_logits, gamma, *, num_heads, head_dim,
                       chunk_size, eps):
    B, Lp, C3 = qkv.shape
    H, D, C = num_heads, head_dim, chunk_size
    P = H * D
    assert C3 == 3 * P and Lp % C == 0
    n_chunks = Lp // C
    HP = beta_logits.shape[-1]
    kernel = partial(_delta_chunk_kernel, chunk_size=C, num_heads=H,
                     head_dim=D, eps=eps)
    # TODO(synk): add a parallel head-group grid axis (interleaved per-head qkv
    # lane layout) so v7x's second TensorCore is busy when B == 1.
    # TODO(synk): sweep chunk_size 64 vs 128 on v6e/v7x (256-wide MXU).
    return pl.pallas_call(
        kernel,
        out_shape=(
            jax.ShapeDtypeStruct((B, Lp, P), qkv.dtype),
            jax.ShapeDtypeStruct((B, H * D, D), jnp.float32),
        ),
        grid_spec=pltpu.PrefetchScalarGridSpec(
            num_scalar_prefetch=0,
            grid=(B, n_chunks),
            in_specs=[
                pl.BlockSpec((1, C, 3 * P), lambda b, c: (b, c, 0)),
                pl.BlockSpec((1, C, HP), lambda b, c: (b, c, 0)),
                pl.BlockSpec((1, D), lambda b, c: (0, 0)),
            ],
            out_specs=[
                pl.BlockSpec((1, C, P), lambda b, c: (b, c, 0)),
                pl.BlockSpec((1, H * D, D), lambda b, c: (b, 0, 0)),  # revisited
            ],
        ),
        compiler_params=pltpu.CompilerParams(
            dimension_semantics=("parallel", "arbitrary"),
            vmem_limit_bytes=_VMEM_LIMIT),
    )(qkv, beta_logits, gamma)


# ----------------------------------------------------------------------------
# Full forward
# ----------------------------------------------------------------------------
def deltanet_forward(x, params, *, num_heads, head_dim, conv_size, chunk_size,
                     norm_eps):
    B, L, Dh = x.shape
    H, hd, C, Kc = num_heads, head_dim, chunk_size, conv_size
    P = H * hd
    HP = _round_up(H, 128)          # lane-aligned beta section of the fused proj

    # fused q/k/v/beta projection (beta columns zero-padded to a 128-lane slab)
    w_all = jnp.concatenate(
        [params['wq'].T, params['wk'].T, params['wv'].T,
         jnp.pad(params['wb'].T, ((0, 0), (0, HP - H)))], axis=1)  # (Dh, 3P+HP)
    proj = pallas_matmul(x.reshape(B * L, Dh), w_all)              # (B*L, 3P+HP)
    proj3 = proj.reshape(B, L, 3 * P + HP)

    Lp = _round_up(L, C)

    # causal depthwise conv + SiLU on the q/k/v lanes of proj3 (read in place,
    # no wrapper-side slice/pad of the big activation); rows >= L are zeroed so
    # the output is already chunk-padded to Lp.
    wc = jnp.concatenate(
        [params['wq_conv'], params['wk_conv'], params['wv_conv']],
        axis=0).T                                                  # (K, 3P)
    conv_in = proj3 if (3 * P) % 128 == 0 else proj3[:, :, :3 * P]
    yc = pallas_causal_conv_silu(conv_in, wc, n_channels=3 * P,
                                 out_len=Lp, valid_len=L)          # (B, Lp, 3P)

    # beta logits stay at the padded 128-lane width (sigmoid fused in-kernel);
    # the small row-pad to Lp is harmless: pad rows have k = v = 0.
    bp = jnp.pad(proj3[:, :, 3 * P:], ((0, 0), (0, Lp - L), (0, 0)))  # (B,Lp,HP)

    gamma = params['o_norm_w'].reshape(1, hd).astype(jnp.float32)

    o_n, s_fin = pallas_delta_chunk(
        yc, bp, gamma, num_heads=H, head_dim=hd, chunk_size=C, eps=norm_eps)

    o = o_n[:, :L].reshape(B * L, P)        # lane layout == (H, hd) flattened
    out = pallas_matmul(o, params['wo'].T).reshape(B, L, Dh)
    last_state = s_fin.reshape(B, H, hd, hd)
    return out, last_state


# ----------------------------------------------------------------------------
# Pure-JAX reference (mirrors the PyTorch module op-for-op) for self-check
# ----------------------------------------------------------------------------
def deltanet_ref(x, params, *, num_heads, head_dim, conv_size, chunk_size,
                 norm_eps):
    B, L, Dh = x.shape
    H, hd, C, K = num_heads, head_dim, chunk_size, conv_size
    P = H * hd

    q = x.reshape(B * L, Dh) @ params['wq'].T
    k = x.reshape(B * L, Dh) @ params['wk'].T
    v = x.reshape(B * L, Dh) @ params['wv'].T
    q, k, v = (t.reshape(B, L, P) for t in (q, k, v))

    def conv_silu(t, w):                 # t (B,L,P), w (P,K)
        tc = jnp.transpose(t, (0, 2, 1))     # NCL
        y = lax.conv_general_dilated(
            tc, w[:, None, :], window_strides=(1,), padding=[(K - 1, K - 1)],
            dimension_numbers=('NCH', 'OIH', 'NCH'), feature_group_count=P)
        y = jax.nn.silu(y[:, :, :L])
        return jnp.transpose(y, (0, 2, 1))

    k = conv_silu(k, params['wk_conv'])
    q = conv_silu(q, params['wq_conv'])
    v = conv_silu(v, params['wv_conv'])

    q, k, v = (t.reshape(B, L, H, hd) for t in (q, k, v))
    k = k / jnp.linalg.norm(k, axis=-1, keepdims=True)
    q = q / jnp.linalg.norm(q, axis=-1, keepdims=True)
    beta = jax.nn.sigmoid(x.reshape(B * L, Dh) @ params['wb'].T).reshape(B, L, H)

    tr = lambda t: jnp.transpose(t, (0, 2, 1, 3))
    qc, kc, vc = tr(q), tr(k), tr(v)                        # (B,H,L,hd)
    betac = jnp.transpose(beta, (0, 2, 1))[..., None]       # (B,H,L,1)

    n_chunks = math.ceil(L / C)
    last = L % C
    pad = C - last if last > 0 else 0
    if pad:
        pf = lambda t: jnp.pad(t, ((0, 0), (0, 0), (0, pad), (0, 0)))
        qc, kc, vc, betac = map(pf, (qc, kc, vc, betac))
    qc = qc / (hd ** 0.5)

    S = jnp.zeros((B, H, hd, hd), x.dtype)
    I = jnp.eye(C, dtype=x.dtype)
    M = jnp.tril(jnp.ones((C, C), x.dtype))
    o = jnp.zeros((B, L, H, hd), x.dtype)
    for idx in range(n_chunks):
        sl = slice(idx * C, (idx + 1) * C)
        Q, Kk, V, Bb = qc[:, :, sl], kc[:, :, sl], vc[:, :, sl], betac[:, :, sl]
        K_beta, V_beta = Kk * Bb, V * Bb
        A = I + jnp.tril(K_beta @ jnp.swapaxes(Kk, -1, -2), -1)
        T = jax.scipy.linalg.solve_triangular(A, jnp.broadcast_to(I, A.shape),
                                              lower=True)
        W, U = T @ K_beta, T @ V_beta
        St = jnp.swapaxes(S, -1, -2)
        O = Q @ St + (Q @ jnp.swapaxes(Kk, -1, -2) * M) @ (U - W @ St)
        O = jnp.moveaxis(O, 2, 1)
        start, end = idx * C, min((idx + 1) * C, L)
        if idx == n_chunks - 1 and last > 0:
            O = O[:, :last]
        o = o.at[:, start:end].set(O)
        S = S + jnp.swapaxes(U - W @ St, -1, -2) @ Kk

    ms = jnp.mean(o * o, axis=-1, keepdims=True)
    o = o * lax.rsqrt(ms + norm_eps) * params['o_norm_w']
    out = (o.reshape(B * L, P) @ params['wo'].T).reshape(B, L, Dh)
    return out, S


# ----------------------------------------------------------------------------
def init_params(key, hidden, heads, head_dim, conv_size):
    P = heads * head_dim
    ks = jax.random.split(key, 8)
    s = 0.08
    n = lambda k, shp: s * jax.random.normal(k, shp, jnp.float32)
    return dict(
        wq=n(ks[0], (P, hidden)),            # torch nn.Linear weight layout (out, in)
        wk=n(ks[1], (P, hidden)),
        wv=n(ks[2], (P, hidden)),
        wb=n(ks[3], (heads, hidden)),
        wq_conv=n(ks[4], (P, conv_size)),    # depthwise conv weight[c, 0, j], squeezed
        wk_conv=n(ks[5], (P, conv_size)),
        wv_conv=n(ks[6], (P, conv_size)),
        wo=n(ks[7], (hidden, P)),
        o_norm_w=jnp.ones((head_dim,), jnp.float32),
    )


if __name__ == "__main__":
    hidden, heads, conv_size, chunk_size, eps = 128, 4, 4, 64, 1e-5
    head_dim = hidden // heads
    B, L = 2, 100     # L not a multiple of chunk_size -> exercises the padding path

    key = jax.random.PRNGKey(0)
    kx, kp = jax.random.split(key)
    x = jax.random.normal(kx, (B, L, hidden), jnp.float32)
    params = init_params(kp, hidden, heads, head_dim, conv_size)

    cfg = dict(num_heads=heads, head_dim=head_dim, conv_size=conv_size,
               chunk_size=chunk_size, norm_eps=eps)

    fwd = jax.jit(lambda xx: deltanet_forward(xx, params, **cfg))
    out, state = fwd(x)
    jax.block_until_ready((out, state))

    ref_out, ref_state = jax.jit(lambda xx: deltanet_ref(xx, params, **cfg))(x)
    jax.block_until_ready((ref_out, ref_state))

    # bf16 MXU operands (f32 accumulation) in the Pallas path vs f32 reference
    # -> slightly looser tolerance than an all-f32 comparison.
    np.testing.assert_allclose(np.asarray(out), np.asarray(ref_out),
                               rtol=5e-2, atol=5e-2)
    np.testing.assert_allclose(np.asarray(state), np.asarray(ref_state),
                               rtol=5e-2, atol=2e-2)

    assert out.shape == (B, L, hidden)
    assert state.shape == (B, heads, head_dim, head_dim)
    print("KERNEL_OK")
</pallas_src>

<mosaic_0001>
module attributes {stable_mosaic.version = 11 : i64} {
  func.func @_matmul_kernel(%arg0: i32, %arg1: i32, %arg2: i32, %arg3: memref<200x128xf32, #tpu.memory_space<vmem>>, %arg4: memref<128x256xbf16, #tpu.memory_space<vmem>>, %arg5: memref<200x256xf32, #tpu.memory_space<vmem>>, %arg6: memref<200x256xf32, #tpu.memory_space<vmem>>) attributes {dimension_semantics = [#tpu.dimension_semantics<parallel>, #tpu.dimension_semantics<parallel>, #tpu.dimension_semantics<arbitrary>], iteration_bounds = array<i64: 1, 2, 1>, scalar_prefetch = 0 : i64, scratch_operands = 1 : i64, tpu.core_type = #tpu.core_type<tc>, window_params = [{transform_indices = @transform_0, window_bounds = array<i64: 200, 128>}, {transform_indices = @transform_1, window_bounds = array<i64: 128, 256>}, {transform_indices = @transform_2, window_bounds = array<i64: 200, 256>}]} {
    %c0_i32 = arith.constant 0 : i32
    %0 = arith.cmpi eq, %arg2, %c0_i32 : i32
    %1 = arith.extui %0 : i1 to i32
    %c0_i32_0 = arith.constant 0 : i32
    %2 = arith.cmpi ne, %1, %c0_i32_0 : i32
    scf.if %2 {
      %cst_10 = arith.constant 0.000000e+00 : f32
      %13 = vector.broadcast %cst_10 : f32 to vector<200x256xf32>
      %c0_11 = arith.constant 0 : index
      %c0_12 = arith.constant 0 : index
      %14 = vector.load %arg6[%c0_11, %c0_12] : memref<200x256xf32, #tpu.memory_space<vmem>>, vector<200x256xf32>
      tpu.vector_store %arg6[%c0_11, %c0_12], %13 {strides = array<i32>} : memref<200x256xf32, #tpu.memory_space<vmem>>, vector<200x256xf32>,
    } else {
    }
    %c0 = arith.constant 0 : index
    %c0_1 = arith.constant 0 : index
    %3 = vector.load %arg6[%c0, %c0_1] : memref<200x256xf32, #tpu.memory_space<vmem>>, vector<200x256xf32>
    %c0_2 = arith.constant 0 : index
    %c0_3 = arith.constant 0 : index
    %4 = vector.load %arg3[%c0_2, %c0_3] : memref<200x128xf32, #tpu.memory_space<vmem>>, vector<200x128xf32>
    %5 = arith.truncf %4 : vector<200x128xf32> to vector<200x128xbf16>
    %c0_4 = arith.constant 0 : index
    %c0_5 = arith.constant 0 : index
    %6 = vector.load %arg4[%c0_4, %c0_5] : memref<128x256xbf16, #tpu.memory_space<vmem>>, vector<128x256xbf16>
    %cst = arith.constant dense<0.000000e+00> : vector<200x256xf32>
    %7 = tpu.matmul %5, %6, %cst {dimension_numbers = #tpu.dot_dimension_numbers<[1], [0], [0], [1], [0, 0, 1, 1], [], []>} : vector<200x128xbf16>, vector<128x256xbf16>, vector<200x256xf32> -> vector<200x256xf32>
    %8 = arith.addf %3, %7 : vector<200x256xf32>
    %c0_6 = arith.constant 0 : index
    %c0_7 = arith.constant 0 : index
    %9 = vector.load %arg6[%c0_6, %c0_7] : memref<200x256xf32, #tpu.memory_space<vmem>>, vector<200x256xf32>
    tpu.vector_store %arg6[%c0_6, %c0_7], %8 {strides = array<i32>} : memref<200x256xf32, #tpu.memory_space<vmem>>, vector<200x256xf32>,
    %c0_i32_8 = arith.constant 0 : i32
    %10 = arith.cmpi eq, %arg2, %c0_i32_8 : i32
    %11 = arith.extui %10 : i1 to i32
    %c0_i32_9 = arith.constant 0 : i32
    %12 = arith.cmpi ne, %11, %c0_i32_9 : i32
    scf.if %12 {
      %c0_10 = arith.constant 0 : index
      %c0_11 = arith.constant 0 : index
      %13 = vector.load %arg6[%c0_10, %c0_11] : memref<200x256xf32, #tpu.memory_space<vmem>>, vector<200x256xf32>
      %c0_12 = arith.constant 0 : index
      %c0_13 = arith.constant 0 : index
      %14 = vector.load %arg5[%c0_12, %c0_13] : memref<200x256xf32, #tpu.memory_space<vmem>>, vector<200x256xf32>
      tpu.vector_store %arg5[%c0_12, %c0_13], %13 {strides = array<i32>} : memref<200x256xf32, #tpu.memory_space<vmem>>, vector<200x256xf32>,
    } else {
    }
    return
  }
  func.func @transform_0(%arg0: i32, %arg1: i32, %arg2: i32) -> (i32, i32) {
    %c0_i32 = arith.constant 0 : i32
    return %arg0, %arg2 : i32, i32
  }
  func.func @transform_1(%arg0: i32, %arg1: i32, %arg2: i32) -> (i32, i32) {
    %c0_i32 = arith.constant 0 : i32
    return %arg2, %arg1 : i32, i32
  }
  func.func @transform_2(%arg0: i32, %arg1: i32, %arg2: i32) -> (i32, i32) {
    %c0_i32 = arith.constant 0 : i32
    return %arg0, %arg1 : i32, i32
  }
}

module attributes {stable_mosaic.version = 11 : i64} {
  func.func @_causal_conv_silu_kernel(%arg0: i32, %arg1: i32, %arg2: memref<1x100x128xf32, #tpu.memory_space<vmem>>, %arg3: memref<4x128xf32, #tpu.memory_space<vmem>>, %arg4: memref<1x128x128xf32, #tpu.memory_space<vmem>>) attributes {dimension_semantics = [#tpu.dimension_semantics<parallel>, #tpu.dimension_semantics<parallel>], iteration_bounds = array<i64: 2, 3>, scalar_prefetch = 0 : i64, scratch_operands = 0 : i64, tpu.core_type = #tpu.core_type<tc>, window_params = [{transform_indices = @transform_0, window_bounds = array<i64: 1, 100, 128>}, {transform_indices = @transform_1, window_bounds = array<i64: 4, 128>}, {transform_indices = @transform_2, window_bounds = array<i64: 1, 128, 128>}]} {
    %c0 = arith.constant 0 : index
    %c0_0 = arith.constant 0 : index
    %c0_1 = arith.constant 0 : index
    %0 = vector.load %arg2[%c0, %c0_0, %c0_1] : memref<1x100x128xf32, #tpu.memory_space<vmem>>, vector<1x100x128xf32>
    %1 = vector.shape_cast %0 : vector<1x100x128xf32> to vector<100x128xf32>
    %cst = arith.constant 0.000000e+00 : f32
    %2 = vector.broadcast %cst : f32 to vector<28x128xf32>
    %3 = tpu.concatenate %1, %2 in 0 : vector<100x128xf32>, vector<28x128xf32> -> vector<128x128xf32>
    %c0_2 = arith.constant 0 : index
    %c0_3 = arith.constant 0 : index
    %4 = vector.load %arg3[%c0_2, %c0_3] : memref<4x128xf32, #tpu.memory_space<vmem>>, vector<4x128xf32>
    %5 = tpu.iota {dimensions = array<i32: 0>} : vector<128x128xi32>
    %6 = vector.extract_strided_slice %4 {offsets = [3, 0], sizes = [1, 128], strides = [1, 1]} : vector<4x128xf32> to vector<1x128xf32>
    %7 = vector.broadcast %6 : vector<1x128xf32> to vector<128x128xf32>
    %8 = arith.mulf %3, %7 : vector<128x128xf32>
    %cst_4 = arith.constant 0.000000e+00 : f32
    %9 = vector.broadcast %cst_4 : f32 to vector<3x128xf32>
    %10 = vector.extract_strided_slice %3 {offsets = [0, 0], sizes = [125, 128], strides = [1, 1]} : vector<128x128xf32> to vector<125x128xf32>
    %11 = tpu.concatenate %9, %10 in 0 : vector<3x128xf32>, vector<125x128xf32> -> vector<128x128xf32>
    %12 = vector.extract_strided_slice %4 {offsets = [0, 0], sizes = [1, 128], strides = [1, 1]} : vector<4x128xf32> to vector<1x128xf32>
    %13 = vector.broadcast %12 : vector<1x128xf32> to vector<128x128xf32>
    %14 = arith.mulf %11, %13 : vector<128x128xf32>
    %15 = arith.addf %8, %14 : vector<128x128xf32>
    %cst_5 = arith.constant 0.000000e+00 : f32
    %16 = vector.broadcast %cst_5 : f32 to vector<2x128xf32>
    %17 = vector.extract_strided_slice %3 {offsets = [0, 0], sizes = [126, 128], strides = [1, 1]} : vector<128x128xf32> to vector<126x128xf32>
    %18 = tpu.concatenate %16, %17 in 0 : vector<2x128xf32>, vector<126x128xf32> -> vector<128x128xf32>
    %19 = vector.extract_strided_slice %4 {offsets = [1, 0], sizes = [1, 128], strides = [1, 1]} : vector<4x128xf32> to vector<1x128xf32>
    %20 = vector.broadcast %19 : vector<1x128xf32> to vector<128x128xf32>
    %21 = arith.mulf %18, %20 : vector<128x128xf32>
    %22 = arith.addf %15, %21 : vector<128x128xf32>
    %cst_6 = arith.constant 0.000000e+00 : f32
    %23 = vector.broadcast %cst_6 : f32 to vector<1x128xf32>
    %24 = vector.extract_strided_slice %3 {offsets = [0, 0], sizes = [127, 128], strides = [1, 1]} : vector<128x128xf32> to vector<127x128xf32>
    %25 = tpu.concatenate %23, %24 in 0 : vector<1x128xf32>, vector<127x128xf32> -> vector<128x128xf32>
    %26 = vector.extract_strided_slice %4 {offsets = [2, 0], sizes = [1, 128], strides = [1, 1]} : vector<4x128xf32> to vector<1x128xf32>
    %27 = vector.broadcast %26 : vector<1x128xf32> to vector<128x128xf32>
    %28 = arith.mulf %25, %27 : vector<128x128xf32>
    %29 = arith.addf %22, %28 : vector<128x128xf32>
    %30 = arith.negf %29 : vector<128x128xf32>
    %31 = math.exp %30 : vector<128x128xf32>
    %cst_7 = arith.constant 1.000000e+00 : f32
    %32 = vector.broadcast %cst_7 : f32 to vector<128x128xf32>
    %33 = arith.addf %32, %31 : vector<128x128xf32>
    %34 = arith.divf %32, %33 : vector<128x128xf32>
    %35 = arith.mulf %29, %34 : vector<128x128xf32>
    %c100_i32 = arith.constant 100 : i32
    %36 = vector.broadcast %c100_i32 : i32 to vector<128x128xi32>
    %37 = arith.cmpi slt, %5, %36 : vector<128x128xi32>
    %cst_8 = arith.constant 0.000000e+00 : f32
    %38 = vector.broadcast %cst_8 : f32 to vector<128x128xf32>
    %39 = arith.select %37, %35, %38 : vector<128x128xi1>, vector<128x128xf32>
    %c0_9 = arith.constant 0 : index
    %c0_10 = arith.constant 0 : index
    %c0_11 = arith.constant 0 : index
    %40 = vector.load %arg4[%c0_9, %c0_10, %c0_11] : memref<1x128x128xf32, #tpu.memory_space<vmem>>, vector<1x128x128xf32>
    %41 = vector.shape_cast %40 : vector<1x128x128xf32> to vector<128x128xf32>
    %42 = vector.shape_cast %39 : vector<128x128xf32> to vector<1x128x128xf32>
    tpu.vector_store %arg4[%c0_9, %c0_10, %c0_11], %42 {strides = array<i32>} : memref<1x128x128xf32, #tpu.memory_space<vmem>>, vector<1x128x128xf32>,
    return
  }
  func.func @transform_0(%arg0: i32, %arg1: i32) -> (i32, i32, i32) {
    %c0_i32 = arith.constant 0 : i32
    %c0_i32_0 = arith.constant 0 : i32
    return %arg0, %c0_i32, %arg1 : i32, i32, i32
  }
  func.func @transform_1(%arg0: i32, %arg1: i32) -> (i32, i32) {
    %c0_i32 = arith.constant 0 : i32
    %c0_i32_0 = arith.constant 0 : i32
    return %c0_i32, %arg1 : i32, i32
  }
  func.func @transform_2(%arg0: i32, %arg1: i32) -> (i32, i32, i32) {
    %c0_i32 = arith.constant 0 : i32
    %c0_i32_0 = arith.constant 0 : i32
    return %arg0, %c0_i32, %arg1 : i32, i32, i32
  }
}

module attributes {stable_mosaic.version = 11 : i64} {
  func.func @_delta_chunk_kernel(%arg0: i32, %arg1: i32, %arg2: memref<1x64x384xf32, #tpu.memory_space<vmem>>, %arg3: memref<1x64x128xf32, #tpu.memory_space<vmem>>, %arg4: memref<1x32xf32, #tpu.memory_space<vmem>>, %arg5: memref<1x64x128xf32, #tpu.memory_space<vmem>>, %arg6: memref<1x128x32xf32, #tpu.memory_space<vmem>>) attributes {dimension_semantics = [#tpu.dimension_semantics<parallel>, #tpu.dimension_semantics<arbitrary>], iteration_bounds = array<i64: 2, 2>, scalar_prefetch = 0 : i64, scratch_operands = 0 : i64, tpu.core_type = #tpu.core_type<tc>, window_params = [{transform_indices = @transform_0, window_bounds = array<i64: 1, 64, 384>}, {transform_indices = @transform_1, window_bounds = array<i64: 1, 64, 128>}, {pipeline_mode = #tpu.pipeline_mode<synchronous>, transform_indices = @transform_2, window_bounds = array<i64: 1, 32>}, {transform_indices = @transform_3, window_bounds = array<i64: 1, 64, 128>}, {transform_indices = @transform_4, window_bounds = array<i64: 1, 128, 32>}]} {
    %c0_i32 = arith.constant 0 : i32
    %0 = arith.cmpi eq, %arg1, %c0_i32 : i32
    %1 = arith.extui %0 : i1 to i32
    %c0_i32_0 = arith.constant 0 : i32
    %2 = arith.cmpi ne, %1, %c0_i32_0 : i32
    scf.if %2 {
      %cst_157 = arith.constant 0.000000e+00 : f32
      %468 = vector.broadcast %cst_157 : f32 to vector<1x128x32xf32>
      %c0_158 = arith.constant 0 : index
      %c0_159 = arith.constant 0 : index
      %c0_160 = arith.constant 0 : index
      %469 = vector.load %arg6[%c0_158, %c0_159, %c0_160] : memref<1x128x32xf32, #tpu.memory_space<vmem>>, vector<1x128x32xf32>
      tpu.vector_store %arg6[%c0_158, %c0_159, %c0_160], %468 {strides = array<i32>} : memref<1x128x32xf32, #tpu.memory_space<vmem>>, vector<1x128x32xf32>,
    } else {
    }
    %3 = tpu.iota {dimensions = array<i32: 0>} : vector<64x64xi32>
    %4 = tpu.iota {dimensions = array<i32: 1>} : vector<64x64xi32>
    %5 = arith.cmpi sgt, %3, %4 : vector<64x64xi32>
    %6 = arith.extui %5 : vector<64x64xi1> to vector<64x64xi32>
    %7 = arith.sitofp %6 : vector<64x64xi32> to vector<64x64xf32>
    %8 = arith.cmpi sge, %3, %4 : vector<64x64xi32>
    %9 = arith.extui %8 : vector<64x64xi1> to vector<64x64xi32>
    %10 = arith.sitofp %9 : vector<64x64xi32> to vector<64x64xf32>
    %11 = arith.cmpi eq, %3, %4 : vector<64x64xi32>
    %12 = arith.extui %11 : vector<64x64xi1> to vector<64x64xi32>
    %13 = arith.sitofp %12 : vector<64x64xi32> to vector<64x64xf32>
    %c0 = arith.constant 0 : index
    %c0_1 = arith.constant 0 : index
    %14 = vector.load %arg4[%c0, %c0_1] : memref<1x32xf32, #tpu.memory_space<vmem>>, vector<1x32xf32>
    %c0_2 = arith.constant 0 : index
    %c0_3 = arith.constant 0 : index
    %c0_4 = arith.constant 0 : index
    %15 = vector.load %arg2[%c0_2, %c0_3, %c0_4] : memref<1x64x384xf32, #tpu.memory_space<vmem>>, vector<1x64x384xf32>
    %16 = vector.shape_cast %15 : vector<1x64x384xf32> to vector<64x384xf32>
    %c0_5 = arith.constant 0 : index
    %c0_6 = arith.constant 0 : index
    %c0_7 = arith.constant 0 : index
    %17 = vector.load %arg3[%c0_5, %c0_6, %c0_7] : memref<1x64x128xf32, #tpu.memory_space<vmem>>, vector<1x64x128xf32>
    %18 = vector.shape_cast %17 : vector<1x64x128xf32> to vector<64x128xf32>
    %19 = arith.negf %18 : vector<64x128xf32>
    %20 = math.exp %19 : vector<64x128xf32>
    %cst = arith.constant 1.000000e+00 : f32
    %21 = vector.broadcast %cst : f32 to vector<64x128xf32>
    %22 = arith.addf %21, %20 : vector<64x128xf32>
    %23 = arith.divf %21, %22 : vector<64x128xf32>
    %24 = vector.extract_strided_slice %16 {offsets = [0, 0], sizes = [64, 32], strides = [1, 1]} : vector<64x384xf32> to vector<64x32xf32>
    %25 = vector.extract_strided_slice %16 {offsets = [0, 128], sizes = [64, 32], strides = [1, 1]} : vector<64x384xf32> to vector<64x32xf32>
    %26 = vector.extract_strided_slice %16 {offsets = [0, 256], sizes = [64, 32], strides = [1, 1]} : vector<64x384xf32> to vector<64x32xf32>
    %27 = vector.extract_strided_slice %23 {offsets = [0, 0], sizes = [64, 1], strides = [1, 1]} : vector<64x128xf32> to vector<64x1xf32>
    %28 = arith.mulf %24, %24 : vector<64x32xf32>
    %cst_8 = arith.constant dense<0.000000e+00> : vector<64xf32>
    %29 = vector.multi_reduction <add>, %28, %cst_8 [1] : vector<64x32xf32> to vector<64xf32>
    %30 = vector.shape_cast %29 : vector<64xf32> to vector<64x1xf32>
    %31 = arith.mulf %25, %25 : vector<64x32xf32>
    %cst_9 = arith.constant dense<0.000000e+00> : vector<64xf32>
    %32 = vector.multi_reduction <add>, %31, %cst_9 [1] : vector<64x32xf32> to vector<64xf32>
    %33 = vector.shape_cast %32 : vector<64xf32> to vector<64x1xf32>
    %cst_10 = arith.constant 0.000000e+00 : f32
    %34 = vector.broadcast %cst_10 : f32 to vector<64x1xf32>
    %35 = arith.cmpf ogt, %30, %34 : vector<64x1xf32>
    %36 = math.rsqrt %30 : vector<64x1xf32>
    %cst_11 = arith.constant 0.000000e+00 : f32
    %37 = vector.broadcast %cst_11 : f32 to vector<64x1xf32>
    %38 = arith.select %35, %36, %37 : vector<64x1xi1>, vector<64x1xf32>
    %39 = vector.broadcast %38 : vector<64x1xf32> to vector<64x32xf32>
    %40 = arith.mulf %24, %39 : vector<64x32xf32>
    %cst_12 = arith.constant 0.176776692 : f32
    %41 = vector.broadcast %cst_12 : f32 to vector<64x32xf32>
    %42 = arith.mulf %40, %41 : vector<64x32xf32>
    %cst_13 = arith.constant 0.000000e+00 : f32
    %43 = vector.broadcast %cst_13 : f32 to vector<64x1xf32>
    %44 = arith.cmpf ogt, %33, %43 : vector<64x1xf32>
    %45 = math.rsqrt %33 : vector<64x1xf32>
    %cst_14 = arith.constant 0.000000e+00 : f32
    %46 = vector.broadcast %cst_14 : f32 to vector<64x1xf32>
    %47 = arith.select %44, %45, %46 : vector<64x1xi1>, vector<64x1xf32>
    %48 = vector.broadcast %47 : vector<64x1xf32> to vector<64x32xf32>
    %49 = arith.mulf %25, %48 : vector<64x32xf32>
    %50 = vector.broadcast %27 : vector<64x1xf32> to vector<64x32xf32>
    %51 = arith.mulf %49, %50 : vector<64x32xf32>
    %52 = vector.broadcast %27 : vector<64x1xf32> to vector<64x32xf32>
    %53 = arith.mulf %26, %52 : vector<64x32xf32>
    %54 = arith.truncf %42 : vector<64x32xf32> to vector<64x32xbf16>
    %55 = arith.truncf %49 : vector<64x32xf32> to vector<64x32xbf16>
    %56 = arith.truncf %51 : vector<64x32xf32> to vector<64x32xbf16>
    %57 = arith.truncf %53 : vector<64x32xf32> to vector<64x32xbf16>
    %cst_15 = arith.constant dense<0.000000e+00> : vector<64x64xf32>
    %58 = tpu.matmul %56, %55, %cst_15 {dimension_numbers = #tpu.dot_dimension_numbers<[1], [1], [0], [0], [0, 0, 1, 0], [], []>} : vector<64x32xbf16>, vector<64x32xbf16>, vector<64x64xf32> -> vector<64x64xf32>
    %59 = arith.mulf %58, %7 : vector<64x64xf32>
    %cst_16 = arith.constant 0.000000e+00 : f32
    %60 = vector.broadcast %cst_16 : f32 to vector<64x64xf32>
    %61 = arith.subf %60, %59 : vector<64x64xf32>
    %62 = arith.addf %13, %61 : vector<64x64xf32>
    %63 = arith.truncf %61 : vector<64x64xf32> to vector<64x64xbf16>
    %64 = arith.truncf %61 : vector<64x64xf32> to vector<64x64xbf16>
    %cst_17 = arith.constant dense<0.000000e+00> : vector<64x64xf32>
    %65 = tpu.matmul %63, %64, %cst_17 {dimension_numbers = #tpu.dot_dimension_numbers<[1], [0], [0], [1], [0, 0, 1, 1], [], []>} : vector<64x64xbf16>, vector<64x64xbf16>, vector<64x64xf32> -> vector<64x64xf32>
    %66 = arith.truncf %65 : vector<64x64xf32> to vector<64x64xbf16>
    %67 = arith.truncf %62 : vector<64x64xf32> to vector<64x64xbf16>
    %cst_18 = arith.constant dense<0.000000e+00> : vector<64x64xf32>
    %68 = tpu.matmul %66, %67, %cst_18 {dimension_numbers = #tpu.dot_dimension_numbers<[1], [0], [0], [1], [0, 0, 1, 1], [], []>} : vector<64x64xbf16>, vector<64x64xbf16>, vector<64x64xf32> -> vector<64x64xf32>
    %69 = arith.addf %62, %68 : vector<64x64xf32>
    %70 = arith.truncf %65 : vector<64x64xf32> to vector<64x64xbf16>
    %71 = arith.truncf %65 : vector<64x64xf32> to vector<64x64xbf16>
    %cst_19 = arith.constant dense<0.000000e+00> : vector<64x64xf32>
    %72 = tpu.matmul %70, %71, %cst_19 {dimension_numbers = #tpu.dot_dimension_numbers<[1], [0], [0], [1], [0, 0, 1, 1], [], []>} : vector<64x64xbf16>, vector<64x64xbf16>, vector<64x64xf32> -> vector<64x64xf32>
    %73 = arith.truncf %72 : vector<64x64xf32> to vector<64x64xbf16>
    %74 = arith.truncf %69 : vector<64x64xf32> to vector<64x64xbf16>
    %cst_20 = arith.constant dense<0.000000e+00> : vector<64x64xf32>
    %75 = tpu.matmul %73, %74, %cst_20 {dimension_numbers = #tpu.dot_dimension_numbers<[1], [0], [0], [1], [0, 0, 1, 1], [], []>} : vector<64x64xbf16>, vector<64x64xbf16>, vector<64x64xf32> -> vector<64x64xf32>
    %76 = arith.addf %69, %75 : vector<64x64xf32>
    %77 = arith.truncf %72 : vector<64x64xf32> to vector<64x64xbf16>
    %78 = arith.truncf %72 : vector<64x64xf32> to vector<64x64xbf16>
    %cst_21 = arith.constant dense<0.000000e+00> : vector<64x64xf32>
    %79 = tpu.matmul %77, %78, %cst_21 {dimension_numbers = #tpu.dot_dimension_numbers<[1], [0], [0], [1], [0, 0, 1, 1], [], []>} : vector<64x64xbf16>, vector<64x64xbf16>, vector<64x64xf32> -> vector<64x64xf32>
    %80 = arith.truncf %79 : vector<64x64xf32> to vector<64x64xbf16>
    %81 = arith.truncf %76 : vector<64x64xf32> to vector<64x64xbf16>
    %cst_22 = arith.constant dense<0.000000e+00> : vector<64x64xf32>
    %82 = tpu.matmul %80, %81, %cst_22 {dimension_numbers = #tpu.dot_dimension_numbers<[1], [0], [0], [1], [0, 0, 1, 1], [], []>} : vector<64x64xbf16>, vector<64x64xbf16>, vector<64x64xf32> -> vector<64x64xf32>
    %83 = arith.addf %76, %82 : vector<64x64xf32>
    %84 = arith.truncf %79 : vector<64x64xf32> to vector<64x64xbf16>
    %85 = arith.truncf %79 : vector<64x64xf32> to vector<64x64xbf16>
    %cst_23 = arith.constant dense<0.000000e+00> : vector<64x64xf32>
    %86 = tpu.matmul %84, %85, %cst_23 {dimension_numbers = #tpu.dot_dimension_numbers<[1], [0], [0], [1], [0, 0, 1, 1], [], []>} : vector<64x64xbf16>, vector<64x64xbf16>, vector<64x64xf32> -> vector<64x64xf32>
    %87 = arith.truncf %86 : vector<64x64xf32> to vector<64x64xbf16>
    %88 = arith.truncf %83 : vector<64x64xf32> to vector<64x64xbf16>
    %cst_24 = arith.constant dense<0.000000e+00> : vector<64x64xf32>
    %89 = tpu.matmul %87, %88, %cst_24 {dimension_numbers = #tpu.dot_dimension_numbers<[1], [0], [0], [1], [0, 0, 1, 1], [], []>} : vector<64x64xbf16>, vector<64x64xbf16>, vector<64x64xf32> -> vector<64x64xf32>
    %90 = arith.addf %83, %89 : vector<64x64xf32>
    %91 = arith.truncf %86 : vector<64x64xf32> to vector<64x64xbf16>
    %92 = arith.truncf %86 : vector<64x64xf32> to vector<64x64xbf16>
    %cst_25 = arith.constant dense<0.000000e+00> : vector<64x64xf32>
    %93 = tpu.matmul %91, %92, %cst_25 {dimension_numbers = #tpu.dot_dimension_numbers<[1], [0], [0], [1], [0, 0, 1, 1], [], []>} : vector<64x64xbf16>, vector<64x64xbf16>, vector<64x64xf32> -> vector<64x64xf32>
    %94 = arith.truncf %93 : vector<64x64xf32> to vector<64x64xbf16>
    %95 = arith.truncf %90 : vector<64x64xf32> to vector<64x64xbf16>
    %cst_26 = arith.constant dense<0.000000e+00> : vector<64x64xf32>
    %96 = tpu.matmul %94, %95, %cst_26 {dimension_numbers = #tpu.dot_dimension_numbers<[1], [0], [0], [1], [0, 0, 1, 1], [], []>} : vector<64x64xbf16>, vector<64x64xbf16>, vector<64x64xf32> -> vector<64x64xf32>
    %97 = arith.addf %90, %96 : vector<64x64xf32>
    %98 = arith.truncf %97 : vector<64x64xf32> to vector<64x64xbf16>
    %cst_27 = arith.constant dense<0.000000e+00> : vector<64x32xf32>
    %99 = tpu.matmul %98, %56, %cst_27 {dimension_numbers = #tpu.dot_dimension_numbers<[1], [0], [0], [1], [0, 0, 1, 1], [], []>} : vector<64x64xbf16>, vector<64x32xbf16>, vector<64x32xf32> -> vector<64x32xf32>
    %cst_28 = arith.constant dense<0.000000e+00> : vector<64x32xf32>
    %100 = tpu.matmul %98, %57, %cst_28 {dimension_numbers = #tpu.dot_dimension_numbers<[1], [0], [0], [1], [0, 0, 1, 1], [], []>} : vector<64x64xbf16>, vector<64x32xbf16>, vector<64x32xf32> -> vector<64x32xf32>
    %c0_29 = arith.constant 0 : index
    %c0_30 = arith.constant 0 : index
    %c0_31 = arith.constant 0 : index
    %101 = vector.load %arg6[%c0_29, %c0_30, %c0_31] : memref<1x128x32xf32, #tpu.memory_space<vmem>>, vector<1x32x32xf32>
    %102 = vector.shape_cast %101 : vector<1x32x32xf32> to vector<32x32xf32>
    %103 = arith.truncf %102 : vector<32x32xf32> to vector<32x32xbf16>
    %104 = arith.truncf %99 : vector<64x32xf32> to vector<64x32xbf16>
    %cst_32 = arith.constant dense<0.000000e+00> : vector<64x32xf32>
    %105 = tpu.matmul %104, %103, %cst_32 {dimension_numbers = #tpu.dot_dimension_numbers<[1], [1], [0], [0], [0, 0, 1, 0], [], []>} : vector<64x32xbf16>, vector<32x32xbf16>, vector<64x32xf32> -> vector<64x32xf32>
    %106 = arith.subf %100, %105 : vector<64x32xf32>
    %cst_33 = arith.constant dense<0.000000e+00> : vector<64x64xf32>
    %107 = tpu.matmul %54, %55, %cst_33 {dimension_numbers = #tpu.dot_dimension_numbers<[1], [1], [0], [0], [0, 0, 1, 0], [], []>} : vector<64x32xbf16>, vector<64x32xbf16>, vector<64x64xf32> -> vector<64x64xf32>
    %108 = arith.mulf %107, %10 : vector<64x64xf32>
    %cst_34 = arith.constant dense<0.000000e+00> : vector<64x32xf32>
    %109 = tpu.matmul %54, %103, %cst_34 {dimension_numbers = #tpu.dot_dimension_numbers<[1], [1], [0], [0], [0, 0, 1, 0], [], []>} : vector<64x32xbf16>, vector<32x32xbf16>, vector<64x32xf32> -> vector<64x32xf32>
    %110 = arith.truncf %108 : vector<64x64xf32> to vector<64x64xbf16>
    %111 = arith.truncf %106 : vector<64x32xf32> to vector<64x32xbf16>
    %cst_35 = arith.constant dense<0.000000e+00> : vector<64x32xf32>
    %112 = tpu.matmul %110, %111, %cst_35 {dimension_numbers = #tpu.dot_dimension_numbers<[1], [0], [0], [1], [0, 0, 1, 1], [], []>} : vector<64x64xbf16>, vector<64x32xbf16>, vector<64x32xf32> -> vector<64x32xf32>
    %113 = arith.addf %109, %112 : vector<64x32xf32>
    %114 = arith.mulf %113, %113 : vector<64x32xf32>
    %cst_36 = arith.constant dense<0.000000e+00> : vector<64xf32>
    %115 = vector.multi_reduction <add>, %114, %cst_36 [1] : vector<64x32xf32> to vector<64xf32>
    %116 = vector.shape_cast %115 : vector<64xf32> to vector<64x1xf32>
    %cst_37 = arith.constant 3.200000e+01 : f32
    %117 = vector.broadcast %cst_37 : f32 to vector<64x1xf32>
    %118 = arith.divf %116, %117 : vector<64x1xf32>
    %cst_38 = arith.constant 9.99999974E-6 : f32
    %119 = vector.broadcast %cst_38 : f32 to vector<64x1xf32>
    %120 = arith.addf %118, %119 : vector<64x1xf32>
    %121 = math.rsqrt %120 : vector<64x1xf32>
    %122 = vector.broadcast %121 : vector<64x1xf32> to vector<64x32xf32>
    %123 = arith.mulf %113, %122 : vector<64x32xf32>
    %124 = vector.broadcast %14 : vector<1x32xf32> to vector<64x32xf32>
    %125 = arith.mulf %123, %124 : vector<64x32xf32>
    %c0_39 = arith.constant 0 : index
    %c0_40 = arith.constant 0 : index
    %c0_41 = arith.constant 0 : index
    %126 = vector.load %arg5[%c0_39, %c0_40, %c0_41] : memref<1x64x128xf32, #tpu.memory_space<vmem>>, vector<1x64x32xf32>
    %127 = vector.shape_cast %126 : vector<1x64x32xf32> to vector<64x32xf32>
    %128 = vector.shape_cast %125 : vector<64x32xf32> to vector<1x64x32xf32>
    tpu.vector_store %arg5[%c0_39, %c0_40, %c0_41], %128 {strides = array<i32>} : memref<1x64x128xf32, #tpu.memory_space<vmem>>, vector<1x64x32xf32>,
    %129 = arith.truncf %106 : vector<64x32xf32> to vector<64x32xbf16>
    %cst_42 = arith.constant dense<0.000000e+00> : vector<32x32xf32>
    %130 = tpu.matmul %129, %55, %cst_42 {dimension_numbers = #tpu.dot_dimension_numbers<[0], [0], [1], [1], [0, 1, 1, 1], [], []>} : vector<64x32xbf16>, vector<64x32xbf16>, vector<32x32xf32> -> vector<32x32xf32>
    %131 = arith.addf %102, %130 : vector<32x32xf32>
    %c0_43 = arith.constant 0 : index
    %c0_44 = arith.constant 0 : index
    %c0_45 = arith.constant 0 : index
    %132 = vector.load %arg6[%c0_43, %c0_44, %c0_45] : memref<1x128x32xf32, #tpu.memory_space<vmem>>, vector<1x32x32xf32>
    %133 = vector.shape_cast %132 : vector<1x32x32xf32> to vector<32x32xf32>
    %134 = vector.shape_cast %131 : vector<32x32xf32> to vector<1x32x32xf32>
    tpu.vector_store %arg6[%c0_43, %c0_44, %c0_45], %134 {strides = array<i32>} : memref<1x128x32xf32, #tpu.memory_space<vmem>>, vector<1x32x32xf32>,
    %135 = vector.extract_strided_slice %16 {offsets = [0, 32], sizes = [64, 32], strides = [1, 1]} : vector<64x384xf32> to vector<64x32xf32>
    %136 = vector.extract_strided_slice %16 {offsets = [0, 160], sizes = [64, 32], strides = [1, 1]} : vector<64x384xf32> to vector<64x32xf32>
    %137 = vector.extract_strided_slice %16 {offsets = [0, 288], sizes = [64, 32], strides = [1, 1]} : vector<64x384xf32> to vector<64x32xf32>
    %138 = vector.extract_strided_slice %23 {offsets = [0, 1], sizes = [64, 1], strides = [1, 1]} : vector<64x128xf32> to vector<64x1xf32>
    %139 = arith.mulf %135, %135 : vector<64x32xf32>
    %cst_46 = arith.constant dense<0.000000e+00> : vector<64xf32>
    %140 = vector.multi_reduction <add>, %139, %cst_46 [1] : vector<64x32xf32> to vector<64xf32>
    %141 = vector.shape_cast %140 : vector<64xf32> to vector<64x1xf32>
    %142 = arith.mulf %136, %136 : vector<64x32xf32>
    %cst_47 = arith.constant dense<0.000000e+00> : vector<64xf32>
    %143 = vector.multi_reduction <add>, %142, %cst_47 [1] : vector<64x32xf32> to vector<64xf32>
    %144 = vector.shape_cast %143 : vector<64xf32> to vector<64x1xf32>
    %cst_48 = arith.constant 0.000000e+00 : f32
    %145 = vector.broadcast %cst_48 : f32 to vector<64x1xf32>
    %146 = arith.cmpf ogt, %141, %145 : vector<64x1xf32>
    %147 = math.rsqrt %141 : vector<64x1xf32>
    %cst_49 = arith.constant 0.000000e+00 : f32
    %148 = vector.broadcast %cst_49 : f32 to vector<64x1xf32>
    %149 = arith.select %146, %147, %148 : vector<64x1xi1>, vector<64x1xf32>
    %150 = vector.broadcast %149 : vector<64x1xf32> to vector<64x32xf32>
    %151 = arith.mulf %135, %150 : vector<64x32xf32>
    %cst_50 = arith.constant 0.176776692 : f32
    %152 = vector.broadcast %cst_50 : f32 to vector<64x32xf32>
    %153 = arith.mulf %151, %152 : vector<64x32xf32>
    %cst_51 = arith.constant 0.000000e+00 : f32
    %154 = vector.broadcast %cst_51 : f32 to vector<64x1xf32>
    %155 = arith.cmpf ogt, %144, %154 : vector<64x1xf32>
    %156 = math.rsqrt %144 : vector<64x1xf32>
    %cst_52 = arith.constant 0.000000e+00 : f32
    %157 = vector.broadcast %cst_52 : f32 to vector<64x1xf32>
    %158 = arith.select %155, %156, %157 : vector<64x1xi1>, vector<64x1xf32>
    %159 = vector.broadcast %158 : vector<64x1xf32> to vector<64x32xf32>
    %160 = arith.mulf %136, %159 : vector<64x32xf32>
    %161 = vector.broadcast %138 : vector<64x1xf32> to vector<64x32xf32>
    %162 = arith.mulf %160, %161 : vector<64x32xf32>
    %163 = vector.broadcast %138 : vector<64x1xf32> to vector<64x32xf32>
    %164 = arith.mulf %137, %163 : vector<64x32xf32>
    %165 = arith.truncf %153 : vector<64x32xf32> to vector<64x32xbf16>
    %166 = arith.truncf %160 : vector<64x32xf32> to vector<64x32xbf16>
    %167 = arith.truncf %162 : vector<64x32xf32> to vector<64x32xbf16>
    %168 = arith.truncf %164 : vector<64x32xf32> to vector<64x32xbf16>
    %cst_53 = arith.constant dense<0.000000e+00> : vector<64x64xf32>
    %169 = tpu.matmul %167, %166, %cst_53 {dimension_numbers = #tpu.dot_dimension_numbers<[1], [1], [0], [0], [0, 0, 1, 0], [], []>} : vector<64x32xbf16>, vector<64x32xbf16>, vector<64x64xf32> -> vector<64x64xf32>
    %170 = arith.mulf %169, %7 : vector<64x64xf32>
    %cst_54 = arith.constant 0.000000e+00 : f32
    %171 = vector.broadcast %cst_54 : f32 to vector<64x64xf32>
    %172 = arith.subf %171, %170 : vector<64x64xf32>
    %173 = arith.addf %13, %172 : vector<64x64xf32>
    %174 = arith.truncf %172 : vector<64x64xf32> to vector<64x64xbf16>
    %175 = arith.truncf %172 : vector<64x64xf32> to vector<64x64xbf16>
    %cst_55 = arith.constant dense<0.000000e+00> : vector<64x64xf32>
    %176 = tpu.matmul %174, %175, %cst_55 {dimension_numbers = #tpu.dot_dimension_numbers<[1], [0], [0], [1], [0, 0, 1, 1], [], []>} : vector<64x64xbf16>, vector<64x64xbf16>, vector<64x64xf32> -> vector<64x64xf32>
    %177 = arith.truncf %176 : vector<64x64xf32> to vector<64x64xbf16>
    %178 = arith.truncf %173 : vector<64x64xf32> to vector<64x64xbf16>
    %cst_56 = arith.constant dense<0.000000e+00> : vector<64x64xf32>
    %179 = tpu.matmul %177, %178, %cst_56 {dimension_numbers = #tpu.dot_dimension_numbers<[1], [0], [0], [1], [0, 0, 1, 1], [], []>} : vector<64x64xbf16>, vector<64x64xbf16>, vector<64x64xf32> -> vector<64x64xf32>
    %180 = arith.addf %173, %179 : vector<64x64xf32>
    %181 = arith.truncf %176 : vector<64x64xf32> to vector<64x64xbf16>
    %182 = arith.truncf %176 : vector<64x64xf32> to vector<64x64xbf16>
    %cst_57 = arith.constant dense<0.000000e+00> : vector<64x64xf32>
    %183 = tpu.matmul %181, %182, %cst_57 {dimension_numbers = #tpu.dot_dimension_numbers<[1], [0], [0], [1], [0, 0, 1, 1], [], []>} : vector<64x64xbf16>, vector<64x64xbf16>, vector<64x64xf32> -> vector<64x64xf32>
    %184 = arith.truncf %183 : vector<64x64xf32> to vector<64x64xbf16>
    %185 = arith.truncf %180 : vector<64x64xf32> to vector<64x64xbf16>
    %cst_58 = arith.constant dense<0.000000e+00> : vector<64x64xf32>
    %186 = tpu.matmul %184, %185, %cst_58 {dimension_numbers = #tpu.dot_dimension_numbers<[1], [0], [0], [1], [0, 0, 1, 1], [], []>} : vector<64x64xbf16>, vector<64x64xbf16>, vector<64x64xf32> -> vector<64x64xf32>
    %187 = arith.addf %180, %186 : vector<64x64xf32>
    %188 = arith.truncf %183 : vector<64x64xf32> to vector<64x64xbf16>
    %189 = arith.truncf %183 : vector<64x64xf32> to vector<64x64xbf16>
    %cst_59 = arith.constant dense<0.000000e+00> : vector<64x64xf32>
    %190 = tpu.matmul %188, %189, %cst_59 {dimension_numbers = #tpu.dot_dimension_numbers<[1], [0], [0], [1], [0, 0, 1, 1], [], []>} : vector<64x64xbf16>, vector<64x64xbf16>, vector<64x64xf32> -> vector<64x64xf32>
    %191 = arith.truncf %190 : vector<64x64xf32> to vector<64x64xbf16>
    %192 = arith.truncf %187 : vector<64x64xf32> to vector<64x64xbf16>
    %cst_60 = arith.constant dense<0.000000e+00> : vector<64x64xf32>
    %193 = tpu.matmul %191, %192, %cst_60 {dimension_numbers = #tpu.dot_dimension_numbers<[1], [0], [0], [1], [0, 0, 1, 1], [], []>} : vector<64x64xbf16>, vector<64x64xbf16>, vector<64x64xf32> -> vector<64x64xf32>
    %194 = arith.addf %187, %193 : vector<64x64xf32>
    %195 = arith.truncf %190 : vector<64x64xf32> to vector<64x64xbf16>
    %196 = arith.truncf %190 : vector<64x64xf32> to vector<64x64xbf16>
    %cst_61 = arith.constant dense<0.000000e+00> : vector<64x64xf32>
    %197 = tpu.matmul %195, %196, %cst_61 {dimension_numbers = #tpu.dot_dimension_numbers<[1], [0], [0], [1], [0, 0, 1, 1], [], []>} : vector<64x64xbf16>, vector<64x64xbf16>, vector<64x64xf32> -> vector<64x64xf32>
    %198 = arith.truncf %197 : vector<64x64xf32> to vector<64x64xbf16>
    %199 = arith.truncf %194 : vector<64x64xf32> to vector<64x64xbf16>
    %cst_62 = arith.constant dense<0.000000e+00> : vector<64x64xf32>
    %200 = tpu.matmul %198, %199, %cst_62 {dimension_numbers = #tpu.dot_dimension_numbers<[1], [0], [0], [1], [0, 0, 1, 1], [], []>} : vector<64x64xbf16>, vector<64x64xbf16>, vector<64x64xf32> -> vector<64x64xf32>
    %201 = arith.addf %194, %200 : vector<64x64xf32>
    %202 = arith.truncf %197 : vector<64x64xf32> to vector<64x64xbf16>
    %203 = arith.truncf %197 : vector<64x64xf32> to vector<64x64xbf16>
    %cst_63 = arith.constant dense<0.000000e+00> : vector<64x64xf32>
    %204 = tpu.matmul %202, %203, %cst_63 {dimension_numbers = #tpu.dot_dimension_numbers<[1], [0], [0], [1], [0, 0, 1, 1], [], []>} : vector<64x64xbf16>, vector<64x64xbf16>, vector<64x64xf32> -> vector<64x64xf32>
    %205 = arith.truncf %204 : vector<64x64xf32> to vector<64x64xbf16>
    %206 = arith.truncf %201 : vector<64x64xf32> to vector<64x64xbf16>
    %cst_64 = arith.constant dense<0.000000e+00> : vector<64x64xf32>
    %207 = tpu.matmul %205, %206, %cst_64 {dimension_numbers = #tpu.dot_dimension_numbers<[1], [0], [0], [1], [0, 0, 1, 1], [], []>} : vector<64x64xbf16>, vector<64x64xbf16>, vector<64x64xf32> -> vector<64x64xf32>
    %208 = arith.addf %201, %207 : vector<64x64xf32>
    %209 = arith.truncf %208 : vector<64x64xf32> to vector<64x64xbf16>
    %cst_65 = arith.constant dense<0.000000e+00> : vector<64x32xf32>
    %210 = tpu.matmul %209, %167, %cst_65 {dimension_numbers = #tpu.dot_dimension_numbers<[1], [0], [0], [1], [0, 0, 1, 1], [], []>} : vector<64x64xbf16>, vector<64x32xbf16>, vector<64x32xf32> -> vector<64x32xf32>
    %cst_66 = arith.constant dense<0.000000e+00> : vector<64x32xf32>
    %211 = tpu.matmul %209, %168, %cst_66 {dimension_numbers = #tpu.dot_dimension_numbers<[1], [0], [0], [1], [0, 0, 1, 1], [], []>} : vector<64x64xbf16>, vector<64x32xbf16>, vector<64x32xf32> -> vector<64x32xf32>
    %c0_67 = arith.constant 0 : index
    %c32 = arith.constant 32 : index
    %c0_68 = arith.constant 0 : index
    %212 = vector.load %arg6[%c0_67, %c32, %c0_68] : memref<1x128x32xf32, #tpu.memory_space<vmem>>, vector<1x32x32xf32>
    %213 = vector.shape_cast %212 : vector<1x32x32xf32> to vector<32x32xf32>
    %214 = arith.truncf %213 : vector<32x32xf32> to vector<32x32xbf16>
    %215 = arith.truncf %210 : vector<64x32xf32> to vector<64x32xbf16>
    %cst_69 = arith.constant dense<0.000000e+00> : vector<64x32xf32>
    %216 = tpu.matmul %215, %214, %cst_69 {dimension_numbers = #tpu.dot_dimension_numbers<[1], [1], [0], [0], [0, 0, 1, 0], [], []>} : vector<64x32xbf16>, vector<32x32xbf16>, vector<64x32xf32> -> vector<64x32xf32>
    %217 = arith.subf %211, %216 : vector<64x32xf32>
    %cst_70 = arith.constant dense<0.000000e+00> : vector<64x64xf32>
    %218 = tpu.matmul %165, %166, %cst_70 {dimension_numbers = #tpu.dot_dimension_numbers<[1], [1], [0], [0], [0, 0, 1, 0], [], []>} : vector<64x32xbf16>, vector<64x32xbf16>, vector<64x64xf32> -> vector<64x64xf32>
    %219 = arith.mulf %218, %10 : vector<64x64xf32>
    %cst_71 = arith.constant dense<0.000000e+00> : vector<64x32xf32>
    %220 = tpu.matmul %165, %214, %cst_71 {dimension_numbers = #tpu.dot_dimension_numbers<[1], [1], [0], [0], [0, 0, 1, 0], [], []>} : vector<64x32xbf16>, vector<32x32xbf16>, vector<64x32xf32> -> vector<64x32xf32>
    %221 = arith.truncf %219 : vector<64x64xf32> to vector<64x64xbf16>
    %222 = arith.truncf %217 : vector<64x32xf32> to vector<64x32xbf16>
    %cst_72 = arith.constant dense<0.000000e+00> : vector<64x32xf32>
    %223 = tpu.matmul %221, %222, %cst_72 {dimension_numbers = #tpu.dot_dimension_numbers<[1], [0], [0], [1], [0, 0, 1, 1], [], []>} : vector<64x64xbf16>, vector<64x32xbf16>, vector<64x32xf32> -> vector<64x32xf32>
    %224 = arith.addf %220, %223 : vector<64x32xf32>
    %225 = arith.mulf %224, %224 : vector<64x32xf32>
    %cst_73 = arith.constant dense<0.000000e+00> : vector<64xf32>
    %226 = vector.multi_reduction <add>, %225, %cst_73 [1] : vector<64x32xf32> to vector<64xf32>
    %227 = vector.shape_cast %226 : vector<64xf32> to vector<64x1xf32>
    %cst_74 = arith.constant 3.200000e+01 : f32
    %228 = vector.broadcast %cst_74 : f32 to vector<64x1xf32>
    %229 = arith.divf %227, %228 : vector<64x1xf32>
    %cst_75 = arith.constant 9.99999974E-6 : f32
    %230 = vector.broadcast %cst_75 : f32 to vector<64x1xf32>
    %231 = arith.addf %229, %230 : vector<64x1xf32>
    %232 = math.rsqrt %231 : vector<64x1xf32>
    %233 = vector.broadcast %232 : vector<64x1xf32> to vector<64x32xf32>
    %234 = arith.mulf %224, %233 : vector<64x32xf32>
    %235 = vector.broadcast %14 : vector<1x32xf32> to vector<64x32xf32>
    %236 = arith.mulf %234, %235 : vector<64x32xf32>
    %c0_76 = arith.constant 0 : index
    %c0_77 = arith.constant 0 : index
    %c32_78 = arith.constant 32 : index
    %237 = vector.load %arg5[%c0_76, %c0_77, %c32_78] : memref<1x64x128xf32, #tpu.memory_space<vmem>>, vector<1x64x32xf32>
    %238 = vector.shape_cast %237 : vector<1x64x32xf32> to vector<64x32xf32>
    %239 = vector.shape_cast %236 : vector<64x32xf32> to vector<1x64x32xf32>
    tpu.vector_store %arg5[%c0_76, %c0_77, %c32_78], %239 {strides = array<i32>} : memref<1x64x128xf32, #tpu.memory_space<vmem>>, vector<1x64x32xf32>,
    %240 = arith.truncf %217 : vector<64x32xf32> to vector<64x32xbf16>
    %cst_79 = arith.constant dense<0.000000e+00> : vector<32x32xf32>
    %241 = tpu.matmul %240, %166, %cst_79 {dimension_numbers = #tpu.dot_dimension_numbers<[0], [0], [1], [1], [0, 1, 1, 1], [], []>} : vector<64x32xbf16>, vector<64x32xbf16>, vector<32x32xf32> -> vector<32x32xf32>
    %242 = arith.addf %213, %241 : vector<32x32xf32>
    %c0_80 = arith.constant 0 : index
    %c32_81 = arith.constant 32 : index
    %c0_82 = arith.constant 0 : index
    %243 = vector.load %arg6[%c0_80, %c32_81, %c0_82] : memref<1x128x32xf32, #tpu.memory_space<vmem>>, vector<1x32x32xf32>
    %244 = vector.shape_cast %243 : vector<1x32x32xf32> to vector<32x32xf32>
    %245 = vector.shape_cast %242 : vector<32x32xf32> to vector<1x32x32xf32>
    tpu.vector_store %arg6[%c0_80, %c32_81, %c0_82], %245 {strides = array<i32>} : memref<1x128x32xf32, #tpu.memory_space<vmem>>, vector<1x32x32xf32>,
    %246 = vector.extract_strided_slice %16 {offsets = [0, 64], sizes = [64, 32], strides = [1, 1]} : vector<64x384xf32> to vector<64x32xf32>
    %247 = vector.extract_strided_slice %16 {offsets = [0, 192], sizes = [64, 32], strides = [1, 1]} : vector<64x384xf32> to vector<64x32xf32>
    %248 = vector.extract_strided_slice %16 {offsets = [0, 320], sizes = [64, 32], strides = [1, 1]} : vector<64x384xf32> to vector<64x32xf32>
    %249 = vector.extract_strided_slice %23 {offsets = [0, 2], sizes = [64, 1], strides = [1, 1]} : vector<64x128xf32> to vector<64x1xf32>
    %250 = arith.mulf %246, %246 : vector<64x32xf32>
    %cst_83 = arith.constant dense<0.000000e+00> : vector<64xf32>
    %251 = vector.multi_reduction <add>, %250, %cst_83 [1] : vector<64x32xf32> to vector<64xf32>
    %252 = vector.shape_cast %251 : vector<64xf32> to vector<64x1xf32>
    %253 = arith.mulf %247, %247 : vector<64x32xf32>
    %cst_84 = arith.constant dense<0.000000e+00> : vector<64xf32>
    %254 = vector.multi_reduction <add>, %253, %cst_84 [1] : vector<64x32xf32> to vector<64xf32>
    %255 = vector.shape_cast %254 : vector<64xf32> to vector<64x1xf32>
    %cst_85 = arith.constant 0.000000e+00 : f32
    %256 = vector.broadcast %cst_85 : f32 to vector<64x1xf32>
    %257 = arith.cmpf ogt, %252, %256 : vector<64x1xf32>
    %258 = math.rsqrt %252 : vector<64x1xf32>
    %cst_86 = arith.constant 0.000000e+00 : f32
    %259 = vector.broadcast %cst_86 : f32 to vector<64x1xf32>
    %260 = arith.select %257, %258, %259 : vector<64x1xi1>, vector<64x1xf32>
    %261 = vector.broadcast %260 : vector<64x1xf32> to vector<64x32xf32>
    %262 = arith.mulf %246, %261 : vector<64x32xf32>
    %cst_87 = arith.constant 0.176776692 : f32
    %263 = vector.broadcast %cst_87 : f32 to vector<64x32xf32>
    %264 = arith.mulf %262, %263 : vector<64x32xf32>
    %cst_88 = arith.constant 0.000000e+00 : f32
    %265 = vector.broadcast %cst_88 : f32 to vector<64x1xf32>
    %266 = arith.cmpf ogt, %255, %265 : vector<64x1xf32>
    %267 = math.rsqrt %255 : vector<64x1xf32>
    %cst_89 = arith.constant 0.000000e+00 : f32
    %268 = vector.broadcast %cst_89 : f32 to vector<64x1xf32>
    %269 = arith.select %266, %267, %268 : vector<64x1xi1>, vector<64x1xf32>
    %270 = vector.broadcast %269 : vector<64x1xf32> to vector<64x32xf32>
    %271 = arith.mulf %247, %270 : vector<64x32xf32>
    %272 = vector.broadcast %249 : vector<64x1xf32> to vector<64x32xf32>
    %273 = arith.mulf %271, %272 : vector<64x32xf32>
    %274 = vector.broadcast %249 : vector<64x1xf32> to vector<64x32xf32>
    %275 = arith.mulf %248, %274 : vector<64x32xf32>
    %276 = arith.truncf %264 : vector<64x32xf32> to vector<64x32xbf16>
    %277 = arith.truncf %271 : vector<64x32xf32> to vector<64x32xbf16>
    %278 = arith.truncf %273 : vector<64x32xf32> to vector<64x32xbf16>
    %279 = arith.truncf %275 : vector<64x32xf32> to vector<64x32xbf16>
    %cst_90 = arith.constant dense<0.000000e+00> : vector<64x64xf32>
    %280 = tpu.matmul %278, %277, %cst_90 {dimension_numbers = #tpu.dot_dimension_numbers<[1], [1], [0], [0], [0, 0, 1, 0], [], []>} : vector<64x32xbf16>, vector<64x32xbf16>, vector<64x64xf32> -> vector<64x64xf32>
    %281 = arith.mulf %280, %7 : vector<64x64xf32>
    %cst_91 = arith.constant 0.000000e+00 : f32
    %282 = vector.broadcast %cst_91 : f32 to vector<64x64xf32>
    %283 = arith.subf %282, %281 : vector<64x64xf32>
    %284 = arith.addf %13, %283 : vector<64x64xf32>
    %285 = arith.truncf %283 : vector<64x64xf32> to vector<64x64xbf16>
    %286 = arith.truncf %283 : vector<64x64xf32> to vector<64x64xbf16>
    %cst_92 = arith.constant dense<0.000000e+00> : vector<64x64xf32>
    %287 = tpu.matmul %285, %286, %cst_92 {dimension_numbers = #tpu.dot_dimension_numbers<[1], [0], [0], [1], [0, 0, 1, 1], [], []>} : vector<64x64xbf16>, vector<64x64xbf16>, vector<64x64xf32> -> vector<64x64xf32>
    %288 = arith.truncf %287 : vector<64x64xf32> to vector<64x64xbf16>
    %289 = arith.truncf %284 : vector<64x64xf32> to vector<64x64xbf16>
    %cst_93 = arith.constant dense<0.000000e+00> : vector<64x64xf32>
    %290 = tpu.matmul %288, %289, %cst_93 {dimension_numbers = #tpu.dot_dimension_numbers<[1], [0], [0], [1], [0, 0, 1, 1], [], []>} : vector<64x64xbf16>, vector<64x64xbf16>, vector<64x64xf32> -> vector<64x64xf32>
    %291 = arith.addf %284, %290 : vector<64x64xf32>
    %292 = arith.truncf %287 : vector<64x64xf32> to vector<64x64xbf16>
    %293 = arith.truncf %287 : vector<64x64xf32> to vector<64x64xbf16>
    %cst_94 = arith.constant dense<0.000000e+00> : vector<64x64xf32>
    %294 = tpu.matmul %292, %293, %cst_94 {dimension_numbers = #tpu.dot_dimension_numbers<[1], [0], [0], [1], [0, 0, 1, 1], [], []>} : vector<64x64xbf16>, vector<64x64xbf16>, vector<64x64xf32> -> vector<64x64xf32>
    %295 = arith.truncf %294 : vector<64x64xf32> to vector<64x64xbf16>
    %296 = arith.truncf %291 : vector<64x64xf32> to vector<64x64xbf16>
    %cst_95 = arith.constant dense<0.000000e+00> : vector<64x64xf32>
    %297 = tpu.matmul %295, %296, %cst_95 {dimension_numbers = #tpu.dot_dimension_numbers<[1], [0], [0], [1], [0, 0, 1, 1], [], []>} : vector<64x64xbf16>, vector<64x64xbf16>, vector<64x64xf32> -> vector<64x64xf32>
    %298 = arith.addf %291, %297 : vector<64x64xf32>
    %299 = arith.truncf %294 : vector<64x64xf32> to vector<64x64xbf16>
    %300 = arith.truncf %294 : vector<64x64xf32> to vector<64x64xbf16>
    %cst_96 = arith.constant dense<0.000000e+00> : vector<64x64xf32>
    %301 = tpu.matmul %299, %300, %cst_96 {dimension_numbers = #tpu.dot_dimension_numbers<[1], [0], [0], [1], [0, 0, 1, 1], [], []>} : vector<64x64xbf16>, vector<64x64xbf16>, vector<64x64xf32> -> vector<64x64xf32>
    %302 = arith.truncf %301 : vector<64x64xf32> to vector<64x64xbf16>
    %303 = arith.truncf %298 : vector<64x64xf32> to vector<64x64xbf16>
    %cst_97 = arith.constant dense<0.000000e+00> : vector<64x64xf32>
    %304 = tpu.matmul %302, %303, %cst_97 {dimension_numbers = #tpu.dot_dimension_numbers<[1], [0], [0], [1], [0, 0, 1, 1], [], []>} : vector<64x64xbf16>, vector<64x64xbf16>, vector<64x64xf32> -> vector<64x64xf32>
    %305 = arith.addf %298, %304 : vector<64x64xf32>
    %306 = arith.truncf %301 : vector<64x64xf32> to vector<64x64xbf16>
    %307 = arith.truncf %301 : vector<64x64xf32> to vector<64x64xbf16>
    %cst_98 = arith.constant dense<0.000000e+00> : vector<64x64xf32>
    %308 = tpu.matmul %306, %307, %cst_98 {dimension_numbers = #tpu.dot_dimension_numbers<[1], [0], [0], [1], [0, 0, 1, 1], [], []>} : vector<64x64xbf16>, vector<64x64xbf16>, vector<64x64xf32> -> vector<64x64xf32>
    %309 = arith.truncf %308 : vector<64x64xf32> to vector<64x64xbf16>
    %310 = arith.truncf %305 : vector<64x64xf32> to vector<64x64xbf16>
    %cst_99 = arith.constant dense<0.000000e+00> : vector<64x64xf32>
    %311 = tpu.matmul %309, %310, %cst_99 {dimension_numbers = #tpu.dot_dimension_numbers<[1], [0], [0], [1], [0, 0, 1, 1], [], []>} : vector<64x64xbf16>, vector<64x64xbf16>, vector<64x64xf32> -> vector<64x64xf32>
    %312 = arith.addf %305, %311 : vector<64x64xf32>
    %313 = arith.truncf %308 : vector<64x64xf32> to vector<64x64xbf16>
    %314 = arith.truncf %308 : vector<64x64xf32> to vector<64x64xbf16>
    %cst_100 = arith.constant dense<0.000000e+00> : vector<64x64xf32>
    %315 = tpu.matmul %313, %314, %cst_100 {dimension_numbers = #tpu.dot_dimension_numbers<[1], [0], [0], [1], [0, 0, 1, 1], [], []>} : vector<64x64xbf16>, vector<64x64xbf16>, vector<64x64xf32> -> vector<64x64xf32>
    %316 = arith.truncf %315 : vector<64x64xf32> to vector<64x64xbf16>
    %317 = arith.truncf %312 : vector<64x64xf32> to vector<64x64xbf16>
    %cst_101 = arith.constant dense<0.000000e+00> : vector<64x64xf32>
    %318 = tpu.matmul %316, %317, %cst_101 {dimension_numbers = #tpu.dot_dimension_numbers<[1], [0], [0], [1], [0, 0, 1, 1], [], []>} : vector<64x64xbf16>, vector<64x64xbf16>, vector<64x64xf32> -> vector<64x64xf32>
    %319 = arith.addf %312, %318 : vector<64x64xf32>
    %320 = arith.truncf %319 : vector<64x64xf32> to vector<64x64xbf16>
    %cst_102 = arith.constant dense<0.000000e+00> : vector<64x32xf32>
    %321 = tpu.matmul %320, %278, %cst_102 {dimension_numbers = #tpu.dot_dimension_numbers<[1], [0], [0], [1], [0, 0, 1, 1], [], []>} : vector<64x64xbf16>, vector<64x32xbf16>, vector<64x32xf32> -> vector<64x32xf32>
    %cst_103 = arith.constant dense<0.000000e+00> : vector<64x32xf32>
    %322 = tpu.matmul %320, %279, %cst_103 {dimension_numbers = #tpu.dot_dimension_numbers<[1], [0], [0], [1], [0, 0, 1, 1], [], []>} : vector<64x64xbf16>, vector<64x32xbf16>, vector<64x32xf32> -> vector<64x32xf32>
    %c0_104 = arith.constant 0 : index
    %c64 = arith.constant 64 : index
    %c0_105 = arith.constant 0 : index
    %323 = vector.load %arg6[%c0_104, %c64, %c0_105] : memref<1x128x32xf32, #tpu.memory_space<vmem>>, vector<1x32x32xf32>
    %324 = vector.shape_cast %323 : vector<1x32x32xf32> to vector<32x32xf32>
    %325 = arith.truncf %324 : vector<32x32xf32> to vector<32x32xbf16>
    %326 = arith.truncf %321 : vector<64x32xf32> to vector<64x32xbf16>
    %cst_106 = arith.constant dense<0.000000e+00> : vector<64x32xf32>
    %327 = tpu.matmul %326, %325, %cst_106 {dimension_numbers = #tpu.dot_dimension_numbers<[1], [1], [0], [0], [0, 0, 1, 0], [], []>} : vector<64x32xbf16>, vector<32x32xbf16>, vector<64x32xf32> -> vector<64x32xf32>
    %328 = arith.subf %322, %327 : vector<64x32xf32>
    %cst_107 = arith.constant dense<0.000000e+00> : vector<64x64xf32>
    %329 = tpu.matmul %276, %277, %cst_107 {dimension_numbers = #tpu.dot_dimension_numbers<[1], [1], [0], [0], [0, 0, 1, 0], [], []>} : vector<64x32xbf16>, vector<64x32xbf16>, vector<64x64xf32> -> vector<64x64xf32>
    %330 = arith.mulf %329, %10 : vector<64x64xf32>
    %cst_108 = arith.constant dense<0.000000e+00> : vector<64x32xf32>
    %331 = tpu.matmul %276, %325, %cst_108 {dimension_numbers = #tpu.dot_dimension_numbers<[1], [1], [0], [0], [0, 0, 1, 0], [], []>} : vector<64x32xbf16>, vector<32x32xbf16>, vector<64x32xf32> -> vector<64x32xf32>
    %332 = arith.truncf %330 : vector<64x64xf32> to vector<64x64xbf16>
    %333 = arith.truncf %328 : vector<64x32xf32> to vector<64x32xbf16>
    %cst_109 = arith.constant dense<0.000000e+00> : vector<64x32xf32>
    %334 = tpu.matmul %332, %333, %cst_109 {dimension_numbers = #tpu.dot_dimension_numbers<[1], [0], [0], [1], [0, 0, 1, 1], [], []>} : vector<64x64xbf16>, vector<64x32xbf16>, vector<64x32xf32> -> vector<64x32xf32>
    %335 = arith.addf %331, %334 : vector<64x32xf32>
    %336 = arith.mulf %335, %335 : vector<64x32xf32>
    %cst_110 = arith.constant dense<0.000000e+00> : vector<64xf32>
    %337 = vector.multi_reduction <add>, %336, %cst_110 [1] : vector<64x32xf32> to vector<64xf32>
    %338 = vector.shape_cast %337 : vector<64xf32> to vector<64x1xf32>
    %cst_111 = arith.constant 3.200000e+01 : f32
    %339 = vector.broadcast %cst_111 : f32 to vector<64x1xf32>
    %340 = arith.divf %338, %339 : vector<64x1xf32>
    %cst_112 = arith.constant 9.99999974E-6 : f32
    %341 = vector.broadcast %cst_112 : f32 to vector<64x1xf32>
    %342 = arith.addf %340, %341 : vector<64x1xf32>
    %343 = math.rsqrt %342 : vector<64x1xf32>
    %344 = vector.broadcast %343 : vector<64x1xf32> to vector<64x32xf32>
    %345 = arith.mulf %335, %344 : vector<64x32xf32>
    %346 = vector.broadcast %14 : vector<1x32xf32> to vector<64x32xf32>
    %347 = arith.mulf %345, %346 : vector<64x32xf32>
    %c0_113 = arith.constant 0 : index
    %c0_114 = arith.constant 0 : index
    %c64_115 = arith.constant 64 : index
    %348 = vector.load %arg5[%c0_113, %c0_114, %c64_115] : memref<1x64x128xf32, #tpu.memory_space<vmem>>, vector<1x64x32xf32>
    %349 = vector.shape_cast %348 : vector<1x64x32xf32> to vector<64x32xf32>
    %350 = vector.shape_cast %347 : vector<64x32xf32> to vector<1x64x32xf32>
    tpu.vector_store %arg5[%c0_113, %c0_114, %c64_115], %350 {strides = array<i32>} : memref<1x64x128xf32, #tpu.memory_space<vmem>>, vector<1x64x32xf32>,
    %351 = arith.truncf %328 : vector<64x32xf32> to vector<64x32xbf16>
    %cst_116 = arith.constant dense<0.000000e+00> : vector<32x32xf32>
    %352 = tpu.matmul %351, %277, %cst_116 {dimension_numbers = #tpu.dot_dimension_numbers<[0], [0], [1], [1], [0, 1, 1, 1], [], []>} : vector<64x32xbf16>, vector<64x32xbf16>, vector<32x32xf32> -> vector<32x32xf32>
    %353 = arith.addf %324, %352 : vector<32x32xf32>
    %c0_117 = arith.constant 0 : index
    %c64_118 = arith.constant 64 : index
    %c0_119 = arith.constant 0 : index
    %354 = vector.load %arg6[%c0_117, %c64_118, %c0_119] : memref<1x128x32xf32, #tpu.memory_space<vmem>>, vector<1x32x32xf32>
    %355 = vector.shape_cast %354 : vector<1x32x32xf32> to vector<32x32xf32>
    %356 = vector.shape_cast %353 : vector<32x32xf32> to vector<1x32x32xf32>
    tpu.vector_store %arg6[%c0_117, %c64_118, %c0_119], %356 {strides = array<i32>} : memref<1x128x32xf32, #tpu.memory_space<vmem>>, vector<1x32x32xf32>,
    %357 = vector.extract_strided_slice %16 {offsets = [0, 96], sizes = [64, 32], strides = [1, 1]} : vector<64x384xf32> to vector<64x32xf32>
    %358 = vector.extract_strided_slice %16 {offsets = [0, 224], sizes = [64, 32], strides = [1, 1]} : vector<64x384xf32> to vector<64x32xf32>
    %359 = vector.extract_strided_slice %16 {offsets = [0, 352], sizes = [64, 32], strides = [1, 1]} : vector<64x384xf32> to vector<64x32xf32>
    %360 = vector.extract_strided_slice %23 {offsets = [0, 3], sizes = [64, 1], strides = [1, 1]} : vector<64x128xf32> to vector<64x1xf32>
    %361 = arith.mulf %357, %357 : vector<64x32xf32>
    %cst_120 = arith.constant dense<0.000000e+00> : vector<64xf32>
    %362 = vector.multi_reduction <add>, %361, %cst_120 [1] : vector<64x32xf32> to vector<64xf32>
    %363 = vector.shape_cast %362 : vector<64xf32> to vector<64x1xf32>
    %364 = arith.mulf %358, %358 : vector<64x32xf32>
    %cst_121 = arith.constant dense<0.000000e+00> : vector<64xf32>
    %365 = vector.multi_reduction <add>, %364, %cst_121 [1] : vector<64x32xf32> to vector<64xf32>
    %366 = vector.shape_cast %365 : vector<64xf32> to vector<64x1xf32>
    %cst_122 = arith.constant 0.000000e+00 : f32
    %367 = vector.broadcast %cst_122 : f32 to vector<64x1xf32>
    %368 = arith.cmpf ogt, %363, %367 : vector<64x1xf32>
    %369 = math.rsqrt %363 : vector<64x1xf32>
    %cst_123 = arith.constant 0.000000e+00 : f32
    %370 = vector.broadcast %cst_123 : f32 to vector<64x1xf32>
    %371 = arith.select %368, %369, %370 : vector<64x1xi1>, vector<64x1xf32>
    %372 = vector.broadcast %371 : vector<64x1xf32> to vector<64x32xf32>
    %373 = arith.mulf %357, %372 : vector<64x32xf32>
    %cst_124 = arith.constant 0.176776692 : f32
    %374 = vector.broadcast %cst_124 : f32 to vector<64x32xf32>
    %375 = arith.mulf %373, %374 : vector<64x32xf32>
    %cst_125 = arith.constant 0.000000e+00 : f32
    %376 = vector.broadcast %cst_125 : f32 to vector<64x1xf32>
    %377 = arith.cmpf ogt, %366, %376 : vector<64x1xf32>
    %378 = math.rsqrt %366 : vector<64x1xf32>
    %cst_126 = arith.constant 0.000000e+00 : f32
    %379 = vector.broadcast %cst_126 : f32 to vector<64x1xf32>
    %380 = arith.select %377, %378, %379 : vector<64x1xi1>, vector<64x1xf32>
    %381 = vector.broadcast %380 : vector<64x1xf32> to vector<64x32xf32>
    %382 = arith.mulf %358, %381 : vector<64x32xf32>
    %383 = vector.broadcast %360 : vector<64x1xf32> to vector<64x32xf32>
    %384 = arith.mulf %382, %383 : vector<64x32xf32>
    %385 = vector.broadcast %360 : vector<64x1xf32> to vector<64x32xf32>
    %386 = arith.mulf %359, %385 : vector<64x32xf32>
    %387 = arith.truncf %375 : vector<64x32xf32> to vector<64x32xbf16>
    %388 = arith.truncf %382 : vector<64x32xf32> to vector<64x32xbf16>
    %389 = arith.truncf %384 : vector<64x32xf32> to vector<64x32xbf16>
    %390 = arith.truncf %386 : vector<64x32xf32> to vector<64x32xbf16>
    %cst_127 = arith.constant dense<0.000000e+00> : vector<64x64xf32>
    %391 = tpu.matmul %389, %388, %cst_127 {dimension_numbers = #tpu.dot_dimension_numbers<[1], [1], [0], [0], [0, 0, 1, 0], [], []>} : vector<64x32xbf16>, vector<64x32xbf16>, vector<64x64xf32> -> vector<64x64xf32>
    %392 = arith.mulf %391, %7 : vector<64x64xf32>
    %cst_128 = arith.constant 0.000000e+00 : f32
    %393 = vector.broadcast %cst_128 : f32 to vector<64x64xf32>
    %394 = arith.subf %393, %392 : vector<64x64xf32>
    %395 = arith.addf %13, %394 : vector<64x64xf32>
    %396 = arith.truncf %394 : vector<64x64xf32> to vector<64x64xbf16>
    %397 = arith.truncf %394 : vector<64x64xf32> to vector<64x64xbf16>
    %cst_129 = arith.constant dense<0.000000e+00> : vector<64x64xf32>
    %398 = tpu.matmul %396, %397, %cst_129 {dimension_numbers = #tpu.dot_dimension_numbers<[1], [0], [0], [1], [0, 0, 1, 1], [], []>} : vector<64x64xbf16>, vector<64x64xbf16>, vector<64x64xf32> -> vector<64x64xf32>
    %399 = arith.truncf %398 : vector<64x64xf32> to vector<64x64xbf16>
    %400 = arith.truncf %395 : vector<64x64xf32> to vector<64x64xbf16>
    %cst_130 = arith.constant dense<0.000000e+00> : vector<64x64xf32>
    %401 = tpu.matmul %399, %400, %cst_130 {dimension_numbers = #tpu.dot_dimension_numbers<[1], [0], [0], [1], [0, 0, 1, 1], [], []>} : vector<64x64xbf16>, vector<64x64xbf16>, vector<64x64xf32> -> vector<64x64xf32>
    %402 = arith.addf %395, %401 : vector<64x64xf32>
    %403 = arith.truncf %398 : vector<64x64xf32> to vector<64x64xbf16>
    %404 = arith.truncf %398 : vector<64x64xf32> to vector<64x64xbf16>
    %cst_131 = arith.constant dense<0.000000e+00> : vector<64x64xf32>
    %405 = tpu.matmul %403, %404, %cst_131 {dimension_numbers = #tpu.dot_dimension_numbers<[1], [0], [0], [1], [0, 0, 1, 1], [], []>} : vector<64x64xbf16>, vector<64x64xbf16>, vector<64x64xf32> -> vector<64x64xf32>
    %406 = arith.truncf %405 : vector<64x64xf32> to vector<64x64xbf16>
    %407 = arith.truncf %402 : vector<64x64xf32> to vector<64x64xbf16>
    %cst_132 = arith.constant dense<0.000000e+00> : vector<64x64xf32>
    %408 = tpu.matmul %406, %407, %cst_132 {dimension_numbers = #tpu.dot_dimension_numbers<[1], [0], [0], [1], [0, 0, 1, 1], [], []>} : vector<64x64xbf16>, vector<64x64xbf16>, vector<64x64xf32> -> vector<64x64xf32>
    %409 = arith.addf %402, %408 : vector<64x64xf32>
    %410 = arith.truncf %405 : vector<64x64xf32> to vector<64x64xbf16>
    %411 = arith.truncf %405 : vector<64x64xf32> to vector<64x64xbf16>
    %cst_133 = arith.constant dense<0.000000e+00> : vector<64x64xf32>
    %412 = tpu.matmul %410, %411, %cst_133 {dimension_numbers = #tpu.dot_dimension_numbers<[1], [0], [0], [1], [0, 0, 1, 1], [], []>} : vector<64x64xbf16>, vector<64x64xbf16>, vector<64x64xf32> -> vector<64x64xf32>
    %413 = arith.truncf %412 : vector<64x64xf32> to vector<64x64xbf16>
    %414 = arith.truncf %409 : vector<64x64xf32> to vector<64x64xbf16>
    %cst_134 = arith.constant dense<0.000000e+00> : vector<64x64xf32>
    %415 = tpu.matmul %413, %414, %cst_134 {dimension_numbers = #tpu.dot_dimension_numbers<[1], [0], [0], [1], [0, 0, 1, 1], [], []>} : vector<64x64xbf16>, vector<64x64xbf16>, vector<64x64xf32> -> vector<64x64xf32>
    %416 = arith.addf %409, %415 : vector<64x64xf32>
    %417 = arith.truncf %412 : vector<64x64xf32> to vector<64x64xbf16>
    %418 = arith.truncf %412 : vector<64x64xf32> to vector<64x64xbf16>
    %cst_135 = arith.constant dense<0.000000e+00> : vector<64x64xf32>
    %419 = tpu.matmul %417, %418, %cst_135 {dimension_numbers = #tpu.dot_dimension_numbers<[1], [0], [0], [1], [0, 0, 1, 1], [], []>} : vector<64x64xbf16>, vector<64x64xbf16>, vector<64x64xf32> -> vector<64x64xf32>
    %420 = arith.truncf %419 : vector<64x64xf32> to vector<64x64xbf16>
    %421 = arith.truncf %416 : vector<64x64xf32> to vector<64x64xbf16>
    %cst_136 = arith.constant dense<0.000000e+00> : vector<64x64xf32>
    %422 = tpu.matmul %420, %421, %cst_136 {dimension_numbers = #tpu.dot_dimension_numbers<[1], [0], [0], [1], [0, 0, 1, 1], [], []>} : vector<64x64xbf16>, vector<64x64xbf16>, vector<64x64xf32> -> vector<64x64xf32>
    %423 = arith.addf %416, %422 : vector<64x64xf32>
    %424 = arith.truncf %419 : vector<64x64xf32> to vector<64x64xbf16>
    %425 = arith.truncf %419 : vector<64x64xf32> to vector<64x64xbf16>
    %cst_137 = arith.constant dense<0.000000e+00> : vector<64x64xf32>
    %426 = tpu.matmul %424, %425, %cst_137 {dimension_numbers = #tpu.dot_dimension_numbers<[1], [0], [0], [1], [0, 0, 1, 1], [], []>} : vector<64x64xbf16>, vector<64x64xbf16>, vector<64x64xf32> -> vector<64x64xf32>
    %427 = arith.truncf %426 : vector<64x64xf32> to vector<64x64xbf16>
    %428 = arith.truncf %423 : vector<64x64xf32> to vector<64x64xbf16>
    %cst_138 = arith.constant dense<0.000000e+00> : vector<64x64xf32>
    %429 = tpu.matmul %427, %428, %cst_138 {dimension_numbers = #tpu.dot_dimension_numbers<[1], [0], [0], [1], [0, 0, 1, 1], [], []>} : vector<64x64xbf16>, vector<64x64xbf16>, vector<64x64xf32> -> vector<64x64xf32>
    %430 = arith.addf %423, %429 : vector<64x64xf32>
    %431 = arith.truncf %430 : vector<64x64xf32> to vector<64x64xbf16>
    %cst_139 = arith.constant dense<0.000000e+00> : vector<64x32xf32>
    %432 = tpu.matmul %431, %389, %cst_139 {dimension_numbers = #tpu.dot_dimension_numbers<[1], [0], [0], [1], [0, 0, 1, 1], [], []>} : vector<64x64xbf16>, vector<64x32xbf16>, vector<64x32xf32> -> vector<64x32xf32>
    %cst_140 = arith.constant dense<0.000000e+00> : vector<64x32xf32>
    %433 = tpu.matmul %431, %390, %cst_140 {dimension_numbers = #tpu.dot_dimension_numbers<[1], [0], [0], [1], [0, 0, 1, 1], [], []>} : vector<64x64xbf16>, vector<64x32xbf16>, vector<64x32xf32> -> vector<64x32xf32>
    %c0_141 = arith.constant 0 : index
    %c96 = arith.constant 96 : index
    %c0_142 = arith.constant 0 : index
    %434 = vector.load %arg6[%c0_141, %c96, %c0_142] : memref<1x128x32xf32, #tpu.memory_space<vmem>>, vector<1x32x32xf32>
    %435 = vector.shape_cast %434 : vector<1x32x32xf32> to vector<32x32xf32>
    %436 = arith.truncf %435 : vector<32x32xf32> to vector<32x32xbf16>
    %437 = arith.truncf %432 : vector<64x32xf32> to vector<64x32xbf16>
    %cst_143 = arith.constant dense<0.000000e+00> : vector<64x32xf32>
    %438 = tpu.matmul %437, %436, %cst_143 {dimension_numbers = #tpu.dot_dimension_numbers<[1], [1], [0], [0], [0, 0, 1, 0], [], []>} : vector<64x32xbf16>, vector<32x32xbf16>, vector<64x32xf32> -> vector<64x32xf32>
    %439 = arith.subf %433, %438 : vector<64x32xf32>
    %cst_144 = arith.constant dense<0.000000e+00> : vector<64x64xf32>
    %440 = tpu.matmul %387, %388, %cst_144 {dimension_numbers = #tpu.dot_dimension_numbers<[1], [1], [0], [0], [0, 0, 1, 0], [], []>} : vector<64x32xbf16>, vector<64x32xbf16>, vector<64x64xf32> -> vector<64x64xf32>
    %441 = arith.mulf %440, %10 : vector<64x64xf32>
    %cst_145 = arith.constant dense<0.000000e+00> : vector<64x32xf32>
    %442 = tpu.matmul %387, %436, %cst_145 {dimension_numbers = #tpu.dot_dimension_numbers<[1], [1], [0], [0], [0, 0, 1, 0], [], []>} : vector<64x32xbf16>, vector<32x32xbf16>, vector<64x32xf32> -> vector<64x32xf32>
    %443 = arith.truncf %441 : vector<64x64xf32> to vector<64x64xbf16>
    %444 = arith.truncf %439 : vector<64x32xf32> to vector<64x32xbf16>
    %cst_146 = arith.constant dense<0.000000e+00> : vector<64x32xf32>
    %445 = tpu.matmul %443, %444, %cst_146 {dimension_numbers = #tpu.dot_dimension_numbers<[1], [0], [0], [1], [0, 0, 1, 1], [], []>} : vector<64x64xbf16>, vector<64x32xbf16>, vector<64x32xf32> -> vector<64x32xf32>
    %446 = arith.addf %442, %445 : vector<64x32xf32>
    %447 = arith.mulf %446, %446 : vector<64x32xf32>
    %cst_147 = arith.constant dense<0.000000e+00> : vector<64xf32>
    %448 = vector.multi_reduction <add>, %447, %cst_147 [1] : vector<64x32xf32> to vector<64xf32>
    %449 = vector.shape_cast %448 : vector<64xf32> to vector<64x1xf32>
    %cst_148 = arith.constant 3.200000e+01 : f32
    %450 = vector.broadcast %cst_148 : f32 to vector<64x1xf32>
    %451 = arith.divf %449, %450 : vector<64x1xf32>
    %cst_149 = arith.constant 9.99999974E-6 : f32
    %452 = vector.broadcast %cst_149 : f32 to vector<64x1xf32>
    %453 = arith.addf %451, %452 : vector<64x1xf32>
    %454 = math.rsqrt %453 : vector<64x1xf32>
    %455 = vector.broadcast %454 : vector<64x1xf32> to vector<64x32xf32>
    %456 = arith.mulf %446, %455 : vector<64x32xf32>
    %457 = vector.broadcast %14 : vector<1x32xf32> to vector<64x32xf32>
    %458 = arith.mulf %456, %457 : vector<64x32xf32>
    %c0_150 = arith.constant 0 : index
    %c0_151 = arith.constant 0 : index
    %c96_152 = arith.constant 96 : index
    %459 = vector.load %arg5[%c0_150, %c0_151, %c96_152] : memref<1x64x128xf32, #tpu.memory_space<vmem>>, vector<1x64x32xf32>
    %460 = vector.shape_cast %459 : vector<1x64x32xf32> to vector<64x32xf32>
    %461 = vector.shape_cast %458 : vector<64x32xf32> to vector<1x64x32xf32>
    tpu.vector_store %arg5[%c0_150, %c0_151, %c96_152], %461 {strides = array<i32>} : memref<1x64x128xf32, #tpu.memory_space<vmem>>, vector<1x64x32xf32>,
    %462 = arith.truncf %439 : vector<64x32xf32> to vector<64x32xbf16>
    %cst_153 = arith.constant dense<0.000000e+00> : vector<32x32xf32>
    %463 = tpu.matmul %462, %388, %cst_153 {dimension_numbers = #tpu.dot_dimension_numbers<[0], [0], [1], [1], [0, 1, 1, 1], [], []>} : vector<64x32xbf16>, vector<64x32xbf16>, vector<32x32xf32> -> vector<32x32xf32>
    %464 = arith.addf %435, %463 : vector<32x32xf32>
    %c0_154 = arith.constant 0 : index
    %c96_155 = arith.constant 96 : index
    %c0_156 = arith.constant 0 : index
    %465 = vector.load %arg6[%c0_154, %c96_155, %c0_156] : memref<1x128x32xf32, #tpu.memory_space<vmem>>, vector<1x32x32xf32>
    %466 = vector.shape_cast %465 : vector<1x32x32xf32> to vector<32x32xf32>
    %467 = vector.shape_cast %464 : vector<32x32xf32> to vector<1x32x32xf32>
    tpu.vector_store %arg6[%c0_154, %c96_155, %c0_156], %467 {strides = array<i32>} : memref<1x128x32xf32, #tpu.memory_space<vmem>>, vector<1x32x32xf32>,
    return
  }
  func.func @transform_0(%arg0: i32, %arg1: i32) -> (i32, i32, i32) {
    %c0_i32 = arith.constant 0 : i32
    %c0_i32_0 = arith.constant 0 : i32
    return %arg0, %arg1, %c0_i32 : i32, i32, i32
  }
  func.func @transform_1(%arg0: i32, %arg1: i32) -> (i32, i32, i32) {
    %c0_i32 = arith.constant 0 : i32
    %c0_i32_0 = arith.constant 0 : i32
    return %arg0, %arg1, %c0_i32 : i32, i32, i32
  }
  func.func @transform_2(%arg0: i32, %arg1: i32) -> (i32, i32) {
    %c0_i32 = arith.constant 0 : i32
    %c0_i32_0 = arith.constant 0 : i32
    %c0_i32_1 = arith.constant 0 : i32
    return %c0_i32, %c0_i32_0 : i32, i32
  }
  func.func @transform_3(%arg0: i32, %arg1: i32) -> (i32, i32, i32) {
    %c0_i32 = arith.constant 0 : i32
    %c0_i32_0 = arith.constant 0 : i32
    return %arg0, %arg1, %c0_i32 : i32, i32, i32
  }
  func.func @transform_4(%arg0: i32, %arg1: i32) -> (i32, i32, i32) {
    %c0_i32 = arith.constant 0 : i32
    %c0_i32_0 = arith.constant 0 : i32
    %c0_i32_1 = arith.constant 0 : i32
    return %arg0, %c0_i32, %c0_i32_0 : i32, i32, i32
  }
}

module attributes {stable_mosaic.version = 11 : i64} {
  func.func @_matmul_kernel(%arg0: i32, %arg1: i32, %arg2: i32, %arg3: memref<200x128xf32, #tpu.memory_space<vmem>>, %arg4: memref<128x128xbf16, #tpu.memory_space<vmem>>, %arg5: memref<200x128xf32, #tpu.memory_space<vmem>>, %arg6: memref<200x128xf32, #tpu.memory_space<vmem>>) attributes {dimension_semantics = [#tpu.dimension_semantics<parallel>, #tpu.dimension_semantics<parallel>, #tpu.dimension_semantics<arbitrary>], iteration_bounds = array<i64: 1, 1, 1>, scalar_prefetch = 0 : i64, scratch_operands = 1 : i64, tpu.core_type = #tpu.core_type<tc>, window_params = [{transform_indices = @transform_0, window_bounds = array<i64: 200, 128>}, {transform_indices = @transform_1, window_bounds = array<i64: 128, 128>}, {transform_indices = @transform_2, window_bounds = array<i64: 200, 128>}]} {
    %c0_i32 = arith.constant 0 : i32
    %0 = arith.cmpi eq, %arg2, %c0_i32 : i32
    %1 = arith.extui %0 : i1 to i32
    %c0_i32_0 = arith.constant 0 : i32
    %2 = arith.cmpi ne, %1, %c0_i32_0 : i32
    scf.if %2 {
      %cst_10 = arith.constant 0.000000e+00 : f32
      %13 = vector.broadcast %cst_10 : f32 to vector<200x128xf32>
      %c0_11 = arith.constant 0 : index
      %c0_12 = arith.constant 0 : index
      %14 = vector.load %arg6[%c0_11, %c0_12] : memref<200x128xf32, #tpu.memory_space<vmem>>, vector<200x128xf32>
      tpu.vector_store %arg6[%c0_11, %c0_12], %13 {strides = array<i32>} : memref<200x128xf32, #tpu.memory_space<vmem>>, vector<200x128xf32>,
    } else {
    }
    %c0 = arith.constant 0 : index
    %c0_1 = arith.constant 0 : index
    %3 = vector.load %arg6[%c0, %c0_1] : memref<200x128xf32, #tpu.memory_space<vmem>>, vector<200x128xf32>
    %c0_2 = arith.constant 0 : index
    %c0_3 = arith.constant 0 : index
    %4 = vector.load %arg3[%c0_2, %c0_3] : memref<200x128xf32, #tpu.memory_space<vmem>>, vector<200x128xf32>
    %5 = arith.truncf %4 : vector<200x128xf32> to vector<200x128xbf16>
    %c0_4 = arith.constant 0 : index
    %c0_5 = arith.constant 0 : index
    %6 = vector.load %arg4[%c0_4, %c0_5] : memref<128x128xbf16, #tpu.memory_space<vmem>>, vector<128x128xbf16>
    %cst = arith.constant dense<0.000000e+00> : vector<200x128xf32>
    %7 = tpu.matmul %5, %6, %cst {dimension_numbers = #tpu.dot_dimension_numbers<[1], [0], [0], [1], [0, 0, 1, 1], [], []>} : vector<200x128xbf16>, vector<128x128xbf16>, vector<200x128xf32> -> vector<200x128xf32>
    %8 = arith.addf %3, %7 : vector<200x128xf32>
    %c0_6 = arith.constant 0 : index
    %c0_7 = arith.constant 0 : index
    %9 = vector.load %arg6[%c0_6, %c0_7] : memref<200x128xf32, #tpu.memory_space<vmem>>, vector<200x128xf32>
    tpu.vector_store %arg6[%c0_6, %c0_7], %8 {strides = array<i32>} : memref<200x128xf32, #tpu.memory_space<vmem>>, vector<200x128xf32>,
    %c0_i32_8 = arith.constant 0 : i32
    %10 = arith.cmpi eq, %arg2, %c0_i32_8 : i32
    %11 = arith.extui %10 : i1 to i32
    %c0_i32_9 = arith.constant 0 : i32
    %12 = arith.cmpi ne, %11, %c0_i32_9 : i32
    scf.if %12 {
      %c0_10 = arith.constant 0 : index
      %c0_11 = arith.constant 0 : index
      %13 = vector.load %arg6[%c0_10, %c0_11] : memref<200x128xf32, #tpu.memory_space<vmem>>, vector<200x128xf32>
      %c0_12 = arith.constant 0 : index
      %c0_13 = arith.constant 0 : index
      %14 = vector.load %arg5[%c0_12, %c0_13] : memref<200x128xf32, #tpu.memory_space<vmem>>, vector<200x128xf32>
      tpu.vector_store %arg5[%c0_12, %c0_13], %13 {strides = array<i32>} : memref<200x128xf32, #tpu.memory_space<vmem>>, vector<200x128xf32>,
    } else {
    }
    return
  }
  func.func @transform_0(%arg0: i32, %arg1: i32, %arg2: i32) -> (i32, i32) {
    %c0_i32 = arith.constant 0 : i32
    return %arg0, %arg2 : i32, i32
  }
  func.func @transform_1(%arg0: i32, %arg1: i32, %arg2: i32) -> (i32, i32) {
    %c0_i32 = arith.constant 0 : i32
    return %arg2, %arg1 : i32, i32
  }
  func.func @transform_2(%arg0: i32, %arg1: i32, %arg2: i32) -> (i32, i32) {
    %c0_i32 = arith.constant 0 : i32
    return %arg0, %arg1 : i32, i32
  }
}

</mosaic_0001>

<bundles_post_ra>
// kernel: _lambda_.5
= control target key start
LH: loop header
LB: loop body
LE: loop exit
PB: predicated region body
PF: predicated region fallthrough
CT: control target
= control target key end

     0   :  { %s1733_s0 = inlined_call_operand.hbm [shape: f32[2,100,512], index: 0, kind: input, shape index: {}]   ;;  %s1734_s1 = inlined_call_operand.hbm [shape: f32[4,384], index: 1, kind: input, shape index: {}]   ;;  %s1735_s2 = inlined_call_operand.hbm [shape: f32[2,128,384], index: 2, kind: output, shape index: {}]  }
   0x1   :  { %1743 = sst [smem:[#allocation12_spill]] %s1733_s0 }
   0x2   :  { %7 = vsyncpa [#allocation3], 0 }
   0x3   :  { %9 = vsyncpa [#allocation3 + $0x1], 0 }
   0x4   :  { %10 = vsyncpa [#allocation6], 0 }
   0x5   :  { %12 = vsyncpa [#allocation6 + $0x1], 0 }
   0x6   :  { %13 = vsyncpa [#allocation4], 0 }
   0x7   :  { %15 = vsyncpa [#allocation4 + $0x1], 0  ;;  %s1209_s9 = smov 0   ;;  %s1211_s10 = smov 0  }
   0x8   :  { %s1213_s11 = smov 0   ;;  %s1215_s12 = smov 0  }
   0x9   :  { %s1217_s13 = smov 0   ;;  %s1219_s14 = smov 0  }
   0xa   :  { %s1221_s15 = smov 0   ;;  %s1223_s16 = smov 0  }
   0xb   :  { %s1225_s17 = smov 0   ;;  %s1227_s18 = smov 0  }
   0xc   :  { %s1229_s19 = smov 0  }
   0xd LB: > { %s30_s20 = sadd.s32 1, %s1174_s17  ;;  %s33_s21 = sadd.s32 1, %s1178_s18  ;;  %s1182_s19 = sphi %s1229_s19, %s21_s19   ;;  %s1178_s18 = sphi %s1227_s18, %s1773_s18   ;;  %s1174_s17 = sphi %s1225_s17, %s1772_s17   ;;  %s1170_s16 = sphi %s1223_s16, %s1771_s16   ;;  %s1166_s15 = sphi %s1221_s15, %s1770_s15   ;;  %s1162_s14 = sphi %s1219_s14, %s1769_s14   ;;  %s1158_s13 = sphi %s1217_s13, %s1768_s13   ;;  %s1154_s12 = sphi %s1215_s12, %s1767_s12   ;;  %s1150_s11 = sphi %s1213_s11, %s1766_s11   ;;  %s1146_s10 = sphi %s1211_s10, %s1765_s10   ;;  %s1142_s9 = sphi %s1209_s9, %s1764_s9  }
   0xe   : > { %p1268_p0 = scmp.ge.s32.totalorder %s30_s20, 3  ;;  %s42_s23 = sadd.s32 1, %s1162_s14 }
   0xf   : > { %p1737_p1 = scmp.ne.s32.totalorder %s1162_s14, %s1158_s13  ;;  %p1738_p2 = scmp.eq.s32.totalorder %s1182_s19, 0 }
  0x10   : > { %s1775_s21 = smov (!%p1268_p0, %s33_s21), %s1178_s18  ;;  %p1736_p4 = scmp.lt.s32.totalorder %s1182_s19, 6 }
  0x11   : > { %p51_p3 = por %p1738_p2, %p1737_p1  ;;  %s133_s24 = sand.u32 1, %s1162_s14  }
  0x12   : > { %s826_s25 = smul.u32 104, %s133_s24  ;;  %s1746_s0 = sld [smem:[#allocation12_spill]] }
  0x13   : > { %s827_s26 = smul.u32 52, %s1178_s18  ;;  %p1291_p5 = pnand %p1736_p4, %p51_p3 }
  0x14   : > { %s137_s29 = scalar_lea.vmem [#allocation2], %s826_s25  ;;  %s1303_s7 = scalar_lea.sflag [#allocation3], %s133_s24 }
  0x15   : > { %s142_s28 = sadd.s32 %s1174_s17, %s827_s26  ;;  %s145_s30 = sshll.u32 %s137_s29, 4  ;;  %s1296_s30 = int_to_ptr.vmem [resolvable:$true] %s145_s30 }
  0x16   : > { %s801_s3 = sshll.u32 %s142_s28, 7  ;;  %p998_p7 = pneg %p1291_p5 }
  0x18   : > { %s1301_s6 = scalar_lea.hbm %s1746_s0, %s801_s3  ;;  %s1001_s28 = scalar_lea.hbm %s1746_s0, 13312 }
  0x19   : > { %s996_s8 = scalar_lea.hbm %s1301_s6, 1664  ;;  %p1002_p10 = scmp.lt.u32.totalorder %s1301_s6, %s1746_s0 }
  0x1a   : > { %p997_p6 = scmp.ne.s32.totalorder %s1301_s6, %s996_s8  ;;  %p1003_p11 = scmp.lt.u32.totalorder %s1001_s28, %s996_s8 }
  0x1b   : > { %p1005_p13 = scmp.lt.u32.totalorder %s996_s8, %s1301_s6 }
  0x1c   : > { %p999_p8 = pnand %p998_p7, %p997_p6  ;;  %p1004_p12 = por %p1003_p11, %p1002_p10 }
  0x1e   : > { %p1000_p9 = pneg %p999_p8  ;;  %p1006_p3 = por %p1005_p13, %p1004_p12 }
  0x20   : > { %p1007_p4 = pnand %p1006_p3, %p1000_p9 }
  0x22   : > { %1010 = shalt.err (!%p1007_p4)
}
  0x23   : > { %s1011_s24 = scalar_lea.vmem %s1296_s30, 1664  ;;  %s1184_s4 = smov [#allocation2]  }
  0x24   : > { %p1012_p6 = scmp.ne.s32.totalorder %s1296_s30, %s1011_s24  ;;  %s1016_s5 = sshll.u32 %s1184_s4, 4  ;;  %s1017_s5 = int_to_ptr.vmem [resolvable:$false] %s1016_s5 }
  0x25   : > { %s1018_s25 = scalar_lea.vmem %s1017_s5, 3328  ;;  %p1019_p2 = scmp.lt.s32.totalorder %s1296_s30, %s1017_s5 }
  0x26   : > { %p1014_p8 = pnand %p1012_p6, %p998_p7  ;;  %p1020_p10 = scmp.lt.s32.totalorder %s1018_s25, %s1011_s24 }
  0x28   : > { %p1015_p1 = pneg %p1014_p8  ;;  %p1021_p11 = por %p1020_p10, %p1019_p2 }
  0x2a   : > { %p1022_p12 = pnand %p1021_p11, %p1015_p1 }
  0x2c   : > { %1025 = shalt.err (!%p1022_p12)
}
  0x2d   : > { %s1185_s8 = smov 512   ;;  %s1186_s26 = smov 128  }
  0x2e   : > { %s1187_s28 = smov 8   ;;  %p804_p1 = scmp.ge.s32.totalorder %s1182_s19, 1 }
  0x2f   : > { %839 = dma.hbm_to_vmem [thread:$0]  (!%p1291_p5), %s1301_s6, 1664, %s1296_s30, %s1303_s7, %s1185_s8, %s1186_s26, %s1187_s28  }
  0x30   : > { %p171_p2 = scmp.lt.s32.totalorder %s1182_s19, 7  ;;  %s797_s3 = sadd.s32 4294967295, %s1182_s19  }
  0x31   : > { %s798_s24 = sadd.s32 4294967294, %s1182_s19   ;;  %p35_p7 = scmp.ge.s32.totalorder %s1775_s21, 2 }
  0x32   : > { %p1333_p4 = pnand %p804_p1, %p171_p2  ;;  %s1777_s20 = smov (%p1268_p0, %s30_s20), 0 }
  0x33   : > { %s1779_s21 = smov (%p35_p7, %s1775_s21), 0  ;;  %s38_s27 = ssub.s32 %s1174_s17, %s1777_s20 }
  0x34   : > { %1748 = sst [smem:[#allocation11_spill]] %s1779_s21  ;;  %p55_p5 = scmp.ne.s32.totalorder %s1158_s13, %s1154_s12 }
  0x35   : > { %s37_s30 = ssub.s32 %s1178_s18, %s1779_s21  ;;  %p1355_p9 = scmp.eq.s32.totalorder %s797_s3, 0 }
  0x36   : > { %s39_s22 = sor.u32 %s38_s27, %s37_s30  ;;  %p66_p0 = scmp.eq.s32.totalorder %s38_s27, 0 }
  0x37   : > { %p40_p13 = scmp.eq.s32.totalorder %s39_s22, 0  ;;  %p1364_p3 = por %p1355_p9, %p55_p5 }
  0x38   : > { %s68_s4 = sadd.s32 1, %s1150_s11  ;;  %p75_p6 = scmp.ne.s32.totalorder %s1150_s11, %s1146_s10 }
  0x39   : > { %s1750_s7 = scalar_select %p1364_p3, 1, 0 }
  0x3a   : > { %s1374_s5 = scalar_select %p40_p13, %s1162_s14, %s42_s23  }
  0x3b   : > { %s1377_s25 = scalar_select %p66_p0, %s1150_s11, %s68_s4  }
  0x3c   : > { %p1751_p8 = scmp.eq.s32.totalorder %s1182_s19, 0  ;;  %p81_p11 = scmp.ne.s32.totalorder %s1146_s10, %s1142_s9 }
  0x3d   : > { %p107_p12 = scmp.eq.s32.totalorder %s797_s3, 5  ;;  %p113_p1 = scmp.eq.s32.totalorder %s798_s24, 5 }
  0x3e   : > { %p1381_p10 = por %p75_p6, %p1751_p8  ;;  %p1389_p2 = por %p81_p11, %p1355_p9 }
  0x3f   : > { %s155_s28 = sand.u32 1, %s1150_s11   ;;  %p1754_p7 = scmp.ne.s32.totalorder %s1162_s14, %s1158_s13 }
  0x40   : > { %s1753_s26 = scalar_select %p1389_p2, 1, 0 }
  0x41   : > { %p1397_p13 = por %p107_p12, %p1754_p7  ;;  %p1404_p0 = por %p113_p1, %p55_p5 }
  0x42   : > { %s802_s30 = sshll.u32 %s155_s28, 2  ;;  %s803_s9 = sshll.u32 %s1174_s17, 6 }
  0x43   : > { %s1755_s23 = scalar_select %p1397_p13, 1, 0 }
  0x44   : > { %s1756_s27 = scalar_select %p1404_p0, 1, 0 }
  0x45   : > { %s1412_s6 = scalar_lea.hbm %s1734_s1, %s803_s9  ;;  %s159_s22 = scalar_lea.vmem [#allocation5], %s802_s30 }
  0x46   : > { %s166_s4 = sshll.u32 %s159_s22, 4  ;;  %p1757_p5 = scmp.lt.s32.totalorder %s1182_s19, 6  ;;  %s1414_s4 = int_to_ptr.vmem [resolvable:$true] %s166_s4 }
  0x47   : > { %s156_s21 = scalar_lea.sflag [#allocation6], %s155_s28  ;;  %s1026_s3 = scalar_lea.hbm %s1412_s6, 64 }
  0x48   : > { %p1420_p9 = pnand %p1757_p5, %p1381_p10  ;;  %p1027_p6 = scmp.ne.s32.totalorder %s1412_s6, %s1026_s3 }
  0x49   : > { %s1031_s8 = scalar_lea.hbm %s1734_s1, 192  ;;  %p1032_p10 = scmp.lt.u32.totalorder %s1412_s6, %s1734_s1 }
  0x4a   : > { %p1028_p8 = pneg %p1420_p9  ;;  %p1033_p1 = scmp.lt.u32.totalorder %s1031_s8, %s1026_s3 }
  0x4b   : > { %p1035_p5 = scmp.lt.u32.totalorder %s1026_s3, %s1412_s6 }
  0x4c   : > { %p1029_p11 = pnand %p1028_p8, %p1027_p6  ;;  %p1034_p7 = por %p1033_p1, %p1032_p10 }
  0x4e   : > { %p1030_p12 = pneg %p1029_p11  ;;  %p1036_p0 = por %p1035_p5, %p1034_p7 }
  0x50   : > { %p1037_p13 = pnand %p1036_p0, %p1030_p12 }
  0x52   : > { %1040 = shalt.err (!%p1037_p13)
}
  0x53   : > { %s1041_s28 = scalar_lea.vmem %s1414_s4, 64  ;;  %s1188_s30 = smov [#allocation5]  }
  0x54   : > { %p1042_p6 = scmp.ne.s32.totalorder %s1414_s4, %s1041_s28  ;;  %s1046_s9 = sshll.u32 %s1188_s30, 4  ;;  %s1047_s9 = int_to_ptr.vmem [resolvable:$false] %s1046_s9 }
  0x55   : > { %s1048_s24 = scalar_lea.vmem %s1047_s9, 128  ;;  %p1049_p3 = scmp.lt.s32.totalorder %s1414_s4, %s1047_s9 }
  0x56   : > { %p1044_p11 = pnand %p1042_p6, %p1028_p8  ;;  %p1050_p10 = scmp.lt.s32.totalorder %s1048_s24, %s1041_s28 }
  0x58   : > { %p1045_p2 = pneg %p1044_p11  ;;  %p1051_p1 = por %p1050_p10, %p1049_p3 }
  0x5a   : > { %p1052_p7 = pnand %p1051_p1, %p1045_p2 }
  0x5c   : > { %1055 = shalt.err (!%p1052_p7)
}
  0x5d   : > { %842 = dma.hbm_to_vmem [thread:$0]  (!%p1420_p9), %s1412_s6, 64, %s1414_s4, %s156_s21  }
  0x5e   : > { %175 = sbr.rel (%p1333_p4) target bundleno = 214 (0xd6), region = 28  ;;  %s1452_s3 = sand.u32 (!%p1333_p4), 1, %s1158_s13  }
  0x5f   : > { %s828_s8 = smul.u32 (!%p1333_p4), 104, %s1452_s3  ;;  %s178_s22 = scalar_lea.sflag (!%p1333_p4), [#allocation3], %s1452_s3 }
  0x60   : > { %p1759_p3 = scmp.ne.s32.totalorder (!%p1333_p4), %s1750_s7, 0 }
  0x61   : > { %s1456_s28 = scalar_lea.vmem (!%p1333_p4), [#allocation2], %s828_s8 }
  0x65   : > { %1129 = dma.done.wait (%p1759_p3), %s178_s22, 1664  }
  0x66   : > { %1131 = vsyncadd (%p1759_p3), %s178_s22, 4294965632  ;;  %s186_s0 = sand.u32 1, %s1146_s10   ;;  %p1760_p4 = scmp.ne.s32.totalorder %s1753_s26, 0 }
  0x67   : > { %s805_s21 = sshll.u32 %s186_s0, 2  ;;  %s187_s29 = scalar_lea.sflag [#allocation6], %s186_s0 }
  0x68   : > { %s190_s6 = scalar_lea.vmem [#allocation5], %s805_s21 }
  0x69   : > { %1133 = dma.done.wait (%p1760_p4), %s187_s29, 64  }
  0x6a   : > { %1135 = vsyncadd (%p1760_p4), %s187_s29, 4294967232  ;;  %s806_s4 = sshll.u32 %s1452_s3, 7  ;;  %v232_v0 = vlaneseq  ;;  %v1189_v2 = vmov 0.0   ;;  %vm281_vm0 = vcmask 1042432   ;;  %v216_v7 = vld [vmem:[%s1456_s28] sm:$0xff]  ;;  %vm360_vm1 = vcmask 1041408  }
  0x6b   : > { %s1470_s7 = scalar_lea.vmem [#allocation7], %s806_s4  ;;  %v231_v8 = vld [vmem:[%s190_s6] sm:$0xf]  ;;  %vm439_vm2 = vcmask 1040384   ;;  %v282_v11 = vrot.slane %v216_v7, 5  ;;  %v361_v13 = vrot.slane %v216_v7, 6 }
  0x6c   : > { %v1468_v1 = vshrl.u32 %v232_v0, 7  ;;  %668 = vst [vmem:[%s1470_s7 + $0x68] sm:$0xff] %v1189_v2  ;;  %669 = vst [vmem:[%s1470_s7 + $0x70] sm:$0xff] %v1189_v2  ;;  %v217_v9 = vld [vmem:[%s1456_s28 + $0x8] sm:$0xff]  ;;  %v440_v15 = vrot.slane %v216_v7, 7  ;;  %v218_v22 = vld [vmem:[%s1456_s28 + $0x10] sm:$0xff] }
  0x6d   : > { %670 = vst [vmem:[%s1470_s7 + $0x78] sm:$0xff] %v1189_v2  ;;  %v283_v17 = vrot.slane %v217_v9, 5  ;;  %v325_v19 = vsel %vm281_vm0, 0.0, %v282_v11  ;;  %v404_v20 = vsel %vm360_vm1, 0.0, %v361_v13  ;;  %v362_v29 = vrot.slane %v217_v9, 6  ;;  %v219_v43 = vld [vmem:[%s1456_s28 + $0x18] sm:$0xff] }
  0x6e   : > { %v251_v3 = vsub.s32 3, %v1468_v1  ;;  %v328_v4 = vsub.s32 0, %v1468_v1  ;;  %v407_v5 = vsub.s32 1, %v1468_v1  ;;  %v486_v6 = vsub.s32 2, %v1468_v1  ;;  %v220_v48 = vld [vmem:[%s1456_s28 + $0x20] sm:$0xff]  ;;  %s829_s26 = smul.u32 48, %s1170_s16 }
  0x6f   : > { %v483_v25 = vsel %vm439_vm2, 0.0, %v440_v15  ;;  %v284_v26 = vsel %vm281_vm0, %v282_v11, %v283_v17  ;;  %v441_v30 = vrot.slane %v217_v9, 7  ;;  %v285_v33 = vrot.slane %v218_v22, 5  ;;  %s686_s9 = sshll.u32 %s1470_s7, 4  ;;  %p1761_p13 = scmp.ne.s32.totalorder %s1755_s23, 0  ;;  %s1664_s9 = int_to_ptr.vmem [resolvable:$true] %s686_s9 }
  0x70   : > { %v1481_v10 = vrot.slane %v231_v8, %v251_v3  ;;  %v1483_v12 = vrot.slane %v231_v8, %v328_v4  ;;  %v1485_v14 = vrot.slane %v231_v8, %v407_v5  ;;  %v1487_v16 = vrot.slane %v231_v8, %v486_v6  ;;  %v221_v5 = vld [vmem:[%s1456_s28 + $0x28] sm:$0xff]  ;;  %s683_s30 = sadd.s32 %s1166_s15, %s829_s26  ;;  %s1056_s15 = scalar_lea.vmem %s1664_s9, 2048 }
  0x71   : > { %v364_v34 = vrot.slane %v218_v22, 6  ;;  %v363_v36 = vsel %vm360_vm1, %v361_v13, %v362_v29  ;;  %v442_v37 = vsel %vm439_vm2, %v440_v15, %v441_v30  ;;  %v443_v38 = vrot.slane %v218_v22, 7  ;;  %s823_s24 = sshll.u32 %s683_s30, 7  ;;  %p1057_p2 = scmp.ne.s32.totalorder %s1664_s9, %s1056_s15 }
  0x72   : > { %v253_v18 = vmul.f32 %v1481_v10, %v216_v7  ;;  %v254_v21 = vmul.f32 %v1481_v10, %v217_v9  ;;  %v330_v23 = vmul.f32 %v1483_v12, %v325_v19  ;;  %v409_v24 = vmul.f32 %v1485_v14, %v404_v20  ;;  %s1669_s16 = scalar_lea.hbm %s1735_s2, %s823_s24  ;;  %s1190_s0 = smov [#allocation7]  }
  0x73   : > { %v488_v27 = vmul.f32 %v1487_v16, %v483_v25  ;;  %v331_v28 = vmul.f32 %v1483_v12, %v284_v26  ;;  %v255_v32 = vmul.f32 %v1481_v10, %v218_v22  ;;  %v410_v40 = vmul.f32 %v1485_v14, %v363_v36  ;;  %v222_v25 = vld [vmem:[%s1456_s28 + $0x30] sm:$0xff]  ;;  %p1058_p0 = pnand %p1057_p2, %p1761_p13  ;;  %s1060_s21 = sshll.u32 %s1190_s0, 4  ;;  %s1061_s21 = int_to_ptr.vmem [resolvable:$false] %s1060_s21 }
  0x74   : > { %v345_v31 = vadd.f32 %v330_v23, %v253_v18  ;;  %v489_v41 = vmul.f32 %v1487_v16, %v442_v37  ;;  %v286_v42 = vsel %vm281_vm0, %v283_v17, %v285_v33  ;;  %v365_v45 = vsel %vm360_vm1, %v362_v29, %v364_v34  ;;  %s1062_s29 = scalar_lea.vmem %s1061_s21, 4096  ;;  %p1063_p8 = scmp.lt.s32.totalorder %s1664_s9, %s1061_s21 }
  0x75   : > { %v346_v35 = vadd.f32 %v331_v28, %v254_v21  ;;  %v332_v44 = vmul.f32 %v1483_v12, %v286_v42  ;;  %v444_v46 = vsel %vm439_vm2, %v441_v30, %v443_v38  ;;  %v256_v47 = vmul.f32 %v1481_v10, %v219_v43  ;;  %p1059_p9 = pneg %p1058_p0  ;;  %p1064_p12 = scmp.lt.s32.totalorder %s1062_s29, %s1056_s15 }
  0x76   : > { %v424_v39 = vadd.f32 %v409_v24, %v345_v31  ;;  %v411_v51 = vmul.f32 %v1485_v14, %v365_v45  ;;  %v490_v52 = vmul.f32 %v1487_v16, %v444_v46  ;;  %v287_v54 = vrot.slane %v219_v43, 5 }
  0x77   : > { %v425_v50 = vadd.f32 %v410_v40, %v346_v35  ;;  %v347_v53 = vadd.f32 %v332_v44, %v255_v32  ;;  %v366_v55 = vrot.slane %v219_v43, 6  ;;  %v445_v56 = vrot.slane %v219_v43, 7  ;;  %p1065_p5 = por %p1064_p12, %p1063_p8 }
  0x78   : > { %v1512_v49 = vadd.f32 %v488_v27, %v424_v39  ;;  %v257_v59 = vmul.f32 %v1481_v10, %v220_v48  ;;  %v289_v60 = vrot.slane %v220_v48, 5  ;;  %v288_v62 = vsel %vm281_vm0, %v285_v33, %v287_v54 }
  0x79   : > { %v1517_v58 = vadd.f32 %v489_v41, %v425_v50  ;;  %v426_v61 = vadd.f32 %v411_v51, %v347_v53  ;;  %v367_v63 = vsel %vm360_vm1, %v364_v34, %v366_v55  ;;  %v446_v0 = vsel %vm439_vm2, %v443_v38, %v445_v56  ;;  %v223_v50 = vld [vmem:[%s1456_s28 + $0x38] sm:$0xff]  ;;  %p1066_p6 = pnand %p1065_p5, %p1059_p9 }
  0x7a   : > { %v807_v57 = vmul.f32 -1.442695, %v1512_v49  ;;  %v333_v3 = vmul.f32 %v1483_v12, %v288_v62  ;;  %v412_v4 = vmul.f32 %v1485_v14, %v367_v63  ;;  %v491_v7 = vmul.f32 %v1487_v16, %v446_v0 }
  0x7b   : > { %v808_v2 = vmul.f32 -1.442695, %v1517_v58  ;;  %v1527_v6 = vadd.f32 %v490_v52, %v426_v61  ;;  %v290_v8 = vsel %vm281_vm0, %v287_v54, %v289_v60  ;;  %v368_v9 = vrot.slane %v220_v48, 6 }
  0x7c   : > { %944 = vpow2.f32 %v807_v57  ;;  %v348_v11 = vadd.f32 %v333_v3, %v256_v47  ;;  %v334_v13 = vmul.f32 %v1483_v12, %v290_v8  ;;  %v447_v15 = vrot.slane %v220_v48, 7 }
  0x7d   : > { %946 = vpow2.f32 %v808_v2  ;;  %v809_v17 = vmul.f32 -1.442695, %v1527_v6  ;;  %v369_v18 = vsel %vm360_vm1, %v366_v55, %v368_v9  ;;  %v258_v19 = vmul.f32 %v1481_v10, %v221_v5 }
  0x7e   : > { %v291_v20 = vrot.slane %v221_v5, 5  ;;  %v427_v21 = vadd.f32 %v412_v4, %v348_v11  ;;  %v349_v22 = vadd.f32 %v334_v13, %v257_v59  ;;  %v413_v23 = vmul.f32 %v1485_v14, %v369_v18 }
  0x7f   : > { %v448_v24 = vsel %vm439_vm2, %v445_v56, %v447_v15  ;;  %948 = vpow2.f32 %v809_v17  ;;  %v370_v28 = vrot.slane %v221_v5, 6  ;;  %v449_v32 = vrot.slane %v221_v5, 7 }
  0x80   : > { %v492_v26 = vmul.f32 %v1487_v16, %v448_v24  ;;  %v292_v27 = vsel %vm281_vm0, %v289_v60, %v291_v20  ;;  %v1540_v29 = vadd.f32 %v491_v7, %v427_v21  ;;  %v428_v30 = vadd.f32 %v413_v23, %v349_v22  ;;  %v1563_v60 = vld [vmem:[%s1456_s28 + $0x40] sm:$0xff]  ;;  %v1578_v21 = vld [vmem:[%s1456_s28 + $0x48] sm:$0xff] }
  0x81   : > { %v335_v31 = vmul.f32 %v1483_v12, %v292_v27  ;;  %v371_v33 = vsel %vm360_vm1, %v368_v9, %v370_v28  ;;  %v259_v34 = vmul.f32 %v1481_v10, %v222_v25  ;;  %v293_v35 = vrot.slane %v222_v25, 5 }
  0x82   : > { %v372_v36 = vrot.slane %v222_v25, 6  ;;  %v810_v37 = vmul.f32 -1.442695, %v1540_v29  ;;  %v1546_v38 = vadd.f32 %v492_v26, %v428_v30  ;;  %v414_v40 = vmul.f32 %v1485_v14, %v371_v33 }
  0x83   : > { %v350_v39 = vadd.f32 %v335_v31, %v258_v19  ;;  %v450_v41 = vsel %vm439_vm2, %v447_v15, %v449_v32  ;;  %v294_v42 = vsel %vm281_vm0, %v291_v20, %v293_v35  ;;  %v451_v44 = vrot.slane %v222_v25, 7 }
  0x84   : > { %v373_v43 = vsel %vm360_vm1, %v370_v28, %v372_v36  ;;  %950 = vpow2.f32 %v810_v37  ;;  %v811_v46 = vmul.f32 -1.442695, %v1546_v38  ;;  %v493_v48 = vmul.f32 %v1487_v16, %v450_v41 }
  0x85   : > { %v429_v47 = vadd.f32 %v414_v40, %v350_v39  ;;  %v336_v52 = vmul.f32 %v1483_v12, %v294_v42  ;;  %v415_v53 = vmul.f32 %v1485_v14, %v373_v43  ;;  %v452_v54 = vsel %vm439_vm2, %v449_v32, %v451_v44 }
  0x86   : > { %v945_v45 = vpop.eup %944  ;;  %952 = vpow2.f32 %v811_v46  ;;  %v494_v57 = vmul.f32 %v1487_v16, %v452_v54  ;;  %v260_v59 = vmul.f32 %v1481_v10, %v223_v50  ;;  %v295_v63 = vrot.slane %v223_v50, 5 }
  0x87   : > { %v563_v51 = vadd.f32 1.0, %v945_v45  ;;  %v947_v55 = vpop.eup %946  ;;  %v1558_v56 = vadd.f32 %v493_v48, %v429_v47  ;;  %v351_v62 = vadd.f32 %v336_v52, %v259_v34  ;;  %v374_v2 = vrot.slane %v223_v50, 6  ;;  %v226_v48 = vld [vmem:[%s1456_s28 + $0x50] sm:$0xff] }
  0x88   : > { %v564_v61 = vadd.f32 1.0, %v947_v55  ;;  %v453_v3 = vrot.slane %v223_v50, 7  ;;  %v261_v4 = vmul.f32 %v1481_v10, %v1563_v60  ;;  %v296_v8 = vsel %vm281_vm0, %v293_v35, %v295_v63 }
  0x89   : > { %954 = vrcp.f32 %v563_v51  ;;  %v812_v0 = vmul.f32 -1.442695, %v1558_v56  ;;  %v949_v5 = vpop.eup %948  ;;  %v430_v7 = vadd.f32 %v415_v53, %v351_v62  ;;  %v297_v9 = vrot.slane %v1563_v60, 5 }
  0x8a   : > { %956 = vrcp.f32 %v564_v61  ;;  %v565_v11 = vadd.f32 1.0, %v949_v5  ;;  %v337_v13 = vmul.f32 %v1483_v12, %v296_v8  ;;  %v375_v15 = vsel %vm360_vm1, %v372_v36, %v374_v2 }
  0x8b   : > { %958 = vpow2.f32 %v812_v0  ;;  %v1572_v17 = vadd.f32 %v494_v57, %v430_v7  ;;  %v416_v18 = vmul.f32 %v1485_v14, %v375_v15  ;;  %v454_v19 = vsel %vm439_vm2, %v451_v44, %v453_v3 }
  0x8c   : > { %v298_v20 = vsel %vm281_vm0, %v295_v63, %v297_v9  ;;  %960 = vrcp.f32 %v565_v11  ;;  %v352_v22 = vadd.f32 %v337_v13, %v260_v59  ;;  %v495_v23 = vmul.f32 %v1487_v16, %v454_v19 }
  0x8d   : > { %v338_v24 = vmul.f32 %v1483_v12, %v298_v20  ;;  %v813_v25 = vmul.f32 -1.442695, %v1572_v17  ;;  %v376_v26 = vrot.slane %v1563_v60, 6  ;;  %v455_v27 = vrot.slane %v1563_v60, 7 }
  0x8e   : > { %v262_v28 = vmul.f32 %v1481_v10, %v1578_v21  ;;  %v951_v30 = vpop.eup %950  ;;  %v431_v31 = vadd.f32 %v416_v18, %v352_v22  ;;  %v299_v33 = vrot.slane %v1578_v21, 5  ;;  %v378_v34 = vrot.slane %v1578_v21, 6 }
  0x8f   : > { %v353_v32 = vadd.f32 %v338_v24, %v261_v4  ;;  %v566_v35 = vadd.f32 1.0, %v951_v30  ;;  %962 = vpow2.f32 %v813_v25  ;;  %v377_v36 = vsel %vm360_vm1, %v374_v2, %v376_v26 }
  0x90   : > { %v456_v37 = vsel %vm439_vm2, %v453_v3, %v455_v27  ;;  %v953_v39 = vpop.eup %952  ;;  %v1591_v40 = vadd.f32 %v495_v23, %v431_v31  ;;  %v417_v41 = vmul.f32 %v1485_v14, %v377_v36  ;;  %v300_v43 = vsel %vm281_vm0, %v297_v9, %v299_v33  ;;  %v227_v9 = vld [vmem:[%s1456_s28 + $0x58] sm:$0xff] }
  0x91   : > { %v496_v42 = vmul.f32 %v1487_v16, %v456_v37  ;;  %vm229_vm3 = vcmask 1043456   ;;  %964 = vrcp.f32 %v566_v35  ;;  %v567_v45 = vadd.f32 1.0, %v953_v39 }
  0x92   : > { %v339_v46 = vmul.f32 %v1483_v12, %v300_v43  ;;  %v379_v47 = vsel %vm360_vm1, %v376_v26, %v378_v34  ;;  %v814_v51 = vmul.f32 -1.442695, %v1591_v40  ;;  %v432_v52 = vadd.f32 %v417_v41, %v353_v32 }
  0x93   : > { %v955_v44 = vpop.eup %954  ;;  %v418_v53 = vmul.f32 %v1485_v14, %v379_v47  ;;  %966 = vrcp.f32 %v567_v45  ;;  %v457_v57 = vrot.slane %v1578_v21, 7  ;;  %v263_v59 = vmul.f32 %v1481_v10, %v226_v48  ;;  %v228_v21 = vld [vmem:[%s1456_s28 + $0x60] sm:$0xf]  ;;  %s672_s28 = scalar_lea.sflag [#allocation4], %s1452_s3 }
  0x94   : > { %v608_v50 = vmul.f32 %v955_v44, %v1512_v49  ;;  %v957_v54 = vpop.eup %956  ;;  %v354_v55 = vadd.f32 %v339_v46, %v262_v28  ;;  %968 = vpow2.f32 %v814_v51  ;;  %v1606_v49 = vadd.f32 %v496_v42, %v432_v52 }
  0x95   : > { %v959_v60 = vpop.eup %958  ;;  %v609_v61 = vmul.f32 %v957_v54, %v1517_v58  ;;  %v301_v62 = vrot.slane %v226_v48, 5  ;;  %v458_v2 = vsel %vm439_vm2, %v455_v27, %v457_v57  ;;  %v380_v3 = vrot.slane %v226_v48, 6 }
  0x96   : > { %655 = vst [vmem:[%s1470_s7] sm:$0xff] %v608_v50  ;;  %v568_v63 = vadd.f32 1.0, %v959_v60  ;;  %v433_v0 = vadd.f32 %v418_v53, %v354_v55  ;;  %v961_v4 = vpop.eup %960  ;;  %v815_v5 = vmul.f32 -1.442695, %v1606_v49  ;;  %v497_v7 = vmul.f32 %v1487_v16, %v458_v2 }
  0x97   : > { %656 = vst [vmem:[%s1470_s7 + $0x8] sm:$0xff] %v609_v61  ;;  %v302_v8 = vsel %vm281_vm0, %v299_v33, %v301_v62  ;;  %v459_v58 = vrot.slane %v226_v48, 7  ;;  %v610_v11 = vmul.f32 %v961_v4, %v1527_v6  ;;  %v381_v15 = vsel %vm360_vm1, %v378_v34, %v380_v3 }
  0x98   : > { %970 = vrcp.f32 %v568_v63  ;;  %v340_v13 = vmul.f32 %v1483_v12, %v302_v8  ;;  %v1617_v18 = vadd.f32 %v497_v7, %v433_v0  ;;  %v419_v19 = vmul.f32 %v1485_v14, %v381_v15 }
  0x99   : > { %972 = vpow2.f32 %v815_v5  ;;  %v460_v20 = vsel %vm439_vm2, %v457_v57, %v459_v58  ;;  %v963_v22 = vpop.eup %962  ;;  %657 = vst [vmem:[%s1470_s7 + $0x10] sm:$0xff] %v610_v11  ;;  %v264_v6 = vmul.f32 %v1481_v10, %v227_v9  ;;  %v303_v25 = vrot.slane %v227_v9, 5 }
  0x9a   : > { %v355_v23 = vadd.f32 %v340_v13, %v263_v59  ;;  %v498_v24 = vmul.f32 %v1487_v16, %v460_v20  ;;  %v569_v26 = vadd.f32 1.0, %v963_v22  ;;  %v816_v27 = vmul.f32 -1.442695, %v1617_v18 }
  0x9b   : > { %v382_v28 = vrot.slane %v227_v9, 6  ;;  %v461_v30 = vrot.slane %v227_v9, 7  ;;  %v965_v31 = vpop.eup %964  ;;  %v304_v33 = vsel %vm281_vm0, %v301_v62, %v303_v25  ;;  %v230_v34 = vsel %vm229_vm3, %v228_v21, 0.0 }
  0x9c   : > { %v434_v32 = vadd.f32 %v419_v19, %v355_v23  ;;  %v611_v35 = vmul.f32 %v965_v31, %v1540_v29  ;;  %974 = vrcp.f32 %v569_v26  ;;  %v341_v36 = vmul.f32 %v1483_v12, %v304_v33 }
  0x9d   : > { %v383_v37 = vsel %vm360_vm1, %v380_v3, %v382_v28  ;;  %v967_v39 = vpop.eup %966  ;;  %976 = vpow2.f32 %v816_v27  ;;  %v462_v43 = vsel %vm439_vm2, %v459_v58, %v461_v30  ;;  %v305_v50 = vrot.slane %v230_v34, 5 }
  0x9e   : > { %v1631_v41 = vadd.f32 %v498_v24, %v434_v32  ;;  %v420_v42 = vmul.f32 %v1485_v14, %v383_v37  ;;  %v969_v44 = vpop.eup %968  ;;  %658 = vst [vmem:[%s1470_s7 + $0x18] sm:$0xff] %v611_v35  ;;  %v612_v45 = vmul.f32 %v967_v39, %v1546_v38  ;;  %v356_v46 = vadd.f32 %v341_v36, %v264_v6 }
  0x9f   : > { %v499_v29 = vmul.f32 %v1487_v16, %v462_v43  ;;  %v570_v47 = vadd.f32 1.0, %v969_v44  ;;  %v384_v51 = vrot.slane %v230_v34, 6  ;;  %v265_v53 = vmul.f32 %v1481_v10, %v230_v34 }
  0xa0   : > { %v817_v48 = vmul.f32 -1.442695, %v1631_v41  ;;  %659 = vst [vmem:[%s1470_s7 + $0x20] sm:$0xff] %v612_v45  ;;  %v435_v52 = vadd.f32 %v420_v42, %v356_v46  ;;  %v463_v54 = vrot.slane %v230_v34, 7  ;;  %v306_v57 = vsel %vm281_vm0, %v303_v25, %v305_v50 }
  0xa1   : > { %978 = vrcp.f32 %v570_v47  ;;  %v385_v38 = vsel %vm360_vm1, %v382_v28, %v384_v51  ;;  %v342_v62 = vmul.f32 %v1483_v12, %v306_v57  ;;  %v245_v26 = vadd.s32 96, %v1468_v1 }
  0xa2   : > { %v971_v55 = vpop.eup %970  ;;  %980 = vpow2.f32 %v817_v48  ;;  %v514_v61 = vadd.f32 %v499_v29, %v435_v52  ;;  %v421_v0 = vmul.f32 %v1485_v14, %v385_v38  ;;  %v464_v10 = vsel %vm439_vm2, %v461_v30, %v463_v54 }
  0xa3   : > { %v973_v59 = vpop.eup %972  ;;  %v613_v60 = vmul.f32 %v971_v55, %v1558_v56  ;;  %v357_v3 = vadd.f32 %v342_v62, %v265_v53  ;;  %v500_v4 = vmul.f32 %v1487_v16, %v464_v10  ;;  %vm635_vm4 = vcmp.lt.s32.totalorder %v245_v26, 100 }
  0xa4   : > { %v571_v63 = vadd.f32 1.0, %v973_v59  ;;  %v818_v2 = vmul.f32 -1.442695, %v514_v61 }
  0xa5   : > { %660 = vst [vmem:[%s1470_s7 + $0x28] sm:$0xff] %v613_v60  ;;  %v436_v56 = vadd.f32 %v421_v0, %v357_v3 }
  0xa6   : > { %982 = vrcp.f32 %v571_v63  ;;  %v975_v5 = vpop.eup %974 }
  0xa7   : > { %984 = vpow2.f32 %v818_v2  ;;  %v977_v7 = vpop.eup %976  ;;  %v614_v8 = vmul.f32 %v975_v5, %v1572_v17  ;;  %v515_v58 = vadd.f32 %v500_v4, %v436_v56 }
  0xa8   : > { %v572_v12 = vadd.f32 1.0, %v977_v7 }
  0xa9   : > { %661 = vst [vmem:[%s1470_s7 + $0x30] sm:$0xff] %v614_v8  ;;  %v819_v14 = vmul.f32 -1.442695, %v515_v58 }
  0xaa   : > { %986 = vrcp.f32 %v572_v12 }
  0xab   : > { %v979_v9 = vpop.eup %978  ;;  %988 = vpow2.f32 %v819_v14 }
  0xac   : > { %v981_v11 = vpop.eup %980  ;;  %v615_v13 = vmul.f32 %v979_v9, %v1591_v40 }
  0xad   : > { %v573_v16 = vadd.f32 1.0, %v981_v11 }
  0xae   : > { %662 = vst [vmem:[%s1470_s7 + $0x38] sm:$0xff] %v615_v13 }
  0xaf   : > { %990 = vrcp.f32 %v573_v16 }
  0xb0   : > { %v983_v15 = vpop.eup %982 }
  0xb1   : > { %v985_v19 = vpop.eup %984  ;;  %v616_v17 = vmul.f32 %v983_v15, %v1606_v49 }
  0xb2   : > { %v574_v20 = vadd.f32 1.0, %v985_v19 }
  0xb3   : > { %663 = vst [vmem:[%s1470_s7 + $0x40] sm:$0xff] %v616_v17 }
  0xb4   : > { %992 = vrcp.f32 %v574_v20  ;;  %v987_v21 = vpop.eup %986 }
  0xb5   : > { %v617_v22 = vmul.f32 %v987_v21, %v1617_v18  ;;  %v989_v40 = vpop.eup %988 }
  0xb6   : > { %v575_v23 = vadd.f32 1.0, %v989_v40 }
  0xb7   : > { %664 = vst [vmem:[%s1470_s7 + $0x48] sm:$0xff] %v617_v22 }
  0xb8   : > { %994 = vrcp.f32 %v575_v23 }
  0xb9   : > { %v991_v24 = vpop.eup %990 }
  0xba   : > { %v618_v6 = vmul.f32 %v991_v24, %v1631_v41 }
  0xbc   : > { %665 = vst [vmem:[%s1470_s7 + $0x50] sm:$0xff] %v618_v6 }
  0xbe   : > { %v993_v49 = vpop.eup %992 }
  0xbf   : > { %v619_v25 = vmul.f32 %v993_v49, %v514_v61 }
  0xc1   : > { %666 = vst [vmem:[%s1470_s7 + $0x58] sm:$0xff] %v619_v25 }
  0xc2   : > { %v995_v18 = vpop.eup %994 }
  0xc3   : > { %v620_v27 = vmul.f32 %v995_v18, %v515_v58 }
  0xc5   : > { %v651_v28 = vsel %vm635_vm4, %v620_v27, 0.0 }
  0xc6   : > { %667 = vst [vmem:[%s1470_s7 + $0x60] sm:$0xff] %v651_v28 }
  0xc7   : > { %1069 = shalt.err (!%p1066_p6)
}
  0xc8   : > { %s1070_s6 = scalar_lea.hbm %s1669_s16, 2048  ;;  %s1074_s26 = scalar_lea.hbm %s1735_s2, 12288 }
  0xc9   : > { %p1071_p11 = scmp.ne.s32.totalorder %s1669_s16, %s1070_s6  ;;  %p1075_p7 = scmp.lt.u32.totalorder %s1669_s16, %s1735_s2 }
  0xca   : > { %p1076_p3 = scmp.lt.u32.totalorder %s1074_s26, %s1070_s6  ;;  %p1078_p2 = scmp.lt.u32.totalorder %s1070_s6, %s1669_s16 }
  0xcb   : > { %p1072_p10 = pnand %p1071_p11, %p1761_p13 }
  0xcc   : > { %p1077_p4 = por %p1076_p3, %p1075_p7 }
  0xcd   : > { %p1073_p1 = pneg %p1072_p10 }
  0xce   : > { %p1079_p0 = por %p1078_p2, %p1077_p4 }
  0xd0   : > { %p1080_p9 = pnand %p1079_p0, %p1073_p1 }
  0xd2   : > { %1083 = shalt.err (!%p1080_p9)
}
  0xd3   : > { %s1191_s8 = smov 128   ;;  %s1192_s22 = smov 384  }
  0xd4   : > { %s1193_s15 = smov 8  }
  0xd5   : > { %834 = dma.vmem_to_hbm [thread:$0]  (%p1761_p13), %s1664_s9, 2048, %s1669_s16, %s672_s28, %s1191_s8, %s1192_s22, %s1193_s15  }
  0xd6 PF: > { %p848_p8 = scmp.ge.s32.totalorder %s1182_s19, 2  ;;  %s701_s0 = sand.u32 1, %s1154_s12  }
  0xd7   : > { %p1762_p12 = scmp.ne.s32.totalorder %s1756_s27, 0  ;;  %s702_s21 = scalar_lea.sflag [#allocation4], %s701_s0 }
  0xd9   : > { %p844_p5 = pnand %p848_p8, %p1762_p12 }
  0xdb   : > { %1137 = dma.done.wait (!%p844_p5), %s702_s21, 2048  }
  0xdc   : > { %1139 = vsyncadd (!%p844_p5), %s702_s21, 4294965248  ;;  %s21_s19 = sadd.s32 1, %s1182_s19   ;;  %s1763_s23 = sld [smem:[#allocation11_spill]] }
  0xdd   : > { %p18_p6 = scmp.ge.s32.totalorder %s21_s19, 8   ;;  %s1764_s9 = smov %s1146_s10 }
  0xde   : > { %s1765_s10 = smov %s1150_s11  ;;  %s1766_s11 = smov %s1377_s25 }
  0xdf   : > { %s1767_s12 = smov %s1158_s13  ;;  %s1768_s13 = smov %s1162_s14 }
  0xe0   : > { %s1769_s14 = smov %s1374_s5  ;;  %s1770_s15 = smov %s1174_s17 }
  0xe1   : > { %s1771_s16 = smov %s1178_s18  ;;  %s1772_s17 = smov %s1777_s20 }
  0xe2   : > { %s1773_s18 = smov %s1763_s23  ;;  %20 = sbr.rel (!%p18_p6) target bundleno = 13 (0xd), region = 86 }
  0xe9   :  { %707 = vsyncpa [#allocation3], 1 }
  0xea   :  { %709 = vsyncpa [#allocation3 + $0x1], 1 }
  0xeb   :  { %710 = vsyncpa [#allocation6], 1 }
  0xec   :  { %712 = vsyncpa [#allocation6 + $0x1], 1 }
  0xed   :  { %713 = vsyncpa [#allocation4], 1 }
  0xee   :  { %715 = vsyncpa [#allocation4 + $0x1], 1 }

// kernel: _lambda_.7
= control target key start
LH: loop header
LB: loop body
LE: loop exit
PB: predicated region body
PF: predicated region fallthrough
CT: control target
= control target key end

     0   :  { %7 = vsyncpa [#allocation4], 0  ;;  %s764_s0 = inlined_call_operand.hbm [shape: f32[200,128], index: 0, kind: input, shape index: {}]   ;;  %s765_s1 = inlined_call_operand.hbm [shape: bf16[128,128], index: 1, kind: input, shape index: {}]   ;;  %s766_s2 = inlined_call_operand.hbm [shape: f32[200,128], index: 2, kind: output, shape index: {}]  }
   0x1   :  { %8 = vsyncpa [#allocation7], 0 }
   0x2   :  { %9 = vsyncpa [#allocation5], 0  ;;  %s656_s9 = smov [#allocation3]   ;;  %s584_s13 = scalar_lea.hbm %s764_s0, 3200 }
   0x3   :  { %s15_s10 = sshll.u32 %s656_s9, 4  ;;  %p585_p0 = scmp.ne.s32.totalorder %s764_s0, %s584_s13  ;;  %s16_s10 = int_to_ptr.vmem [resolvable:$true] %s15_s10 }
   0x4   :  { %p588_p1 = scmp.lt.u32.totalorder %s584_s13, %s764_s0 }
   0x6   :  { %p590_p2 = pnand %p588_p1, %p585_p0 }
   0x8   :  { %593 = shalt.err (!%p590_p2)
}
   0x9   :  { %s594_s18 = scalar_lea.vmem %s16_s10, 3200  ;;  %p599_p4 = scmp.lt.s32.totalorder %s16_s10, %s16_s10 }
   0xa   :  { %p595_p3 = scmp.ne.s32.totalorder %s16_s10, %s594_s18  ;;  %p600_p5 = scmp.lt.s32.totalorder %s594_s18, %s594_s18 }
   0xc   :  { %p601_p6 = por %p600_p5, %p599_p4 }
   0xe   :  { %p602_p7 = pnand %p601_p6, %p595_p3 }
  0x10   :  { %605 = shalt.err (!%p602_p7)
}
  0x11   :  { %s657_s19 = smov 128   ;;  %s658_s20 = smov 8  }
  0x12   :  { %21 = dma.hbm_to_vmem [thread:$0]  %s764_s0, 3200, %s16_s10, [#allocation4], %s657_s19, %s657_s19, %s658_s20  }
  0x13   :  { %s659_s23 = smov [#allocation6]   ;;  %s606_s27 = scalar_lea.hbm %s765_s1, 1024 }
  0x14   :  { %s27_s24 = sshll.u32 %s659_s23, 4  ;;  %p607_p8 = scmp.ne.s32.totalorder %s765_s1, %s606_s27  ;;  %s28_s24 = int_to_ptr.vmem [resolvable:$true] %s27_s24 }
  0x15   :  { %p610_p9 = scmp.lt.u32.totalorder %s606_s27, %s765_s1 }
  0x17   :  { %p612_p10 = pnand %p610_p9, %p607_p8 }
  0x19   :  { %615 = shalt.err (!%p612_p10)
}
  0x1a   :  { %s616_s4 = scalar_lea.vmem %s28_s24, 1024  ;;  %p621_p12 = scmp.lt.s32.totalorder %s28_s24, %s28_s24 }
  0x1b   :  { %p617_p11 = scmp.ne.s32.totalorder %s28_s24, %s616_s4  ;;  %p622_p13 = scmp.lt.s32.totalorder %s616_s4, %s616_s4 }
  0x1d   :  { %p623_p0 = por %p622_p13, %p621_p12 }
  0x1f   :  { %p624_p1 = pnand %p623_p0, %p617_p11 }
  0x21   :  { %627 = shalt.err (!%p624_p1)
}
  0x22   :  { %s660_s0 = smov 64   ;;  %s661_s5 = smov 4  }
  0x23   :  { %33 = dma.hbm_to_vmem [thread:$0]  %s765_s1, 1024, %s28_s24, [#allocation7], %s660_s0, %s660_s0, %s661_s5  }
  0x24   :  { %650 = dma.done.wait [#allocation4], 3200  }
  0x25   :  { %651 = vsyncadd [#allocation4], 4294964096 }
  0x26   :  { %652 = dma.done.wait [#allocation7], 1024  }
  0x27   :  { %653 = vsyncadd [#allocation7], 4294966272  ;;  %v662_v0 = vmov 0.0   ;;  %vm663_vm0 = vmmov 0   ;;  %v576_v1 = vld [vmem:[#allocation6] sm:$0xff]   ;;  %v577_v2 = vld [vmem:[#allocation6 + $0x8] sm:$0xff]  }
  0x28   :  { %483 = vmatprep.subr.bf16.mxu0 %v662_v0  ;;  %551 = vmatprep.subr.bf16.mxu1 %v662_v0  ;;  %v578_v3 = vld [vmem:[#allocation6 + $0x10] sm:$0xff]   ;;  %v579_v4 = vld [vmem:[#allocation6 + $0x18] sm:$0xff]   ;;  %v580_v5 = vld [vmem:[#allocation6 + $0x20] sm:$0xff]   ;;  %s664_s1 = smov [#allocation8]  }
  0x29   :  { %499 = vmatprep.mubr.msk.bf16.mxu0 %vm663_vm0, %v662_v0  ;;  %527 = vmatprep.mubr.msk.bf16.mxu1 %vm663_vm0, %v662_v0  ;;  %v581_v6 = vld [vmem:[#allocation6 + $0x28] sm:$0xff]   ;;  %v582_v7 = vld [vmem:[#allocation6 + $0x30] sm:$0xff]   ;;  %v583_v8 = vld [vmem:[#allocation6 + $0x38] sm:$0xff]   ;;  %s441_s8 = sshll.u32 %s664_s1, 4  ;;  %s442_s8 = int_to_ptr.vmem [resolvable:$true] %s441_s8 }
  0x2a   :  { %484 = vmatpush3.bf16.msra.mxu0 %v576_v1  ;;  %559 = vmatpush3.bf16.msra.mxu1 %v576_v1  ;;  %v95_v9 = vld [vmem:[#allocation3] sm:$0xff]  ;;  %v96_v10 = vld [vmem:[#allocation3 + $0x8] sm:$0xff]  ;;  %v109_v11 = vld [vmem:[#allocation3 + $0x70] sm:$0xff]  ;;  %s628_s9 = scalar_lea.vmem %s442_s8, 3200  ;;  %p633_p3 = scmp.lt.s32.totalorder %s442_s8, %s442_s8 }
  0x2b   :  { %485 = vmatprep.subr.bf16.mxu0 %v662_v0  ;;  %552 = vmatprep.subr.bf16.mxu1 %v662_v0  ;;  %v110_v12 = vld [vmem:[#allocation3 + $0x78] sm:$0xff]  ;;  %v120_v13 = vpack.c.bf16 %v96_v10, %v95_v9  ;;  %v97_v15 = vld [vmem:[#allocation3 + $0x10] sm:$0xff]  ;;  %v111_v17 = vld [vmem:[#allocation3 + $0x80] sm:$0xff]  ;;  %p629_p2 = scmp.ne.s32.totalorder %s442_s8, %s628_s9  ;;  %p634_p4 = scmp.lt.s32.totalorder %s628_s9, %s628_s9 }
  0x2c   :  { %v127_v14 = vpack.c.bf16 %v110_v12, %v109_v11  ;;  %v98_v16 = vld [vmem:[#allocation3 + $0x18] sm:$0xff]  ;;  %v112_v18 = vld [vmem:[#allocation3 + $0x88] sm:$0xff]  ;;  %v99_v21 = vld [vmem:[#allocation3 + $0x20] sm:$0xff] }
  0x2d   :  { %v121_v19 = vpack.c.bf16 %v98_v16, %v97_v15  ;;  %v128_v20 = vpack.c.bf16 %v112_v18, %v111_v17  ;;  %v100_v22 = vld [vmem:[#allocation3 + $0x28] sm:$0xff]  ;;  %v113_v23 = vld [vmem:[#allocation3 + $0x90] sm:$0xff]  ;;  %v114_v24 = vld [vmem:[#allocation3 + $0x98] sm:$0xff]  ;;  %p635_p5 = por %p634_p4, %p633_p3 }
  0x2e   :  { %486 = vmatpush3.bf16.msra.mxu0 %v577_v2  ;;  %560 = vmatpush3.bf16.msra.mxu1 %v577_v2  ;;  %v122_v25 = vpack.c.bf16 %v100_v22, %v99_v21  ;;  %v129_v26 = vpack.c.bf16 %v114_v24, %v113_v23  ;;  %v101_v27 = vld [vmem:[#allocation3 + $0x30] sm:$0xff]  ;;  %v102_v28 = vld [vmem:[#allocation3 + $0x38] sm:$0xff]  ;;  %v115_v29 = vld [vmem:[#allocation3 + $0xa0] sm:$0xff] }
  0x2f   :  { %487 = vmatprep.subr.bf16.mxu0 %v662_v0  ;;  %553 = vmatprep.subr.bf16.mxu1 %v662_v0  ;;  %v116_v30 = vld [vmem:[#allocation3 + $0xa8] sm:$0xff]  ;;  %v123_v31 = vpack.c.bf16 %v102_v28, %v101_v27  ;;  %v103_v33 = vld [vmem:[#allocation3 + $0x40] sm:$0xff]  ;;  %v117_v35 = vld [vmem:[#allocation3 + $0xb0] sm:$0xff]  ;;  %p636_p6 = pnand %p635_p5, %p629_p2 }
  0x30   :  { %v130_v32 = vpack.c.bf16 %v116_v30, %v115_v29  ;;  %v104_v34 = vld [vmem:[#allocation3 + $0x48] sm:$0xff]  ;;  %v118_v36 = vld [vmem:[#allocation3 + $0xb8] sm:$0xff]  ;;  %v105_v39 = vld [vmem:[#allocation3 + $0x50] sm:$0xff] }
  0x31   :  { %v124_v37 = vpack.c.bf16 %v104_v34, %v103_v33  ;;  %v131_v38 = vpack.c.bf16 %v118_v36, %v117_v35  ;;  %v106_v40 = vld [vmem:[#allocation3 + $0x58] sm:$0xff]  ;;  %v119_v41 = vld [vmem:[#allocation3 + $0xc0] sm:$0xff]  ;;  %v108_v45 = vld [vmem:[#allocation3 + $0x68] sm:$0xff] }
  0x32   :  { %488 = vmatpush3.bf16.msra.mxu0 %v578_v3  ;;  %561 = vmatpush3.bf16.msra.mxu1 %v578_v3  ;;  %v125_v42 = vpack.c.bf16 %v106_v40, %v105_v39  ;;  %v132_v43 = vpack.c.bf16 %v119_v41, %v119_v41  ;;  %v107_v44 = vld [vmem:[#allocation3 + $0x60] sm:$0xff] }
  0x33   :  { %489 = vmatprep.subr.bf16.mxu0 %v662_v0  ;;  %554 = vmatprep.subr.bf16.mxu1 %v662_v0  ;;  %v126_v46 = vpack.c.bf16 %v108_v45, %v107_v44 }
  0x36   :  { %490 = vmatpush3.bf16.msra.mxu0 %v579_v4  ;;  %562 = vmatpush3.bf16.msra.mxu1 %v579_v4 }
  0x37   :  { %491 = vmatprep.subr.bf16.mxu0 %v662_v0  ;;  %555 = vmatprep.subr.bf16.mxu1 %v662_v0 }
  0x3a   :  { %492 = vmatpush3.bf16.msra.mxu0 %v580_v5  ;;  %563 = vmatpush3.bf16.msra.mxu1 %v580_v5 }
  0x3b   :  { %493 = vmatprep.subr.bf16.mxu0 %v662_v0  ;;  %556 = vmatprep.subr.bf16.mxu1 %v662_v0 }
  0x3e   :  { %494 = vmatpush3.bf16.msra.mxu0 %v581_v6  ;;  %564 = vmatpush3.bf16.msra.mxu1 %v581_v6 }
  0x3f   :  { %495 = vmatprep.subr.bf16.mxu0 %v662_v0  ;;  %557 = vmatprep.subr.bf16.mxu1 %v662_v0 }
  0x42   :  { %496 = vmatpush3.bf16.msra.mxu0 %v582_v7  ;;  %565 = vmatpush3.bf16.msra.mxu1 %v582_v7 }
  0x43   :  { %497 = vmatprep.subr.bf16.mxu0 %v662_v0  ;;  %558 = vmatprep.subr.bf16.mxu1 %v662_v0 }
  0x46   :  { %498 = vmatpush3.bf16.msra.mxu0 %v583_v8  ;;  %566 = vmatpush3.bf16.msra.mxu1 %v583_v8 }
  0x49   :  { %500 = vmatmul.mubr.bf16.vlgmr.msra.gmra.mrb[0].mxu0 %v120_v13  ;;  %528 = vmatmul.mubr.bf16.vlgmr.msra.gmra.mrb[0].mxu1 %v127_v14 }
  0x4a   :  { %503 = vmatprep.mubr.msk.bf16.mxu0 %vm663_vm0, %v662_v0  ;;  %531 = vmatprep.mubr.msk.bf16.mxu1 %vm663_vm0, %v662_v0 }
  0x51   :  { %504 = vmatmul.mubr.bf16.gmra.mrb[4].mxu0 %v121_v19  ;;  %532 = vmatmul.mubr.bf16.gmra.mrb[4].mxu1 %v128_v20 }
  0x52   :  { %507 = vmatprep.mubr.msk.bf16.mxu0 %vm663_vm0, %v662_v0  ;;  %535 = vmatprep.mubr.msk.bf16.mxu1 %vm663_vm0, %v662_v0 }
  0x59   :  { %508 = vmatmul.mubr.bf16.gmra.mrb[8].mxu0 %v122_v25  ;;  %536 = vmatmul.mubr.bf16.gmra.mrb[8].mxu1 %v129_v26 }
  0x5a   :  { %511 = vmatprep.mubr.msk.bf16.mxu0 %vm663_vm0, %v662_v0  ;;  %539 = vmatprep.mubr.msk.bf16.mxu1 %vm663_vm0, %v662_v0 }
  0x61   :  { %512 = vmatmul.mubr.bf16.gmra.mrb[12].mxu0 %v123_v31  ;;  %540 = vmatmul.mubr.bf16.gmra.mrb[12].mxu1 %v130_v32 }
  0x62   :  { %515 = vmatprep.mubr.msk.bf16.mxu0 %vm663_vm0, %v662_v0  ;;  %543 = vmatprep.mubr.msk.bf16.mxu1 %vm663_vm0, %v662_v0 }
  0x69   :  { %516 = vmatmul.mubr.bf16.gmra.mrb[16].mxu0 %v124_v37  ;;  %544 = vmatmul.mubr.bf16.gmra.mrb[16].mxu1 %v131_v38 }
  0x6a   :  { %519 = vmatprep.mubr.msk.bf16.mxu0 %vm663_vm0, %v662_v0  ;;  %547 = vmatprep.mubr.msk.bf16.mxu1 %vm663_vm0, %v662_v0 }
  0x71   :  { %520 = vmatmul.mubr.bf16.gmra.mrb[20].mxu0 %v125_v42  ;;  %548 = vmatmul.mubr.bf16.gmra.mrb[20].mxu1 %v132_v43 }
  0x72   :  { %523 = vmatprep.mubr.msk.bf16.mxu0 %vm663_vm0, %v662_v0 }
  0x79   :  { %524 = vmatmul.mubr.bf16.gmra.mrb[24].mxu0 %v126_v46 }
 0x11c   :  { %v231_v47 = vpop.f32.mrb[0].mxu0  ;;  %v287_v48 = vpop.f32.mrb[0].mxu1 }
 0x11d   :  { %411 = vst [vmem:[#allocation8] sm:$0xff] %v231_v47  ;;  %v501_v49 = vpop.f32.mrb[1].mxu0  ;;  %425 = vst [vmem:[#allocation8 + $0x70] sm:$0xff] %v287_v48  ;;  %v529_v50 = vpop.f32.mrb[1].mxu1 }
 0x11e   :  { %v234_v51 = vpop.f32.mrb[2].mxu0  ;;  %v290_v52 = vpop.f32.mrb[2].mxu1 }
 0x11f   :  { %412 = vst [vmem:[#allocation8 + $0x8] sm:$0xff] %v234_v51  ;;  %v502_v53 = vpop.f32.mrb[3].mxu0  ;;  %426 = vst [vmem:[#allocation8 + $0x78] sm:$0xff] %v290_v52  ;;  %v530_v54 = vpop.f32.mrb[3].mxu1 }
 0x124   :  { %v239_v55 = vpop.f32.mrb[4].mxu0  ;;  %v295_v56 = vpop.f32.mrb[4].mxu1 }
 0x125   :  { %413 = vst [vmem:[#allocation8 + $0x10] sm:$0xff] %v239_v55  ;;  %v505_v57 = vpop.f32.mrb[5].mxu0  ;;  %427 = vst [vmem:[#allocation8 + $0x80] sm:$0xff] %v295_v56  ;;  %v533_v58 = vpop.f32.mrb[5].mxu1 }
 0x126   :  { %v242_v59 = vpop.f32.mrb[6].mxu0  ;;  %v298_v60 = vpop.f32.mrb[6].mxu1 }
 0x127   :  { %414 = vst [vmem:[#allocation8 + $0x18] sm:$0xff] %v242_v59  ;;  %v506_v61 = vpop.f32.mrb[7].mxu0  ;;  %428 = vst [vmem:[#allocation8 + $0x88] sm:$0xff] %v298_v60  ;;  %v534_v62 = vpop.f32.mrb[7].mxu1 }
 0x12c   :  { %v247_v63 = vpop.f32.mrb[8].mxu0  ;;  %v303_v0 = vpop.f32.mrb[8].mxu1 }
 0x12d   :  { %415 = vst [vmem:[#allocation8 + $0x20] sm:$0xff] %v247_v63  ;;  %v509_v1 = vpop.f32.mrb[9].mxu0  ;;  %429 = vst [vmem:[#allocation8 + $0x90] sm:$0xff] %v303_v0  ;;  %v537_v2 = vpop.f32.mrb[9].mxu1 }
 0x12e   :  { %v250_v3 = vpop.f32.mrb[10].mxu0  ;;  %v306_v4 = vpop.f32.mrb[10].mxu1 }
 0x12f   :  { %416 = vst [vmem:[#allocation8 + $0x28] sm:$0xff] %v250_v3  ;;  %v510_v5 = vpop.f32.mrb[11].mxu0  ;;  %430 = vst [vmem:[#allocation8 + $0x98] sm:$0xff] %v306_v4  ;;  %v538_v6 = vpop.f32.mrb[11].mxu1 }
 0x134   :  { %v255_v7 = vpop.f32.mrb[12].mxu0  ;;  %v311_v8 = vpop.f32.mrb[12].mxu1 }
 0x135   :  { %417 = vst [vmem:[#allocation8 + $0x30] sm:$0xff] %v255_v7  ;;  %v513_v9 = vpop.f32.mrb[13].mxu0  ;;  %431 = vst [vmem:[#allocation8 + $0xa0] sm:$0xff] %v311_v8  ;;  %v541_v10 = vpop.f32.mrb[13].mxu1 }
 0x136   :  { %v258_v11 = vpop.f32.mrb[14].mxu0  ;;  %v314_v12 = vpop.f32.mrb[14].mxu1 }
 0x137   :  { %418 = vst [vmem:[#allocation8 + $0x38] sm:$0xff] %v258_v11  ;;  %v514_v13 = vpop.f32.mrb[15].mxu0  ;;  %432 = vst [vmem:[#allocation8 + $0xa8] sm:$0xff] %v314_v12  ;;  %v542_v14 = vpop.f32.mrb[15].mxu1 }
 0x13c   :  { %v263_v15 = vpop.f32.mrb[16].mxu0  ;;  %v319_v16 = vpop.f32.mrb[16].mxu1 }
 0x13d   :  { %419 = vst [vmem:[#allocation8 + $0x40] sm:$0xff] %v263_v15  ;;  %v517_v17 = vpop.f32.mrb[17].mxu0  ;;  %433 = vst [vmem:[#allocation8 + $0xb0] sm:$0xff] %v319_v16  ;;  %v545_v18 = vpop.f32.mrb[17].mxu1 }
 0x13e   :  { %v266_v19 = vpop.f32.mrb[18].mxu0  ;;  %v322_v20 = vpop.f32.mrb[18].mxu1 }
 0x13f   :  { %420 = vst [vmem:[#allocation8 + $0x48] sm:$0xff] %v266_v19  ;;  %v518_v21 = vpop.f32.mrb[19].mxu0  ;;  %434 = vst [vmem:[#allocation8 + $0xb8] sm:$0xff] %v322_v20  ;;  %v546_v22 = vpop.f32.mrb[19].mxu1 }
 0x144   :  { %v271_v23 = vpop.f32.mrb[20].mxu0  ;;  %v327_v24 = vpop.f32.mrb[20].mxu1 }
 0x145   :  { %421 = vst [vmem:[#allocation8 + $0x50] sm:$0xff] %v271_v23  ;;  %v521_v25 = vpop.f32.mrb[21].mxu0  ;;  %435 = vst [vmem:[#allocation8 + $0xc0] sm:$0xff] %v327_v24  ;;  %v549_v26 = vpop.f32.mrb[21].mxu1 }
 0x146   :  { %v274_v27 = vpop.f32.mrb[22].mxu0  ;;  %v330_v28 = vpop.f32.mrb[22].mxu1 }
 0x147   :  { %422 = vst [vmem:[#allocation8 + $0x58] sm:$0xff] %v274_v27  ;;  %v522_v29 = vpop.f32.mrb[23].mxu0  ;;  %v550_v30 = vpop.f32.mrb[23].mxu1 }
 0x14c   :  { %v279_v31 = vpop.f32.mrb[24].mxu0 }
 0x14d   :  { %423 = vst [vmem:[#allocation8 + $0x60] sm:$0xff] %v279_v31  ;;  %v525_v32 = vpop.f32.mrb[25].mxu0 }
 0x14e   :  { %v282_v33 = vpop.f32.mrb[26].mxu0 }
 0x14f   :  { %424 = vst [vmem:[#allocation8 + $0x68] sm:$0xff] %v282_v33  ;;  %v526_v34 = vpop.f32.mrb[27].mxu0 }
 0x150   :  { %639 = shalt.err (!%p636_p6)
}
 0x151   :  { %s640_s12 = scalar_lea.hbm %s766_s2, 3200 }
 0x152   :  { %p641_p7 = scmp.ne.s32.totalorder %s766_s2, %s640_s12  ;;  %p644_p8 = scmp.lt.u32.totalorder %s640_s12, %s766_s2 }
 0x154   :  { %p646_p9 = pnand %p644_p8, %p641_p7 }
 0x156   :  { %649 = shalt.err (!%p646_p9)
}
 0x157   :  { %447 = dma.vmem_to_hbm [thread:$0]  %s442_s8, 3200, %s766_s2, [#allocation5], %s657_s19, %s657_s19, %s658_s20  }
 0x158   :  { %654 = dma.done.wait [#allocation5], 3200  }
 0x159   :  { %655 = vsyncadd [#allocation5], 4294964096 }
 0x15a   :  { %451 = vsyncpa [#allocation4], 1 }
 0x15b   :  { %452 = vsyncpa [#allocation7], 1 }
 0x15c   :  { %453 = vsyncpa [#allocation5], 1 }

// kernel: _lambda_.4
= control target key start
LH: loop header
LB: loop body
LE: loop exit
PB: predicated region body
PF: predicated region fallthrough
CT: control target
= control target key end

     0   :  { %7 = vsyncpa [#allocation4], 0  ;;  %s1580_s0 = inlined_call_operand.hbm [shape: f32[200,128], index: 0, kind: input, shape index: {}]   ;;  %s1581_s1 = inlined_call_operand.hbm [shape: bf16[128,512], index: 1, kind: input, shape index: {}]   ;;  %s1582_s2 = inlined_call_operand.hbm [shape: f32[200,512], index: 2, kind: output, shape index: {}]  }
   0x1   :  { %8 = vsyncpa [#allocation7], 0 }
   0x2   :  { %10 = vsyncpa [#allocation7 + $0x1], 0 }
   0x3   :  { %11 = vsyncpa [#allocation5], 0 }
   0x4   :  { %13 = vsyncpa [#allocation5 + $0x1], 0  ;;  %s1270_s9 = smov 0   ;;  %s1272_s10 = smov 0  }
   0x5   :  { %s1274_s11 = smov 0   ;;  %s1276_s12 = smov 0  }
   0x6   :  { %s1278_s13 = smov 0   ;;  %s1280_s14 = smov 0  }
   0x7 LB: > { %s945_s15 = sadd.s32 4294967295, %s1243_s14   ;;  %s946_s16 = sadd.s32 4294967294, %s1243_s14   ;;  %s1243_s14 = sphi %s1280_s14, %s19_s14   ;;  %s1239_s13 = sphi %s1278_s13, %s1608_s13   ;;  %s1235_s12 = sphi %s1276_s12, %s1607_s12   ;;  %s1231_s11 = sphi %s1274_s11, %s1606_s11   ;;  %s1227_s10 = sphi %s1272_s10, %s1605_s10   ;;  %s1223_s9 = sphi %s1270_s9, %s1604_s9  }
   0x8   : > { %p82_p0 = scmp.ne.s32.totalorder %s1231_s11, %s1227_s10  ;;  %p83_p1 = scmp.eq.s32.totalorder %s1243_s14, 0 }
   0x9   : > { %p88_p2 = scmp.ne.s32.totalorder %s1227_s10, %s1223_s9  ;;  %p1307_p3 = scmp.eq.s32.totalorder %s945_s15, 0 }
   0xa   : > { %p1311_p4 = por %p83_p1, %p82_p0  ;;  %p114_p5 = scmp.eq.s32.totalorder %s945_s15, 1 }
   0xb   : > { %s1589_s17 = scalar_select %p1307_p3, 1, 0 }
   0xc   : > { %p1317_p6 = por %p1307_p3, %p88_p2  ;;  %p120_p7 = scmp.eq.s32.totalorder %s946_s16, 1 }
   0xd   : > { %p1321_p8 = por %p114_p5, %p82_p0  ;;  %p947_p9 = scmp.ge.s32.totalorder %s1243_s14, 1 }
   0xe   : > { %s1591_s19 = scalar_select %p1317_p6, 1, 0 }
   0xf   : > { %s1592_s20 = scalar_select %p1321_p8, 1, 0 }
  0x10   : > { %p1326_p10 = por %p120_p7, %p88_p2  ;;  %p127_p11 = scmp.lt.s32.totalorder %s1243_s14, 3 }
  0x11   : > { %s1245_s23 = smov [#allocation3]   ;;  %p1016_p1 = scmp.lt.s32.totalorder %s1243_s14, 2 }
  0x12   : > { %s1593_s21 = scalar_select %p1326_p10, 1, 0 }
  0x13   : > { %p1331_p12 = pnand %p947_p9, %p127_p11  ;;  %s143_s24 = sshll.u32 %s1245_s23, 4  ;;  %s1335_s24 = int_to_ptr.vmem [resolvable:$true] %s143_s24 }
  0x14   : > { %p1349_p2 = pnand %p1016_p1, %p1311_p4  ;;  %s34_s27 = sadd.s32 1, %s1239_s13 }
  0x15   : > { %s1594_s22 = scalar_select %p1331_p12, 1, 0 }
  0x16   : > { %p1003_p13 = pneg %p1331_p12  ;;  %s1099_s30 = scalar_lea.hbm %s1580_s0, 3200 }
  0x17   : > { %s1596_s26 = scalar_select %p1349_p2, 1, 0 }
  0x18   : > { %p1343_p5 = pnand %p1003_p13, %p1307_p3  ;;  %p1100_p7 = scmp.ne.s32.totalorder %s1580_s0, %s1099_s30 }
  0x19   : > { %p1106_p4 = scmp.lt.u32.totalorder %s1099_s30, %s1580_s0 }
  0x1a   : > { %p1101_p9 = pneg %p1343_p5 }
  0x1c   : > { %p1102_p11 = pnand %p1101_p9, %p1100_p7 }
  0x1e   : > { %p1103_p13 = pneg %p1102_p11 }
  0x20   : > { %p1108_p1 = pnand %p1106_p4, %p1103_p13 }
  0x22   : > { %1111 = shalt.err (!%p1108_p1)
}
  0x23   : > { %s1112_s7 = scalar_lea.vmem %s1335_s24, 3200  ;;  %p1120_p6 = scmp.lt.s32.totalorder %s1335_s24, %s1335_s24 }
  0x24   : > { %p1113_p0 = scmp.ne.s32.totalorder %s1335_s24, %s1112_s7  ;;  %p1121_p3 = scmp.lt.s32.totalorder %s1112_s7, %s1112_s7 }
  0x26   : > { %p1115_p10 = pnand %p1113_p0, %p1101_p9  ;;  %p1122_p12 = por %p1121_p3, %p1120_p6 }
  0x28   : > { %p1116_p8 = pneg %p1115_p10 }
  0x2a   : > { %p1123_p2 = pnand %p1122_p12, %p1116_p8 }
  0x2c   : > { %1126 = shalt.err (!%p1123_p2)
}
  0x2d   : > { %s1246_s8 = smov 128   ;;  %s1247_s15 = smov 8  }
  0x2e   : > { %1006 = dma.hbm_to_vmem [thread:$0]  (!%p1343_p5), %s1580_s0, 3200, %s1335_s24, [#allocation4], %s1246_s8, %s1246_s8, %s1247_s15  }
  0x2f   : > { %p36_p3 = scmp.ge.s32.totalorder %s34_s27, 2  ;;  %s75_s23 = sadd.s32 1, %s1231_s11 }
  0x30   : > { %s157_s28 = sand.u32 1, %s1231_s11   ;;  %s976_s3 = sshll.u32 %s1239_s13, 7 }
  0x31   : > { %s1610_s27 = smov (%p36_p3, %s34_s27), 0  ;;  %s950_s29 = sshll.u32 %s157_s28, 7 }
  0x32   : > { %s71_s30 = ssub.s32 %s1239_s13, %s1610_s27  ;;  %s1388_s5 = scalar_lea.hbm %s1581_s1, %s976_s3 }
  0x33   : > { %p73_p6 = scmp.eq.s32.totalorder %s71_s30, 0  ;;  %s161_s24 = scalar_lea.vmem [#allocation6], %s950_s29 }
  0x34   : > { %s171_s6 = sshll.u32 %s161_s24, 4  ;;  %s1395_s16 = scalar_lea.sflag [#allocation7], %s157_s28  ;;  %s1393_s6 = int_to_ptr.vmem [resolvable:$true] %s171_s6 }
  0x35   : > { %s1391_s7 = scalar_select %p73_p6, %s1231_s11, %s75_s23  }
  0x36   : > { %s1127_s18 = scalar_lea.hbm %s1388_s5, 2048  ;;  %p1597_p10 = scmp.ne.s32.totalorder %s1596_s26, 0 }
  0x37   : > { %p1128_p8 = scmp.ne.s32.totalorder %s1388_s5, %s1127_s18  ;;  %s1132_s25 = scalar_lea.hbm %s1581_s1, 4096 }
  0x38   : > { %p1129_p12 = pneg %p1597_p10  ;;  %p1133_p2 = scmp.lt.u32.totalorder %s1388_s5, %s1581_s1 }
  0x39   : > { %p1134_p7 = scmp.lt.u32.totalorder %s1132_s25, %s1127_s18  ;;  %p1136_p11 = scmp.lt.u32.totalorder %s1127_s18, %s1388_s5 }
  0x3a   : > { %p1130_p0 = pnand %p1129_p12, %p1128_p8 }
  0x3b   : > { %p1135_p9 = por %p1134_p7, %p1133_p2 }
  0x3c   : > { %p1131_p5 = pneg %p1130_p0 }
  0x3d   : > { %p1137_p13 = por %p1136_p11, %p1135_p9 }
  0x3f   : > { %p1138_p4 = pnand %p1137_p13, %p1131_p5 }
  0x41   : > { %1141 = shalt.err (!%p1138_p4)
}
  0x42   : > { %s1142_s23 = scalar_lea.vmem %s1393_s6, 2048  ;;  %s1248_s28 = smov [#allocation6]  }
  0x43   : > { %p1143_p1 = scmp.ne.s32.totalorder %s1393_s6, %s1142_s23  ;;  %s1147_s24 = sshll.u32 %s1248_s28, 4  ;;  %s1148_s24 = int_to_ptr.vmem [resolvable:$false] %s1147_s24 }
  0x44   : > { %s1149_s30 = scalar_lea.vmem %s1148_s24, 4096  ;;  %p1150_p8 = scmp.lt.s32.totalorder %s1393_s6, %s1148_s24 }
  0x45   : > { %p1145_p3 = pnand %p1143_p1, %p1129_p12  ;;  %p1151_p0 = scmp.lt.s32.totalorder %s1149_s30, %s1142_s23 }
  0x47   : > { %p1146_p6 = pneg %p1145_p3  ;;  %p1152_p2 = por %p1151_p0, %p1150_p8 }
  0x49   : > { %p1153_p7 = pnand %p1152_p2, %p1146_p6 }
  0x4b   : > { %1156 = shalt.err (!%p1153_p7)
}
  0x4c   : > { %s1249_s18 = smov 256   ;;  %p1598_p12 = scmp.ne.s32.totalorder %s1594_s22, 0 }
  0x4d   : > { %1010 = dma.hbm_to_vmem [thread:$0]  (!%p1597_p10), %s1388_s5, 2048, %s1393_s6, %s1395_s16, %s1249_s18, %s1246_s8, %s1247_s15  }
  0x4e   : > { %183 = sbr.rel (%p1598_p12) target bundleno = 403 (0x193), region = 28  ;;  %p1599_p5 = scmp.ne.s32.totalorder (!%p1598_p12), %s1589_s17, 0 }
  0x55   : > { %1210 = dma.done.wait (%p1599_p5), [#allocation4], 3200  }
  0x56   : > { %1212 = vsyncadd (%p1599_p5), [#allocation4], 4294964096  ;;  %s1432_s3 = sand.u32 1, %s1227_s10   ;;  %p1600_p10 = scmp.ne.s32.totalorder %s1591_s19, 0 }
  0x57   : > { %s955_s26 = sshll.u32 %s1432_s3, 7  ;;  %s190_s25 = scalar_lea.sflag [#allocation7], %s1432_s3 }
  0x58   : > { %s1436_s29 = scalar_lea.vmem [#allocation6], %s955_s26 }
  0x59   : > { %1214 = dma.done.wait (%p1600_p10), %s190_s25, 2048  }
  0x5a   : > { %1216 = vsyncadd (%p1600_p10), %s190_s25, 4294965248  ;;  %v1250_v0 = vmov 0   ;;  %v1075_v1 = vld [vmem:[%s1436_s29 + $0x4] ss:$8 sps:$4 sm:$0xff]   ;;  %v1077_v2 = vld [vmem:[%s1436_s29] ss:$8 sps:$4 sm:$0xff]  }
  0x5b   : > { %490 = vmatprep.mubr.bf16.mxu0 %v1250_v0  ;;  %560 = vmatprep.mubr.bf16.mxu1 %v1250_v0  ;;  %v1078_v3 = vld [vmem:[%s1436_s29 + $0x14] ss:$8 sps:$4 sm:$0xff]   ;;  %v1080_v4 = vld [vmem:[%s1436_s29 + $0x10] ss:$8 sps:$4 sm:$0xff]   ;;  %v1081_v5 = vld [vmem:[%s1436_s29 + $0x24] ss:$8 sps:$4 sm:$0xff]  }
  0x5c   : > { %458 = vmatprep.subr.bf16.mxu0 %v1075_v1  ;;  %978 = vmatprep.subr.bf16.mxu1 %v1075_v1  ;;  %v1083_v6 = vld [vmem:[%s1436_s29 + $0x20] ss:$8 sps:$4 sm:$0xff]   ;;  %v1084_v7 = vld [vmem:[%s1436_s29 + $0x34] ss:$8 sps:$4 sm:$0xff]   ;;  %v1086_v8 = vld [vmem:[%s1436_s29 + $0x30] ss:$8 sps:$4 sm:$0xff]  }
  0x5d   : > { %459 = vmatpush1.bf16.msra.mxu0 %v1077_v2  ;;  %986 = vmatpush1.bf16.msra.mxu1 %v1077_v2  ;;  %v1087_v9 = vld [vmem:[%s1436_s29 + $0x44] ss:$8 sps:$4 sm:$0xff]   ;;  %v1089_v10 = vld [vmem:[%s1436_s29 + $0x40] ss:$8 sps:$4 sm:$0xff]   ;;  %v1090_v11 = vld [vmem:[%s1436_s29 + $0x54] ss:$8 sps:$4 sm:$0xff]  }
  0x5e   : > { %460 = vmatprep.subr.bf16.mxu0 %v1078_v3  ;;  %979 = vmatprep.subr.bf16.mxu1 %v1078_v3  ;;  %v1092_v12 = vld [vmem:[%s1436_s29 + $0x50] ss:$8 sps:$4 sm:$0xff]   ;;  %v1093_v13 = vld [vmem:[%s1436_s29 + $0x64] ss:$8 sps:$4 sm:$0xff]   ;;  %v1095_v14 = vld [vmem:[%s1436_s29 + $0x60] ss:$8 sps:$4 sm:$0xff]  }
  0x5f   : > { %v1096_v15 = vld [vmem:[%s1436_s29 + $0x74] ss:$8 sps:$4 sm:$0xff]   ;;  %v1098_v16 = vld [vmem:[%s1436_s29 + $0x70] ss:$8 sps:$4 sm:$0xff]   ;;  %v325_v18 = vld [vmem:[#allocation3 + $0x8] sm:$0xff]  ;;  %s994_s17 = smul.u32 400, %s1432_s3 }
  0x60   : > { %v324_v17 = vld [vmem:[#allocation3] sm:$0xff]  ;;  %v338_v19 = vld [vmem:[#allocation3 + $0x70] sm:$0xff]  ;;  %v339_v20 = vld [vmem:[#allocation3 + $0x78] sm:$0xff]  ;;  %s977_s22 = sshll.u32 %s1235_s12, 8  ;;  %s823_s12 = scalar_lea.sflag [#allocation5], %s1432_s3 }
  0x61   : > { %461 = vmatpush1.bf16.msra.mxu0 %v1080_v4  ;;  %987 = vmatpush1.bf16.msra.mxu1 %v1080_v4  ;;  %v349_v21 = vpack.c.bf16 %v325_v18, %v324_v17  ;;  %v356_v22 = vpack.c.bf16 %v339_v20, %v338_v19  ;;  %v326_v23 = vld [vmem:[#allocation3 + $0x10] sm:$0xff]  ;;  %v327_v24 = vld [vmem:[#allocation3 + $0x18] sm:$0xff]  ;;  %v340_v25 = vld [vmem:[#allocation3 + $0x80] sm:$0xff]  ;;  %s1472_s19 = scalar_lea.vmem [#allocation8], %s994_s17  ;;  %s1525_s6 = scalar_lea.hbm %s1582_s2, %s977_s22 }
  0x62   : > { %462 = vmatprep.subr.bf16.mxu0 %v1081_v5  ;;  %980 = vmatprep.subr.bf16.mxu1 %v1081_v5  ;;  %v341_v26 = vld [vmem:[#allocation3 + $0x88] sm:$0xff]  ;;  %v350_v27 = vpack.c.bf16 %v327_v24, %v326_v23  ;;  %v328_v29 = vld [vmem:[#allocation3 + $0x20] sm:$0xff]  ;;  %v342_v31 = vld [vmem:[#allocation3 + $0x90] sm:$0xff]  ;;  %s839_s8 = sshll.u32 %s1472_s19, 4  ;;  %p1601_p11 = scmp.ne.s32.totalorder %s1592_s20, 0  ;;  %s1528_s8 = int_to_ptr.vmem [resolvable:$true] %s839_s8 }
  0x63   : > { %v357_v28 = vpack.c.bf16 %v341_v26, %v340_v25  ;;  %v329_v30 = vld [vmem:[#allocation3 + $0x28] sm:$0xff]  ;;  %v343_v32 = vld [vmem:[#allocation3 + $0x98] sm:$0xff]  ;;  %v330_v35 = vld [vmem:[#allocation3 + $0x30] sm:$0xff]  ;;  %s1157_s16 = scalar_lea.vmem %s1528_s8, 6400  ;;  %s1251_s4 = smov [#allocation8]  }
  0x64   : > { %v351_v33 = vpack.c.bf16 %v329_v30, %v328_v29  ;;  %v358_v34 = vpack.c.bf16 %v343_v32, %v342_v31  ;;  %v331_v36 = vld [vmem:[#allocation3 + $0x38] sm:$0xff]  ;;  %v344_v37 = vld [vmem:[#allocation3 + $0xa0] sm:$0xff]  ;;  %v345_v38 = vld [vmem:[#allocation3 + $0xa8] sm:$0xff]  ;;  %p1158_p9 = scmp.ne.s32.totalorder %s1528_s8, %s1157_s16  ;;  %s1161_s23 = sshll.u32 %s1251_s4, 4  ;;  %s1162_s23 = int_to_ptr.vmem [resolvable:$false] %s1161_s23 }
  0x65   : > { %463 = vmatpush1.bf16.msra.mxu0 %v1083_v6  ;;  %988 = vmatpush1.bf16.msra.mxu1 %v1083_v6  ;;  %v352_v39 = vpack.c.bf16 %v331_v36, %v330_v35  ;;  %v359_v40 = vpack.c.bf16 %v345_v38, %v344_v37  ;;  %v332_v41 = vld [vmem:[#allocation3 + $0x40] sm:$0xff]  ;;  %v333_v42 = vld [vmem:[#allocation3 + $0x48] sm:$0xff]  ;;  %v346_v43 = vld [vmem:[#allocation3 + $0xb0] sm:$0xff]  ;;  %s1163_s28 = scalar_lea.vmem %s1162_s23, 12800  ;;  %p1164_p1 = scmp.lt.s32.totalorder %s1528_s8, %s1162_s23 }
  0x66   : > { %464 = vmatprep.subr.bf16.mxu0 %v1084_v7  ;;  %981 = vmatprep.subr.bf16.mxu1 %v1084_v7  ;;  %v347_v44 = vld [vmem:[#allocation3 + $0xb8] sm:$0xff]  ;;  %v353_v45 = vpack.c.bf16 %v333_v42, %v332_v41  ;;  %v334_v47 = vld [vmem:[#allocation3 + $0x50] sm:$0xff]  ;;  %v348_v49 = vld [vmem:[#allocation3 + $0xc0] sm:$0xff]  ;;  %p1159_p13 = pnand %p1158_p9, %p1601_p11  ;;  %p1165_p3 = scmp.lt.s32.totalorder %s1163_s28, %s1157_s16 }
  0x67   : > { %v360_v46 = vpack.c.bf16 %v347_v44, %v346_v43  ;;  %v335_v48 = vld [vmem:[#allocation3 + $0x58] sm:$0xff]  ;;  %v361_v51 = vpack.c.bf16 %v348_v49, %v348_v49  ;;  %v336_v52 = vld [vmem:[#allocation3 + $0x60] sm:$0xff]  ;;  %v337_v53 = vld [vmem:[#allocation3 + $0x68] sm:$0xff] }
  0x68   : > { %v354_v50 = vpack.c.bf16 %v335_v48, %v334_v47  ;;  %v355_v54 = vpack.c.bf16 %v337_v53, %v336_v52  ;;  %p1160_p4 = pneg %p1159_p13  ;;  %p1166_p6 = por %p1165_p3, %p1164_p1 }
  0x69   : > { %465 = vmatpush1.bf16.msra.mxu0 %v1086_v8  ;;  %989 = vmatpush1.bf16.msra.mxu1 %v1086_v8 }
  0x6a   : > { %466 = vmatprep.subr.bf16.mxu0 %v1087_v9  ;;  %982 = vmatprep.subr.bf16.mxu1 %v1087_v9  ;;  %p1167_p8 = pnand %p1166_p6, %p1160_p4 }
  0x6d   : > { %467 = vmatpush1.bf16.msra.mxu0 %v1089_v10  ;;  %990 = vmatpush1.bf16.msra.mxu1 %v1089_v10 }
  0x6e   : > { %468 = vmatprep.subr.bf16.mxu0 %v1090_v11  ;;  %983 = vmatprep.subr.bf16.mxu1 %v1090_v11 }
  0x71   : > { %469 = vmatpush1.bf16.msra.mxu0 %v1092_v12  ;;  %991 = vmatpush1.bf16.msra.mxu1 %v1092_v12 }
  0x72   : > { %470 = vmatprep.subr.bf16.mxu0 %v1093_v13  ;;  %984 = vmatprep.subr.bf16.mxu1 %v1093_v13 }
  0x75   : > { %471 = vmatpush1.bf16.msra.mxu0 %v1095_v14  ;;  %992 = vmatpush1.bf16.msra.mxu1 %v1095_v14 }
  0x76   : > { %472 = vmatprep.subr.bf16.mxu0 %v1096_v15  ;;  %985 = vmatprep.subr.bf16.mxu1 %v1096_v15 }
  0x79   : > { %473 = vmatpush1.bf16.msra.mxu0 %v1098_v16  ;;  %993 = vmatpush1.bf16.msra.mxu1 %v1098_v16 }
  0x7c   : > { %491 = vmatmul.mubr.bf16.vlgmr.msra.gmra.mrb[0].mxu0 %v349_v21  ;;  %561 = vmatmul.mubr.bf16.vlgmr.msra.gmra.mrb[0].mxu1 %v356_v22 }
  0x7d   : > { %500 = vmatprep.mubr.bf16.mxu0 %v1250_v0  ;;  %570 = vmatprep.mubr.bf16.mxu1 %v1250_v0 }
  0x84   : > { %501 = vmatmul.mubr.bf16.gmra.mrb[4].mxu0 %v350_v27  ;;  %571 = vmatmul.mubr.bf16.gmra.mrb[4].mxu1 %v357_v28 }
  0x85   : > { %510 = vmatprep.mubr.bf16.mxu0 %v1250_v0  ;;  %580 = vmatprep.mubr.bf16.mxu1 %v1250_v0 }
  0x8c   : > { %511 = vmatmul.mubr.bf16.gmra.mrb[8].mxu0 %v351_v33  ;;  %581 = vmatmul.mubr.bf16.gmra.mrb[8].mxu1 %v358_v34 }
  0x8d   : > { %520 = vmatprep.mubr.bf16.mxu0 %v1250_v0  ;;  %590 = vmatprep.mubr.bf16.mxu1 %v1250_v0 }
  0x94   : > { %521 = vmatmul.mubr.bf16.gmra.mrb[12].mxu0 %v352_v39  ;;  %591 = vmatmul.mubr.bf16.gmra.mrb[12].mxu1 %v359_v40 }
  0x95   : > { %530 = vmatprep.mubr.bf16.mxu0 %v1250_v0  ;;  %600 = vmatprep.mubr.bf16.mxu1 %v1250_v0 }
  0x9c   : > { %531 = vmatmul.mubr.bf16.gmra.mrb[16].mxu0 %v353_v45  ;;  %601 = vmatmul.mubr.bf16.gmra.mrb[16].mxu1 %v360_v46 }
  0x9d   : > { %540 = vmatprep.mubr.bf16.mxu0 %v1250_v0  ;;  %610 = vmatprep.mubr.bf16.mxu1 %v1250_v0 }
  0xa4   : > { %541 = vmatmul.mubr.bf16.gmra.mrb[20].mxu0 %v354_v50  ;;  %611 = vmatmul.mubr.bf16.gmra.mrb[20].mxu1 %v361_v51 }
  0xa5   : > { %550 = vmatprep.mubr.bf16.mxu0 %v1250_v0 }
  0xac   : > { %551 = vmatmul.mubr.bf16.gmra.mrb[24].mxu0 %v355_v54 }
 0x14f   : > { %v492_v55 = vpop.f32.mrb[0].mxu0  ;;  %v562_v56 = vpop.f32.mrb[0].mxu1 }
 0x150   : > { %772 = vst [vmem:[%s1472_s19] sm:$0xff] %v492_v55  ;;  %v494_v57 = vpop.f32.mrb[1].mxu0  ;;  %800 = vst [vmem:[%s1472_s19 + $0xe0] sm:$0xff] %v562_v56  ;;  %v564_v58 = vpop.f32.mrb[1].mxu1 }
 0x151   : > { %773 = vst [vmem:[%s1472_s19 + $0x8] sm:$0xff] %v494_v57  ;;  %v496_v59 = vpop.f32.mrb[2].mxu0  ;;  %801 = vst [vmem:[%s1472_s19 + $0xe8] sm:$0xff] %v564_v58  ;;  %v566_v60 = vpop.f32.mrb[2].mxu1 }
 0x152   : > { %774 = vst [vmem:[%s1472_s19 + $0x10] sm:$0xff] %v496_v59  ;;  %v498_v61 = vpop.f32.mrb[3].mxu0  ;;  %802 = vst [vmem:[%s1472_s19 + $0xf0] sm:$0xff] %v566_v60  ;;  %v568_v62 = vpop.f32.mrb[3].mxu1 }
 0x153   : > { %775 = vst [vmem:[%s1472_s19 + $0x18] sm:$0xff] %v498_v61  ;;  %803 = vst [vmem:[%s1472_s19 + $0xf8] sm:$0xff] %v568_v62 }
 0x157   : > { %v502_v63 = vpop.f32.mrb[4].mxu0  ;;  %v572_v0 = vpop.f32.mrb[4].mxu1 }
 0x158   : > { %776 = vst [vmem:[%s1472_s19 + $0x20] sm:$0xff] %v502_v63  ;;  %v504_v1 = vpop.f32.mrb[5].mxu0  ;;  %804 = vst [vmem:[%s1472_s19 + $0x100] sm:$0xff] %v572_v0  ;;  %v574_v2 = vpop.f32.mrb[5].mxu1 }
 0x159   : > { %777 = vst [vmem:[%s1472_s19 + $0x28] sm:$0xff] %v504_v1  ;;  %v506_v3 = vpop.f32.mrb[6].mxu0  ;;  %805 = vst [vmem:[%s1472_s19 + $0x108] sm:$0xff] %v574_v2  ;;  %v576_v4 = vpop.f32.mrb[6].mxu1 }
 0x15a   : > { %778 = vst [vmem:[%s1472_s19 + $0x30] sm:$0xff] %v506_v3  ;;  %v508_v5 = vpop.f32.mrb[7].mxu0  ;;  %806 = vst [vmem:[%s1472_s19 + $0x110] sm:$0xff] %v576_v4  ;;  %v578_v6 = vpop.f32.mrb[7].mxu1 }
 0x15b   : > { %779 = vst [vmem:[%s1472_s19 + $0x38] sm:$0xff] %v508_v5  ;;  %807 = vst [vmem:[%s1472_s19 + $0x118] sm:$0xff] %v578_v6 }
 0x15f   : > { %v512_v7 = vpop.f32.mrb[8].mxu0  ;;  %v582_v8 = vpop.f32.mrb[8].mxu1 }
 0x160   : > { %780 = vst [vmem:[%s1472_s19 + $0x40] sm:$0xff] %v512_v7  ;;  %v514_v9 = vpop.f32.mrb[9].mxu0  ;;  %808 = vst [vmem:[%s1472_s19 + $0x120] sm:$0xff] %v582_v8  ;;  %v584_v10 = vpop.f32.mrb[9].mxu1 }
 0x161   : > { %781 = vst [vmem:[%s1472_s19 + $0x48] sm:$0xff] %v514_v9  ;;  %v516_v11 = vpop.f32.mrb[10].mxu0  ;;  %809 = vst [vmem:[%s1472_s19 + $0x128] sm:$0xff] %v584_v10  ;;  %v586_v12 = vpop.f32.mrb[10].mxu1 }
 0x162   : > { %782 = vst [vmem:[%s1472_s19 + $0x50] sm:$0xff] %v516_v11  ;;  %v518_v13 = vpop.f32.mrb[11].mxu0  ;;  %810 = vst [vmem:[%s1472_s19 + $0x130] sm:$0xff] %v586_v12  ;;  %v588_v14 = vpop.f32.mrb[11].mxu1 }
 0x163   : > { %783 = vst [vmem:[%s1472_s19 + $0x58] sm:$0xff] %v518_v13  ;;  %811 = vst [vmem:[%s1472_s19 + $0x138] sm:$0xff] %v588_v14 }
 0x167   : > { %v522_v15 = vpop.f32.mrb[12].mxu0  ;;  %v592_v16 = vpop.f32.mrb[12].mxu1 }
 0x168   : > { %784 = vst [vmem:[%s1472_s19 + $0x60] sm:$0xff] %v522_v15  ;;  %v524_v17 = vpop.f32.mrb[13].mxu0  ;;  %812 = vst [vmem:[%s1472_s19 + $0x140] sm:$0xff] %v592_v16  ;;  %v594_v18 = vpop.f32.mrb[13].mxu1 }
 0x169   : > { %785 = vst [vmem:[%s1472_s19 + $0x68] sm:$0xff] %v524_v17  ;;  %v526_v19 = vpop.f32.mrb[14].mxu0  ;;  %813 = vst [vmem:[%s1472_s19 + $0x148] sm:$0xff] %v594_v18  ;;  %v596_v20 = vpop.f32.mrb[14].mxu1 }
 0x16a   : > { %786 = vst [vmem:[%s1472_s19 + $0x70] sm:$0xff] %v526_v19  ;;  %v528_v21 = vpop.f32.mrb[15].mxu0  ;;  %814 = vst [vmem:[%s1472_s19 + $0x150] sm:$0xff] %v596_v20  ;;  %v598_v22 = vpop.f32.mrb[15].mxu1 }
 0x16b   : > { %787 = vst [vmem:[%s1472_s19 + $0x78] sm:$0xff] %v528_v21  ;;  %815 = vst [vmem:[%s1472_s19 + $0x158] sm:$0xff] %v598_v22 }
 0x16f   : > { %v532_v23 = vpop.f32.mrb[16].mxu0  ;;  %v602_v24 = vpop.f32.mrb[16].mxu1 }
 0x170   : > { %788 = vst [vmem:[%s1472_s19 + $0x80] sm:$0xff] %v532_v23  ;;  %v534_v25 = vpop.f32.mrb[17].mxu0  ;;  %816 = vst [vmem:[%s1472_s19 + $0x160] sm:$0xff] %v602_v24  ;;  %v604_v26 = vpop.f32.mrb[17].mxu1 }
 0x171   : > { %789 = vst [vmem:[%s1472_s19 + $0x88] sm:$0xff] %v534_v25  ;;  %v536_v27 = vpop.f32.mrb[18].mxu0  ;;  %817 = vst [vmem:[%s1472_s19 + $0x168] sm:$0xff] %v604_v26  ;;  %v606_v28 = vpop.f32.mrb[18].mxu1 }
 0x172   : > { %790 = vst [vmem:[%s1472_s19 + $0x90] sm:$0xff] %v536_v27  ;;  %v538_v29 = vpop.f32.mrb[19].mxu0  ;;  %818 = vst [vmem:[%s1472_s19 + $0x170] sm:$0xff] %v606_v28  ;;  %v608_v30 = vpop.f32.mrb[19].mxu1 }
 0x173   : > { %791 = vst [vmem:[%s1472_s19 + $0x98] sm:$0xff] %v538_v29  ;;  %819 = vst [vmem:[%s1472_s19 + $0x178] sm:$0xff] %v608_v30 }
 0x177   : > { %v542_v31 = vpop.f32.mrb[20].mxu0  ;;  %v612_v32 = vpop.f32.mrb[20].mxu1 }
 0x178   : > { %792 = vst [vmem:[%s1472_s19 + $0xa0] sm:$0xff] %v542_v31  ;;  %v544_v33 = vpop.f32.mrb[21].mxu0  ;;  %820 = vst [vmem:[%s1472_s19 + $0x180] sm:$0xff] %v612_v32  ;;  %v614_v34 = vpop.f32.mrb[21].mxu1 }
 0x179   : > { %793 = vst [vmem:[%s1472_s19 + $0xa8] sm:$0xff] %v544_v33  ;;  %v546_v35 = vpop.f32.mrb[22].mxu0  ;;  %821 = vst [vmem:[%s1472_s19 + $0x188] sm:$0xff] %v614_v34  ;;  %v616_v36 = vpop.f32.mrb[22].mxu1 }
 0x17a   : > { %794 = vst [vmem:[%s1472_s19 + $0xb0] sm:$0xff] %v546_v35  ;;  %v548_v37 = vpop.f32.mrb[23].mxu0  ;;  %v617_v38 = vpop.f32.mrb[23].mxu1 }
 0x17b   : > { %795 = vst [vmem:[%s1472_s19 + $0xb8] sm:$0xff] %v548_v37 }
 0x17f   : > { %v552_v39 = vpop.f32.mrb[24].mxu0 }
 0x180   : > { %796 = vst [vmem:[%s1472_s19 + $0xc0] sm:$0xff] %v552_v39  ;;  %v554_v40 = vpop.f32.mrb[25].mxu0 }
 0x181   : > { %797 = vst [vmem:[%s1472_s19 + $0xc8] sm:$0xff] %v554_v40  ;;  %v556_v41 = vpop.f32.mrb[26].mxu0 }
 0x182   : > { %798 = vst [vmem:[%s1472_s19 + $0xd0] sm:$0xff] %v556_v41  ;;  %v558_v42 = vpop.f32.mrb[27].mxu0 }
 0x183   : > { %799 = vst [vmem:[%s1472_s19 + $0xd8] sm:$0xff] %v558_v42 }
 0x184   : > { %1170 = shalt.err (!%p1167_p8)
}
 0x185   : > { %s1171_s24 = scalar_lea.hbm %s1525_s6, 6400  ;;  %s1175_s26 = scalar_lea.hbm %s1582_s2, 12800 }
 0x186   : > { %p1172_p0 = scmp.ne.s32.totalorder %s1525_s6, %s1171_s24  ;;  %p1176_p12 = scmp.lt.u32.totalorder %s1525_s6, %s1582_s2 }
 0x187   : > { %p1177_p5 = scmp.lt.u32.totalorder %s1175_s26, %s1171_s24  ;;  %p1179_p9 = scmp.lt.u32.totalorder %s1171_s24, %s1525_s6 }
 0x188   : > { %p1173_p2 = pnand %p1172_p0, %p1601_p11 }
 0x189   : > { %p1178_p10 = por %p1177_p5, %p1176_p12 }
 0x18a   : > { %p1174_p7 = pneg %p1173_p2 }
 0x18b   : > { %p1180_p13 = por %p1179_p9, %p1178_p10 }
 0x18d   : > { %p1181_p4 = pnand %p1180_p13, %p1174_p7 }
 0x18f   : > { %1184 = shalt.err (!%p1181_p4)
}
 0x190   : > { %s1252_s17 = smov 256   ;;  %s1253_s19 = smov 512  }
 0x191   : > { %s1254_s22 = smov 16  }
 0x192   : > { %1001 = dma.vmem_to_hbm [thread:$0]  (%p1601_p11), %s1528_s8, 6400, %s1525_s6, %s823_s12, %s1252_s17, %s1253_s19, %s1254_s22  }
 0x193 PF: > { %s854_s15 = sand.u32 1, %s1223_s9   ;;  %p1602_p1 = scmp.ne.s32.totalorder %s1593_s21, 0 }
 0x194   : > { %p1603_p3 = scmp.ge.s32.totalorder %s1243_s14, 2  ;;  %s855_s5 = scalar_lea.sflag [#allocation5], %s854_s15 }
 0x196   : > { %p1012_p6 = pnand %p1603_p3, %p1602_p1 }
 0x198   : > { %1218 = dma.done.wait (!%p1012_p6), %s855_s5, 6400  }
 0x199   : > { %1220 = vsyncadd (!%p1012_p6), %s855_s5, 4294960896  ;;  %s19_s14 = sadd.s32 1, %s1243_s14   ;;  %s1604_s9 = smov %s1227_s10 }
 0x19a   : > { %p16_p8 = scmp.ge.s32.totalorder %s19_s14, 4   ;;  %s1605_s10 = smov %s1231_s11 }
 0x19b   : > { %s1606_s11 = smov %s1391_s7  ;;  %s1607_s12 = smov %s1239_s13 }
 0x19c   : > { %s1608_s13 = smov %s1610_s27  ;;  %18 = sbr.rel (!%p16_p8) target bundleno = 7 (0x7), region = 87 }
 0x1a3   :  { %860 = vsyncpa [#allocation4], 1 }
 0x1a4   :  { %862 = vsyncpa [#allocation4 + $0x1], 1 }
 0x1a5   :  { %863 = vsyncpa [#allocation7], 1 }
 0x1a6   :  { %865 = vsyncpa [#allocation7 + $0x1], 1 }
 0x1a7   :  { %866 = vsyncpa [#allocation5], 1 }
 0x1a8   :  { %868 = vsyncpa [#allocation5 + $0x1], 1 }

// kernel: _lambda_.6
= control target key start
LH: loop header
LB: loop body
LE: loop exit
PB: predicated region body
PF: predicated region fallthrough
CT: control target
= control target key end

     0   :  { %s13966_s0 = inlined_call_operand.hbm [shape: f32[2,128,384], index: 0, kind: input, shape index: {}]   ;;  %s13967_s1 = inlined_call_operand.hbm [shape: f32[2,128,128], index: 1, kind: input, shape index: {}]   ;;  %s13968_s2 = inlined_call_operand.hbm [shape: f32[1,32], index: 2, kind: input, shape index: {}]   ;;  %s13969_s3 = inlined_call_operand.hbm [shape: f32[2,128,128], index: 3, kind: output, shape index: {0}]   ;;  %s13970_s4 = inlined_call_operand.hbm [shape: f32[2,128,32], index: 4, kind: output, shape index: {1}]  }
   0x1   :  { %14126 = sst [smem:[#allocation88_spill]] %s13966_s0 }
   0x2   :  { %14127 = sst [smem:[#allocation89_spill]] %s13968_s2 }
   0x3   :  { %14128 = sst [smem:[#allocation90_spill]] %s13969_s3 }
   0x4   :  { %14129 = sst [smem:[#allocation91_spill]] %s13970_s4 }
   0x5   :  { %10 = vsyncpa [#allocation3], 0 }
   0x6   :  { %12 = vsyncpa [#allocation3 + $0x1], 0 }
   0x7   :  { %13 = vsyncpa [#allocation6], 0 }
   0x8   :  { %15 = vsyncpa [#allocation6 + $0x1], 0 }
   0x9   :  { %16 = vsyncpa [#allocation4], 0 }
   0xa   :  { %18 = vsyncpa [#allocation4 + $0x1], 0 }
   0xb   :  { %19 = vsyncpa [#allocation10], 0 }
   0xc   :  { %21 = vsyncpa [#allocation10 + $0x1], 0  ;;  %s10938_s15 = smov 0   ;;  %s10940_s16 = smov 0  }
   0xd   :  { %s10942_s17 = smov 0   ;;  %s10944_s18 = smov 0  }
   0xe   :  { %s10946_s19 = smov 0   ;;  %s10948_s20 = smov 0  }
   0xf   :  { %s10950_s21 = smov 0   ;;  %s10952_s22 = smov 0  }
  0x10   :  { %s10954_s23 = smov 0   ;;  %s10956_s24 = smov 0  }
  0x11   :  { %s10958_s25 = smov 0  }
  0x12 LB: > { %14130 = sst [smem:[#allocation16_spill]] %s10851_s15  ;;  %s10994_s26 = sadd.s32 4294967295, %s10891_s25   ;;  %s10891_s25 = sphi %s10958_s25, %s27_s25   ;;  %s10887_s24 = sphi %s10956_s24, %s14395_s24   ;;  %s10883_s23 = sphi %s10954_s23, %s14394_s23   ;;  %s10879_s22 = sphi %s10952_s22, %s14393_s22   ;;  %s10875_s21 = sphi %s10950_s21, %s14392_s21   ;;  %s10871_s20 = sphi %s10948_s20, %s14391_s20   ;;  %s10867_s19 = sphi %s10946_s19, %s14390_s19   ;;  %s10863_s18 = sphi %s10944_s18, %s14389_s18   ;;  %s10859_s17 = sphi %s10942_s17, %s14388_s17   ;;  %s10855_s16 = sphi %s10940_s16, %s14387_s16   ;;  %s10851_s15 = sphi %s10938_s15, %s14386_s15  }
  0x13   : > { %14131 = sst [smem:[#allocation17_spill]] %s10863_s18  ;;  %s8134_s27 = sadd.s32 4294967294, %s10891_s25  }
  0x14   : > { %14132 = sst [smem:[#allocation18_spill]] %s10871_s20  ;;  %p55_p0 = scmp.ne.s32.totalorder %s10871_s20, %s10867_s19 }
  0x15   : > { %p56_p1 = scmp.eq.s32.totalorder %s10891_s25, 0  ;;  %p61_p2 = scmp.ne.s32.totalorder %s10867_s19, %s10863_s18 }
  0x16   : > { %p13971_p3 = scmp.eq.s32.totalorder %s10994_s26, 0  ;;  %p136_p4 = scmp.eq.s32.totalorder %s10994_s26, 3 }
  0x17   : > { %p11005_p5 = por %p56_p1, %p55_p0  ;;  %p142_p6 = scmp.eq.s32.totalorder %s8134_s27, 3 }
  0x18   : > { %p11011_p7 = por %p13971_p3, %p61_p2  ;;  %p11015_p8 = por %p136_p4, %p55_p0 }
  0x19   : > { %p11019_p9 = por %p142_p6, %p61_p2  ;;  %p161_p10 = scmp.ne.s32.totalorder %s10859_s17, %s10855_s16 }
  0x1a   : > { %s14134_s30 = scalar_select %p11011_p7, 1, 0 }
  0x1b   : > { %s14135_s5 = scalar_select %p11015_p8, 1, 0 }
  0x1c   : > { %s14137_s6 = scalar_select %p11019_p9, 1, 0 }
  0x1d   : > { %14136 = sst [smem:[#allocation19_spill]] %s14135_s5  ;;  %p167_p11 = scmp.ne.s32.totalorder %s10855_s16, %s10851_s15 }
  0x1e   : > { %14138 = sst [smem:[#allocation20_spill]] %s14137_s6  ;;  %p8135_p12 = scmp.ge.s32.totalorder %s10891_s25, 1 }
  0x1f   : > { %p175_p13 = scmp.lt.s32.totalorder %s10891_s25, 5  ;;  %p11030_p1 = por %p161_p10, %p136_p4 }
  0x20   : > { %p11034_p3 = por %p167_p11, %p142_p6  ;;  %s10893_s11 = smov [#allocation7]  }
  0x21   : > { %s14139_s8 = scalar_select %p11030_p1, 1, 0 }
  0x22   : > { %s14140_s9 = scalar_select %p11034_p3, 1, 0 }
  0x23   : > { %p11038_p0 = pnand %p8135_p12, %p175_p13  ;;  %s188_s12 = sshll.u32 %s10893_s11, 4  ;;  %s189_s12 = int_to_ptr.vmem [resolvable:$true] %s188_s12 }
  0x24   : > { %14141 = sst [smem:[#allocation21_spill]] %s14140_s9  ;;  %p10245_p9 = scmp.lt.s32.totalorder %s10891_s25, 4 }
  0x25   : > { %s14142_s10 = scalar_select %p11038_p0, 1, 0 }
  0x26   : > { %p10226_p2 = pneg %p11038_p0  ;;  %p14143_p8 = scmp.eq.s32.totalorder %s10994_s26, 0 }
  0x27   : > { %p11053_p6 = pnand %p10245_p9, %p11005_p5  ;;  %s14146_s2 = sld [smem:[#allocation89_spill]] }
  0x28   : > { %p11047_p4 = pnand %p10226_p2, %p14143_p8 }
  0x29   : > { %s14145_s14 = scalar_select %p11053_p6, 1, 0 }
  0x2a   : > { %p10643_p11 = pneg %p11047_p4 }
  0x2d   : > { %s10641_s7 = scalar_lea.hbm %s14146_s2, 16 }
  0x2e   : > { %p10642_p10 = scmp.ne.s32.totalorder %s14146_s2, %s10641_s7  ;;  %p10648_p13 = scmp.lt.u32.totalorder %s10641_s7, %s14146_s2 }
  0x30   : > { %p10644_p8 = pnand %p10643_p11, %p10642_p10 }
  0x32   : > { %p10645_p12 = pneg %p10644_p8 }
  0x34   : > { %p10650_p5 = pnand %p10648_p13, %p10645_p12 }
  0x36   : > { %10653 = shalt.err (!%p10650_p5)
}
  0x37   : > { %s10654_s29 = scalar_lea.vmem %s189_s12, 16  ;;  %s10661_s28 = scalar_lea.vmem %s189_s12, 32 }
  0x38   : > { %p10655_p9 = scmp.ne.s32.totalorder %s189_s12, %s10654_s29  ;;  %p10662_p1 = scmp.lt.s32.totalorder %s189_s12, %s189_s12 }
  0x39   : > { %p10663_p7 = scmp.lt.s32.totalorder %s10661_s28, %s10654_s29 }
  0x3a   : > { %p10657_p2 = pnand %p10655_p9, %p10643_p11 }
  0x3b   : > { %p10664_p0 = por %p10663_p7, %p10662_p1 }
  0x3c   : > { %p10658_p3 = pneg %p10657_p2 }
  0x3e   : > { %p10665_p6 = pnand %p10664_p0, %p10658_p3 }
  0x40   : > { %10668 = shalt.err (!%p10665_p6)
}
  0x41   : > { %10229 = dma.hbm_to_vmem [thread:$0]  (!%p11047_p4), %s14146_s2, 16, %s189_s12, [#allocation6]  }
  0x42   : > { %s36_s6 = sadd.s32 1, %s10883_s23  ;;  %s39_s7 = sadd.s32 1, %s10887_s24 }
  0x43   : > { %p37_p10 = scmp.ge.s32.totalorder %s36_s6, 2  ;;  %s11076_s27 = sand.u32 1, %s10871_s20  }
  0x44   : > { %s10210_s11 = smul.u32 192, %s11076_s27  ;;  %s14149_s0 = sld [smem:[#allocation88_spill]] }
  0x45   : > { %s14397_s6 = smov (%p37_p10, %s36_s6), 0  ;;  %s14399_s7 = smov (!%p37_p10, %s39_s7), %s10887_s24 }
  0x46   : > { %14147 = sst [smem:[#allocation22_spill]] %s14397_s6  ;;  %s44_s13 = ssub.s32 %s10883_s23, %s14397_s6 }
  0x47   : > { %p41_p3 = scmp.ge.s32.totalorder %s14399_s7, 2  ;;  %s10211_s12 = smul.u32 24, %s10883_s23 }
  0x48   : > { %s10212_s29 = smul.u32 48, %s10887_s24  ;;  %s203_s28 = scalar_lea.vmem [#allocation2], %s10210_s11 }
  0x49   : > { %s213_s15 = sshll.u32 %s203_s28, 4  ;;  %s14401_s7 = smov (%p41_p3, %s14399_s7), 0  ;;  %s11088_s15 = int_to_ptr.vmem [resolvable:$true] %s213_s15 }
  0x4a   : > { %14148 = sst [smem:[#allocation23_spill]] %s14401_s7  ;;  %s210_s9 = sadd.s32 %s10212_s29, %s10211_s12 }
  0x4b   : > { %s43_s2 = ssub.s32 %s10887_s24, %s14401_s7  ;;  %s8140_s18 = sshll.u32 %s210_s9, 7 }
  0x4c   : > { %s45_s3 = sor.u32 %s44_s13, %s43_s2  ;;  %p149_p7 = scmp.eq.s32.totalorder %s43_s2, 0 }
  0x4d   : > { %p46_p1 = scmp.eq.s32.totalorder %s45_s3, 0  ;;  %s11095_s4 = scalar_lea.hbm %s14149_s0, %s8140_s18 }
  0x4e   : > { %s14150_s11 = sadd.s32 1, %s10859_s17  ;;  %s14152_s12 = sadd.s32 1, %s10871_s20 }
  0x4f   : > { %s11100_s28 = scalar_select %p149_p7, %s10859_s17, %s14150_s11  }
  0x50   : > { %s11105_s29 = scalar_select %p46_p1, %s10871_s20, %s14152_s12  }
  0x51   : > { %14151 = sst [smem:[#allocation24_spill]] %s11100_s28  ;;  %s200_s7 = scalar_lea.sflag [#allocation3], %s11076_s27 }
  0x52   : > { %14153 = sst [smem:[#allocation25_spill]] %s11105_s29  ;;  %s10669_s9 = scalar_lea.hbm %s11095_s4, 3072 }
  0x53   : > { %p10670_p0 = scmp.ne.s32.totalorder %s11095_s4, %s10669_s9  ;;  %p14154_p4 = scmp.ne.s32.totalorder %s14145_s14, 0 }
  0x54   : > { %s10674_s18 = scalar_lea.hbm %s14149_s0, 12288  ;;  %p10675_p12 = scmp.lt.u32.totalorder %s11095_s4, %s14149_s0 }
  0x55   : > { %p10671_p6 = pneg %p14154_p4  ;;  %p10676_p13 = scmp.lt.u32.totalorder %s10674_s18, %s10669_s9 }
  0x56   : > { %p10678_p9 = scmp.lt.u32.totalorder %s10669_s9, %s11095_s4 }
  0x57   : > { %p10672_p11 = pnand %p10671_p6, %p10670_p0  ;;  %p10677_p5 = por %p10676_p13, %p10675_p12 }
  0x59   : > { %p10673_p8 = pneg %p10672_p11  ;;  %p10679_p2 = por %p10678_p9, %p10677_p5 }
  0x5b   : > { %p10680_p10 = pnand %p10679_p2, %p10673_p8 }
  0x5d   : > { %10683 = shalt.err (!%p10680_p10)
}
  0x5e   : > { %s10684_s13 = scalar_lea.vmem %s11088_s15, 3072  ;;  %s10894_s11 = smov [#allocation2]  }
  0x5f   : > { %p10685_p3 = scmp.ne.s32.totalorder %s11088_s15, %s10684_s13  ;;  %s10689_s12 = sshll.u32 %s10894_s11, 4  ;;  %s10690_s12 = int_to_ptr.vmem [resolvable:$false] %s10689_s12 }
  0x60   : > { %s10691_s2 = scalar_lea.vmem %s10690_s12, 6144  ;;  %p10692_p0 = scmp.lt.s32.totalorder %s11088_s15, %s10690_s12 }
  0x61   : > { %p10687_p7 = pnand %p10685_p3, %p10671_p6  ;;  %p10693_p11 = scmp.lt.s32.totalorder %s10691_s2, %s10684_s13 }
  0x63   : > { %p10688_p1 = pneg %p10687_p7  ;;  %p10694_p12 = por %p10693_p11, %p10692_p0 }
  0x65   : > { %p10695_p13 = pnand %p10694_p12, %p10688_p1 }
  0x67   : > { %10698 = shalt.err (!%p10695_p13)
}
  0x68   : > { %s10895_s9 = smov 384   ;;  %s10896_s3 = smov 24  }
  0x69   : > { %10233 = dma.hbm_to_vmem [thread:$0]  (!%p14154_p4), %s11095_s4, 3072, %s11088_s15, %s200_s7, %s10895_s9, %s10895_s9, %s10896_s3  }
  0x6a   : > { %s223_s18 = sand.u32 1, %s10891_s25   ;;  %s8141_s5 = sshll.u32 %s11076_s27, 6 }
  0x6b   : > { %s8142_s6 = sshll.u32 %s10883_s23, 3  ;;  %s8143_s13 = sshll.u32 %s10887_s24, 4 }
  0x6c   : > { %s233_s11 = sadd.s32 %s8143_s13, %s8142_s6  ;;  %s227_s12 = scalar_lea.vmem [#allocation5], %s8141_s5 }
  0x6d   : > { %s236_s2 = sshll.u32 %s227_s12, 4  ;;  %s8144_s0 = sshll.u32 %s233_s11, 7  ;;  %s11139_s2 = int_to_ptr.vmem [resolvable:$true] %s236_s2 }
  0x6e   : > { %s11144_s28 = scalar_lea.hbm %s13967_s1, %s8144_s0  ;;  %s11146_s4 = scalar_lea.sflag [#allocation6], %s223_s18 }
  0x6f   : > { %s10699_s7 = scalar_lea.hbm %s11144_s28, 1024  ;;  %s10704_s9 = scalar_lea.hbm %s13967_s1, 4096 }
  0x70   : > { %p10700_p8 = scmp.ne.s32.totalorder %s11144_s28, %s10699_s7  ;;  %p10705_p2 = scmp.lt.u32.totalorder %s11144_s28, %s13967_s1 }
  0x71   : > { %p10706_p10 = scmp.lt.u32.totalorder %s10704_s9, %s10699_s7  ;;  %p10708_p7 = scmp.lt.u32.totalorder %s10699_s7, %s11144_s28 }
  0x72   : > { %p10702_p5 = pnand %p10700_p8, %p10671_p6 }
  0x73   : > { %p10707_p3 = por %p10706_p10, %p10705_p2 }
  0x74   : > { %p10703_p9 = pneg %p10702_p5 }
  0x75   : > { %p10709_p1 = por %p10708_p7, %p10707_p3 }
  0x77   : > { %p10710_p0 = pnand %p10709_p1, %p10703_p9 }
  0x79   : > { %10713 = shalt.err (!%p10710_p0)
}
  0x7a   : > { %s10714_s0 = scalar_lea.vmem %s11139_s2, 1024  ;;  %s10897_s29 = smov [#allocation5]  }
  0x7b   : > { %p10715_p11 = scmp.ne.s32.totalorder %s11139_s2, %s10714_s0  ;;  %s10719_s18 = sshll.u32 %s10897_s29, 4  ;;  %s10720_s18 = int_to_ptr.vmem [resolvable:$false] %s10719_s18 }
  0x7c   : > { %s10721_s5 = scalar_lea.vmem %s10720_s18, 2048  ;;  %p10722_p8 = scmp.lt.s32.totalorder %s11139_s2, %s10720_s18 }
  0x7d   : > { %p10717_p12 = pnand %p10715_p11, %p10671_p6  ;;  %p10723_p5 = scmp.lt.s32.totalorder %s10721_s5, %s10714_s0 }
  0x7f   : > { %p10718_p13 = pneg %p10717_p12  ;;  %p10724_p2 = por %p10723_p5, %p10722_p8 }
  0x81   : > { %p10725_p10 = pnand %p10724_p2, %p10718_p13 }
  0x83   : > { %10728 = shalt.err (!%p10725_p10)
}
  0x84   : > { %s10898_s6 = smov 128   ;;  %s10899_s13 = smov 8  }
  0x85   : > { %10236 = dma.hbm_to_vmem [thread:$0]  (!%p14154_p4), %s11144_s28, 1024, %s11139_s2, %s11146_s4, %s10898_s6, %s10898_s6, %s10899_s13  }
  0x86   : > { %p14155_p6 = scmp.ne.s32.totalorder %s14142_s10, 0 }
  0x88   : > { %248 = sbr.rel (%p14155_p6) target bundleno = 9352 (0x2488), region = 32 }
  0x8f   : > { %s11175_s11 = sand.u32 1, %s10867_s19   ;;  %p14156_p9 = scmp.ne.s32.totalorder %s14134_s30, 0 }
  0x90   : > { %s10213_s12 = smul.u32 192, %s11175_s11  ;;  %s251_s7 = scalar_lea.sflag [#allocation3], %s11175_s11 }
  0x92   : > { %s11179_s27 = scalar_lea.vmem [#allocation2], %s10213_s12 }
  0x93   : > { %10830 = dma.done.wait (%p14156_p9), %s251_s7, 3072  }
  0x94   : > { %10832 = vsyncadd (%p14156_p9), %s251_s7, 4294964224  ;;  %s259_s10 = sand.u32 1, %s10994_s26   ;;  %s8146_s14 = sshll.u32 %s11175_s11, 6 }
  0x95   : > { %s260_s28 = scalar_lea.sflag [#allocation6], %s259_s10  ;;  %s11187_s2 = scalar_lea.vmem [#allocation5], %s8146_s14 }
  0x96   : > { %10834 = dma.done.wait (%p14156_p9), %s260_s28, 1024  }
  0x97   : > { %10836 = vsyncadd (%p14156_p9), %s260_s28, 4294966272  ;;  %p14157_p4 = scmp.eq.s32.totalorder %s10994_s26, 0 }
  0x99   : > { %10838 = dma.done.wait (%p14157_p4), [#allocation6], 16   ;;  %p14158_p3 = pmov %p14157_p4 }
  0x9a   : > { %s299_s4 = sand.u32 1, %s10855_s16   ;;  %s11200_s9 = scalar_lea.vmem [#allocation8], %s8146_s14 }
  0x9b   : > { %10840 = vsyncadd (%p14158_p3), [#allocation6], 4294967280  ;;  %s8149_s15 = sshll.u32 %s299_s4, 7  ;;  %p8150_p7 = scmp.ne.s32.totalorder %s10875_s21, 0 }
  0x9c   : > { %s11202_s3 = scalar_lea.vmem [#allocation9], %s8149_s15  ;;  %vm310_vm0 = vcmask (!%p8150_p7), 261120   ;;  %v10900_v0 = vmov (!%p8150_p7), 0.0  }
  0x9d   : > { %309 = sbr.rel (%p8150_p7) target bundleno = 165 (0xa5), region = 48  ;;  %311 = vst.msk [vmem:[%s11202_s3] sm:$0xff] (!%p8150_p7), %vm310_vm0, %v10900_v0  ;;  %312 = vst.msk [vmem:[%s11202_s3 + $0x8] sm:$0xff] (!%p8150_p7), %vm310_vm0, %v10900_v0 }
  0x9e   : > { %313 = vst.msk [vmem:[%s11202_s3 + $0x10] sm:$0xff] (!%p8150_p7), %vm310_vm0, %v10900_v0  ;;  %314 = vst.msk [vmem:[%s11202_s3 + $0x18] sm:$0xff] (!%p8150_p7), %vm310_vm0, %v10900_v0 }
  0x9f   : > { %315 = vst.msk [vmem:[%s11202_s3 + $0x20] sm:$0xff] (!%p8150_p7), %vm310_vm0, %v10900_v0  ;;  %316 = vst.msk [vmem:[%s11202_s3 + $0x28] sm:$0xff] (!%p8150_p7), %vm310_vm0, %v10900_v0 }
  0xa0   : > { %317 = vst.msk [vmem:[%s11202_s3 + $0x30] sm:$0xff] (!%p8150_p7), %vm310_vm0, %v10900_v0  ;;  %318 = vst.msk [vmem:[%s11202_s3 + $0x38] sm:$0xff] (!%p8150_p7), %vm310_vm0, %v10900_v0 }
  0xa1   : > { %319 = vst.msk [vmem:[%s11202_s3 + $0x40] sm:$0xff] (!%p8150_p7), %vm310_vm0, %v10900_v0  ;;  %320 = vst.msk [vmem:[%s11202_s3 + $0x48] sm:$0xff] (!%p8150_p7), %vm310_vm0, %v10900_v0 }
  0xa2   : > { %321 = vst.msk [vmem:[%s11202_s3 + $0x50] sm:$0xff] (!%p8150_p7), %vm310_vm0, %v10900_v0  ;;  %322 = vst.msk [vmem:[%s11202_s3 + $0x58] sm:$0xff] (!%p8150_p7), %vm310_vm0, %v10900_v0 }
  0xa3   : > { %323 = vst.msk [vmem:[%s11202_s3 + $0x60] sm:$0xff] (!%p8150_p7), %vm310_vm0, %v10900_v0  ;;  %324 = vst.msk [vmem:[%s11202_s3 + $0x68] sm:$0xff] (!%p8150_p7), %vm310_vm0, %v10900_v0 }
  0xa4   : > { %325 = vst.msk [vmem:[%s11202_s3 + $0x70] sm:$0xff] %vm310_vm0, %v10900_v0  ;;  %326 = vst.msk [vmem:[%s11202_s3 + $0x78] sm:$0xff] %vm310_vm0, %v10900_v0 }
  0xa5 PF: > { %v11238_v1 = vld [vmem:[%s11179_s27 + $0x38] sm:$0xff]  ;;  %vm499_vm1 = vcmask 261120   ;;  %v11241_v2 = vld [vmem:[%s11179_s27 + $0x8] sm:$0xff]  ;;  %v11244_v3 = vld [vmem:[%s11179_s27 + $0x50] sm:$0xff]  ;;  %v10901_v10 = vmov 0   ;;  %s10903_s26 = smov 96  }
  0xa6   : > { %v11248_v4 = vmul.f32 %v11238_v1, %v11238_v1  ;;  %v11252_v5 = vmul.f32 %v11241_v2, %v11241_v2  ;;  %v11256_v6 = vmul.f32 %v11244_v3, %v11244_v3  ;;  %v11259_v7 = vld [vmem:[%s11179_s27 + $0x20] sm:$0xff]  ;;  %v11265_v9 = vld [vmem:[%s11179_s27 + $0x68] sm:$0xff]  ;;  %10353 = vset.pattern.permute.xlu1 %v10901_v10  ;;  %10352 = vset.pattern.permute.xlu0 %v10901_v10  ;;  %v437_v15 = vld [vmem:[%s11187_s2 + $0x10] sm:$0xff]  ;;  %s10905_s30 = smov 64   ;;  %s10907_s20 = smov 32  }
  0xa7   : > { %v11262_v8 = vld [vmem:[%s11179_s27 + $0x80] sm:$0xff]  ;;  %v11269_v11 = vmul.f32 %v11259_v7, %v11259_v7  ;;  %v436_v12 = vld [vmem:[%s11187_s2 + $0x8] sm:$0xff]  ;;  %v11284_v18 = vmul.f32 %v11265_v9, %v11265_v9  ;;  %v11287_v19 = vld [vmem:[%s11179_s27 + $0xb0] sm:$0xff]  ;;  %v8177_v24 = vmul.f32 -1.442695, %v437_v15  ;;  %s8473_s0 = sshll.u32 %s10879_s22, 11 }
  0xa8   : > { %14159 = vst [vmem:[#allocation26_spill] sm:$0xff] %v11248_v4  ;;  %14160 = vst [vmem:[#allocation27_spill] sm:$0xff] %v11252_v5  ;;  %v538_v13 = vsel %vm499_vm1, %v11248_v4, 0.0  ;;  %v532_v14 = vsel %vm499_vm1, %v11252_v5, 0.0  ;;  %v435_v16 = vld [vmem:[%s11187_s2] sm:$0xff]  ;;  %v11280_v17 = vmul.f32 %v11262_v8, %v11262_v8  ;;  %v438_v20 = vld [vmem:[%s11187_s2 + $0x18] sm:$0xff]  ;;  %v11299_v28 = vmul.f32 %v11287_v19, %v11287_v19 }
  0xa9   : > { %14161 = vst [vmem:[#allocation28_spill] sm:$0xff] %v11256_v6  ;;  %14162 = vst [vmem:[#allocation29_spill] sm:$0xff] %v11269_v11  ;;  %539 = vadd.xlane.f32.xlu1 %v538_v13  ;;  %533 = vadd.xlane.f32.xlu0 %v532_v14  ;;  %v541_v21 = vsel %vm499_vm1, %v11256_v6, 0.0  ;;  %v535_v22 = vsel %vm499_vm1, %v11269_v11, 0.0  ;;  %v8176_v23 = vmul.f32 -1.442695, %v436_v12 }
  0xaa   : > { %14163 = vst [vmem:[#allocation30_spill] sm:$0xff] %v11280_v17  ;;  %14164 = vst [vmem:[#allocation31_spill] sm:$0xff] %v11284_v18  ;;  %v11295_v25 = vld [vmem:[%s11179_s27 + $0x98] sm:$0xff]  ;;  %v8175_v26 = vmul.f32 -1.442695, %v435_v16  ;;  %v439_v29 = vld [vmem:[%s11187_s2 + $0x20] sm:$0xff] }
  0xab   : > { %10360 = vpow2.f32 %v8176_v23  ;;  %v8178_v27 = vmul.f32 -1.442695, %v438_v20  ;;  %14165 = vst [vmem:[#allocation32_spill] sm:$0xff] %v11299_v28  ;;  %v547_v30 = vsel %vm499_vm1, %v11280_v17, 0.0  ;;  %v544_v31 = vsel %vm499_vm1, %v11284_v18, 0.0  ;;  %v440_v34 = vld [vmem:[%s11187_s2 + $0x28] sm:$0xff] }
  0xac   : > { %10362 = vpow2.f32 %v8177_v24  ;;  %v11308_v32 = vmul.f32 %v11295_v25, %v11295_v25  ;;  %v8179_v33 = vmul.f32 -1.442695, %v439_v29  ;;  %v553_v35 = vsel %vm499_vm1, %v11299_v28, 0.0  ;;  %v441_v38 = vld [vmem:[%s11187_s2 + $0x30] sm:$0xff]  ;;  %v442_v45 = vld [vmem:[%s11187_s2 + $0x38] sm:$0xff]  ;;  %s7976_s29 = sshll.u32 %s11202_s3, 4  ;;  %s13811_s29 = int_to_ptr.vmem [resolvable:$true] %s7976_s29 }
  0xad   : > { %542 = vadd.xlane.f32.xlu1 %v541_v21  ;;  %536 = vadd.xlane.f32.xlu0 %v535_v22  ;;  %10364 = vpow2.f32 %v8175_v26  ;;  %v8180_v37 = vmul.f32 -1.442695, %v440_v34  ;;  %v8181_v43 = vmul.f32 -1.442695, %v441_v38  ;;  %v8182_v48 = vmul.f32 -1.442695, %v442_v45 }
  0xae   : > { %14166 = vst [vmem:[#allocation33_spill] sm:$0xff] %v11308_v32  ;;  %10366 = vpow2.f32 %v8178_v27  ;;  %v550_v36 = vsel %vm499_vm1, %v11308_v32, 0.0  ;;  %s14369_s6 = sld [smem:[#allocation91_spill]]  ;;  %s13817_s12 = scalar_lea.sflag [#allocation10], %s299_s4 }
  0xaf   : > { %10368 = vpow2.f32 %v8179_v33  ;;  %s10729_s7 = scalar_lea.vmem %s13811_s29, 2048  ;;  %p14370_p0 = scmp.ne.s32.totalorder %s14139_s8, 0 }
  0xb0   : > { %10370 = vpow2.f32 %v8180_v37  ;;  %p10730_p1 = scmp.ne.s32.totalorder %s13811_s29, %s10729_s7 }
  0xb1   : > { %548 = vadd.xlane.f32.xlu1 %v547_v30  ;;  %545 = vadd.xlane.f32.xlu0 %v544_v31 }
  0xb2   : > { %p10731_p11 = pnand %p10730_p1, %p14370_p0 }
  0xb4   : > { %s13809_s13 = scalar_lea.hbm %s14369_s6, %s8473_s0  ;;  %p10732_p12 = pneg %p10731_p11 }
  0xb5   : > { %554 = vadd.xlane.f32.xlu1 %v553_v35  ;;  %551 = vadd.xlane.f32.xlu0 %v550_v36  ;;  %v10361_v39 = vpop.eup %10360 }
  0xb6   : > { %v10363_v40 = vpop.eup %10362  ;;  %v468_v41 = vadd.f32 1.0, %v10361_v39 }
  0xb7   : > { %v10365_v42 = vpop.eup %10364  ;;  %v469_v44 = vadd.f32 1.0, %v10363_v40 }
  0xb8   : > { %10372 = vrcp.f32 %v468_v41  ;;  %v10367_v46 = vpop.eup %10366  ;;  %v467_v47 = vadd.f32 1.0, %v10365_v42 }
  0xb9   : > { %10374 = vpow2.f32 %v8181_v43  ;;  %v470_v49 = vadd.f32 1.0, %v10367_v46  ;;  %v10369_v50 = vpop.eup %10368 }
  0xba   : > { %10376 = vrcp.f32 %v469_v44  ;;  %v471_v51 = vadd.f32 1.0, %v10369_v50  ;;  %v10371_v52 = vpop.eup %10370 }
  0xbb   : > { %10378 = vrcp.f32 %v467_v47  ;;  %v472_v54 = vadd.f32 1.0, %v10371_v52 }
  0xbc   : > { %10380 = vpow2.f32 %v8182_v48 }
  0xbd   : > { %10382 = vrcp.f32 %v470_v49 }
  0xbe   : > { %10384 = vrcp.f32 %v471_v51 }
  0xbf   : > { %10386 = vrcp.f32 %v472_v54 }
  0xc2   : > { %v11317_v53 = vpop.eup %10372 }
  0xc3   : > { %14167 = vst [vmem:[#allocation34_spill] sm:$0xff] %v11317_v53  ;;  %v10375_v55 = vpop.eup %10374 }
  0xc4   : > { %v11320_v56 = vpop.eup %10376  ;;  %v473_v58 = vadd.f32 1.0, %v10375_v55 }
  0xc5   : > { %14168 = vst [vmem:[#allocation35_spill] sm:$0xff] %v11320_v56  ;;  %v11322_v57 = vpop.eup %10378 }
  0xc6   : > { %635 = vperm.xlu1 %10353, %v11317_v53   ;;  %14169 = vst [vmem:[#allocation36_spill] sm:$0xff] %v11322_v57  ;;  %v10381_v59 = vpop.eup %10380  ;;  %10388 = vrcp.f32 %v473_v58 }
  0xc7   : > { %v11325_v60 = vpop.eup %10382  ;;  %v474_v61 = vadd.f32 1.0, %v10381_v59 }
  0xc8   : > { %14170 = vst [vmem:[#allocation37_spill] sm:$0xff] %v11325_v60  ;;  %v11329_v62 = vpop.eup %10384 }
  0xc9   : > { %14171 = vst [vmem:[#allocation38_spill] sm:$0xff] %v11329_v62  ;;  %10390 = vrcp.f32 %v474_v61  ;;  %v11332_v63 = vpop.eup %10386 }
  0xca   : > { %640 = vperm.xlu1 %10353, %v11320_v56   ;;  %14172 = vst [vmem:[#allocation39_spill] sm:$0xff] %v11332_v63 }
  0xcb   : > { %630 = vperm.xlu0 %10352, %v11322_v57  }
  0xce   : > { %645 = vperm.xlu1 %10353, %v11325_v60  }
  0xd0   : > { %v11335_v0 = vpop.eup %10388 }
  0xd1   : > { %14173 = vst [vmem:[#allocation40_spill] sm:$0xff] %v11335_v0 }
  0xd2   : > { %650 = vperm.xlu1 %10353, %v11329_v62  }
  0xd3   : > { %v11338_v10 = vpop.eup %10390 }
  0xd4   : > { %14174 = vst [vmem:[#allocation41_spill] sm:$0xff] %v11338_v10 }
  0xd6   : > { %655 = vperm.xlu1 %10353, %v11332_v63  }
  0xda   : > { %660 = vperm.xlu1 %10353, %v11335_v0  }
  0xde   : > { %665 = vperm.xlu1 %10353, %v11338_v10  }
 0x136   : > { %v540_v12 = vpop.xlane.xlu1 %539  ;;  %v534_v13 = vpop.xlane.xlu0 %533 }
 0x137   : > { %10392 = vrsqrt.f32 %v534_v13  ;;  %vm596_vm2 = vcmp.gt.f32.partialorder %v534_v13, 0.0  ;;  %vm598_vm4 = vcmp.gt.f32.partialorder %v540_v12, 0.0 }
 0x138   : > { %10394 = vrsqrt.f32 %v540_v12 }
 0x13a   : > { %v543_v14 = vpop.xlane.xlu1 %542  ;;  %v537_v15 = vpop.xlane.xlu0 %536 }
 0x13b   : > { %10396 = vrsqrt.f32 %v543_v14  ;;  %vm599_vm3 = vcmp.gt.f32.partialorder %v543_v14, 0.0  ;;  %vm597_vm5 = vcmp.gt.f32.partialorder %v537_v15, 0.0 }
 0x13c   : > { %10398 = vrsqrt.f32 %v537_v15 }
 0x13e   : > { %v549_v16 = vpop.xlane.xlu1 %548  ;;  %v546_v20 = vpop.xlane.xlu0 %545 }
 0x13f   : > { %10400 = vrsqrt.f32 %v549_v16  ;;  %vm601_vm6 = vcmp.gt.f32.partialorder %v549_v16, 0.0  ;;  %vm600_vm7 = vcmp.gt.f32.partialorder %v546_v20, 0.0 }
 0x140   : > { %10402 = vrsqrt.f32 %v546_v20 }
 0x141   : > { %v10393_v21 = vpop.eup %10392 }
 0x142   : > { %v555_v22 = vpop.xlane.xlu1 %554  ;;  %v10395_v23 = vpop.eup %10394  ;;  %v612_v27 = vsel %vm596_vm2, %v10393_v21, 0.0 }
 0x143   : > { %v552_v24 = vpop.xlane.xlu0 %551  ;;  %v614_v31 = vsel %vm598_vm4, %v10395_v23, 0.0  ;;  %10404 = vrsqrt.f32 %v555_v22  ;;  %v620_v37 = vmul.f32 %v612_v27, %v11241_v2  ;;  %vm603_vm8 = vcmp.gt.f32.partialorder %v555_v22, 0.0 }
 0x144   : > { %10406 = vrsqrt.f32 %v552_v24  ;;  %v622_v40 = vmul.f32 %v614_v31, %v11238_v1  ;;  %vm602_vm9 = vcmp.gt.f32.partialorder %v552_v24, 0.0 }
 0x145   : > { %v10397_v26 = vpop.eup %10396 }
 0x146   : > { %v10399_v29 = vpop.eup %10398  ;;  %v615_v30 = vsel %vm599_vm3, %v10397_v26, 0.0  ;;  %v11341_v34 = vpop.permute.xlu1 %635  ;;  %vm817_vm3 = vcmask 523264  }
 0x147   : > { %v613_v33 = vsel %vm597_vm5, %v10399_v29, 0.0  ;;  %v623_v35 = vmul.f32 %v615_v30, %v11244_v3  ;;  %v327_v29 = vlaneseq }
 0x148   : > { %v621_v36 = vmul.f32 %v613_v33, %v11259_v7 }
 0x149   : > { %v10401_v38 = vpop.eup %10400  ;;  %v11352_v44 = vpack.c.bf16 %v623_v35, %v622_v40  ;;  %v11425_v30 = vshrl.u32 %v327_v29, 7  ;;  %v11430_v33 = vand.u32 127, %v327_v29 }
 0x14a   : > { %v10403_v39 = vpop.eup %10402  ;;  %v11347_v41 = vpack.c.bf16 %v621_v36, %v620_v37  ;;  %v11349_v42 = vpop.permute.xlu0 %630  ;;  %v669_v43 = vmul.f32 %v11341_v34, %v621_v36  ;;  %v617_v7 = vsel %vm601_vm6, %v10401_v38, 0.0 }
 0x14b   : > { %v668_v3 = vmul.f32 %v11349_v42, %v620_v37  ;;  %v616_v45 = vsel %vm600_vm7, %v10403_v39, 0.0  ;;  %v11361_v1 = vpop.permute.xlu1 %640  ;;  %v625_v47 = vmul.f32 %v617_v7, %v11262_v8  ;;  %v11378_v54 = vsel %vm499_vm1, %v11352_v44, 0  ;;  %14177 = vst [vmem:[#allocation44_spill] sm:$0xff] %v11425_v30 }
 0x14c   : > { %10162 = vmatprep.subr.msk.bf16.mxu0 %vm499_vm1, %v11347_v41  ;;  %v11359_v2 = vsel %vm499_vm1, %v11347_v41, 0  ;;  %v624_v48 = vmul.f32 %v616_v45, %v11265_v9  ;;  %v670_v16 = vmul.f32 %v11361_v1, %v622_v40  ;;  %v11428_v31 = vadd.s32 16, %v11425_v30 }
 0x14d   : > { %9027 = vmatpush3.bf16.xpose.msra.mxu0 %v11359_v2  ;;  %v11366_v46 = vpack.c.bf16 %v669_v43, %v668_v3  ;;  %v10405_v49 = vpop.eup %10404  ;;  %v11436_v36 = vadd.s32 8, %v11425_v30  ;;  %vm338_vm11 = vcmp.gt.s32.totalorder %v11425_v30, %v11430_v33  ;;  %v13998_v37 = vmov 0.0  }
 0x14e   : > { %10163 = vmatprep.subr.msk.bf16.mxu0 %vm499_vm1, %v11352_v44  ;;  %v10407_v50 = vpop.eup %10406  ;;  %v11374_v52 = vpack.c.bf16 %v625_v47, %v624_v48  ;;  %v619_v55 = vsel %vm603_vm8, %v10405_v49, 0.0  ;;  %vm340_vm10 = vcmp.gt.s32.totalorder %v11428_v31, %v11430_v33  ;;  %v11450_v39 = vsel %vm338_vm11, 1.0, %v13998_v37 }
 0x14f   : > { %9034 = vmatprep.mubr.msk.bf16.mxu0 %vm499_vm1, %v11366_v46  ;;  %v11372_v51 = vpop.permute.xlu1 %645  ;;  %v618_v58 = vsel %vm602_vm9, %v10407_v50, 0.0  ;;  %v627_v8 = vmul.f32 %v619_v55, %v11287_v19  ;;  %14179 = vst [vmem:[#allocation46_spill] sm:$0xff] %v11436_v36  ;;  %v11445_v38 = vsel %vm340_vm10, 1.0, %v13998_v37  ;;  %vm339_vm13 = vcmp.gt.s32.totalorder %v11436_v36, %v11430_v33  ;;  %14181 = vst [vmem:[#allocation48_spill] sm:$0xff] %v11450_v39 }
 0x150   : > { %v626_v9 = vmul.f32 %v618_v58, %v11295_v25  ;;  %v11391_v12 = vsel %vm499_vm1, %v11374_v52, 0  ;;  %v671_v14 = vmul.f32 %v11372_v51, %v623_v35  ;;  %v11433_v35 = vadd.s32 24, %v11425_v30  ;;  %14180 = vst [vmem:[#allocation47_spill] sm:$0xff] %v11445_v38 }
 0x151   : > { %v11453_v40 = vadd.s32 48, %v11425_v30  ;;  %v11459_v7 = vadd.s32 32, %v11425_v30  ;;  %v11468_v49 = vadd.s32 56, %v11425_v30  ;;  %v11472_v58 = vadd.s32 40, %v11425_v30 }
 0x152   : > { %v11387_v61 = vpack.c.bf16 %v627_v8, %v626_v9  ;;  %v11409_v21 = vpack.c.bf16 %v671_v14, %v670_v16  ;;  %14178 = vst [vmem:[#allocation45_spill] sm:$0xff] %v11433_v35  ;;  %vm341_vm12 = vcmp.gt.s32.totalorder %v11433_v35, %v11430_v33  ;;  %vm387_vm4 = vcmp.eq.s32.totalorder %v11436_v36, %v11430_v33 }
 0x153   : > { %v11385_v59 = vpop.permute.xlu1 %650  ;;  %14182 = vst [vmem:[#allocation49_spill] sm:$0xff] %v11453_v40  ;;  %v11456_v3 = vsel %vm341_vm12, 1.0, %v13998_v37  ;;  %14184 = vst [vmem:[#allocation51_spill] sm:$0xff] %v11459_v7  ;;  %vm344_vm14 = vcmp.gt.s32.totalorder %v11453_v40, %v11430_v33  ;;  %vm342_vm15 = vcmp.gt.s32.totalorder %v11459_v7, %v11430_v33  ;;  %vm345_vm0 = vcmp.gt.s32.totalorder %v11468_v49, %v11430_v33 }
 0x154   : > { %14175 = vst [vmem:[#allocation42_spill] sm:$0xff] %v11387_v61  ;;  %v11400_v19 = vsel %vm499_vm1, %v11387_v61, 0  ;;  %v672_v20 = vmul.f32 %v11385_v59, %v624_v48  ;;  %14183 = vst [vmem:[#allocation50_spill] sm:$0xff] %v11456_v3  ;;  %v11465_v48 = vsel %vm339_vm13, 1.0, %v13998_v37  ;;  %vm343_vm2 = vcmp.gt.s32.totalorder %v11472_v58, %v11430_v33 }
 0x155   : > { %9029 = vmatpush3.bf16.xpose.msra.mxu0 %v11378_v54  ;;  %14176 = vst [vmem:[#allocation43_spill] sm:$0xff] %v11400_v19  ;;  %14185 = vst [vmem:[#allocation52_spill] sm:$0xff] %v11465_v48  ;;  %vm386_vm5 = vcmp.eq.s32.totalorder %v11425_v30, %v11430_v33  ;;  %vm389_vm6 = vcmp.eq.s32.totalorder %v11433_v35, %v11430_v33  ;;  %vm388_vm7 = vcmp.eq.s32.totalorder %v11428_v31, %v11430_v33 }
 0x156   : > { %10164 = vmatprep.subr.msk.bf16.mxu0 %vm499_vm1, %v11374_v52  ;;  %14186 = vst [vmem:[#allocation53_spill] sm:$0xff] %v11468_v49  ;;  %14187 = vst [vmem:[#allocation54_spill] sm:$0xff] %v11472_v58  ;;  %vm391_vm8 = vcmp.eq.s32.totalorder %v11472_v58, %v11430_v33  ;;  %vm390_vm9 = vcmp.eq.s32.totalorder %v11459_v7, %v11430_v33  ;;  %vm393_vm10 = vcmp.eq.s32.totalorder %v11468_v49, %v11430_v33 }
 0x157   : > { %v11396_v13 = vpop.permute.xlu1 %655  ;;  %vm392_vm11 = vcmp.eq.s32.totalorder %v11453_v40, %v11430_v33 }
 0x158   : > { %v673_v15 = vmul.f32 %v11396_v13, %v625_v47 }
 0x15a   : > { %v11411_v22 = vpack.c.bf16 %v673_v15, %v672_v20 }
 0x15b   : > { %v11402_v25 = vpop.permute.xlu1 %660 }
 0x15c   : > { %v674_v26 = vmul.f32 %v11402_v25, %v626_v9 }
 0x15d   : > { %9031 = vmatpush3.bf16.xpose.msra.mxu0 %v11391_v12 }
 0x15e   : > { %10165 = vmatprep.subr.msk.bf16.mxu0 %vm499_vm1, %v11387_v61 }
 0x15f   : > { %v11413_v23 = vpop.permute.xlu1 %665 }
 0x160   : > { %v675_v24 = vmul.f32 %v11413_v23, %v627_v8 }
 0x162   : > { %v11421_v27 = vpack.c.bf16 %v675_v24, %v674_v26  ;;  %v11484_v26 = vsel %vm344_vm14, 1.0, %v13998_v37 }
 0x163   : > { %14188 = vst [vmem:[#allocation55_spill] sm:$0xff] %v11484_v26 }
 0x165   : > { %9033 = vmatpush3.bf16.xpose.msra.mxu0 %v11400_v19 }
 0x16c   : > { %9035 = vmatmul.mubr.msk.bf16.vlgmr.msra.gmra.mrb[0].mxu0 %vm499_vm1, %v11409_v21 }
 0x16d   : > { %9038 = vmatprep.mubr.msk.bf16.mxu0 %vm499_vm1, %v11411_v22 }
 0x174   : > { %9039 = vmatmul.mubr.msk.bf16.gmra.mrb[4].mxu0 %vm499_vm1, %v11421_v27 }
 0x23f   : > { %v9036_v43 = vpop.f32.mrb[0].mxu0 }
 0x240   : > { %v11462_v45 = vmul.f32 %v9036_v43, %v11445_v38  ;;  %v758_v47 = vpop.f32.mrb[1].mxu0  ;;  %v11489_v43 = vsel %vm342_vm15, 1.0, %v13998_v37 }
 0x241   : > { %v789_v50 = vmul.f32 %v11450_v39, %v758_v47  ;;  %v9037_v55 = vpop.f32.mrb[2].mxu0  ;;  %14189 = vst [vmem:[#allocation56_spill] sm:$0xff] %v11489_v43 }
 0x242   : > { %v792_v8 = vmul.f32 %v9037_v55, %v11456_v3  ;;  %v761_v9 = vpop.f32.mrb[3].mxu0  ;;  %v799_v15 = vsub.f32 0.0, %v11462_v45  ;;  %v11492_v45 = vsel %vm345_vm0, 1.0, %v13998_v37 }
 0x243   : > { %v790_v14 = vmul.f32 %v11465_v48, %v761_v9  ;;  %v797_v20 = vsub.f32 0.0, %v789_v50  ;;  %14190 = vst [vmem:[#allocation57_spill] sm:$0xff] %v11492_v45  ;;  %v11496_v9 = vsel %vm343_vm2, 1.0, %v13998_v37 }
 0x244   : > { %v800_v16 = vsub.f32 0.0, %v792_v8  ;;  %14191 = vst [vmem:[#allocation58_spill] sm:$0xff] %v11496_v9 }
 0x245   : > { %v798_v24 = vsub.f32 0.0, %v790_v14 }
 0x246   : > { %v814_v29 = vpack.c.bf16 %v800_v16, %v799_v15 }
 0x247   : > { %v813_v47 = vpack.c.bf16 %v798_v24, %v797_v20  ;;  %v9040_v55 = vpop.f32.mrb[4].mxu0 }
 0x248   : > { %v795_v8 = vmul.f32 %v9040_v55, %v11484_v26  ;;  %v774_v50 = vpop.f32.mrb[5].mxu0 }
 0x249   : > { %v793_v14 = vmul.f32 %v11489_v43, %v774_v50  ;;  %v9041_v48 = vpop.f32.mrb[6].mxu0  ;;  %9042 = vmatprep.subr.bf16.mxu1 %v813_v47  ;;  %9050 = vmatprep.mubr.msk.bf16.mxu1 %vm817_vm3, %v813_v47  ;;  %v14192_v43 = vmov 0.0  }
 0x24a   : > { %v796_v3 = vmul.f32 %v9041_v48, %v11492_v45  ;;  %v777_v39 = vpop.f32.mrb[7].mxu0  ;;  %9043 = vmatpush3.bf16.msra.mxu1 %v813_v47  ;;  %v803_v55 = vsub.f32 0.0, %v795_v8  ;;  %v11507_v19 = vsel %vm387_vm4, 1.0, %v14192_v43  ;;  %v11512_v47 = vsel %vm386_vm5, 1.0, %v14192_v43 }
 0x24b   : > { %v794_v38 = vmul.f32 %v11496_v9, %v777_v39  ;;  %9044 = vmatprep.subr.bf16.mxu1 %v814_v29  ;;  %v801_v50 = vsub.f32 0.0, %v793_v14  ;;  %14193 = vst [vmem:[#allocation59_spill] sm:$0xff] %v11507_v19  ;;  %14194 = vst [vmem:[#allocation60_spill] sm:$0xff] %v11512_v47  ;;  %v11517_v39 = vadd.f32 %v11507_v19, %v798_v24  ;;  %v11528_v8 = vsel %vm388_vm7, 1.0, %v14192_v43 }
 0x24c   : > { %v804_v26 = vsub.f32 0.0, %v796_v3  ;;  %v11523_v3 = vadd.f32 %v11512_v47, %v797_v20  ;;  %14196 = vst [vmem:[#allocation62_spill] sm:$0xff] %v11528_v8  ;;  %v11536_v19 = vsel %vm391_vm8, 1.0, %v14192_v43  ;;  %v807_v20 = vadd.f32 %v11528_v8, %v799_v15 }
 0x24d   : > { %v802_v37 = vsub.f32 0.0, %v794_v38  ;;  %v11520_v38 = vsel %vm389_vm6, 1.0, %v14192_v43  ;;  %14197 = vst [vmem:[#allocation63_spill] sm:$0xff] %v11536_v19  ;;  %v11542_v47 = vsel %vm390_vm9, 1.0, %v14192_v43  ;;  %v11551_v9 = vsel %vm393_vm10, 1.0, %v14192_v43 }
 0x24e   : > { %v816_v61 = vpack.c.bf16 %v804_v26, %v803_v55  ;;  %9045 = vmatpush3.bf16.msra.mxu1 %v814_v29  ;;  %14195 = vst [vmem:[#allocation61_spill] sm:$0xff] %v11520_v38  ;;  %v808_v14 = vadd.f32 %v11520_v38, %v800_v16  ;;  %v899_v24 = vpack.c.bf16 %v11517_v39, %v11523_v3  ;;  %14198 = vst [vmem:[#allocation64_spill] sm:$0xff] %v11542_v47 }
 0x24f   : > { %v815_v48 = vpack.c.bf16 %v802_v37, %v801_v50  ;;  %v11547_v16 = vadd.f32 %v11536_v19, %v802_v37  ;;  %14199 = vst [vmem:[#allocation65_spill] sm:$0xff] %v11551_v9  ;;  %v809_v15 = vadd.f32 %v11542_v47, %v801_v50  ;;  %v11556_v8 = vsel %vm392_vm11, 1.0, %v14192_v43 }
 0x250   : > { %v900_v38 = vpack.c.bf16 %v808_v14, %v807_v20  ;;  %14200 = vst [vmem:[#allocation66_spill] sm:$0xff] %v11556_v8  ;;  %v812_v45 = vadd.f32 %v11551_v9, %v804_v26 }
 0x251   : > { %9046 = vmatprep.subr.bf16.mxu1 %v815_v48  ;;  %v901_v37 = vpack.c.bf16 %v11547_v16, %v809_v15 }
 0x252   : > { %9047 = vmatpush3.bf16.msra.mxu1 %v815_v48 }
 0x253   : > { %9048 = vmatprep.subr.bf16.mxu1 %v816_v61 }
 0x256   : > { %9049 = vmatpush3.bf16.msra.mxu1 %v816_v61 }
 0x257   : > { %9058 = vmatprep.subr.bf16.mxu1 %v899_v24 }
 0x259   : > { %9051 = vmatmul.mubr.msk.bf16.vlgmr.msra.gmra.mrb[0].mxu1 %vm817_vm3, %v814_v29  ;;  %v811_v29 = vadd.f32 %v11556_v8, %v803_v55 }
 0x25a   : > { %9054 = vmatprep.mubr.msk.bf16.mxu1 %vm817_vm3, %v815_v48  ;;  %9059 = vmatpush3.bf16.msra.mxu1 %v899_v24 }
 0x25b   : > { %9060 = vmatprep.subr.bf16.mxu1 %v900_v38  ;;  %v902_v19 = vpack.c.bf16 %v812_v45, %v811_v29 }
 0x25e   : > { %9061 = vmatpush3.bf16.msra.mxu1 %v900_v38 }
 0x25f   : > { %9062 = vmatprep.subr.bf16.mxu1 %v901_v37 }
 0x261   : > { %9055 = vmatmul.mubr.msk.bf16.gmra.mrb[4].mxu1 %vm817_vm3, %v816_v61 }
 0x262   : > { %9063 = vmatpush3.bf16.msra.mxu1 %v901_v37 }
 0x263   : > { %9064 = vmatprep.subr.bf16.mxu1 %v902_v19 }
 0x266   : > { %9065 = vmatpush3.bf16.msra.mxu1 %v902_v19 }
 0x32c   : > { %v9052_v48 = vpop.f32.mrb[0].mxu1 }
 0x32d   : > { %v864_v50 = vpop.f32.mrb[1].mxu1 }
 0x32e   : > { %v9053_v24 = vpop.f32.mrb[2].mxu1 }
 0x32f   : > { %v896_v47 = vpack.c.bf16 %v9053_v24, %v9052_v48  ;;  %v867_v58 = vpop.f32.mrb[3].mxu1 }
 0x330   : > { %v895_v49 = vpack.c.bf16 %v867_v58, %v864_v50 }
 0x332   : > { %9066 = vmatprep.mubr.msk.bf16.mxu1 %vm817_vm3, %v895_v49  ;;  %9074 = vmatprep.subr.bf16.mxu0 %v895_v49 }
 0x333   : > { %9082 = vmatprep.mubr.msk.bf16.mxu0 %vm817_vm3, %v895_v49  ;;  %9067 = vmatmul.mubr.msk.bf16.vlgmr.msra.gmra.mrb[8].mxu1 %vm817_vm3, %v896_v47 }
 0x334   : > { %9075 = vmatpush3.bf16.msra.mxu0 %v895_v49  ;;  %v9056_v26 = vpop.f32.mrb[4].mxu1 }
 0x335   : > { %9076 = vmatprep.subr.bf16.mxu0 %v896_v47  ;;  %v880_v61 = vpop.f32.mrb[5].mxu1 }
 0x336   : > { %v9057_v55 = vpop.f32.mrb[6].mxu1 }
 0x337   : > { %v898_v38 = vpack.c.bf16 %v9057_v55, %v9056_v26  ;;  %v883_v19 = vpop.f32.mrb[7].mxu1 }
 0x338   : > { %v897_v37 = vpack.c.bf16 %v883_v19, %v880_v61  ;;  %9077 = vmatpush3.bf16.msra.mxu0 %v896_v47 }
 0x33a   : > { %9070 = vmatprep.mubr.msk.bf16.mxu1 %vm817_vm3, %v897_v37  ;;  %9078 = vmatprep.subr.bf16.mxu0 %v897_v37 }
 0x33b   : > { %9071 = vmatmul.mubr.msk.bf16.gmra.mrb[12].mxu1 %vm817_vm3, %v898_v38 }
 0x33c   : > { %9079 = vmatpush3.bf16.msra.mxu0 %v897_v37 }
 0x33d   : > { %9080 = vmatprep.subr.bf16.mxu0 %v898_v38 }
 0x340   : > { %9081 = vmatpush3.bf16.msra.mxu0 %v898_v38 }
 0x343   : > { %9083 = vmatmul.mubr.msk.bf16.vlgmr.msra.gmra.mrb[8].mxu0 %vm817_vm3, %v896_v47 }
 0x344   : > { %9086 = vmatprep.mubr.msk.bf16.mxu0 %vm817_vm3, %v897_v37 }
 0x34b   : > { %9087 = vmatmul.mubr.msk.bf16.gmra.mrb[12].mxu0 %vm817_vm3, %v898_v38 }
 0x406   : > { %v9068_v49 = vpop.f32.mrb[8].mxu1 }
 0x407   : > { %v949_v58 = vpop.f32.mrb[9].mxu1  ;;  %v982_v55 = vadd.f32 %v9068_v49, %v807_v20 }
 0x408   : > { %v9069_v48 = vpop.f32.mrb[10].mxu1  ;;  %v980_v24 = vadd.f32 %v949_v58, %v11523_v3 }
 0x409   : > { %v952_v50 = vpop.f32.mrb[11].mxu1  ;;  %v983_v26 = vadd.f32 %v9069_v48, %v808_v14 }
 0x40a   : > { %v981_v61 = vadd.f32 %v952_v50, %v11517_v39 }
 0x40b   : > { %v1058_v9 = vpack.c.bf16 %v983_v26, %v982_v55 }
 0x40c   : > { %v1057_v19 = vpack.c.bf16 %v981_v61, %v980_v24 }
 0x40e   : > { %v9072_v8 = vpop.f32.mrb[12].mxu1  ;;  %9090 = vmatprep.subr.bf16.mxu1 %v1057_v19 }
 0x40f   : > { %v965_v7 = vpop.f32.mrb[13].mxu1  ;;  %9091 = vmatpush3.bf16.msra.mxu1 %v1057_v19  ;;  %v986_v43 = vadd.f32 %v9072_v8, %v811_v29 }
 0x410   : > { %v9073_v47 = vpop.f32.mrb[14].mxu1  ;;  %9092 = vmatprep.subr.bf16.mxu1 %v1058_v9  ;;  %v984_v38 = vadd.f32 %v965_v7, %v809_v15 }
 0x411   : > { %v968_v37 = vpop.f32.mrb[15].mxu1  ;;  %v987_v40 = vadd.f32 %v9073_v47, %v812_v45 }
 0x412   : > { %v985_v36 = vadd.f32 %v968_v37, %v11547_v16 }
 0x413   : > { %9093 = vmatpush3.bf16.msra.mxu1 %v1058_v9  ;;  %v1060_v39 = vpack.c.bf16 %v987_v40, %v986_v43 }
 0x414   : > { %v1059_v3 = vpack.c.bf16 %v985_v36, %v984_v38 }
 0x416   : > { %v9084_v14 = vpop.f32.mrb[8].mxu0  ;;  %9094 = vmatprep.subr.bf16.mxu1 %v1059_v3 }
 0x417   : > { %v1022_v20 = vpop.f32.mrb[9].mxu0  ;;  %9095 = vmatpush3.bf16.msra.mxu1 %v1059_v3 }
 0x418   : > { %v9085_v49 = vpop.f32.mrb[10].mxu0  ;;  %9096 = vmatprep.subr.bf16.mxu1 %v1060_v39 }
 0x419   : > { %v1054_v58 = vpack.c.bf16 %v9085_v49, %v9084_v14  ;;  %v1025_v48 = vpop.f32.mrb[11].mxu0 }
 0x41a   : > { %v1053_v50 = vpack.c.bf16 %v1025_v48, %v1022_v20 }
 0x41b   : > { %9097 = vmatpush3.bf16.msra.mxu1 %v1060_v39 }
 0x41c   : > { %9098 = vmatprep.mubr.msk.bf16.mxu1 %vm817_vm3, %v1053_v50  ;;  %9106 = vmatprep.subr.bf16.mxu0 %v1053_v50 }
 0x41d   : > { %9114 = vmatprep.mubr.msk.bf16.mxu0 %vm817_vm3, %v1053_v50  ;;  %9107 = vmatpush3.bf16.msra.mxu0 %v1053_v50 }
 0x41e   : > { %v9088_v7 = vpop.f32.mrb[12].mxu0  ;;  %9108 = vmatprep.subr.bf16.mxu0 %v1054_v58  ;;  %9099 = vmatmul.mubr.msk.bf16.vlgmr.msra.gmra.mrb[16].mxu1 %vm817_vm3, %v1054_v58 }
 0x41f   : > { %v1038_v45 = vpop.f32.mrb[13].mxu0 }
 0x420   : > { %v9089_v9 = vpop.f32.mrb[14].mxu0 }
 0x421   : > { %v1056_v8 = vpack.c.bf16 %v9089_v9, %v9088_v7  ;;  %v1041_v16 = vpop.f32.mrb[15].mxu0  ;;  %9109 = vmatpush3.bf16.msra.mxu0 %v1054_v58 }
 0x422   : > { %v1055_v15 = vpack.c.bf16 %v1041_v16, %v1038_v45 }
 0x424   : > { %9102 = vmatprep.mubr.msk.bf16.mxu1 %vm817_vm3, %v1055_v15  ;;  %9110 = vmatprep.subr.bf16.mxu0 %v1055_v15 }
 0x425   : > { %9111 = vmatpush3.bf16.msra.mxu0 %v1055_v15 }
 0x426   : > { %9112 = vmatprep.subr.bf16.mxu0 %v1056_v8  ;;  %9103 = vmatmul.mubr.msk.bf16.gmra.mrb[20].mxu1 %vm817_vm3, %v1056_v8 }
 0x429   : > { %9113 = vmatpush3.bf16.msra.mxu0 %v1056_v8 }
 0x42c   : > { %9115 = vmatmul.mubr.msk.bf16.vlgmr.msra.gmra.mrb[16].mxu0 %vm817_vm3, %v1054_v58 }
 0x42d   : > { %9118 = vmatprep.mubr.msk.bf16.mxu0 %vm817_vm3, %v1055_v15 }
 0x434   : > { %9119 = vmatmul.mubr.msk.bf16.gmra.mrb[20].mxu0 %vm817_vm3, %v1056_v8 }
 0x4f1   : > { %v9100_v29 = vpop.f32.mrb[16].mxu1 }
 0x4f2   : > { %v1107_v19 = vpop.f32.mrb[17].mxu1  ;;  %v1140_v20 = vadd.f32 %v9100_v29, %v982_v55 }
 0x4f3   : > { %v9101_v47 = vpop.f32.mrb[18].mxu1  ;;  %v1138_v3 = vadd.f32 %v1107_v19, %v980_v24 }
 0x4f4   : > { %v1110_v37 = vpop.f32.mrb[19].mxu1  ;;  %v1141_v14 = vadd.f32 %v9101_v47, %v983_v26 }
 0x4f5   : > { %v1139_v39 = vadd.f32 %v1110_v37, %v981_v61 }
 0x4f6   : > { %v1216_v48 = vpack.c.bf16 %v1141_v14, %v1140_v20 }
 0x4f7   : > { %v1215_v49 = vpack.c.bf16 %v1139_v39, %v1138_v3 }
 0x4f9   : > { %v9104_v50 = vpop.f32.mrb[20].mxu1  ;;  %9122 = vmatprep.subr.bf16.mxu1 %v1215_v49 }
 0x4fa   : > { %v1123_v7 = vpop.f32.mrb[21].mxu1  ;;  %9123 = vmatpush3.bf16.msra.mxu1 %v1215_v49  ;;  %v1144_v15 = vadd.f32 %v9104_v50, %v986_v43 }
 0x4fb   : > { %v9105_v45 = vpop.f32.mrb[22].mxu1  ;;  %9124 = vmatprep.subr.bf16.mxu1 %v1216_v48  ;;  %v1142_v9 = vadd.f32 %v1123_v7, %v984_v38 }
 0x4fc   : > { %v1126_v58 = vpop.f32.mrb[23].mxu1  ;;  %v1145_v16 = vadd.f32 %v9105_v45, %v987_v40 }
 0x4fd   : > { %v1143_v8 = vadd.f32 %v1126_v58, %v985_v36 }
 0x4fe   : > { %9125 = vmatpush3.bf16.msra.mxu1 %v1216_v48  ;;  %v1218_v26 = vpack.c.bf16 %v1145_v16, %v1144_v15 }
 0x4ff   : > { %v1217_v35 = vpack.c.bf16 %v1143_v8, %v1142_v9  ;;  %v9116_v30 = vpop.f32.mrb[16].mxu0 }
 0x500   : > { %v1180_v24 = vpop.f32.mrb[17].mxu0 }
 0x501   : > { %v9117_v61 = vpop.f32.mrb[18].mxu0  ;;  %9126 = vmatprep.subr.bf16.mxu1 %v1217_v35 }
 0x502   : > { %v1212_v55 = vpack.c.bf16 %v9117_v61, %v9116_v30  ;;  %v1183_v29 = vpop.f32.mrb[19].mxu0  ;;  %9127 = vmatpush3.bf16.msra.mxu1 %v1217_v35 }
 0x503   : > { %v1211_v19 = vpack.c.bf16 %v1183_v29, %v1180_v24  ;;  %9128 = vmatprep.subr.bf16.mxu1 %v1218_v26 }
 0x505   : > { %9130 = vmatprep.mubr.msk.bf16.mxu1 %vm817_vm3, %v1211_v19  ;;  %9138 = vmatprep.subr.bf16.mxu0 %v1211_v19 }
 0x506   : > { %9146 = vmatprep.mubr.msk.bf16.mxu0 %vm817_vm3, %v1211_v19  ;;  %9139 = vmatpush3.bf16.msra.mxu0 %v1211_v19 }
 0x507   : > { %v9120_v36 = vpop.f32.mrb[20].mxu0  ;;  %9129 = vmatpush3.bf16.msra.mxu1 %v1218_v26  ;;  %9140 = vmatprep.subr.bf16.mxu0 %v1212_v55 }
 0x508   : > { %v1196_v40 = vpop.f32.mrb[21].mxu0 }
 0x509   : > { %v9121_v43 = vpop.f32.mrb[22].mxu0 }
 0x50a   : > { %v1214_v38 = vpack.c.bf16 %v9121_v43, %v9120_v36  ;;  %v1199_v47 = vpop.f32.mrb[23].mxu0  ;;  %9131 = vmatmul.mubr.msk.bf16.vlgmr.msra.gmra.mrb[24].mxu1 %vm817_vm3, %v1212_v55  ;;  %9141 = vmatpush3.bf16.msra.mxu0 %v1212_v55 }
 0x50b   : > { %v1213_v30 = vpack.c.bf16 %v1199_v47, %v1196_v40 }
 0x50d   : > { %9134 = vmatprep.mubr.msk.bf16.mxu1 %vm817_vm3, %v1213_v30  ;;  %9142 = vmatprep.subr.bf16.mxu0 %v1213_v30 }
 0x50e   : > { %9143 = vmatpush3.bf16.msra.mxu0 %v1213_v30 }
 0x50f   : > { %9144 = vmatprep.subr.bf16.mxu0 %v1214_v38 }
 0x512   : > { %9135 = vmatmul.mubr.msk.bf16.gmra.mrb[28].mxu1 %vm817_vm3, %v1214_v38  ;;  %9145 = vmatpush3.bf16.msra.mxu0 %v1214_v38 }
 0x515   : > { %9147 = vmatmul.mubr.msk.bf16.vlgmr.msra.gmra.mrb[24].mxu0 %vm817_vm3, %v1212_v55 }
 0x516   : > { %9150 = vmatprep.mubr.msk.bf16.mxu0 %vm817_vm3, %v1213_v30 }
 0x51d   : > { %9151 = vmatmul.mubr.msk.bf16.gmra.mrb[28].mxu0 %vm817_vm3, %v1214_v38 }
 0x5dd   : > { %v9132_v35 = vpop.f32.mrb[24].mxu1 }
 0x5de   : > { %v1265_v37 = vpop.f32.mrb[25].mxu1  ;;  %v11595_v58 = vadd.f32 %v9132_v35, %v1140_v20 }
 0x5df   : > { %v9133_v49 = vpop.f32.mrb[26].mxu1  ;;  %v11589_v50 = vadd.f32 %v1265_v37, %v1138_v3 }
 0x5e0   : > { %v1268_v48 = vpop.f32.mrb[27].mxu1  ;;  %v11591_v7 = vadd.f32 %v9133_v49, %v1141_v14 }
 0x5e1   : > { %v11593_v45 = vadd.f32 %v1268_v48, %v1139_v39 }
 0x5e2   : > { %v1374_v26 = vpack.c.bf16 %v11591_v7, %v11595_v58 }
 0x5e3   : > { %v1373_v24 = vpack.c.bf16 %v11593_v45, %v11589_v50 }
 0x5e5   : > { %v9136_v61 = vpop.f32.mrb[28].mxu1  ;;  %9154 = vmatprep.subr.bf16.mxu1 %v1373_v24 }
 0x5e6   : > { %v1281_v55 = vpop.f32.mrb[29].mxu1  ;;  %9155 = vmatpush3.bf16.msra.mxu1 %v1373_v24  ;;  %v11609_v30 = vadd.f32 %v9136_v61, %v1144_v15  ;;  %v11630_v24 = vld [vmem:[%s11179_s27 + $0x18] sm:$0xff]  ;;  %v11644_v61 = vld [vmem:[%s11179_s27] sm:$0xff] }
 0x5e7   : > { %v9137_v29 = vpop.f32.mrb[30].mxu1  ;;  %9156 = vmatprep.subr.bf16.mxu1 %v1374_v26  ;;  %v11601_v14 = vadd.f32 %v1281_v55, %v1142_v9  ;;  %v11650_v55 = vld [vmem:[%s11179_s27 + $0x60] sm:$0xff] }
 0x5e8   : > { %v1284_v3 = vpop.f32.mrb[31].mxu1  ;;  %v9148_v19 = vpop.f32.mrb[24].mxu0  ;;  %v11605_v36 = vadd.f32 %v9137_v29, %v1145_v16 }
 0x5e9   : > { %v11603_v39 = vadd.f32 %v1284_v3, %v1143_v8  ;;  %v1338_v20 = vpop.f32.mrb[25].mxu0 }
 0x5ea   : > { %v9149_v40 = vpop.f32.mrb[26].mxu0  ;;  %9157 = vmatpush3.bf16.msra.mxu1 %v1374_v26  ;;  %v1376_v9 = vpack.c.bf16 %v11605_v36, %v11609_v30  ;;  %v11633_v26 = vld [vmem:[%s11179_s27 + $0x30] sm:$0xff] }
 0x5eb   : > { %v1375_v43 = vpack.c.bf16 %v11603_v39, %v11601_v14  ;;  %v1370_v38 = vpack.c.bf16 %v9149_v40, %v9148_v19  ;;  %v1341_v47 = vpop.f32.mrb[27].mxu0  ;;  %v11663_v19 = vld [vmem:[%s11179_s27 + $0x78] sm:$0xff] }
 0x5ec   : > { %v1369_v35 = vpack.c.bf16 %v1341_v47, %v1338_v20 }
 0x5ed   : > { %9158 = vmatprep.subr.bf16.mxu1 %v1375_v43 }
 0x5ee   : > { %9159 = vmatpush3.bf16.msra.mxu1 %v1375_v43  ;;  %9162 = vmatprep.mubr.msk.bf16.mxu1 %vm817_vm3, %v1369_v35  ;;  %v11671_v43 = vmul.f32 %v11650_v55, %v11650_v55 }
 0x5ef   : > { %9170 = vmatprep.subr.bf16.mxu0 %v1369_v35  ;;  %9178 = vmatprep.mubr.msk.bf16.mxu0 %vm817_vm3, %v1369_v35 }
 0x5f0   : > { %9160 = vmatprep.subr.bf16.mxu1 %v1376_v9  ;;  %9171 = vmatpush3.bf16.msra.mxu0 %v1369_v35  ;;  %v9152_v16 = vpop.f32.mrb[28].mxu0  ;;  %14205 = vst [vmem:[#allocation71_spill] sm:$0xff] %v11671_v43  ;;  %v11680_v35 = vmul.f32 %v11663_v19, %v11663_v19 }
 0x5f1   : > { %9172 = vmatprep.subr.bf16.mxu0 %v1370_v38  ;;  %v1354_v8 = vpop.f32.mrb[29].mxu0 }
 0x5f2   : > { %v9153_v37 = vpop.f32.mrb[30].mxu0  ;;  %9161 = vmatpush3.bf16.msra.mxu1 %v1376_v9  ;;  %14206 = vst [vmem:[#allocation72_spill] sm:$0xff] %v11680_v35  ;;  %v11683_v9 = vld [vmem:[%s11179_s27 + $0xa8] sm:$0xff] }
 0x5f3   : > { %v1372_v15 = vpack.c.bf16 %v9153_v37, %v9152_v16  ;;  %v1357_v49 = vpop.f32.mrb[31].mxu0  ;;  %v512_v16 = vsel %vm499_vm1, %v11671_v43, 0.0  ;;  %v515_v37 = vsel %vm499_vm1, %v11680_v35, 0.0 }
 0x5f4   : > { %v1371_v48 = vpack.c.bf16 %v1357_v49, %v1354_v8  ;;  %9173 = vmatpush3.bf16.msra.mxu0 %v1370_v38 }
 0x5f5   : > { %9163 = vmatmul.mubr.msk.bf16.vlgmr.msra.gmra.mrb[32].mxu1 %vm817_vm3, %v1370_v38 }
 0x5f6   : > { %9166 = vmatprep.mubr.msk.bf16.mxu1 %vm817_vm3, %v1371_v48  ;;  %9174 = vmatprep.subr.bf16.mxu0 %v1371_v48 }
 0x5f8   : > { %9175 = vmatpush3.bf16.msra.mxu0 %v1371_v48 }
 0x5f9   : > { %9176 = vmatprep.subr.bf16.mxu0 %v1372_v15 }
 0x5fc   : > { %9177 = vmatpush3.bf16.msra.mxu0 %v1372_v15 }
 0x5fd   : > { %9202 = vmatprep.subr.bf16.mxu0 %v11366_v46  ;;  %9167 = vmatmul.mubr.msk.bf16.gmra.mrb[36].mxu1 %vm817_vm3, %v1372_v15 }
 0x5ff   : > { %9179 = vmatmul.mubr.msk.bf16.vlgmr.msra.gmra.mrb[32].mxu0 %vm817_vm3, %v1370_v38  ;;  %v11674_v38 = vld [vmem:[%s11179_s27 + $0x90] sm:$0xff] }
 0x600   : > { %9182 = vmatprep.mubr.msk.bf16.mxu0 %vm817_vm3, %v1371_v48  ;;  %9203 = vmatpush3.bf16.msra.mxu0 %v11366_v46  ;;  %v11637_v46 = vmul.f32 %v11630_v24, %v11630_v24  ;;  %v11689_v8 = vmul.f32 %v11674_v38, %v11674_v38 }
 0x601   : > { %9204 = vmatprep.subr.bf16.mxu0 %v11409_v21 }
 0x602   : > { %14201 = vst [vmem:[#allocation67_spill] sm:$0xff] %v11637_v46  ;;  %v503_v3 = vsel %vm499_vm1, %v11637_v46, 0.0  ;;  %14207 = vst [vmem:[#allocation73_spill] sm:$0xff] %v11689_v8  ;;  %v518_v49 = vsel %vm499_vm1, %v11689_v8, 0.0 }
 0x603   : > { %504 = vadd.xlane.f32.xlu0 %v503_v3 }
 0x604   : > { %9205 = vmatpush3.bf16.msra.mxu0 %v11409_v21  ;;  %v11641_v21 = vmul.f32 %v11633_v26, %v11633_v26 }
 0x605   : > { %9206 = vmatprep.subr.bf16.mxu0 %v11411_v22 }
 0x606   : > { %14202 = vst [vmem:[#allocation68_spill] sm:$0xff] %v11641_v21  ;;  %v506_v40 = vsel %vm499_vm1, %v11641_v21, 0.0 }
 0x607   : > { %9183 = vmatmul.mubr.msk.bf16.gmra.mrb[36].mxu0 %vm817_vm3, %v1372_v15  ;;  %507 = vadd.xlane.f32.xlu0 %v506_v40  ;;  %v11695_v15 = vmul.f32 %v11683_v9, %v11683_v9 }
 0x608   : > { %9207 = vmatpush3.bf16.msra.mxu0 %v11411_v22  ;;  %v11647_v22 = vld [vmem:[%s11179_s27 + $0x48] sm:$0xff] }
 0x609   : > { %9208 = vmatprep.subr.bf16.mxu0 %v11421_v27  ;;  %v11658_v29 = vmul.f32 %v11647_v22, %v11647_v22  ;;  %14208 = vst [vmem:[#allocation74_spill] sm:$0xff] %v11695_v15  ;;  %v521_v48 = vsel %vm499_vm1, %v11695_v15, 0.0 }
 0x60b   : > { %14204 = vst [vmem:[#allocation70_spill] sm:$0xff] %v11658_v29  ;;  %v509_v47 = vsel %vm499_vm1, %v11658_v29, 0.0  ;;  %513 = vadd.xlane.f32.xlu0 %v512_v16 }
 0x60c   : > { %9209 = vmatpush3.bf16.msra.mxu0 %v11421_v27  ;;  %v11654_v27 = vmul.f32 %v11644_v61, %v11644_v61 }
 0x60e   : > { %14203 = vst [vmem:[#allocation69_spill] sm:$0xff] %v11654_v27  ;;  %v500_v20 = vsel %vm499_vm1, %v11654_v27, 0.0 }
 0x60f   : > { %501 = vadd.xlane.f32.xlu1 %v500_v20  ;;  %519 = vadd.xlane.f32.xlu0 %v518_v49 }
 0x613   : > { %510 = vadd.xlane.f32.xlu1 %v509_v47 }
 0x617   : > { %516 = vadd.xlane.f32.xlu1 %v515_v37 }
 0x61b   : > { %522 = vadd.xlane.f32.xlu1 %v521_v48 }
 0x625   : > { %2332 = vrot.lane.b32.xlu0 %v11252_v5, %s10903_s26 }
 0x629   : > { %2338 = vrot.lane.b32.xlu0 %v11256_v6, %s10903_s26  ;;  %v11743_v6 = vld [vmem:[%s11179_s27 + $0x28] sm:$0xff] }
 0x62a   : > { %14209 = vst [vmem:[#allocation75_spill] sm:$0xff] %v11743_v6 }
 0x62c   : > { %2334 = vrot.lane.b32.xlu1 %v11269_v11, %s10903_s26 }
 0x62d   : > { %2342 = vrot.lane.b32.xlu0 %v11280_v17, %s10903_s26 }
 0x630   : > { %2336 = vrot.lane.b32.xlu1 %v11248_v4, %s10903_s26 }
 0x631   : > { %2346 = vrot.lane.b32.xlu0 %v11299_v28, %s10903_s26 }
 0x634   : > { %2340 = vrot.lane.b32.xlu1 %v11284_v18, %s10903_s26 }
 0x638   : > { %2344 = vrot.lane.b32.xlu1 %v11308_v32, %s10903_s26 }
 0x6c8   : > { %v9164_v3 = vpop.f32.mrb[32].mxu1 }
 0x6c9   : > { %v1423_v20 = vpop.f32.mrb[33].mxu1  ;;  %v11727_v48 = vadd.f32 %v9164_v3, %v11595_v58 }
 0x6ca   : > { %v9165_v40 = vpop.f32.mrb[34].mxu1  ;;  %v11718_v16 = vadd.f32 %v1423_v20, %v11589_v50 }
 0x6cb   : > { %v1426_v47 = vpop.f32.mrb[35].mxu1  ;;  %v11721_v37 = vadd.f32 %v9165_v40, %v11591_v7 }
 0x6cc   : > { %v11724_v49 = vadd.f32 %v1426_v47, %v11593_v45 }
 0x6cd   : > { %v1532_v32 = vpack.c.bf16 %v11721_v37, %v11727_v48 }
 0x6ce   : > { %v1531_v28 = vpack.c.bf16 %v11724_v49, %v11718_v16 }
 0x6d0   : > { %v9168_v17 = vpop.f32.mrb[36].mxu1  ;;  %9186 = vmatprep.subr.bf16.mxu1 %v1531_v28 }
 0x6d1   : > { %v1439_v50 = vpop.f32.mrb[37].mxu1  ;;  %9187 = vmatpush3.bf16.msra.mxu1 %v1531_v28  ;;  %v11746_v28 = vld [vmem:[%s11179_s27 + $0x10] sm:$0xff]  ;;  %v11749_v5 = vadd.f32 %v9168_v17, %v11609_v30  ;;  %v11761_v17 = vld [vmem:[%s11179_s27 + $0x40] sm:$0xff] }
 0x6d2   : > { %v9180_v7 = vpop.f32.mrb[32].mxu0  ;;  %v9169_v20 = vpop.f32.mrb[38].mxu1  ;;  %9188 = vmatprep.subr.bf16.mxu1 %v1532_v32  ;;  %v11734_v58 = vadd.f32 %v1439_v50, %v11601_v14  ;;  %14210 = vst [vmem:[#allocation76_spill] sm:$0xff] %v11746_v28  ;;  %v676_v50 = vmul.f32 %v11349_v42, %v11746_v28 }
 0x6d3   : > { %v1496_v45 = vpop.f32.mrb[33].mxu0  ;;  %v1442_v40 = vpop.f32.mrb[39].mxu1  ;;  %v11737_v3 = vadd.f32 %v9169_v20, %v11605_v36 }
 0x6d4   : > { %v11740_v47 = vadd.f32 %v1442_v40, %v11603_v39  ;;  %v9181_v18 = vpop.f32.mrb[34].mxu0  ;;  %v677_v39 = vmul.f32 %v11341_v34, %v11743_v6  ;;  %v678_v34 = vmul.f32 %v11361_v1, %v11761_v17  ;;  %v11774_v40 = vld [vmem:[%s11179_s27 + $0x88] sm:$0xff] }
 0x6d5   : > { %v1528_v4 = vpack.c.bf16 %v9181_v18, %v9180_v7  ;;  %v1499_v11 = vpop.f32.mrb[35].mxu0  ;;  %9189 = vmatpush3.bf16.msra.mxu1 %v1532_v32  ;;  %v1534_v18 = vpack.c.bf16 %v11737_v3, %v11749_v5  ;;  %v11764_v32 = vld [vmem:[%s11179_s27 + $0x58] sm:$0xff]  ;;  %v681_v1 = vmul.f32 %v11396_v13, %v11774_v40  ;;  %v505_v13 = vpop.xlane.xlu0 %504 }
 0x6d6   : > { %v1533_v14 = vpack.c.bf16 %v11740_v47, %v11734_v58  ;;  %v1527_v36 = vpack.c.bf16 %v1499_v11, %v1496_v45  ;;  %v679_v42 = vmul.f32 %v11372_v51, %v11764_v32  ;;  %v696_v20 = vpack.c.bf16 %v677_v39, %v676_v50  ;;  %v11771_v45 = vld [vmem:[%s11179_s27 + $0x70] sm:$0xff]  ;;  %v11782_v39 = vld [vmem:[%s11179_s27 + $0xb8] sm:$0xff]  ;;  %v11786_v50 = vld [vmem:[%s11179_s27 + $0xa0] sm:$0xff] }
 0x6d7   : > { %v680_v6 = vmul.f32 %v11385_v59, %v11771_v45  ;;  %14211 = vst [vmem:[#allocation77_spill] sm:$0xff] %v11782_v39  ;;  %v682_v59 = vmul.f32 %v11402_v25, %v11786_v50  ;;  %10408 = vrsqrt.f32 %v505_v13  ;;  %vm557_vm12 = vcmp.gt.f32.partialorder %v505_v13, 0.0 }
 0x6d8   : > { %9194 = vmatprep.mubr.msk.bf16.mxu1 %vm817_vm3, %v1527_v36  ;;  %9190 = vmatprep.subr.bf16.mxu1 %v1533_v14  ;;  %v697_v51 = vpack.c.bf16 %v679_v42, %v678_v34 }
 0x6d9   : > { %9191 = vmatpush3.bf16.msra.mxu1 %v1533_v14 }
 0x6da   : > { %v9184_v11 = vpop.f32.mrb[36].mxu0  ;;  %9192 = vmatprep.subr.bf16.mxu1 %v1534_v18 }
 0x6db   : > { %v1512_v30 = vpop.f32.mrb[37].mxu0 }
 0x6dc   : > { %v9185_v7 = vpop.f32.mrb[38].mxu0 }
 0x6dd   : > { %v1530_v36 = vpack.c.bf16 %v9185_v7, %v9184_v11  ;;  %v1515_v28 = vpop.f32.mrb[39].mxu0  ;;  %9193 = vmatpush3.bf16.msra.mxu1 %v1534_v18  ;;  %v698_v18 = vpack.c.bf16 %v681_v1, %v680_v6  ;;  %v11795_v11 = vpop.xlane.xlu0 %507 }
 0x6de   : > { %v1529_v14 = vpack.c.bf16 %v1515_v28, %v1512_v30  ;;  %9218 = vmatprep.subr.bf16.mxu1 %v696_v20  ;;  %v683_v28 = vmul.f32 %v11413_v23, %v11782_v39  ;;  %v502_v30 = vpop.xlane.xlu1 %501  ;;  %vm558_vm14 = vcmp.gt.f32.partialorder %v11795_v11, 0.0 }
 0x6df   : > { %10410 = vrsqrt.f32 %v502_v30  ;;  %vm556_vm13 = vcmp.gt.f32.partialorder %v502_v30, 0.0 }
 0x6e0   : > { %9195 = vmatmul.mubr.msk.bf16.vlgmr.msra.gmra.mrb[40].mxu1 %vm817_vm3, %v1528_v4  ;;  %v699_v4 = vpack.c.bf16 %v683_v28, %v682_v59  ;;  %10412 = vrsqrt.f32 %v11795_v11 }
 0x6e1   : > { %9198 = vmatprep.mubr.msk.bf16.mxu1 %vm817_vm3, %v1529_v14  ;;  %9219 = vmatpush3.bf16.msra.mxu1 %v696_v20  ;;  %v11797_v23 = vpop.xlane.xlu0 %513 }
 0x6e2   : > { %9220 = vmatprep.subr.bf16.mxu1 %v697_v51  ;;  %v11801_v34 = vpop.xlane.xlu1 %510  ;;  %10414 = vrsqrt.f32 %v11797_v23  ;;  %vm560_vm0 = vcmp.gt.f32.partialorder %v11797_v23, 0.0 }
 0x6e3   : > { %10416 = vrsqrt.f32 %v11801_v34  ;;  %vm559_vm15 = vcmp.gt.f32.partialorder %v11801_v34, 0.0 }
 0x6e5   : > { %9221 = vmatpush3.bf16.msra.mxu1 %v697_v51  ;;  %v11799_v6 = vpop.xlane.xlu0 %519 }
 0x6e6   : > { %9222 = vmatprep.subr.bf16.mxu1 %v698_v18  ;;  %v11803_v42 = vpop.xlane.xlu1 %516  ;;  %vm562_vm4 = vcmp.gt.f32.partialorder %v11799_v6, 0.0 }
 0x6e7   : > { %10418 = vrsqrt.f32 %v11803_v42  ;;  %vm561_vm2 = vcmp.gt.f32.partialorder %v11803_v42, 0.0 }
 0x6e8   : > { %9199 = vmatmul.mubr.msk.bf16.gmra.mrb[44].mxu1 %vm817_vm3, %v1530_v36  ;;  %10420 = vrsqrt.f32 %v11799_v6 }
 0x6e9   : > { %9223 = vmatpush3.bf16.msra.mxu1 %v698_v18  ;;  %v2333_v25 = vpop.permute.xlu0 %2332 }
 0x6ea   : > { %9224 = vmatprep.subr.bf16.mxu1 %v699_v4  ;;  %v2356_v7 = vsel %vm499_vm1, %v2333_v25, 0.0  ;;  %v11806_v36 = vpop.xlane.xlu1 %522 }
 0x6eb   : > { %2357 = vadd.xlane.f32.xlu1 %v2356_v7  ;;  %10422 = vrsqrt.f32 %v11806_v36  ;;  %vm563_vm5 = vcmp.gt.f32.partialorder %v11806_v36, 0.0 }
 0x6ed   : > { %9225 = vmatpush3.bf16.msra.mxu1 %v699_v4  ;;  %v2339_v20 = vpop.permute.xlu0 %2338 }
 0x6ee   : > { %10168 = vmatprep.subr.msk.bf16.mxu1 %vm499_vm1, %v11347_v41  ;;  %v2365_v14 = vsel %vm499_vm1, %v2339_v20, 0.0  ;;  %v2335_v51 = vpop.permute.xlu1 %2334 }
 0x6ef   : > { %2366 = vadd.xlane.f32.xlu1 %v2365_v14  ;;  %v2359_v18 = vsel %vm499_vm1, %v2335_v51, 0.0  ;;  %v10904_v51 = vmov 1  }
 0x6f0   : > { %2360 = vadd.xlane.f32.xlu0 %v2359_v18  ;;  %10355 = vset.pattern.permute.xlu1 %v10904_v51 }
 0x6f1   : > { %v2343_v1 = vpop.permute.xlu0 %2342  ;;  %10354 = vset.pattern.permute.xlu0 %v10904_v51 }
 0x6f2   : > { %v2371_v28 = vsel %vm499_vm1, %v2343_v1, 0.0  ;;  %v2337_v4 = vpop.permute.xlu1 %2336 }
 0x6f3   : > { %2372 = vadd.xlane.f32.xlu1 %v2371_v28  ;;  %v2362_v25 = vsel %vm499_vm1, %v2337_v4, 0.0  ;;  %v11827_v28 = vld [vmem:[%s11202_s3 + $0x8] sm:$0xff] }
 0x6f4   : > { %2363 = vadd.xlane.f32.xlu0 %v2362_v25 }
 0x6f5   : > { %v2347_v59 = vpop.permute.xlu0 %2346 }
 0x6f6   : > { %v2377_v39 = vsel %vm499_vm1, %v2347_v59, 0.0  ;;  %v2341_v7 = vpop.permute.xlu1 %2340  ;;  %v10409_v59 = vpop.eup %10408 }
 0x6f7   : > { %2378 = vadd.xlane.f32.xlu1 %v2377_v39  ;;  %v2368_v20 = vsel %vm499_vm1, %v2341_v7, 0.0  ;;  %v11824_v39 = vld [vmem:[%s11202_s3] sm:$0xff]  ;;  %v10411_v4 = vpop.eup %10410 }
 0x6f8   : > { %2369 = vadd.xlane.f32.xlu0 %v2368_v20  ;;  %v11831_v18 = vpack.c.bf16 %v11827_v28, %v11824_v39 }
 0x6fa   : > { %v2345_v14 = vpop.permute.xlu1 %2344  ;;  %10166 = vmatprep.subr.msk.bf16.mxu0 %vm499_vm1, %v11831_v18 }
 0x6fb   : > { %v2374_v1 = vsel %vm499_vm1, %v2345_v14, 0.0 }
 0x6fc   : > { %2375 = vadd.xlane.f32.xlu0 %v2374_v1  ;;  %v573_v1 = vsel %vm557_vm12, %v10409_v59, 0.0 }
 0x6fd   : > { %v581_v13 = vmul.f32 %v573_v1, %v11630_v24 }
 0x708   : > { %2457 = vperm.xlu1 %10355, %v11317_v53  }
 0x70c   : > { %2461 = vperm.xlu1 %10355, %v11320_v56  }
 0x710   : > { %2465 = vperm.xlu1 %10355, %v11325_v60   ;;  %v11843_v60 = vld [vmem:[%s11202_s3 + $0x18] sm:$0xff] }
 0x712   : > { %2453 = vperm.xlu0 %10354, %v11322_v57  }
 0x714   : > { %2469 = vperm.xlu1 %10355, %v11329_v62   ;;  %v11840_v62 = vld [vmem:[%s11202_s3 + $0x10] sm:$0xff] }
 0x718   : > { %2473 = vperm.xlu1 %10355, %v11332_v63  }
 0x71c   : > { %2477 = vperm.xlu1 %10355, %v11335_v0   ;;  %v572_v0 = vsel %vm556_vm13, %v10411_v4, 0.0 }
 0x71d   : > { %v580_v57 = vmul.f32 %v572_v0, %v11644_v61 }
 0x720   : > { %2481 = vperm.xlu1 %10355, %v11338_v10  }
 0x7b3   : > { %v9196_v25 = vpop.f32.mrb[40].mxu1 }
 0x7b4   : > { %v1581_v7 = vpop.f32.mrb[41].mxu1  ;;  %v1614_v14 = vadd.f32 %v9196_v25, %v11727_v48  ;;  %v11849_v48 = vsel %vm499_vm1, %v11831_v18, 0 }
 0x7b5   : > { %v9197_v20 = vpop.f32.mrb[42].mxu1  ;;  %v1612_v63 = vadd.f32 %v1581_v7, %v11718_v16 }
 0x7b6   : > { %v1615_v51 = vadd.f32 %v9197_v20, %v11721_v37  ;;  %v1584_v10 = vpop.f32.mrb[43].mxu1  ;;  %v11853_v37 = vpack.c.bf16 %v11843_v60, %v11840_v62 }
 0x7b7   : > { %v1613_v53 = vadd.f32 %v1584_v10, %v11724_v49 }
 0x7b8   : > { %v1621_v56 = vpack.c.bf16 %v1615_v51, %v1614_v14  ;;  %v14212_v14 = vld [vmem:[#allocation42_spill] sm:$0xff] }
 0x7b9   : > { %v1620_v30 = vpack.c.bf16 %v1613_v53, %v1612_v63  ;;  %v589_v53 = vmul.f32 0.17677669, %v581_v13  ;;  %v588_v63 = vmul.f32 0.17677669, %v580_v57 }
 0x7bb   : > { %v9200_v16 = vpop.f32.mrb[44].mxu1  ;;  %9210 = vmatprep.mubr.msk.bf16.mxu0 %vm817_vm3, %v1620_v30  ;;  %9226 = vmatprep.mubr.msk.bf16.mxu1 %vm817_vm3, %v1620_v30  ;;  %v11899_v30 = vpop.xlane.xlu1 %2357 }
 0x7bc   : > { %v1597_v10 = vpop.f32.mrb[45].mxu1  ;;  %9211 = vmatmul.mubr.msk.bf16.vlgmr.msra.gmra.mrb[40].mxu0 %vm817_vm3, %v1621_v56  ;;  %9227 = vmatmul.mubr.msk.bf16.vlgmr.msra.gmra.mrb[48].mxu1 %vm817_vm3, %v1621_v56  ;;  %v1618_v24 = vadd.f32 %v9200_v16, %v11749_v5  ;;  %v11873_v5 = vpack.c.bf16 %v589_v53, %v588_v63  ;;  %v14213_v63 = vld [vmem:[#allocation43_spill] sm:$0xff]  ;;  %vm2420_vm11 = vcmp.gt.f32.partialorder %v11899_v30, 0.0 }
 0x7bd   : > { %9247 = vmatpush3.bf16.xpose.msra.mxu1 %v11359_v2  ;;  %v9201_v0 = vpop.f32.mrb[46].mxu1  ;;  %9235 = vmatpush3.bf16.xpose.msra.mxu0 %v11849_v48  ;;  %v1616_v56 = vadd.f32 %v1597_v10, %v11734_v58  ;;  %v10413_v58 = vpop.eup %10412 }
 0x7be   : > { %v1619_v61 = vadd.f32 %v9201_v0, %v11737_v3  ;;  %10169 = vmatprep.subr.msk.bf16.mxu1 %vm499_vm1, %v11352_v44  ;;  %v1600_v49 = vpop.f32.mrb[47].mxu1  ;;  %10167 = vmatprep.subr.msk.bf16.mxu0 %vm499_vm1, %v11853_v37  ;;  %v10415_v3 = vpop.eup %10414 }
 0x7bf   : > { %v1617_v57 = vadd.f32 %v1600_v49, %v11740_v47  ;;  %v10417_v47 = vpop.eup %10416  ;;  %v576_v7 = vsel %vm560_vm0, %v10415_v3, 0.0  ;;  %v2367_v6 = vpop.xlane.xlu1 %2366 }
 0x7c0   : > { %v1623_v2 = vpack.c.bf16 %v1619_v61, %v1618_v24  ;;  %v10419_v4 = vpop.eup %10418  ;;  %v575_v25 = vsel %vm559_vm15, %v10417_v47, 0.0  ;;  %v584_v34 = vmul.f32 %v576_v7, %v11650_v55  ;;  %10424 = vrsqrt.f32 %v2367_v6  ;;  %v11911_v61 = vpop.xlane.xlu0 %2360  ;;  %v10584_v47 = vld [vmem:[%s11179_s27 + $0x50] sm:$0xff]  ;;  %v10585_v7 = vld [vmem:[%s11179_s27 + $0x38] sm:$0xff] }
 0x7c1   : > { %v1622_v59 = vpack.c.bf16 %v1617_v57, %v1616_v56  ;;  %v577_v20 = vsel %vm561_vm2, %v10419_v4, 0.0  ;;  %v583_v11 = vmul.f32 %v575_v25, %v11647_v22  ;;  %v10421_v51 = vpop.eup %10420  ;;  %vm2423_vm6 = vcmp.gt.f32.partialorder %v2367_v6, 0.0 }
 0x7c2   : > { %v585_v23 = vmul.f32 %v577_v20, %v11663_v19  ;;  %v10423_v13 = vpop.eup %10422  ;;  %v592_v16 = vmul.f32 0.17677669, %v584_v34  ;;  %v578_v10 = vsel %vm562_vm4, %v10421_v51, 0.0  ;;  %v10586_v34 = vld [vmem:[%s11179_s27 + $0xb0] sm:$0xff]  ;;  %vm2421_vm10 = vcmp.gt.f32.partialorder %v11911_v61, 0.0 }
 0x7c3   : > { %9214 = vmatprep.mubr.msk.bf16.mxu0 %vm817_vm3, %v1622_v59  ;;  %9230 = vmatprep.mubr.msk.bf16.mxu1 %vm817_vm3, %v1622_v59  ;;  %v591_v42 = vmul.f32 0.17677669, %v583_v11  ;;  %v586_v22 = vmul.f32 %v578_v10, %v11674_v38  ;;  %v11913_v49 = vpop.xlane.xlu1 %2372  ;;  %v10587_v10 = vld [vmem:[%s11179_s27 + $0x98] sm:$0xff] }
 0x7c4   : > { %9215 = vmatmul.mubr.msk.bf16.gmra.mrb[44].mxu0 %vm817_vm3, %v1623_v2  ;;  %9231 = vmatmul.mubr.msk.bf16.gmra.mrb[52].mxu1 %vm817_vm3, %v1623_v2  ;;  %v593_v53 = vmul.f32 0.17677669, %v585_v23  ;;  %v2364_v38 = vpop.xlane.xlu0 %2363  ;;  %vm2425_vm12 = vcmp.gt.f32.partialorder %v11913_v49, 0.0 }
 0x7c5   : > { %9249 = vmatpush3.bf16.xpose.msra.mxu1 %v11378_v54  ;;  %9254 = vmatprep.mubr.msk.bf16.mxu1 %vm499_vm1, %v11873_v5  ;;  %v574_v54 = vsel %vm558_vm14, %v10413_v58, 0.0  ;;  %v594_v0 = vmul.f32 0.17677669, %v586_v22  ;;  %10426 = vrsqrt.f32 %v2364_v38  ;;  %vm2422_vm7 = vcmp.gt.f32.partialorder %v2364_v38, 0.0 }
 0x7c6   : > { %10170 = vmatprep.subr.msk.bf16.mxu1 %vm499_vm1, %v11374_v52  ;;  %v582_v1 = vmul.f32 %v574_v54, %v11633_v26  ;;  %v579_v26 = vsel %vm563_vm5, %v10423_v13, 0.0  ;;  %v11907_v36 = vpack.c.bf16 %v593_v53, %v592_v16  ;;  %v11968_v38 = vsel %vm499_vm1, %v11853_v37, 0 }
 0x7c7   : > { %v587_v19 = vmul.f32 %v579_v26, %v11683_v9  ;;  %v2379_v9 = vpop.xlane.xlu1 %2378  ;;  %9237 = vmatpush3.bf16.xpose.msra.mxu0 %v11968_v38  ;;  %vm364_vm14 = vcmp.ge.s32.totalorder %v11428_v31, %v11430_v33 }
 0x7c8   : > { %10428 = vrsqrt.f32 %v2379_v9  ;;  %v11923_v57 = vpop.xlane.xlu0 %2369  ;;  %vm2427_vm8 = vcmp.gt.f32.partialorder %v2379_v9, 0.0 }
 0x7c9   : > { %v595_v24 = vmul.f32 0.17677669, %v587_v19  ;;  %vm2424_vm13 = vcmp.gt.f32.partialorder %v11923_v57, 0.0 }
 0x7cb   : > { %v11919_v56 = vpack.c.bf16 %v595_v24, %v594_v0  ;;  %v11925_v2 = vpop.permute.xlu1 %2457 }
 0x7cc   : > { %v2376_v59 = vpop.xlane.xlu0 %2375 }
 0x7cd   : > { %9251 = vmatpush3.bf16.xpose.msra.mxu1 %v11391_v12  ;;  %v590_v12 = vmul.f32 0.17677669, %v582_v1  ;;  %10430 = vrsqrt.f32 %v2376_v59  ;;  %vm2426_vm9 = vcmp.gt.f32.partialorder %v2376_v59, 0.0 }
 0x7ce   : > { %10171 = vmatprep.subr.msk.bf16.mxu1 %vm499_vm1, %v14212_v14  ;;  %10432 = vrsqrt.f32 %v11899_v30 }
 0x7cf   : > { %v11904_v55 = vpack.c.bf16 %v591_v42, %v590_v12  ;;  %v11931_v58 = vpop.permute.xlu1 %2461  ;;  %10434 = vrsqrt.f32 %v11911_v61  ;;  %v10589_v61 = vld [vmem:[%s11179_s27 + $0x68] sm:$0xff] }
 0x7d0   : > { %10436 = vrsqrt.f32 %v11913_v49 }
 0x7d1   : > { %10438 = vrsqrt.f32 %v11923_v57  ;;  %v11989_v57 = vpop.permute.xlu0 %2453 }
 0x7d3   : > { %v11935_v25 = vpop.permute.xlu1 %2465 }
 0x7d5   : > { %9253 = vmatpush3.bf16.xpose.msra.mxu1 %v14213_v63 }
 0x7d6   : > { %9290 = vmatprep.subr.bf16.mxu1 %v11347_v41 }
 0x7d7   : > { %v11938_v51 = vpop.permute.xlu1 %2469 }
 0x7db   : > { %v11942_v12 = vpop.permute.xlu1 %2473 }
 0x7dc   : > { %9255 = vmatmul.mubr.msk.bf16.vlgmr.msra.gmra.mrb[56].mxu1 %vm499_vm1, %v11904_v55 }
 0x7dd   : > { %9291 = vmatpush3.bf16.msra.mxu1 %v11347_v41  ;;  %9258 = vmatprep.mubr.msk.bf16.mxu1 %vm499_vm1, %v11907_v36  ;;  %v10425_v41 = vpop.eup %10424 }
 0x7de   : > { %9292 = vmatprep.subr.bf16.mxu1 %v11352_v44  ;;  %v10427_v3 = vpop.eup %10426 }
 0x7df   : > { %v2438_v54 = vsel %vm2422_vm7, %v10427_v3, 0.0  ;;  %v11947_v63 = vpop.permute.xlu1 %2477 }
 0x7e0   : > { %v2446_v20 = vmul.f32 %v10585_v7, %v2438_v54 }
 0x7e1   : > { %9293 = vmatpush3.bf16.msra.mxu1 %v11352_v44  ;;  %v2439_v44 = vsel %vm2423_vm6, %v10425_v41, 0.0 }
 0x7e2   : > { %9294 = vmatprep.subr.bf16.mxu1 %v11374_v52  ;;  %v2447_v4 = vmul.f32 %v10584_v47, %v2439_v44  ;;  %v2486_v42 = vmul.f32 %v11931_v58, %v2446_v20 }
 0x7e3   : > { %v11951_v6 = vpop.permute.xlu1 %2481 }
 0x7e4   : > { %9259 = vmatmul.mubr.msk.bf16.gmra.mrb[60].mxu1 %vm499_vm1, %v11919_v56  ;;  %v2505_v1 = vpack.c.bf16 %v2447_v4, %v2446_v20  ;;  %v2487_v16 = vmul.f32 %v11935_v25, %v2447_v4 }
 0x7e5   : > { %9295 = vmatpush3.bf16.msra.mxu1 %v11374_v52  ;;  %v10429_v52 = vpop.eup %10428 }
 0x7e6   : > { %9296 = vmatprep.subr.bf16.mxu1 %v14212_v14  ;;  %v2443_v11 = vsel %vm2427_vm8, %v10429_v52, 0.0  ;;  %2534 = vrot.lane.b32.xlu0 %v2505_v1, %s10903_s26  ;;  %v2509_v22 = vpack.c.bf16 %v2487_v16, %v2486_v42  ;;  %v10588_v52 = vld [vmem:[%s11179_s27 + $0x20] sm:$0xff] }
 0x7e7   : > { %v2451_v23 = vmul.f32 %v10586_v34, %v2443_v11  ;;  %v10590_v1 = vld [vmem:[%s11179_s27 + $0x80] sm:$0xff]  ;;  %v10591_v11 = vld [vmem:[%s11179_s27 + $0x8] sm:$0xff] }
 0x7e9   : > { %9297 = vmatpush3.bf16.msra.mxu1 %v14212_v14  ;;  %v10431_v14 = vpop.eup %10430  ;;  %v2491_v0 = vmul.f32 %v11951_v6, %v2451_v23 }
 0x7ea   : > { %v2442_v13 = vsel %vm2426_vm9, %v10431_v14, 0.0  ;;  %v10433_v9 = vpop.eup %10432 }
 0x7eb   : > { %v2450_v53 = vmul.f32 %v10587_v10, %v2442_v13  ;;  %v10435_v41 = vpop.eup %10434  ;;  %v2436_v47 = vsel %vm2420_vm11, %v10433_v9, 0.0 }
 0x7ec   : > { %v10437_v44 = vpop.eup %10436  ;;  %v2437_v3 = vsel %vm2421_vm10, %v10435_v41, 0.0  ;;  %v2444_v49 = vmul.f32 %v10591_v11, %v2436_v47 }
 0x7ed   : > { %v2507_v26 = vpack.c.bf16 %v2451_v23, %v2450_v53  ;;  %v2490_v19 = vmul.f32 %v11947_v63, %v2450_v53  ;;  %v10439_v59 = vpop.eup %10438  ;;  %v2441_v4 = vsel %vm2425_vm12, %v10437_v44, 0.0  ;;  %v2445_v7 = vmul.f32 %v10588_v52, %v2437_v3 }
 0x7ee   : > { %v2440_v54 = vsel %vm2424_vm13, %v10439_v59, 0.0  ;;  %v2449_v30 = vmul.f32 %v10590_v1, %v2441_v4  ;;  %v2484_v23 = vmul.f32 %v11989_v57, %v2444_v49 }
 0x7ef   : > { %2538 = vrot.lane.b32.xlu0 %v2507_v26, %s10903_s26  ;;  %v2511_v24 = vpack.c.bf16 %v2491_v0, %v2490_v19  ;;  %v2448_v20 = vmul.f32 %v10589_v61, %v2440_v54  ;;  %v2504_v14 = vpack.c.bf16 %v2445_v7, %v2444_v49  ;;  %v2485_v34 = vmul.f32 %v11925_v2, %v2445_v7 }
 0x7f0   : > { %v2489_v16 = vmul.f32 %v11942_v12, %v2449_v30 }
 0x7f1   : > { %2532 = vrot.lane.b32.xlu1 %v2504_v14, %s10903_s26  ;;  %v2506_v13 = vpack.c.bf16 %v2449_v30, %v2448_v20  ;;  %v2488_v42 = vmul.f32 %v11938_v51, %v2448_v20  ;;  %v2508_v10 = vpack.c.bf16 %v2485_v34, %v2484_v23 }
 0x7f3   : > { %2522 = vrot.lane.b32.xlu0 %v2509_v22, %s10903_s26  ;;  %v2510_v53 = vpack.c.bf16 %v2489_v16, %v2488_v42 }
 0x7f5   : > { %2536 = vrot.lane.b32.xlu1 %v2506_v13, %s10903_s26 }
 0x7f7   : > { %2526 = vrot.lane.b32.xlu0 %v2511_v24, %s10903_s26 }
 0x7f9   : > { %2520 = vrot.lane.b32.xlu1 %v2508_v10, %s10903_s26 }
 0x7fb   : > { %2276 = vrot.lane.b32.xlu0 %v11654_v27, %s10903_s26 }
 0x7fd   : > { %2524 = vrot.lane.b32.xlu1 %v2510_v53, %s10903_s26 }
 0x7ff   : > { %2278 = vrot.lane.b32.xlu0 %v11637_v46, %s10903_s26 }
 0x803   : > { %2280 = vrot.lane.b32.xlu0 %v11641_v21, %s10903_s26 }
 0x807   : > { %2282 = vrot.lane.b32.xlu0 %v11658_v29, %s10903_s26 }
 0x80b   : > { %2284 = vrot.lane.b32.xlu0 %v11671_v43, %s10903_s26 }
 0x80f   : > { %2286 = vrot.lane.b32.xlu0 %v11680_v35, %s10903_s26 }
 0x813   : > { %2288 = vrot.lane.b32.xlu0 %v11689_v8, %s10903_s26 }
 0x817   : > { %2290 = vrot.lane.b32.xlu0 %v11695_v15, %s10903_s26 }
 0x858   : > { %v11999_v26 = vpop.permute.xlu0 %2534 }
 0x861   : > { %v12001_v22 = vpop.permute.xlu0 %2538 }
 0x865   : > { %v12003_v19 = vpop.permute.xlu0 %2522 }
 0x869   : > { %v12005_v0 = vpop.permute.xlu0 %2526 }
 0x86d   : > { %v2277_v24 = vpop.permute.xlu0 %2276 }
 0x86e   : > { %v2300_v9 = vsel %vm499_vm1, %v2277_v24, 0.0 }
 0x86f   : > { %2301 = vadd.xlane.f32.xlu0 %v2300_v9 }
 0x871   : > { %v12008_v41 = vpop.permute.xlu0 %2278 }
 0x875   : > { %v12010_v44 = vpop.permute.xlu0 %2280 }
 0x879   : > { %v2283_v59 = vpop.permute.xlu0 %2282 }
 0x87a   : > { %v2309_v3 = vsel %vm499_vm1, %v2283_v59, 0.0 }
 0x87b   : > { %2310 = vadd.xlane.f32.xlu0 %v2309_v3 }
 0x87d   : > { %v12013_v47 = vpop.permute.xlu0 %2284 }
 0x881   : > { %v2287_v4 = vpop.permute.xlu0 %2286 }
 0x882   : > { %v2315_v54 = vsel %vm499_vm1, %v2287_v4, 0.0 }
 0x883   : > { %2316 = vadd.xlane.f32.xlu0 %v2315_v54 }
 0x885   : > { %v12025_v23 = vpop.permute.xlu0 %2288 }
 0x889   : > { %v2291_v54 = vpop.permute.xlu0 %2290 }
 0x88f   : > { %v9212_v52 = vpop.f32.mrb[40].mxu0  ;;  %v12016_v7 = vpop.f32.mrb[48].mxu1 }
 0x890   : > { %v1670_v61 = vpop.f32.mrb[41].mxu0  ;;  %v12018_v20 = vpop.f32.mrb[49].mxu1 }
 0x891   : > { %v9213_v1 = vpop.f32.mrb[42].mxu0  ;;  %v12020_v30 = vpop.f32.mrb[50].mxu1 }
 0x892   : > { %v1773_v11 = vpack.c.bf16 %v9213_v1, %v9212_v52  ;;  %v1673_v49 = vpop.f32.mrb[43].mxu0  ;;  %v12022_v14 = vpop.f32.mrb[51].mxu1  ;;  %v2321_v52 = vsel %vm499_vm1, %v2291_v54, 0.0  ;;  %v2495_v1 = vmul.f32 %v11935_v25, %v11764_v32 }
 0x893   : > { %v1772_v34 = vpack.c.bf16 %v1673_v49, %v1670_v61  ;;  %2322 = vadd.xlane.f32.xlu0 %v2321_v52  ;;  %v2494_v61 = vmul.f32 %v11931_v58, %v11761_v17  ;;  %v14215_v49 = vld [vmem:[#allocation45_spill] sm:$0xff] }
 0x894   : > { %vm365_vm0 = vcmp.ge.s32.totalorder %v14215_v49, %v11430_v33 }
 0x895   : > { %9238 = vmatprep.mubr.msk.bf16.mxu0 %vm499_vm1, %v1772_v34  ;;  %v14216_v34 = vmov 0.0  }
 0x896   : > { %9239 = vmatmul.mubr.msk.bf16.vlgmr.msra.gmra.mrb[48].mxu0 %vm499_vm1, %v1773_v11  ;;  %v14214_v11 = vld [vmem:[#allocation44_spill] sm:$0xff]  ;;  %v12058_v58 = vsel %vm365_vm0, 1.0, %v14216_v34 }
 0x897   : > { %v9216_v13 = vpop.f32.mrb[44].mxu0  ;;  %v12028_v42 = vpop.f32.mrb[52].mxu1  ;;  %vm362_vm15 = vcmp.ge.s32.totalorder %v14214_v11, %v11430_v33  ;;  %14220 = vst [vmem:[#allocation44_spill] sm:$0xff] %v12058_v58  ;;  %v14222_v11 = vld [vmem:[#allocation49_spill] sm:$0xff] }
 0x898   : > { %v1686_v16 = vpop.f32.mrb[45].mxu0  ;;  %v12030_v10 = vpop.f32.mrb[53].mxu1  ;;  %v12055_v31 = vsel %vm362_vm15, 1.0, %v14216_v34  ;;  %vm368_vm4 = vcmp.ge.s32.totalorder %v14222_v11, %v11430_v33 }
 0x899   : > { %v9217_v53 = vpop.f32.mrb[46].mxu0  ;;  %v12032_v24 = vpop.f32.mrb[54].mxu1  ;;  %14219 = vst [vmem:[#allocation43_spill] sm:$0xff] %v12055_v31 }
 0x89a   : > { %v1775_v9 = vpack.c.bf16 %v9217_v53, %v9216_v13  ;;  %v1689_v59 = vpop.f32.mrb[47].mxu0  ;;  %v12034_v3 = vpop.f32.mrb[55].mxu1  ;;  %v12050_v13 = vsel %vm364_vm14, 1.0, %v14216_v34  ;;  %v2513_v53 = vpack.c.bf16 %v2495_v1, %v2494_v61  ;;  %v14223_v1 = vld [vmem:[#allocation51_spill] sm:$0xff] }
 0x89b   : > { %v1774_v4 = vpack.c.bf16 %v1689_v59, %v1686_v16  ;;  %14217 = vst [vmem:[#allocation42_spill] sm:$0xff] %v12050_v13  ;;  %v14218_v16 = vld [vmem:[#allocation46_spill] sm:$0xff]  ;;  %vm366_vm5 = vcmp.ge.s32.totalorder %v14223_v1, %v11430_v33 }
 0x89c   : > { %vm363_vm2 = vcmp.ge.s32.totalorder %v14218_v16, %v11430_v33  ;;  %v14224_v16 = vld [vmem:[#allocation53_spill] sm:$0xff]  ;;  %v12083_v11 = vsel %vm366_vm5, 1.0, %v14216_v34 }
 0x89d   : > { %9242 = vmatprep.mubr.msk.bf16.mxu0 %vm499_vm1, %v1774_v4  ;;  %vm369_vm6 = vcmp.ge.s32.totalorder %v14224_v16, %v11430_v33  ;;  %14227 = vst [vmem:[#allocation49_spill] sm:$0xff] %v12083_v11 }
 0x89e   : > { %9243 = vmatmul.mubr.msk.bf16.gmra.mrb[52].mxu0 %vm499_vm1, %v1775_v9  ;;  %v12064_v9 = vsel %vm363_vm2, 1.0, %v14216_v34 }
 0x89f   : > { %14221 = vst [vmem:[#allocation45_spill] sm:$0xff] %v12064_v9 }
 0x8a9   : > { %3550 = vrot.lane.b32.xlu0 %v2513_v53, %s10903_s26 }
 0x8af   : > { %v9256_v17 = vpop.f32.mrb[56].mxu1 }
 0x8b0   : > { %v12061_v32 = vmul.f32 %v9256_v17, %v12050_v13  ;;  %v1913_v25 = vpop.f32.mrb[57].mxu1 }
 0x8b1   : > { %v1944_v59 = vmul.f32 %v12055_v31, %v1913_v25  ;;  %v9257_v4 = vpop.f32.mrb[58].mxu1  ;;  %v12078_v25 = vsel %vm368_vm4, 1.0, %v14216_v34 }
 0x8b2   : > { %v1947_v54 = vmul.f32 %v9257_v4, %v12058_v58  ;;  %v1916_v52 = vpop.f32.mrb[59].mxu1  ;;  %14225 = vst [vmem:[#allocation46_spill] sm:$0xff] %v12078_v25  ;;  %v14226_v4 = vld [vmem:[#allocation54_spill] sm:$0xff] }
 0x8b3   : > { %v1945_v61 = vmul.f32 %v12064_v9, %v1916_v52  ;;  %vm367_vm7 = vcmp.ge.s32.totalorder %v14226_v4, %v11430_v33  ;;  %v12087_v52 = vsel %vm369_vm6, 1.0, %v14216_v34 }
 0x8b4   : > { %v1953_v49 = vpack.c.bf16 %v1947_v54, %v12061_v32 }
 0x8b5   : > { %v1952_v17 = vpack.c.bf16 %v1945_v61, %v1944_v59  ;;  %v12091_v59 = vsel %vm367_vm7, 1.0, %v14216_v34 }
 0x8b7   : > { %v9260_v53 = vpop.f32.mrb[60].mxu1  ;;  %9270 = vmatprep.mubr.msk.bf16.mxu0 %vm817_vm3, %v1952_v17 }
 0x8b8   : > { %v1950_v32 = vmul.f32 %v9260_v53, %v12078_v25  ;;  %v1929_v54 = vpop.f32.mrb[61].mxu1 }
 0x8b9   : > { %v1948_v61 = vmul.f32 %v12083_v11, %v1929_v54  ;;  %v9261_v1 = vpop.f32.mrb[62].mxu1 }
 0x8ba   : > { %v1951_v33 = vmul.f32 %v9261_v1, %v12087_v52  ;;  %v1932_v16 = vpop.f32.mrb[63].mxu1 }
 0x8bb   : > { %v1949_v4 = vmul.f32 %v12091_v59, %v1932_v16 }
 0x8bc   : > { %v1955_v9 = vpack.c.bf16 %v1951_v33, %v1950_v32 }
 0x8bd   : > { %v1954_v58 = vpack.c.bf16 %v1949_v4, %v1948_v61 }
 0x969   : > { %v9240_v17 = vpop.f32.mrb[48].mxu0 }
 0x96a   : > { %v1861_v31 = vsub.f32 %v12016_v7, %v9240_v17  ;;  %v1828_v13 = vpop.f32.mrb[49].mxu0 }
 0x96b   : > { %v1859_v53 = vsub.f32 %v12018_v20, %v1828_v13  ;;  %v9241_v25 = vpop.f32.mrb[50].mxu0 }
 0x96c   : > { %v1862_v34 = vsub.f32 %v12020_v30, %v9241_v25  ;;  %v1831_v15 = vpop.f32.mrb[51].mxu0 }
 0x96d   : > { %v1860_v54 = vsub.f32 %v12022_v14, %v1831_v15 }
 0x96e   : > { %v1957_v11 = vpack.c.bf16 %v1862_v34, %v1861_v31 }
 0x96f   : > { %v1956_v8 = vpack.c.bf16 %v1860_v54, %v1859_v53  ;;  %v14239_v53 = vld [vmem:[#allocation47_spill] sm:$0xff] }
 0x971   : > { %2189 = vxpose.xlu1.c.b16.start [1/4] (short) (narrow) %v1956_v8, 32  ;;  %v9244_v1 = vpop.f32.mrb[52].mxu0  ;;  %9262 = vmatprep.subr.bf16.mxu0 %v1956_v8 }
 0x972   : > { %v1865_v32 = vsub.f32 %v12028_v42, %v9244_v1  ;;  %v1844_v61 = vpop.f32.mrb[53].mxu0  ;;  %9263 = vmatpush3.bf16.msra.mxu0 %v1956_v8  ;;  %v2303_v8 = vsel %vm499_vm1, %v12008_v41, 0.0  ;;  %v12118_v42 = vpop.permute.xlu1 %2532  ;;  %v14240_v1 = vld [vmem:[#allocation48_spill] sm:$0xff] }
 0x973   : > { %v1863_v7 = vsub.f32 %v12030_v10, %v1844_v61  ;;  %v9245_v33 = vpop.f32.mrb[54].mxu0  ;;  %9264 = vmatprep.subr.bf16.mxu0 %v1957_v11  ;;  %v2497_v10 = vmul.f32 %v11942_v12, %v11774_v40  ;;  %v12176_v12 = vsel %vm499_vm1, %v12001_v22, 0 }
 0x974   : > { %v1866_v20 = vsub.f32 %v12032_v24, %v9245_v33  ;;  %v1847_v13 = vpop.f32.mrb[55].mxu0 }
 0x975   : > { %v1864_v30 = vsub.f32 %v12034_v3, %v1847_v13  ;;  %2190 = vxpose.xlu1.c.b16.cont [2/4] (short) (narrow) %v1957_v11, 32  ;;  %v14242_v13 = vld [vmem:[#allocation52_spill] sm:$0xff] }
 0x976   : > { %v1959_v15 = vpack.c.bf16 %v1866_v20, %v1865_v32  ;;  %9265 = vmatpush3.bf16.msra.mxu0 %v1957_v11 }
 0x977   : > { %v1958_v14 = vpack.c.bf16 %v1864_v30, %v1863_v7  ;;  %v14241_v7 = vld [vmem:[#allocation50_spill] sm:$0xff] }
 0x979   : > { %2191 = vxpose.xlu1.c.b16.cont [3/4] (short) (narrow) %v1958_v14, 32  ;;  %9266 = vmatprep.subr.bf16.mxu0 %v1958_v14 }
 0x97a   : > { %9267 = vmatpush3.bf16.msra.mxu0 %v1958_v14 }
 0x97b   : > { %9268 = vmatprep.subr.bf16.mxu0 %v1959_v15 }
 0x97d   : > { %2192 = vxpose.xlu1.c.b16.end [4/4] (short) (narrow) %v1959_v15, 32 }
 0x97e   : > { %9269 = vmatpush3.bf16.msra.mxu0 %v1959_v15 }
 0x97f   : > { %10172 = vmatprep.subr.msk.bf16.mxu0 %vm499_vm1, %v11831_v18  ;;  %v2306_v18 = vsel %vm499_vm1, %v12010_v44, 0.0 }
 0x981   : > { %9271 = vmatmul.mubr.msk.bf16.vlgmr.msra.gmra.mrb[56].mxu0 %vm817_vm3, %v1953_v49 }
 0x982   : > { %9274 = vmatprep.mubr.msk.bf16.mxu0 %vm817_vm3, %v1954_v58 }
 0x987   : > { %9279 = vmatpush3.bf16.xpose.msra.mxu0 %v11849_v48  ;;  %v2312_v48 = vsel %vm499_vm1, %v12013_v47, 0.0  ;;  %v14229_v47 = vld [vmem:[#allocation76_spill] sm:$0xff] }
 0x988   : > { %10173 = vmatprep.subr.msk.bf16.mxu0 %vm499_vm1, %v11853_v37  ;;  %v2318_v37 = vsel %vm499_vm1, %v12025_v23, 0.0  ;;  %v2492_v23 = vmul.f32 %v11989_v57, %v14229_v47  ;;  %v14230_v57 = vld [vmem:[#allocation77_spill] sm:$0xff] }
 0x989   : > { %9275 = vmatmul.mubr.msk.bf16.gmra.mrb[60].mxu0 %vm817_vm3, %v1955_v9 }
 0x98a   : > { %2304 = vadd.xlane.f32.xlu1 %v2303_v8  ;;  %9282 = vmatprep.mubr.msk.bf16.mxu0 %vm499_vm1, %v11873_v5  ;;  %v12131_v5 = vsel %vm499_vm1, %v12118_v42, 0 }
 0x98e   : > { %2307 = vadd.xlane.f32.xlu1 %v2306_v18 }
 0x98f   : > { %9281 = vmatpush3.bf16.xpose.msra.mxu0 %v11968_v38  ;;  %v12136_v38 = vpop.permute.xlu1 %2536 }
 0x990   : > { %10174 = vmatprep.subr.msk.bf16.mxu0 %vm499_vm1, %v12118_v42  ;;  %v12163_v3 = vsel %vm499_vm1, %v12136_v38, 0 }
 0x992   : > { %2313 = vadd.xlane.f32.xlu1 %v2312_v48 }
 0x993   : > { %v12140_v41 = vpop.permute.xlu1 %2520 }
 0x996   : > { %2319 = vadd.xlane.f32.xlu1 %v2318_v37  ;;  %9283 = vmatmul.mubr.msk.bf16.vlgmr.msra.gmra.mrb[56].mxu0 %vm499_vm1, %v11904_v55  ;;  %v12146_v55 = vsel %vm499_vm1, %v11999_v26, 0 }
 0x997   : > { %9286 = vmatprep.mubr.msk.bf16.mxu0 %vm499_vm1, %v11907_v36  ;;  %9303 = vmatpush3.bf16.xpose.msra.mxu0 %v12131_v5  ;;  %v14228_v36 = vld [vmem:[#allocation75_spill] sm:$0xff]  ;;  %v12180_v31 = vpop.permute.xlu1 %2524 }
 0x998   : > { %10175 = vmatprep.subr.msk.bf16.mxu0 %vm499_vm1, %v11999_v26  ;;  %v2493_v44 = vmul.f32 %v11925_v2, %v14228_v36  ;;  %v2498_v2 = vmul.f32 %v11947_v63, %v11786_v50 }
 0x99a   : > { %v2512_v24 = vpack.c.bf16 %v2493_v44, %v2492_v23  ;;  %v14243_v44 = vld [vmem:[#allocation55_spill] sm:$0xff] }
 0x99e   : > { %9287 = vmatmul.mubr.msk.bf16.gmra.mrb[60].mxu0 %vm499_vm1, %v11919_v56  ;;  %v2496_v56 = vmul.f32 %v11938_v51, %v11771_v45  ;;  %v2499_v45 = vmul.f32 %v11951_v6, %v14230_v57 }
 0x99f   : > { %9305 = vmatpush3.bf16.xpose.msra.mxu0 %v12146_v55  ;;  %9310 = vmatprep.mubr.msk.bf16.mxu0 %vm499_vm1, %v12140_v41 }
 0x9a0   : > { %10176 = vmatprep.subr.msk.bf16.mxu0 %vm499_vm1, %v12136_v38  ;;  %v2514_v51 = vpack.c.bf16 %v2497_v10, %v2496_v56  ;;  %v2515_v40 = vpack.c.bf16 %v2499_v45, %v2498_v2  ;;  %v14244_v56 = vld [vmem:[#allocation56_spill] sm:$0xff]  ;;  %v14245_v2 = vld [vmem:[#allocation57_spill] sm:$0xff] }
 0x9a7   : > { %3548 = vrot.lane.b32.xlu1 %v2512_v24, %s10903_s26  ;;  %9307 = vmatpush3.bf16.xpose.msra.mxu0 %v12163_v3 }
 0x9a8   : > { %10177 = vmatprep.subr.msk.bf16.mxu0 %vm499_vm1, %v12001_v22 }
 0x9ab   : > { %3552 = vrot.lane.b32.xlu1 %v2514_v51, %s10903_s26  ;;  %v14246_v51 = vld [vmem:[#allocation58_spill] sm:$0xff] }
 0x9af   : > { %3554 = vrot.lane.b32.xlu1 %v2515_v40, %s10903_s26  ;;  %9309 = vmatpush3.bf16.xpose.msra.mxu0 %v12176_v12 }
 0x9b6   : > { %9311 = vmatmul.mubr.msk.bf16.vlgmr.msra.gmra.mrb[64].mxu0 %vm499_vm1, %v12003_v19 }
 0x9b7   : > { %9314 = vmatprep.mubr.msk.bf16.mxu0 %vm499_vm1, %v12180_v31 }
 0x9be   : > { %9315 = vmatmul.mubr.msk.bf16.gmra.mrb[68].mxu0 %vm499_vm1, %v12005_v0 }
 0x9d7   : > { %v2197_v50 = vpop.trf.xlu1 }
 0x9d8   : > { %9298 = vmatprep.mubr.msk.bf16.mxu1 %vm817_vm3, %v2197_v50 }
 0x9db   : > { %v2198_v63 = vpop.trf.xlu1 }
 0x9dc   : > { %9299 = vmatmul.mubr.msk.bf16.vlgmr.msra.gmra.mrb[64].mxu1 %vm817_vm3, %v2198_v63 }
 0xa69   : > { %v12190_v6 = vpop.f32.mrb[56].mxu0 }
 0xa6a   : > { %14231 = vst [vmem:[#allocation51_spill] sm:$0xff] %v12190_v6  ;;  %v12192_v58 = vpop.f32.mrb[57].mxu0 }
 0xa6b   : > { %14232 = vst [vmem:[#allocation53_spill] sm:$0xff] %v12192_v58  ;;  %v12194_v9 = vpop.f32.mrb[58].mxu0 }
 0xa6c   : > { %14233 = vst [vmem:[#allocation54_spill] sm:$0xff] %v12194_v9  ;;  %v12196_v49 = vpop.f32.mrb[59].mxu0 }
 0xa6d   : > { %14234 = vst [vmem:[#allocation75_spill] sm:$0xff] %v12196_v49 }
 0xa71   : > { %v12198_v25 = vpop.f32.mrb[60].mxu0 }
 0xa72   : > { %14235 = vst [vmem:[#allocation76_spill] sm:$0xff] %v12198_v25  ;;  %v12200_v11 = vpop.f32.mrb[61].mxu0 }
 0xa73   : > { %14236 = vst [vmem:[#allocation77_spill] sm:$0xff] %v12200_v11  ;;  %v12202_v16 = vpop.f32.mrb[62].mxu0 }
 0xa74   : > { %14237 = vst [vmem:[#allocation78_spill] sm:$0xff] %v12202_v16  ;;  %v12204_v4 = vpop.f32.mrb[63].mxu0 }
 0xa75   : > { %14238 = vst [vmem:[#allocation79_spill] sm:$0xff] %v12204_v4 }
 0xa89   : > { %v9312_v17 = vpop.f32.mrb[64].mxu0 }
 0xa8a   : > { %v2631_v34 = vmul.f32 %v9312_v17, %v14239_v53  ;;  %v2598_v54 = vpop.f32.mrb[65].mxu0 }
 0xa8b   : > { %v2629_v32 = vmul.f32 %v14240_v1, %v2598_v54  ;;  %v9313_v61 = vpop.f32.mrb[66].mxu0 }
 0xa8c   : > { %v2632_v33 = vmul.f32 %v9313_v61, %v14241_v7  ;;  %v2601_v20 = vpop.f32.mrb[67].mxu0  ;;  %v2639_v15 = vsub.f32 0.0, %v2631_v34  ;;  %v14247_v61 = vld [vmem:[#allocation59_spill] sm:$0xff] }
 0xa8d   : > { %v2630_v30 = vmul.f32 %v14242_v13, %v2601_v20  ;;  %v2637_v8 = vsub.f32 0.0, %v2629_v32  ;;  %v14248_v20 = vld [vmem:[#allocation60_spill] sm:$0xff] }
 0xa8e   : > { %v2640_v14 = vsub.f32 0.0, %v2632_v33 }
 0xa8f   : > { %v2638_v18 = vsub.f32 0.0, %v2630_v30  ;;  %v12219_v30 = vadd.f32 %v14248_v20, %v2637_v8 }
 0xa90   : > { %v2654_v48 = vpack.c.bf16 %v2640_v14, %v2639_v15 }
 0xa91   : > { %v2653_v37 = vpack.c.bf16 %v2638_v18, %v2637_v8  ;;  %v9316_v36 = vpop.f32.mrb[68].mxu0  ;;  %v12216_v33 = vadd.f32 %v14247_v61, %v2638_v18 }
 0xa92   : > { %v2635_v47 = vmul.f32 %v9316_v36, %v14243_v44  ;;  %v2614_v23 = vpop.f32.mrb[69].mxu0 }
 0xa93   : > { %v2633_v10 = vmul.f32 %v14244_v56, %v2614_v23  ;;  %v9317_v24 = vpop.f32.mrb[70].mxu0  ;;  %9318 = vmatprep.subr.bf16.mxu1 %v2653_v37  ;;  %9326 = vmatprep.mubr.msk.bf16.mxu1 %vm817_vm3, %v2653_v37  ;;  %v14250_v23 = vld [vmem:[#allocation62_spill] sm:$0xff] }
 0xa94   : > { %v2636_v57 = vmul.f32 %v9317_v24, %v14245_v2  ;;  %v2617_v45 = vpop.f32.mrb[71].mxu0  ;;  %9319 = vmatpush3.bf16.msra.mxu1 %v2653_v37  ;;  %v2643_v50 = vsub.f32 0.0, %v2635_v47  ;;  %v14249_v37 = vld [vmem:[#allocation61_spill] sm:$0xff]  ;;  %v2738_v47 = vpack.c.bf16 %v12216_v33, %v12219_v30  ;;  %v14251_v24 = vld [vmem:[#allocation63_spill] sm:$0xff] }
 0xa95   : > { %v2634_v40 = vmul.f32 %v14246_v51, %v2617_v45  ;;  %9320 = vmatprep.subr.bf16.mxu1 %v2654_v48  ;;  %v2641_v17 = vsub.f32 0.0, %v2633_v10  ;;  %v12222_v36 = vadd.f32 %v14249_v37, %v2640_v14  ;;  %v12227_v10 = vadd.f32 %v14250_v23, %v2639_v15  ;;  %v14252_v14 = vld [vmem:[#allocation64_spill] sm:$0xff]  ;;  %v14253_v45 = vld [vmem:[#allocation65_spill] sm:$0xff] }
 0xa96   : > { %v2644_v63 = vsub.f32 0.0, %v2636_v57 }
 0xa97   : > { %v2642_v34 = vsub.f32 0.0, %v2634_v40  ;;  %v2739_v8 = vpack.c.bf16 %v12222_v36, %v12227_v10  ;;  %v12237_v57 = vadd.f32 %v14252_v14, %v2641_v17 }
 0xa98   : > { %v2656_v54 = vpack.c.bf16 %v2644_v63, %v2643_v50  ;;  %9321 = vmatpush3.bf16.msra.mxu1 %v2654_v48  ;;  %v12240_v15 = vadd.f32 %v14253_v45, %v2644_v63  ;;  %v10598_v45 = vld [vmem:[%s11179_s27 + $0xa8] sm:$0xff] }
 0xa99   : > { %v2655_v32 = vpack.c.bf16 %v2642_v34, %v2641_v17  ;;  %v12230_v18 = vadd.f32 %v14251_v24, %v2642_v34  ;;  %v14254_v34 = vld [vmem:[#allocation66_spill] sm:$0xff] }
 0xa9b   : > { %9322 = vmatprep.subr.bf16.mxu1 %v2655_v32  ;;  %v2740_v40 = vpack.c.bf16 %v12230_v18, %v12237_v57 }
 0xa9c   : > { %9323 = vmatpush3.bf16.msra.mxu1 %v2655_v32 }
 0xa9d   : > { %9324 = vmatprep.subr.bf16.mxu1 %v2656_v54 }
 0xaa0   : > { %9325 = vmatpush3.bf16.msra.mxu1 %v2656_v54 }
 0xaa1   : > { %9334 = vmatprep.subr.bf16.mxu1 %v2738_v47 }
 0xaa3   : > { %9327 = vmatmul.mubr.msk.bf16.vlgmr.msra.gmra.mrb[68].mxu1 %vm817_vm3, %v2654_v48  ;;  %v12245_v48 = vadd.f32 %v14254_v34, %v2643_v50 }
 0xaa4   : > { %9330 = vmatprep.mubr.msk.bf16.mxu1 %vm817_vm3, %v2655_v32  ;;  %9335 = vmatpush3.bf16.msra.mxu1 %v2738_v47 }
 0xaa5   : > { %9336 = vmatprep.subr.bf16.mxu1 %v2739_v8  ;;  %v2741_v17 = vpack.c.bf16 %v12240_v15, %v12245_v48 }
 0xaa8   : > { %9337 = vmatpush3.bf16.msra.mxu1 %v2739_v8 }
 0xaa9   : > { %9338 = vmatprep.subr.bf16.mxu1 %v2740_v40 }
 0xaab   : > { %9331 = vmatmul.mubr.msk.bf16.gmra.mrb[72].mxu1 %vm817_vm3, %v2656_v54 }
 0xaac   : > { %9339 = vmatpush3.bf16.msra.mxu1 %v2740_v40 }
 0xaad   : > { %9340 = vmatprep.subr.bf16.mxu1 %v2741_v17 }
 0xaaf   : > { %v9300_v63 = vpop.f32.mrb[64].mxu1 }
 0xab0   : > { %9341 = vmatpush3.bf16.msra.mxu1 %v2741_v17  ;;  %v2262_v32 = vadd.f32 %v9300_v63, %v11840_v62  ;;  %v2245_v47 = vpop.f32.mrb[65].mxu1 }
 0xab1   : > { %v2260_v8 = vadd.f32 %v2245_v47, %v11824_v39  ;;  %v9301_v25 = vpop.f32.mrb[66].mxu1 }
 0xab2   : > { %2266 = vst.msk [vmem:[%s11202_s3 + $0x10] sm:$0xff] %vm499_vm1, %v2262_v32  ;;  %v2263_v50 = vadd.f32 %v9301_v25, %v11843_v60  ;;  %v2248_v6 = vpop.f32.mrb[67].mxu1 }
 0xab3   : > { %2264 = vst.msk [vmem:[%s11202_s3] sm:$0xff] %vm499_vm1, %v2260_v8  ;;  %v2261_v54 = vadd.f32 %v2248_v6, %v11827_v28 }
 0xab4   : > { %2267 = vst.msk [vmem:[%s11202_s3 + $0x18] sm:$0xff] %vm499_vm1, %v2263_v50 }
 0xab5   : > { %2265 = vst.msk [vmem:[%s11202_s3 + $0x8] sm:$0xff] %vm499_vm1, %v2261_v54 }
 0xb76   : > { %v9328_v40 = vpop.f32.mrb[68].mxu1 }
 0xb77   : > { %v2703_v17 = vpop.f32.mrb[69].mxu1 }
 0xb78   : > { %v9329_v62 = vpop.f32.mrb[70].mxu1 }
 0xb79   : > { %v2735_v63 = vpack.c.bf16 %v9329_v62, %v9328_v40  ;;  %v2706_v16 = vpop.f32.mrb[71].mxu1 }
 0xb7a   : > { %v2734_v39 = vpack.c.bf16 %v2706_v16, %v2703_v17 }
 0xb7c   : > { %9342 = vmatprep.mubr.msk.bf16.mxu1 %vm817_vm3, %v2734_v39  ;;  %9350 = vmatprep.subr.bf16.mxu0 %v2734_v39 }
 0xb7d   : > { %9358 = vmatprep.mubr.msk.bf16.mxu0 %vm817_vm3, %v2734_v39  ;;  %9343 = vmatmul.mubr.msk.bf16.vlgmr.msra.gmra.mrb[76].mxu1 %vm817_vm3, %v2735_v63 }
 0xb7e   : > { %9351 = vmatpush3.bf16.msra.mxu0 %v2734_v39  ;;  %v9332_v60 = vpop.f32.mrb[72].mxu1 }
 0xb7f   : > { %9352 = vmatprep.subr.bf16.mxu0 %v2735_v63  ;;  %v2719_v28 = vpop.f32.mrb[73].mxu1 }
 0xb80   : > { %v9333_v6 = vpop.f32.mrb[74].mxu1 }
 0xb81   : > { %v2737_v25 = vpack.c.bf16 %v9333_v6, %v9332_v60  ;;  %v2722_v32 = vpop.f32.mrb[75].mxu1 }
 0xb82   : > { %v2736_v47 = vpack.c.bf16 %v2722_v32, %v2719_v28  ;;  %9353 = vmatpush3.bf16.msra.mxu0 %v2735_v63 }
 0xb84   : > { %9346 = vmatprep.mubr.msk.bf16.mxu1 %vm817_vm3, %v2736_v47  ;;  %9354 = vmatprep.subr.bf16.mxu0 %v2736_v47 }
 0xb85   : > { %9347 = vmatmul.mubr.msk.bf16.gmra.mrb[80].mxu1 %vm817_vm3, %v2737_v25 }
 0xb86   : > { %9355 = vmatpush3.bf16.msra.mxu0 %v2736_v47 }
 0xb87   : > { %9356 = vmatprep.subr.bf16.mxu0 %v2737_v25 }
 0xb8a   : > { %9357 = vmatpush3.bf16.msra.mxu0 %v2737_v25 }
 0xb8d   : > { %9359 = vmatmul.mubr.msk.bf16.vlgmr.msra.gmra.mrb[72].mxu0 %vm817_vm3, %v2735_v63 }
 0xb8e   : > { %9362 = vmatprep.mubr.msk.bf16.mxu0 %vm817_vm3, %v2736_v47 }
 0xb95   : > { %9363 = vmatmul.mubr.msk.bf16.gmra.mrb[76].mxu0 %vm817_vm3, %v2737_v25 }
 0xc50   : > { %v9344_v16 = vpop.f32.mrb[76].mxu1 }
 0xc51   : > { %v2788_v8 = vpop.f32.mrb[77].mxu1  ;;  %v2821_v39 = vadd.f32 %v9344_v16, %v12227_v10 }
 0xc52   : > { %v9345_v50 = vpop.f32.mrb[78].mxu1  ;;  %v2819_v40 = vadd.f32 %v2788_v8, %v12219_v30 }
 0xc53   : > { %v2791_v54 = vpop.f32.mrb[79].mxu1  ;;  %v2822_v17 = vadd.f32 %v9345_v50, %v12222_v36 }
 0xc54   : > { %v2820_v62 = vadd.f32 %v2791_v54, %v12216_v33 }
 0xc55   : > { %v2897_v28 = vpack.c.bf16 %v2822_v17, %v2821_v39 }
 0xc56   : > { %v2896_v60 = vpack.c.bf16 %v2820_v62, %v2819_v40 }
 0xc58   : > { %v9348_v6 = vpop.f32.mrb[80].mxu1  ;;  %9366 = vmatprep.subr.bf16.mxu1 %v2896_v60 }
 0xc59   : > { %v2804_v63 = vpop.f32.mrb[81].mxu1  ;;  %9367 = vmatpush3.bf16.msra.mxu1 %v2896_v60  ;;  %v2825_v33 = vadd.f32 %v9348_v6, %v12245_v48 }
 0xc5a   : > { %v9349_v32 = vpop.f32.mrb[82].mxu1  ;;  %9368 = vmatprep.subr.bf16.mxu1 %v2897_v28  ;;  %v2823_v47 = vadd.f32 %v2804_v63, %v12237_v57 }
 0xc5b   : > { %v2807_v25 = vpop.f32.mrb[83].mxu1  ;;  %v2826_v4 = vadd.f32 %v9349_v32, %v12240_v15 }
 0xc5c   : > { %v2824_v30 = vadd.f32 %v2807_v25, %v12230_v18 }
 0xc5d   : > { %9369 = vmatpush3.bf16.msra.mxu1 %v2897_v28  ;;  %v2899_v10 = vpack.c.bf16 %v2826_v4, %v2825_v33 }
 0xc5e   : > { %v2898_v36 = vpack.c.bf16 %v2824_v30, %v2823_v47 }
 0xc60   : > { %v9360_v16 = vpop.f32.mrb[72].mxu0  ;;  %9370 = vmatprep.subr.bf16.mxu1 %v2898_v36 }
 0xc61   : > { %v2861_v8 = vpop.f32.mrb[73].mxu0  ;;  %9371 = vmatpush3.bf16.msra.mxu1 %v2898_v36 }
 0xc62   : > { %v9361_v50 = vpop.f32.mrb[74].mxu0  ;;  %9372 = vmatprep.subr.bf16.mxu1 %v2899_v10 }
 0xc63   : > { %v2893_v54 = vpack.c.bf16 %v9361_v50, %v9360_v16  ;;  %v2864_v60 = vpop.f32.mrb[75].mxu0 }
 0xc64   : > { %v2892_v11 = vpack.c.bf16 %v2864_v60, %v2861_v8 }
 0xc65   : > { %9373 = vmatpush3.bf16.msra.mxu1 %v2899_v10 }
 0xc66   : > { %9374 = vmatprep.mubr.msk.bf16.mxu1 %vm817_vm3, %v2892_v11  ;;  %9382 = vmatprep.subr.bf16.mxu0 %v2892_v11 }
 0xc67   : > { %9390 = vmatprep.mubr.msk.bf16.mxu0 %vm817_vm3, %v2892_v11  ;;  %9383 = vmatpush3.bf16.msra.mxu0 %v2892_v11 }
 0xc68   : > { %v9364_v18 = vpop.f32.mrb[76].mxu0  ;;  %9384 = vmatprep.subr.bf16.mxu0 %v2893_v54  ;;  %9375 = vmatmul.mubr.msk.bf16.vlgmr.msra.gmra.mrb[84].mxu1 %vm817_vm3, %v2893_v54 }
 0xc69   : > { %v2877_v57 = vpop.f32.mrb[77].mxu0 }
 0xc6a   : > { %v9365_v15 = vpop.f32.mrb[78].mxu0 }
 0xc6b   : > { %v2895_v48 = vpack.c.bf16 %v9365_v15, %v9364_v18  ;;  %v2880_v28 = vpop.f32.mrb[79].mxu0  ;;  %9385 = vmatpush3.bf16.msra.mxu0 %v2893_v54 }
 0xc6c   : > { %v2894_v6 = vpack.c.bf16 %v2880_v28, %v2877_v57 }
 0xc6e   : > { %9378 = vmatprep.mubr.msk.bf16.mxu1 %vm817_vm3, %v2894_v6  ;;  %9386 = vmatprep.subr.bf16.mxu0 %v2894_v6 }
 0xc6f   : > { %9387 = vmatpush3.bf16.msra.mxu0 %v2894_v6 }
 0xc70   : > { %9388 = vmatprep.subr.bf16.mxu0 %v2895_v48  ;;  %9379 = vmatmul.mubr.msk.bf16.gmra.mrb[88].mxu1 %vm817_vm3, %v2895_v48 }
 0xc73   : > { %9389 = vmatpush3.bf16.msra.mxu0 %v2895_v48 }
 0xc76   : > { %9391 = vmatmul.mubr.msk.bf16.vlgmr.msra.gmra.mrb[80].mxu0 %vm817_vm3, %v2893_v54 }
 0xc77   : > { %9394 = vmatprep.mubr.msk.bf16.mxu0 %vm817_vm3, %v2894_v6 }
 0xc7e   : > { %9395 = vmatmul.mubr.msk.bf16.gmra.mrb[84].mxu0 %vm817_vm3, %v2895_v48 }
 0xd3b   : > { %v9376_v11 = vpop.f32.mrb[84].mxu1 }
 0xd3c   : > { %v2946_v63 = vpop.f32.mrb[85].mxu1  ;;  %v2979_v8 = vadd.f32 %v9376_v11, %v2821_v39 }
 0xd3d   : > { %v9377_v32 = vpop.f32.mrb[86].mxu1  ;;  %v2977_v36 = vadd.f32 %v2946_v63, %v2819_v40 }
 0xd3e   : > { %v2949_v25 = vpop.f32.mrb[87].mxu1  ;;  %v2980_v10 = vadd.f32 %v9377_v32, %v2822_v17 }
 0xd3f   : > { %v2978_v16 = vadd.f32 %v2949_v25, %v2820_v62 }
 0xd40   : > { %v3055_v60 = vpack.c.bf16 %v2980_v10, %v2979_v8 }
 0xd41   : > { %v3054_v50 = vpack.c.bf16 %v2978_v16, %v2977_v36 }
 0xd43   : > { %v9380_v18 = vpop.f32.mrb[88].mxu1  ;;  %9398 = vmatprep.subr.bf16.mxu1 %v3054_v50 }
 0xd44   : > { %v2962_v57 = vpop.f32.mrb[89].mxu1  ;;  %9399 = vmatpush3.bf16.msra.mxu1 %v3054_v50  ;;  %v2983_v9 = vadd.f32 %v9380_v18, %v2825_v33 }
 0xd45   : > { %v9381_v15 = vpop.f32.mrb[90].mxu1  ;;  %9400 = vmatprep.subr.bf16.mxu1 %v3055_v60  ;;  %v2981_v28 = vadd.f32 %v2962_v57, %v2823_v47 }
 0xd46   : > { %v2965_v54 = vpop.f32.mrb[91].mxu1  ;;  %v2984_v6 = vadd.f32 %v9381_v15, %v2826_v4 }
 0xd47   : > { %v2982_v48 = vadd.f32 %v2965_v54, %v2824_v30 }
 0xd48   : > { %9401 = vmatpush3.bf16.msra.mxu1 %v3055_v60  ;;  %v3057_v17 = vpack.c.bf16 %v2984_v6, %v2983_v9 }
 0xd49   : > { %v3056_v49 = vpack.c.bf16 %v2982_v48, %v2981_v28  ;;  %v9392_v58 = vpop.f32.mrb[80].mxu0 }
 0xd4a   : > { %v3019_v40 = vpop.f32.mrb[81].mxu0 }
 0xd4b   : > { %v9393_v62 = vpop.f32.mrb[82].mxu0  ;;  %9402 = vmatprep.subr.bf16.mxu1 %v3056_v49 }
 0xd4c   : > { %v3051_v39 = vpack.c.bf16 %v9393_v62, %v9392_v58  ;;  %v3022_v11 = vpop.f32.mrb[83].mxu0  ;;  %9403 = vmatpush3.bf16.msra.mxu1 %v3056_v49 }
 0xd4d   : > { %v3050_v63 = vpack.c.bf16 %v3022_v11, %v3019_v40  ;;  %9404 = vmatprep.subr.bf16.mxu1 %v3057_v17 }
 0xd4f   : > { %9406 = vmatprep.mubr.msk.bf16.mxu1 %vm817_vm3, %v3050_v63  ;;  %9414 = vmatprep.subr.bf16.mxu0 %v3050_v63 }
 0xd50   : > { %9422 = vmatprep.mubr.msk.bf16.mxu0 %vm817_vm3, %v3050_v63  ;;  %9415 = vmatpush3.bf16.msra.mxu0 %v3050_v63 }
 0xd51   : > { %v9396_v4 = vpop.f32.mrb[84].mxu0  ;;  %9405 = vmatpush3.bf16.msra.mxu1 %v3057_v17  ;;  %9416 = vmatprep.subr.bf16.mxu0 %v3051_v39 }
 0xd52   : > { %v3035_v47 = vpop.f32.mrb[85].mxu0 }
 0xd53   : > { %v9397_v30 = vpop.f32.mrb[86].mxu0 }
 0xd54   : > { %v3053_v33 = vpack.c.bf16 %v9397_v30, %v9396_v4  ;;  %v3038_v32 = vpop.f32.mrb[87].mxu0  ;;  %9407 = vmatmul.mubr.msk.bf16.vlgmr.msra.gmra.mrb[92].mxu1 %vm817_vm3, %v3051_v39  ;;  %9417 = vmatpush3.bf16.msra.mxu0 %v3051_v39 }
 0xd55   : > { %v3052_v58 = vpack.c.bf16 %v3038_v32, %v3035_v47 }
 0xd57   : > { %9410 = vmatprep.mubr.msk.bf16.mxu1 %vm817_vm3, %v3052_v58  ;;  %9418 = vmatprep.subr.bf16.mxu0 %v3052_v58 }
 0xd58   : > { %9419 = vmatpush3.bf16.msra.mxu0 %v3052_v58 }
 0xd59   : > { %9420 = vmatprep.subr.bf16.mxu0 %v3053_v33 }
 0xd5c   : > { %9411 = vmatmul.mubr.msk.bf16.gmra.mrb[96].mxu1 %vm817_vm3, %v3053_v33  ;;  %9421 = vmatpush3.bf16.msra.mxu0 %v3053_v33 }
 0xd5f   : > { %9423 = vmatmul.mubr.msk.bf16.vlgmr.msra.gmra.mrb[88].mxu0 %vm817_vm3, %v3051_v39 }
 0xd60   : > { %9426 = vmatprep.mubr.msk.bf16.mxu0 %vm817_vm3, %v3052_v58 }
 0xd67   : > { %9427 = vmatmul.mubr.msk.bf16.gmra.mrb[92].mxu0 %vm817_vm3, %v3053_v33 }
 0xe27   : > { %v9408_v49 = vpop.f32.mrb[92].mxu1 }
 0xe28   : > { %v3104_v25 = vpop.f32.mrb[93].mxu1  ;;  %v12300_v54 = vadd.f32 %v9408_v49, %v2979_v8 }
 0xe29   : > { %v9409_v50 = vpop.f32.mrb[94].mxu1  ;;  %v12294_v18 = vadd.f32 %v3104_v25, %v2977_v36 }
 0xe2a   : > { %v3107_v60 = vpop.f32.mrb[95].mxu1  ;;  %v12296_v57 = vadd.f32 %v9409_v50, %v2980_v10 }
 0xe2b   : > { %v12298_v15 = vadd.f32 %v3107_v60, %v2978_v16 }
 0xe2c   : > { %v3213_v17 = vpack.c.bf16 %v12296_v57, %v12300_v54 }
 0xe2d   : > { %v3212_v40 = vpack.c.bf16 %v12298_v15, %v12294_v18 }
 0xe2f   : > { %v9412_v62 = vpop.f32.mrb[96].mxu1  ;;  %9430 = vmatprep.subr.bf16.mxu1 %v3212_v40 }
 0xe30   : > { %v3120_v39 = vpop.f32.mrb[97].mxu1  ;;  %9431 = vmatpush3.bf16.msra.mxu1 %v3212_v40  ;;  %v12314_v58 = vadd.f32 %v9412_v62, %v2983_v9  ;;  %v2302_v40 = vpop.xlane.xlu0 %2301 }
 0xe31   : > { %v9413_v11 = vpop.f32.mrb[98].mxu1  ;;  %9432 = vmatprep.subr.bf16.mxu1 %v3213_v17  ;;  %v12306_v10 = vadd.f32 %v3120_v39, %v2981_v28  ;;  %10440 = vrsqrt.f32 %v2302_v40  ;;  %vm2380_vm8 = vcmp.gt.f32.partialorder %v2302_v40, 0.0  ;;  %v10592_v40 = vld [vmem:[%s11179_s27] sm:$0xff] }
 0xe32   : > { %v3123_v36 = vpop.f32.mrb[99].mxu1  ;;  %v9424_v63 = vpop.f32.mrb[88].mxu0  ;;  %v12310_v4 = vadd.f32 %v9413_v11, %v2984_v6 }
 0xe33   : > { %v12308_v16 = vadd.f32 %v3123_v36, %v2982_v48  ;;  %v3177_v8 = vpop.f32.mrb[89].mxu0 }
 0xe34   : > { %v9425_v47 = vpop.f32.mrb[90].mxu0  ;;  %9433 = vmatpush3.bf16.msra.mxu1 %v3213_v17  ;;  %v3215_v28 = vpack.c.bf16 %v12310_v4, %v12314_v58  ;;  %v2305_v17 = vpop.xlane.xlu1 %2304 }
 0xe35   : > { %v3214_v30 = vpack.c.bf16 %v12308_v16, %v12306_v10  ;;  %v3209_v33 = vpack.c.bf16 %v9425_v47, %v9424_v63  ;;  %v3180_v32 = vpop.f32.mrb[91].mxu0  ;;  %v2311_v62 = vpop.xlane.xlu0 %2310  ;;  %vm2381_vm9 = vcmp.gt.f32.partialorder %v2305_v17, 0.0 }
 0xe36   : > { %v3208_v49 = vpack.c.bf16 %v3180_v32, %v3177_v8  ;;  %10442 = vrsqrt.f32 %v2311_v62  ;;  %vm2383_vm11 = vcmp.gt.f32.partialorder %v2311_v62, 0.0  ;;  %v10593_v62 = vld [vmem:[%s11179_s27 + $0x18] sm:$0xff] }
 0xe37   : > { %9434 = vmatprep.subr.bf16.mxu1 %v3214_v30 }
 0xe38   : > { %9435 = vmatpush3.bf16.msra.mxu1 %v3214_v30  ;;  %9438 = vmatprep.mubr.msk.bf16.mxu1 %vm817_vm3, %v3208_v49  ;;  %v2308_v39 = vpop.xlane.xlu1 %2307 }
 0xe39   : > { %9446 = vmatprep.subr.bf16.mxu0 %v3208_v49  ;;  %9454 = vmatprep.mubr.msk.bf16.mxu0 %vm817_vm3, %v3208_v49  ;;  %v2317_v11 = vpop.xlane.xlu0 %2316  ;;  %vm2382_vm10 = vcmp.gt.f32.partialorder %v2308_v39, 0.0 }
 0xe3a   : > { %9436 = vmatprep.subr.bf16.mxu1 %v3215_v28  ;;  %9447 = vmatpush3.bf16.msra.mxu0 %v3208_v49  ;;  %v9428_v6 = vpop.f32.mrb[92].mxu0  ;;  %10444 = vrsqrt.f32 %v2317_v11  ;;  %vm2385_vm12 = vcmp.gt.f32.partialorder %v2317_v11, 0.0  ;;  %v10594_v11 = vld [vmem:[%s11179_s27 + $0x30] sm:$0xff] }
 0xe3b   : > { %9448 = vmatprep.subr.bf16.mxu0 %v3209_v33  ;;  %v3193_v48 = vpop.f32.mrb[93].mxu0 }
 0xe3c   : > { %v9429_v25 = vpop.f32.mrb[94].mxu0  ;;  %9437 = vmatpush3.bf16.msra.mxu1 %v3215_v28 }
 0xe3d   : > { %v3211_v9 = vpack.c.bf16 %v9429_v25, %v9428_v6  ;;  %v3196_v50 = vpop.f32.mrb[95].mxu0 }
 0xe3e   : > { %v3210_v60 = vpack.c.bf16 %v3196_v50, %v3193_v48  ;;  %9449 = vmatpush3.bf16.msra.mxu0 %v3209_v33 }
 0xe3f   : > { %9439 = vmatmul.mubr.msk.bf16.vlgmr.msra.gmra.mrb[100].mxu1 %vm817_vm3, %v3209_v33 }
 0xe40   : > { %9442 = vmatprep.mubr.msk.bf16.mxu1 %vm817_vm3, %v3210_v60  ;;  %9450 = vmatprep.subr.bf16.mxu0 %v3210_v60 }
 0xe42   : > { %9451 = vmatpush3.bf16.msra.mxu0 %v3210_v60 }
 0xe43   : > { %9452 = vmatprep.subr.bf16.mxu0 %v3211_v9 }
 0xe46   : > { %9453 = vmatpush3.bf16.msra.mxu0 %v3211_v9 }
 0xe47   : > { %9478 = vmatprep.subr.bf16.mxu0 %v12140_v41  ;;  %9443 = vmatmul.mubr.msk.bf16.gmra.mrb[104].mxu1 %vm817_vm3, %v3211_v9 }
 0xe49   : > { %9455 = vmatmul.mubr.msk.bf16.vlgmr.msra.gmra.mrb[96].mxu0 %vm817_vm3, %v3209_v33 }
 0xe4a   : > { %9458 = vmatprep.mubr.msk.bf16.mxu0 %vm817_vm3, %v3210_v60  ;;  %9479 = vmatpush3.bf16.msra.mxu0 %v12140_v41  ;;  %v2314_v41 = vpop.xlane.xlu1 %2313 }
 0xe4b   : > { %9480 = vmatprep.subr.bf16.mxu0 %v12003_v19  ;;  %vm2384_vm13 = vcmp.gt.f32.partialorder %v2314_v41, 0.0 }
 0xe4e   : > { %9481 = vmatpush3.bf16.msra.mxu0 %v12003_v19  ;;  %v2323_v19 = vpop.xlane.xlu0 %2322  ;;  %v2320_v36 = vpop.xlane.xlu1 %2319 }
 0xe4f   : > { %9482 = vmatprep.subr.bf16.mxu0 %v12180_v31  ;;  %10446 = vrsqrt.f32 %v2323_v19  ;;  %vm2387_vm14 = vcmp.gt.f32.partialorder %v2323_v19, 0.0  ;;  %vm2386_vm15 = vcmp.gt.f32.partialorder %v2320_v36, 0.0  ;;  %v10595_v19 = vld [vmem:[%s11179_s27 + $0x48] sm:$0xff] }
 0xe50   : > { %10448 = vrsqrt.f32 %v2305_v17 }
 0xe51   : > { %9459 = vmatmul.mubr.msk.bf16.gmra.mrb[100].mxu0 %vm817_vm3, %v3211_v9  ;;  %10450 = vrsqrt.f32 %v2308_v39 }
 0xe52   : > { %9483 = vmatpush3.bf16.msra.mxu0 %v12180_v31  ;;  %10452 = vrsqrt.f32 %v2314_v41  ;;  %v10441_v31 = vpop.eup %10440 }
 0xe53   : > { %9484 = vmatprep.subr.bf16.mxu0 %v12005_v0  ;;  %10454 = vrsqrt.f32 %v2320_v36  ;;  %v10443_v63 = vpop.eup %10442  ;;  %v2396_v49 = vsel %vm2380_vm8, %v10441_v31, 0.0  ;;  %v10596_v31 = vld [vmem:[%s11179_s27 + $0x78] sm:$0xff] }
 0xe54   : > { %v10445_v8 = vpop.eup %10444  ;;  %v2399_v48 = vsel %vm2383_vm11, %v10443_v63, 0.0  ;;  %v2404_v17 = vmul.f32 %v10592_v40, %v2396_v49 }
 0xe55   : > { %v2401_v25 = vsel %vm2385_vm12, %v10445_v8, 0.0  ;;  %v2407_v36 = vmul.f32 %v10595_v19, %v2399_v48  ;;  %v10599_v8 = vld [vmem:[%s11179_s27 + $0x90] sm:$0xff] }
 0xe56   : > { %9485 = vmatpush3.bf16.msra.mxu0 %v12005_v0  ;;  %v2409_v34 = vmul.f32 %v10596_v31, %v2401_v25 }
 0xe58   : > { %v2417_v49 = vmul.f32 0.17677669, %v2409_v34  ;;  %v14256_v34 = vld [vmem:[#allocation29_spill] sm:$0xff] }
 0xe59   : > { %v10447_v0 = vpop.eup %10446 }
 0xe5a   : > { %v10449_v47 = vpop.eup %10448  ;;  %v2403_v50 = vsel %vm2387_vm14, %v10447_v0, 0.0 }
 0xe5b   : > { %v10451_v30 = vpop.eup %10450  ;;  %v2397_v28 = vsel %vm2381_vm9, %v10449_v47, 0.0  ;;  %v10597_v47 = vld [vmem:[%s11179_s27 + $0x60] sm:$0xff]  ;;  %v2411_v63 = vmul.f32 %v10598_v45, %v2403_v50  ;;  %v14255_v45 = vld [vmem:[#allocation27_spill] sm:$0xff] }
 0xe5c   : > { %v10453_v33 = vpop.eup %10452  ;;  %v2398_v6 = vsel %vm2382_vm10, %v10451_v30, 0.0  ;;  %v2405_v39 = vmul.f32 %v10593_v62, %v2397_v28  ;;  %v14261_v50 = vld [vmem:[#allocation33_spill] sm:$0xff] }
 0xe5d   : > { %v10455_v32 = vpop.eup %10454  ;;  %v2400_v9 = vsel %vm2384_vm13, %v10453_v33, 0.0  ;;  %v2406_v41 = vmul.f32 %v10594_v11, %v2398_v6  ;;  %v2412_v33 = vmul.f32 0.17677669, %v2404_v17  ;;  %v2419_v62 = vmul.f32 0.17677669, %v2411_v63 }
 0xe5e   : > { %v2402_v60 = vsel %vm2386_vm15, %v10455_v32, 0.0  ;;  %v2408_v30 = vmul.f32 %v10597_v47, %v2400_v9  ;;  %v2413_v0 = vmul.f32 0.17677669, %v2405_v39  ;;  %v2415_v32 = vmul.f32 0.17677669, %v2407_v36  ;;  %v14260_v9 = vld [vmem:[#allocation30_spill] sm:$0xff] }
 0xe5f   : > { %v2410_v14 = vmul.f32 %v10599_v8, %v2402_v60  ;;  %v2414_v24 = vmul.f32 0.17677669, %v2406_v41  ;;  %v14262_v60 = vld [vmem:[#allocation32_spill] sm:$0xff] }
 0xe60   : > { %v2416_v23 = vmul.f32 0.17677669, %v2408_v30  ;;  %v2500_v40 = vpack.c.bf16 %v2413_v0, %v2412_v33 }
 0xe61   : > { %v2418_v28 = vmul.f32 0.17677669, %v2410_v14  ;;  %v2501_v6 = vpack.c.bf16 %v2415_v32, %v2414_v24  ;;  %v14257_v14 = vld [vmem:[#allocation26_spill] sm:$0xff]  ;;  %v14258_v24 = vld [vmem:[#allocation28_spill] sm:$0xff] }
 0xe62   : > { %3730 = vrot.lane.b32.xlu1 %v2500_v40, %s10903_s26  ;;  %v2502_v48 = vpack.c.bf16 %v2417_v49, %v2416_v23  ;;  %v14259_v23 = vld [vmem:[#allocation31_spill] sm:$0xff] }
 0xe63   : > { %3732 = vrot.lane.b32.xlu0 %v2501_v6, %s10903_s26  ;;  %v2503_v25 = vpack.c.bf16 %v2419_v62, %v2418_v28 }
 0xe66   : > { %3734 = vrot.lane.b32.xlu1 %v2502_v48, %s10903_s26 }
 0xe67   : > { %3736 = vrot.lane.b32.xlu0 %v2503_v25, %s10903_s26 }
 0xe6a   : > { %4217 = vrot.lane.b32.xlu1 %v14255_v45, %s10905_s30  ;;  %v10612_v45 = vld [vmem:[%s11179_s27 + $0xa0] sm:$0xff] }
 0xe6b   : > { %4219 = vrot.lane.b32.xlu0 %v14256_v34, %s10905_s30 }
 0xe6e   : > { %4221 = vrot.lane.b32.xlu1 %v14257_v14, %s10905_s30 }
 0xe6f   : > { %4223 = vrot.lane.b32.xlu0 %v14258_v24, %s10905_s30 }
 0xe72   : > { %4225 = vrot.lane.b32.xlu1 %v14259_v23, %s10905_s30 }
 0xe73   : > { %4227 = vrot.lane.b32.xlu0 %v14260_v9, %s10905_s30 }
 0xe76   : > { %4229 = vrot.lane.b32.xlu1 %v14261_v50, %s10905_s30 }
 0xe77   : > { %4231 = vrot.lane.b32.xlu0 %v14262_v60, %s10905_s30 }
 0xf12   : > { %v9440_v17 = vpop.f32.mrb[100].mxu1 }
 0xf13   : > { %v3262_v39 = vpop.f32.mrb[101].mxu1  ;;  %v12372_v47 = vadd.f32 %v9440_v17, %v12300_v54 }
 0xf14   : > { %v9441_v11 = vpop.f32.mrb[102].mxu1  ;;  %v12363_v19 = vadd.f32 %v3262_v39, %v12294_v18  ;;  %v3549_v39 = vpop.permute.xlu1 %3548 }
 0xf15   : > { %v3265_v41 = vpop.f32.mrb[103].mxu1  ;;  %v12366_v36 = vadd.f32 %v9441_v11, %v12296_v57 }
 0xf16   : > { %v12369_v31 = vadd.f32 %v3265_v41, %v12298_v15 }
 0xf17   : > { %v3371_v63 = vpack.c.bf16 %v12366_v36, %v12372_v47 }
 0xf18   : > { %v3370_v30 = vpack.c.bf16 %v12369_v31, %v12363_v19 }
 0xf1a   : > { %v9444_v8 = vpop.f32.mrb[104].mxu1  ;;  %9462 = vmatprep.subr.bf16.mxu1 %v3370_v30 }
 0xf1b   : > { %v3278_v33 = vpop.f32.mrb[105].mxu1  ;;  %9463 = vmatpush3.bf16.msra.mxu1 %v3370_v30  ;;  %v12388_v6 = vadd.f32 %v9444_v8, %v12314_v58  ;;  %v3551_v30 = vpop.permute.xlu0 %3550 }
 0xf1c   : > { %v9456_v18 = vpop.f32.mrb[96].mxu0  ;;  %v9445_v0 = vpop.f32.mrb[106].mxu1  ;;  %9464 = vmatprep.subr.bf16.mxu1 %v3371_v63  ;;  %v12379_v15 = vadd.f32 %v3278_v33, %v12306_v10 }
 0xf1d   : > { %v3335_v57 = vpop.f32.mrb[97].mxu0  ;;  %v3281_v32 = vpop.f32.mrb[107].mxu1  ;;  %v12382_v54 = vadd.f32 %v9445_v0, %v12310_v4 }
 0xf1e   : > { %v12385_v49 = vadd.f32 %v3281_v32, %v12308_v16  ;;  %v9457_v40 = vpop.f32.mrb[98].mxu0 }
 0xf1f   : > { %v3367_v28 = vpack.c.bf16 %v9457_v40, %v9456_v18  ;;  %v3338_v62 = vpop.f32.mrb[99].mxu0  ;;  %9465 = vmatpush3.bf16.msra.mxu1 %v3371_v63  ;;  %v3373_v10 = vpack.c.bf16 %v12382_v54, %v12388_v6  ;;  %v3553_v63 = vpop.permute.xlu1 %3552 }
 0xf20   : > { %v3372_v48 = vpack.c.bf16 %v12385_v49, %v12379_v15  ;;  %v3366_v25 = vpack.c.bf16 %v3338_v62, %v3335_v57  ;;  %v12402_v18 = vpop.permute.xlu0 %3732 }
 0xf22   : > { %9470 = vmatprep.mubr.msk.bf16.mxu1 %vm817_vm3, %v3366_v25  ;;  %9466 = vmatprep.subr.bf16.mxu1 %v3372_v48 }
 0xf23   : > { %9467 = vmatpush3.bf16.msra.mxu1 %v3372_v48  ;;  %v3555_v8 = vpop.permute.xlu1 %3554 }
 0xf24   : > { %v9460_v16 = vpop.f32.mrb[100].mxu0  ;;  %9468 = vmatprep.subr.bf16.mxu1 %v3373_v10  ;;  %v12406_v57 = vpop.permute.xlu0 %3736 }
 0xf25   : > { %v3351_v4 = vpop.f32.mrb[101].mxu0 }
 0xf26   : > { %v9461_v17 = vpop.f32.mrb[102].mxu0 }
 0xf27   : > { %v3369_v11 = vpack.c.bf16 %v9461_v17, %v9460_v16  ;;  %v3354_v41 = vpop.f32.mrb[103].mxu0  ;;  %9469 = vmatpush3.bf16.msra.mxu1 %v3373_v10  ;;  %v12400_v33 = vpop.permute.xlu1 %3730 }
 0xf28   : > { %v3368_v58 = vpack.c.bf16 %v3354_v41, %v3351_v4  ;;  %9494 = vmatprep.subr.bf16.mxu1 %v3549_v39  ;;  %v4220_v40 = vpop.permute.xlu0 %4219 }
 0xf29   : > { %v4244_v62 = vsel %vm499_vm1, %v4220_v40, 0.0  ;;  %v14264_v40 = vld [vmem:[#allocation35_spill] sm:$0xff] }
 0xf2a   : > { %9471 = vmatmul.mubr.msk.bf16.vlgmr.msra.gmra.mrb[108].mxu1 %vm817_vm3, %v3367_v28  ;;  %4245 = vadd.xlane.f32.xlu0 %v4244_v62  ;;  %v14266_v62 = vld [vmem:[#allocation38_spill] sm:$0xff] }
 0xf2b   : > { %9474 = vmatprep.mubr.msk.bf16.mxu1 %vm817_vm3, %v3368_v58  ;;  %9495 = vmatpush3.bf16.msra.mxu1 %v3549_v39  ;;  %v12404_v0 = vpop.permute.xlu1 %3734 }
 0xf2c   : > { %9496 = vmatprep.subr.bf16.mxu1 %v3551_v30  ;;  %v4224_v16 = vpop.permute.xlu0 %4223 }
 0xf2d   : > { %v4250_v39 = vsel %vm499_vm1, %v4224_v16, 0.0  ;;  %v14270_v16 = vld [vmem:[#allocation41_spill] sm:$0xff] }
 0xf2f   : > { %9497 = vmatpush3.bf16.msra.mxu1 %v3551_v30  ;;  %v4218_v32 = vpop.permute.xlu1 %4217 }
 0xf30   : > { %9498 = vmatprep.subr.bf16.mxu1 %v3553_v63  ;;  %v4241_v48 = vsel %vm499_vm1, %v4218_v32, 0.0  ;;  %v4228_v41 = vpop.permute.xlu0 %4227  ;;  %v14263_v32 = vld [vmem:[#allocation36_spill] sm:$0xff] }
 0xf31   : > { %4242 = vadd.xlane.f32.xlu1 %v4241_v48  ;;  %v4256_v58 = vsel %vm499_vm1, %v4228_v41, 0.0  ;;  %v14267_v48 = vld [vmem:[#allocation34_spill] sm:$0xff] }
 0xf32   : > { %9475 = vmatmul.mubr.msk.bf16.gmra.mrb[112].mxu1 %vm817_vm3, %v3369_v11 }
 0xf33   : > { %9499 = vmatpush3.bf16.msra.mxu1 %v3553_v63  ;;  %v4222_v28 = vpop.permute.xlu1 %4221 }
 0xf34   : > { %9500 = vmatprep.subr.bf16.mxu1 %v3555_v8  ;;  %v4247_v25 = vsel %vm499_vm1, %v4222_v28, 0.0  ;;  %v4232_v30 = vpop.permute.xlu0 %4231  ;;  %v14265_v28 = vld [vmem:[#allocation37_spill] sm:$0xff] }
 0xf35   : > { %4248 = vadd.xlane.f32.xlu0 %v4247_v25  ;;  %v4262_v63 = vsel %vm499_vm1, %v4232_v30, 0.0  ;;  %v14268_v25 = vld [vmem:[#allocation39_spill] sm:$0xff] }
 0xf37   : > { %9501 = vmatpush3.bf16.msra.mxu1 %v3555_v8  ;;  %v4226_v10 = vpop.permute.xlu1 %4225  ;;  %v10906_v8 = vmov 2  }
 0xf38   : > { %10180 = vmatprep.subr.msk.bf16.mxu1 %vm499_vm1, %v12118_v42  ;;  %v4253_v4 = vsel %vm499_vm1, %v4226_v10, 0.0  ;;  %10356 = vset.pattern.permute.xlu1 %v10906_v8  ;;  %v14269_v10 = vld [vmem:[#allocation40_spill] sm:$0xff] }
 0xf39   : > { %4254 = vadd.xlane.f32.xlu1 %v4253_v4  ;;  %4251 = vadd.xlane.f32.xlu0 %v4250_v39  ;;  %v12425_v4 = vld [vmem:[%s11202_s3 + $0x20] sm:$0xff] }
 0xf3a   : > { %10357 = vset.pattern.permute.xlu0 %v10906_v8  ;;  %14271 = vst [vmem:[#allocation80_spill] sm:$0xff] %v12425_v4 }
 0xf3b   : > { %v4230_v17 = vpop.permute.xlu1 %4229 }
 0xf3c   : > { %v4259_v11 = vsel %vm499_vm1, %v4230_v17, 0.0  ;;  %v12428_v17 = vld [vmem:[%s11202_s3 + $0x28] sm:$0xff] }
 0xf3d   : > { %4260 = vadd.xlane.f32.xlu1 %v4259_v11  ;;  %4257 = vadd.xlane.f32.xlu0 %v4256_v58  ;;  %14272 = vst [vmem:[#allocation81_spill] sm:$0xff] %v12428_v17  ;;  %v12432_v39 = vpack.c.bf16 %v12428_v17, %v12425_v4 }
 0xf3f   : > { %10178 = vmatprep.subr.msk.bf16.mxu0 %vm499_vm1, %v12432_v39 }
 0xf41   : > { %4263 = vadd.xlane.f32.xlu0 %v4262_v63 }
 0xf4e   : > { %4338 = vperm.xlu1 %10356, %v14263_v32   ;;  %v10609_v32 = vld [vmem:[%s11179_s27 + $0x28] sm:$0xff] }
 0xf52   : > { %4346 = vperm.xlu1 %10356, %v14264_v40   ;;  %v12448_v40 = vsel %vm499_vm1, %v12432_v39, 0 }
 0xf56   : > { %4350 = vperm.xlu1 %10356, %v14265_v28  }
 0xf57   : > { %4342 = vperm.xlu0 %10357, %v14267_v48   ;;  %v12444_v48 = vld [vmem:[%s11202_s3 + $0x38] sm:$0xff] }
 0xf58   : > { %14273 = vst [vmem:[#allocation82_spill] sm:$0xff] %v12444_v48 }
 0xf5a   : > { %4354 = vperm.xlu1 %10356, %v14266_v62  }
 0xf5e   : > { %4358 = vperm.xlu1 %10356, %v14268_v25   ;;  %v12441_v25 = vld [vmem:[%s11202_s3 + $0x30] sm:$0xff] }
 0xf62   : > { %4362 = vperm.xlu1 %10356, %v14269_v10  }
 0xf66   : > { %4366 = vperm.xlu1 %10356, %v14270_v16  }
 0xffd   : > { %v9472_v11 = vpop.f32.mrb[108].mxu1 }
 0xffe   : > { %v3420_v41 = vpop.f32.mrb[109].mxu1  ;;  %v3453_v30 = vadd.f32 %v9472_v11, %v12372_v47  ;;  %v12452_v47 = vpack.c.bf16 %v12444_v48, %v12441_v25  ;;  %v10613_v48 = vld [vmem:[%s11179_s27 + $0xb8] sm:$0xff] }
 0xfff   : > { %v9473_v58 = vpop.f32.mrb[110].mxu1  ;;  %v3451_v16 = vadd.f32 %v3420_v41, %v12363_v19 }
0x1000   : > { %v3454_v63 = vadd.f32 %v9473_v58, %v12366_v36  ;;  %v3423_v8 = vpop.f32.mrb[111].mxu1 }
0x1001   : > { %v3452_v10 = vadd.f32 %v3423_v8, %v12369_v31 }
0x1002   : > { %v3460_v62 = vpack.c.bf16 %v3454_v63, %v3453_v30 }
0x1003   : > { %v3459_v28 = vpack.c.bf16 %v3452_v10, %v3451_v16 }
0x1005   : > { %v9476_v36 = vpop.f32.mrb[112].mxu1  ;;  %9486 = vmatprep.mubr.msk.bf16.mxu0 %vm817_vm3, %v3459_v28  ;;  %9502 = vmatprep.mubr.msk.bf16.mxu1 %vm817_vm3, %v3459_v28 }
0x1006   : > { %v3436_v19 = vpop.f32.mrb[113].mxu1  ;;  %9487 = vmatmul.mubr.msk.bf16.vlgmr.msra.gmra.mrb[104].mxu0 %vm817_vm3, %v3460_v62  ;;  %9503 = vmatmul.mubr.msk.bf16.vlgmr.msra.gmra.mrb[116].mxu1 %vm817_vm3, %v3460_v62  ;;  %v3457_v10 = vadd.f32 %v9476_v36, %v12388_v6 }
0x1007   : > { %9523 = vmatpush3.bf16.xpose.msra.mxu1 %v12131_v5  ;;  %v9477_v31 = vpop.f32.mrb[114].mxu1  ;;  %9511 = vmatpush3.bf16.xpose.msra.mxu0 %v12448_v40  ;;  %v3455_v28 = vadd.f32 %v3436_v19, %v12379_v15  ;;  %v4246_v15 = vpop.xlane.xlu0 %4245 }
0x1008   : > { %v3458_v16 = vadd.f32 %v9477_v31, %v12382_v54  ;;  %10181 = vmatprep.subr.msk.bf16.mxu1 %vm499_vm1, %v11999_v26  ;;  %v3439_v11 = vpop.f32.mrb[115].mxu1  ;;  %10179 = vmatprep.subr.msk.bf16.mxu0 %vm499_vm1, %v12452_v47  ;;  %v4243_v54 = vpop.xlane.xlu1 %4242  ;;  %10456 = vrsqrt.f32 %v4246_v15  ;;  %vm4306_vm0 = vcmp.gt.f32.partialorder %v4246_v15, 0.0  ;;  %v10601_v31 = vld [vmem:[%s11179_s27 + $0x8] sm:$0xff] }
0x1009   : > { %v3456_v62 = vadd.f32 %v3439_v11, %v12385_v49  ;;  %10458 = vrsqrt.f32 %v4243_v54  ;;  %vm4305_vm2 = vcmp.gt.f32.partialorder %v4243_v54, 0.0 }
0x100a   : > { %v3462_v41 = vpack.c.bf16 %v3458_v16, %v3457_v10 }
0x100b   : > { %v3461_v5 = vpack.c.bf16 %v3456_v62, %v3455_v28 }
0x100c   : > { %v12482_v49 = vpop.xlane.xlu1 %4254 }
0x100d   : > { %9490 = vmatprep.mubr.msk.bf16.mxu0 %vm817_vm3, %v3461_v5  ;;  %9506 = vmatprep.mubr.msk.bf16.mxu1 %vm817_vm3, %v3461_v5  ;;  %v10602_v5 = vld [vmem:[%s11179_s27 + $0x38] sm:$0xff]  ;;  %vm4309_vm8 = vcmp.gt.f32.partialorder %v12482_v49, 0.0 }
0x100e   : > { %9491 = vmatmul.mubr.msk.bf16.gmra.mrb[108].mxu0 %vm817_vm3, %v3462_v41  ;;  %9507 = vmatmul.mubr.msk.bf16.gmra.mrb[120].mxu1 %vm817_vm3, %v3462_v41 }
0x100f   : > { %9525 = vmatpush3.bf16.xpose.msra.mxu1 %v12146_v55  ;;  %9530 = vmatprep.mubr.msk.bf16.mxu1 %vm499_vm1, %v12400_v33  ;;  %v4249_v55 = vpop.xlane.xlu0 %4248 }
0x1010   : > { %10182 = vmatprep.subr.msk.bf16.mxu1 %vm499_vm1, %v12136_v38  ;;  %10460 = vrsqrt.f32 %v4249_v55  ;;  %v4261_v6 = vpop.xlane.xlu1 %4260  ;;  %vm4307_vm4 = vcmp.gt.f32.partialorder %v4249_v55, 0.0 }
0x1011   : > { %vm4311_vm6 = vcmp.gt.f32.partialorder %v4261_v6, 0.0 }
0x1014   : > { %v12492_v8 = vpop.permute.xlu1 %4338 }
0x1017   : > { %9527 = vmatpush3.bf16.xpose.msra.mxu1 %v12163_v3  ;;  %v4252_v3 = vpop.xlane.xlu0 %4251 }
0x1018   : > { %10183 = vmatprep.subr.msk.bf16.mxu1 %vm499_vm1, %v12001_v22  ;;  %10462 = vrsqrt.f32 %v4252_v3  ;;  %v12502_v62 = vpop.permute.xlu1 %4346  ;;  %vm4308_vm5 = vcmp.gt.f32.partialorder %v4252_v3, 0.0 }
0x1019   : > { %10464 = vrsqrt.f32 %v4261_v6 }
0x101b   : > { %v12490_v63 = vpop.xlane.xlu0 %4257 }
0x101c   : > { %v12512_v55 = vpop.permute.xlu1 %4350  ;;  %vm4310_vm9 = vcmp.gt.f32.partialorder %v12490_v63, 0.0 }
0x101f   : > { %9529 = vmatpush3.bf16.xpose.msra.mxu1 %v12176_v12  ;;  %v10457_v12 = vpop.eup %10456  ;;  %v4264_v28 = vpop.xlane.xlu0 %4263 }
0x1020   : > { %9566 = vmatprep.subr.bf16.mxu1 %v12118_v42  ;;  %v10459_v58 = vpop.eup %10458  ;;  %v4322_v30 = vsel %vm4306_vm0, %v10457_v12, 0.0  ;;  %10466 = vrsqrt.f32 %v4264_v28  ;;  %vm4312_vm7 = vcmp.gt.f32.partialorder %v4264_v28, 0.0 }
0x1021   : > { %v4321_v19 = vsel %vm4305_vm2, %v10459_v58, 0.0  ;;  %v10461_v16 = vpop.eup %10460  ;;  %v10603_v58 = vld [vmem:[%s11179_s27 + $0x50] sm:$0xff]  ;;  %10468 = vrsqrt.f32 %v12482_v49 }
0x1022   : > { %v12500_v10 = vmul.f32 %v10601_v31, %v4321_v19  ;;  %v4323_v11 = vsel %vm4307_vm4, %v10461_v16, 0.0  ;;  %v10463_v41 = vpop.eup %10462  ;;  %v10604_v31 = vld [vmem:[%s11179_s27 + $0x98] sm:$0xff]  ;;  %10470 = vrsqrt.f32 %v12490_v63 }
0x1023   : > { %v4331_v15 = vmul.f32 %v10602_v5, %v4323_v11  ;;  %v4324_v54 = vsel %vm4308_vm5, %v10463_v41, 0.0  ;;  %v10465_v12 = vpop.eup %10464  ;;  %v10605_v41 = vld [vmem:[%s11179_s27 + $0xb0] sm:$0xff]  ;;  %v4343_v49 = vpop.permute.xlu0 %4342 }
0x1024   : > { %v4378_v60 = vmul.f32 %v10609_v32, %v4343_v49 }
0x1026   : > { %9531 = vmatmul.mubr.msk.bf16.vlgmr.msra.gmra.mrb[124].mxu1 %vm499_vm1, %v12402_v18 }
0x1027   : > { %9567 = vmatpush3.bf16.msra.mxu1 %v12118_v42  ;;  %9534 = vmatprep.mubr.msk.bf16.mxu1 %vm499_vm1, %v12404_v0  ;;  %v10600_v42 = vld [vmem:[%s11179_s27 + $0x20] sm:$0xff] }
0x1028   : > { %9568 = vmatprep.subr.bf16.mxu1 %v11999_v26  ;;  %v12496_v36 = vmul.f32 %v10600_v42, %v4322_v30  ;;  %v4327_v30 = vsel %vm4311_vm6, %v10465_v12, 0.0  ;;  %v12516_v42 = vpop.permute.xlu1 %4354 }
0x1029   : > { %v4335_v16 = vmul.f32 %v10604_v31, %v4327_v30 }
0x102a   : > { %v10467_v19 = vpop.eup %10466 }
0x102b   : > { %9569 = vmatpush3.bf16.msra.mxu1 %v11999_v26  ;;  %v4389_v26 = vpack.c.bf16 %v12496_v36, %v12500_v10  ;;  %v4328_v11 = vsel %vm4312_vm7, %v10467_v19, 0.0 }
0x102c   : > { %9570 = vmatprep.subr.bf16.mxu1 %v12136_v38  ;;  %v4336_v5 = vmul.f32 %v10605_v41, %v4328_v11  ;;  %v14274_v41 = vld [vmem:[#allocation73_spill] sm:$0xff] }
0x102d   : > { %4417 = vrot.lane.b32.xlu1 %v4389_v26, %s10905_s30  ;;  %v12520_v26 = vpop.permute.xlu1 %4358 }
0x102e   : > { %9535 = vmatmul.mubr.msk.bf16.gmra.mrb[128].mxu1 %vm499_vm1, %v12406_v57 }
0x102f   : > { %9571 = vmatpush3.bf16.msra.mxu1 %v12136_v38  ;;  %v4332_v38 = vmul.f32 %v10603_v58, %v4324_v54  ;;  %v4392_v54 = vpack.c.bf16 %v4336_v5, %v4335_v16 }
0x1030   : > { %9572 = vmatprep.subr.bf16.mxu1 %v12001_v22 }
0x1031   : > { %v4390_v3 = vpack.c.bf16 %v4332_v38, %v4331_v15  ;;  %v4372_v6 = vmul.f32 %v12512_v55, %v4332_v38  ;;  %v12525_v58 = vpop.permute.xlu1 %4362  ;;  %v10469_v38 = vpop.eup %10468 }
0x1032   : > { %v4375_v28 = vmul.f32 %v12525_v58, %v4335_v16  ;;  %v10471_v31 = vpop.eup %10470  ;;  %v4325_v16 = vsel %vm4309_vm8, %v10469_v38, 0.0  ;;  %v4383_v17 = vmul.f32 %v10612_v45, %v12525_v58  ;;  %v14278_v45 = vld [vmem:[#allocation44_spill] sm:$0xff] }
0x1033   : > { %9573 = vmatpush3.bf16.msra.mxu1 %v12001_v22  ;;  %4419 = vrot.lane.b32.xlu1 %v4390_v3, %s10905_s30  ;;  %v4371_v22 = vmul.f32 %v12502_v62, %v4331_v15  ;;  %v12546_v15 = vsel %vm499_vm1, %v12452_v47, 0  ;;  %v4326_v11 = vsel %vm4310_vm9, %v10471_v31, 0.0 }
0x1034   : > { %9513 = vmatpush3.bf16.xpose.msra.mxu0 %v12546_v15 }
0x1035   : > { %v4394_v12 = vpack.c.bf16 %v4372_v6, %v4371_v22  ;;  %v12529_v3 = vpop.permute.xlu1 %4366  ;;  %v10607_v6 = vld [vmem:[%s11179_s27 + $0x80] sm:$0xff] }
0x1036   : > { %v4376_v30 = vmul.f32 %v12529_v3, %v4336_v5  ;;  %v10606_v5 = vld [vmem:[%s11179_s27 + $0x68] sm:$0xff]  ;;  %v4384_v4 = vmul.f32 %v10613_v48, %v12529_v3  ;;  %v14279_v48 = vld [vmem:[#allocation45_spill] sm:$0xff] }
0x1037   : > { %4423 = vrot.lane.b32.xlu1 %v4392_v54, %s10905_s30  ;;  %v4333_v22 = vmul.f32 %v10606_v5, %v4325_v16  ;;  %v4334_v54 = vmul.f32 %v10607_v6, %v4326_v11 }
0x1038   : > { %v4396_v19 = vpack.c.bf16 %v4376_v30, %v4375_v28  ;;  %v14275_v28 = vld [vmem:[#allocation74_spill] sm:$0xff]  ;;  %v4370_v30 = vmul.f32 %v4343_v49, %v12496_v36 }
0x1039   : > { %v4391_v63 = vpack.c.bf16 %v4334_v54, %v4333_v22  ;;  %v4374_v38 = vmul.f32 %v12520_v26, %v4334_v54 }
0x103b   : > { %4407 = vrot.lane.b32.xlu1 %v4394_v12, %s10905_s30  ;;  %v4369_v12 = vmul.f32 %v12492_v8, %v12500_v10  ;;  %4421 = vrot.lane.b32.xlu0 %v4391_v63, %s10905_s30 }
0x103d   : > { %v4393_v31 = vpack.c.bf16 %v4370_v30, %v4369_v12 }
0x103f   : > { %4411 = vrot.lane.b32.xlu1 %v4396_v19, %s10905_s30  ;;  %v4373_v19 = vmul.f32 %v12516_v42, %v4333_v22  ;;  %4405 = vrot.lane.b32.xlu0 %v4393_v31, %s10905_s30 }
0x1041   : > { %v4395_v16 = vpack.c.bf16 %v4374_v38, %v4373_v19 }
0x1043   : > { %4169 = vrot.lane.b32.xlu1 %v11654_v27, %s10905_s30  ;;  %4409 = vrot.lane.b32.xlu0 %v4395_v16, %s10905_s30 }
0x1047   : > { %4171 = vrot.lane.b32.xlu1 %v11637_v46, %s10905_s30 }
0x104b   : > { %4173 = vrot.lane.b32.xlu1 %v11641_v21, %s10905_s30 }
0x104f   : > { %4175 = vrot.lane.b32.xlu1 %v11658_v29, %s10905_s30 }
0x1053   : > { %4177 = vrot.lane.b32.xlu1 %v11671_v43, %s10905_s30 }
0x1057   : > { %4179 = vrot.lane.b32.xlu1 %v11680_v35, %s10905_s30 }
0x105b   : > { %4181 = vrot.lane.b32.xlu1 %v14274_v41, %s10905_s30 }
0x105f   : > { %4183 = vrot.lane.b32.xlu1 %v14275_v28, %s10905_s30 }
0x109f   : > { %v12569_v10 = vpop.permute.xlu1 %4417 }
0x10a5   : > { %v12571_v11 = vpop.permute.xlu1 %4419 }
0x10a9   : > { %v12573_v5 = vpop.permute.xlu1 %4423 }
0x10ad   : > { %v12575_v6 = vpop.permute.xlu1 %4407 }
0x10b1   : > { %v12577_v36 = vpop.permute.xlu1 %4411 }
0x10b5   : > { %v4170_v22 = vpop.permute.xlu1 %4169 }
0x10b6   : > { %v4193_v54 = vsel %vm499_vm1, %v4170_v22, 0.0 }
0x10b7   : > { %4194 = vadd.xlane.f32.xlu1 %v4193_v54 }
0x10b9   : > { %v12580_v12 = vpop.permute.xlu1 %4171 }
0x10bd   : > { %v12582_v63 = vpop.permute.xlu1 %4173 }
0x10c1   : > { %v12584_v30 = vpop.permute.xlu1 %4175 }
0x10c5   : > { %v12586_v19 = vpop.permute.xlu1 %4177 }
0x10c9   : > { %v12588_v38 = vpop.permute.xlu1 %4179 }
0x10cd   : > { %v4182_v31 = vpop.permute.xlu1 %4181 }
0x10ce   : > { %v4211_v16 = vsel %vm499_vm1, %v4182_v31, 0.0  ;;  %v10608_v31 = vld [vmem:[%s11179_s27 + $0x10] sm:$0xff] }
0x10cf   : > { %4212 = vadd.xlane.f32.xlu1 %v4211_v16  ;;  %v4377_v16 = vmul.f32 %v10608_v31, %v12492_v8 }
0x10d1   : > { %v4397_v49 = vpack.c.bf16 %v4378_v60, %v4377_v16 }
0x10d9   : > { %v9488_v28 = vpop.f32.mrb[104].mxu0  ;;  %v12591_v41 = vpop.f32.mrb[116].mxu1 }
0x10da   : > { %v3513_v22 = vpop.f32.mrb[105].mxu0  ;;  %v12593_v54 = vpop.f32.mrb[117].mxu1 }
0x10db   : > { %v9489_v35 = vpop.f32.mrb[106].mxu0  ;;  %v12595_v43 = vpop.f32.mrb[118].mxu1 }
0x10dc   : > { %v3632_v29 = vpack.c.bf16 %v9489_v35, %v9488_v28  ;;  %v3516_v21 = vpop.f32.mrb[107].mxu0  ;;  %v12597_v46 = vpop.f32.mrb[119].mxu1 }
0x10dd   : > { %v3631_v27 = vpack.c.bf16 %v3516_v21, %v3513_v22  ;;  %v10610_v21 = vld [vmem:[%s11179_s27 + $0x70] sm:$0xff]  ;;  %v10611_v22 = vld [vmem:[%s11179_s27 + $0x88] sm:$0xff] }
0x10de   : > { %v4382_v8 = vmul.f32 %v10611_v22, %v12520_v26  ;;  %v14277_v26 = vld [vmem:[#allocation43_spill] sm:$0xff] }
0x10df   : > { %9514 = vmatprep.mubr.msk.bf16.mxu0 %vm499_vm1, %v3631_v27  ;;  %v4381_v27 = vmul.f32 %v10610_v21, %v12516_v42  ;;  %v4400_v42 = vpack.c.bf16 %v4384_v4, %v4383_v17 }
0x10e0   : > { %9515 = vmatmul.mubr.msk.bf16.vlgmr.msra.gmra.mrb[112].mxu0 %vm499_vm1, %v3632_v29  ;;  %5433 = vrot.lane.b32.xlu1 %v4397_v49, %s10905_s30 }
0x10e1   : > { %v9492_v50 = vpop.f32.mrb[108].mxu0  ;;  %v12604_v9 = vpop.f32.mrb[120].mxu1  ;;  %v4399_v34 = vpack.c.bf16 %v4382_v8, %v4381_v27 }
0x10e2   : > { %v3529_v35 = vpop.f32.mrb[109].mxu0  ;;  %v12606_v28 = vpop.f32.mrb[121].mxu1 }
0x10e3   : > { %v9493_v23 = vpop.f32.mrb[110].mxu0  ;;  %v12608_v24 = vpop.f32.mrb[122].mxu1 }
0x10e4   : > { %v3634_v29 = vpack.c.bf16 %v9493_v23, %v9492_v50  ;;  %v3532_v31 = vpop.f32.mrb[111].mxu0  ;;  %v3613_v32 = vpop.f32.mrb[123].mxu1  ;;  %5437 = vrot.lane.b32.xlu1 %v4399_v34, %s10905_s30  ;;  %v14276_v50 = vld [vmem:[#allocation42_spill] sm:$0xff] }
0x10e5   : > { %v3633_v14 = vpack.c.bf16 %v3532_v31, %v3529_v35  ;;  %v14280_v34 = vld [vmem:[#allocation46_spill] sm:$0xff] }
0x10e7   : > { %9518 = vmatprep.mubr.msk.bf16.mxu0 %vm499_vm1, %v3633_v14 }
0x10e8   : > { %9519 = vmatmul.mubr.msk.bf16.gmra.mrb[116].mxu0 %vm499_vm1, %v3634_v29  ;;  %5439 = vrot.lane.b32.xlu1 %v4400_v42, %s10905_s30  ;;  %v14281_v29 = vld [vmem:[#allocation49_spill] sm:$0xff] }
0x10f9   : > { %v9532_v23 = vpop.f32.mrb[124].mxu1 }
0x10fa   : > { %v3817_v60 = vmul.f32 %v9532_v23, %v14276_v50  ;;  %v3784_v14 = vpop.f32.mrb[125].mxu1 }
0x10fb   : > { %v3815_v16 = vmul.f32 %v14277_v26, %v3784_v14  ;;  %v9533_v35 = vpop.f32.mrb[126].mxu1 }
0x10fc   : > { %v3818_v58 = vmul.f32 %v9533_v35, %v14278_v45  ;;  %v3787_v21 = vpop.f32.mrb[127].mxu1 }
0x10fd   : > { %v3816_v3 = vmul.f32 %v14279_v48, %v3787_v21 }
0x10fe   : > { %v3824_v27 = vpack.c.bf16 %v3818_v58, %v3817_v60 }
0x10ff   : > { %v3823_v22 = vpack.c.bf16 %v3816_v3, %v3815_v16 }
0x1101   : > { %9546 = vmatprep.mubr.msk.bf16.mxu0 %vm817_vm3, %v3823_v22  ;;  %v9536_v4 = vpop.f32.mrb[128].mxu1 }
0x1102   : > { %v3821_v17 = vmul.f32 %v9536_v4, %v14280_v34  ;;  %v3800_v8 = vpop.f32.mrb[129].mxu1 }
0x1103   : > { %v3819_v31 = vmul.f32 %v14281_v29, %v3800_v8  ;;  %v9537_v49 = vpop.f32.mrb[130].mxu1 }
0x1104   : > { %v3822_v42 = vmul.f32 %v9537_v49, %v12087_v52  ;;  %v3803_v23 = vpop.f32.mrb[131].mxu1 }
0x1105   : > { %v3820_v14 = vmul.f32 %v12091_v59, %v3803_v23 }
0x1106   : > { %v3826_v35 = vpack.c.bf16 %v3822_v42, %v3821_v17 }
0x1107   : > { %v3825_v45 = vpack.c.bf16 %v3820_v14, %v3819_v31 }
0x11b3   : > { %v9516_v26 = vpop.f32.mrb[112].mxu0 }
0x11b4   : > { %v3720_v60 = vsub.f32 %v12591_v41, %v9516_v26  ;;  %v3687_v16 = vpop.f32.mrb[113].mxu0 }
0x11b5   : > { %v3718_v58 = vsub.f32 %v12593_v54, %v3687_v16  ;;  %v9517_v21 = vpop.f32.mrb[114].mxu0 }
0x11b6   : > { %v3721_v3 = vsub.f32 %v12595_v43, %v9517_v21  ;;  %v3690_v22 = vpop.f32.mrb[115].mxu0 }
0x11b7   : > { %v3719_v4 = vsub.f32 %v12597_v46, %v3690_v22 }
0x11b8   : > { %v3828_v8 = vpack.c.bf16 %v3721_v3, %v3720_v60 }
0x11b9   : > { %v3827_v29 = vpack.c.bf16 %v3719_v4, %v3718_v58 }
0x11bb   : > { %4086 = vxpose.xlu0.c.b16.start [1/4] (short) (narrow) %v3827_v29, 32  ;;  %v9520_v49 = vpop.f32.mrb[116].mxu0  ;;  %9538 = vmatprep.subr.bf16.mxu0 %v3827_v29 }
0x11bc   : > { %v3724_v17 = vsub.f32 %v12604_v9, %v9520_v49  ;;  %v3703_v31 = vpop.f32.mrb[117].mxu0  ;;  %9539 = vmatpush3.bf16.msra.mxu0 %v3827_v29  ;;  %v4199_v9 = vsel %vm499_vm1, %v12582_v63, 0.0 }
0x11bd   : > { %v3722_v41 = vsub.f32 %v12606_v28, %v3703_v31  ;;  %v9521_v26 = vpop.f32.mrb[118].mxu0  ;;  %9540 = vmatprep.subr.bf16.mxu0 %v3828_v8 }
0x11be   : > { %v3725_v54 = vsub.f32 %v12608_v24, %v9521_v26  ;;  %v3706_v42 = vpop.f32.mrb[119].mxu0  ;;  %v4196_v24 = vsel %vm499_vm1, %v12580_v12, 0.0 }
0x11bf   : > { %v3723_v43 = vsub.f32 %v3613_v32, %v3706_v42  ;;  %4087 = vxpose.xlu0.c.b16.cont [2/4] (short) (narrow) %v3828_v8, 32  ;;  %v12702_v32 = vsel %vm499_vm1, %v12573_v5, 0 }
0x11c0   : > { %v3830_v23 = vpack.c.bf16 %v3725_v54, %v3724_v17  ;;  %9541 = vmatpush3.bf16.msra.mxu0 %v3828_v8 }
0x11c1   : > { %v3829_v46 = vpack.c.bf16 %v3723_v43, %v3722_v41 }
0x11c3   : > { %4088 = vxpose.xlu0.c.b16.cont [3/4] (short) (narrow) %v3829_v46, 32  ;;  %9542 = vmatprep.subr.bf16.mxu0 %v3829_v46 }
0x11c4   : > { %9543 = vmatpush3.bf16.msra.mxu0 %v3829_v46 }
0x11c5   : > { %9544 = vmatprep.subr.bf16.mxu0 %v3830_v23 }
0x11c7   : > { %4089 = vxpose.xlu0.c.b16.end [4/4] (short) (narrow) %v3830_v23, 32 }
0x11c8   : > { %9545 = vmatpush3.bf16.msra.mxu0 %v3830_v23 }
0x11c9   : > { %10184 = vmatprep.subr.msk.bf16.mxu0 %vm499_vm1, %v12432_v39  ;;  %v4205_v39 = vsel %vm499_vm1, %v12586_v19, 0.0 }
0x11cb   : > { %9547 = vmatmul.mubr.msk.bf16.vlgmr.msra.gmra.mrb[120].mxu0 %vm817_vm3, %v3824_v27 }
0x11cc   : > { %9550 = vmatprep.mubr.msk.bf16.mxu0 %vm817_vm3, %v3825_v45 }
0x11d1   : > { %9555 = vmatpush3.bf16.xpose.msra.mxu0 %v12448_v40  ;;  %v4202_v40 = vsel %vm499_vm1, %v12584_v30, 0.0 }
0x11d2   : > { %10185 = vmatprep.subr.msk.bf16.mxu0 %vm499_vm1, %v12452_v47  ;;  %v4208_v47 = vsel %vm499_vm1, %v12588_v38, 0.0  ;;  %v10615_v38 = vld [vmem:[%s11179_s27 + $0x58] sm:$0xff] }
0x11d3   : > { %9551 = vmatmul.mubr.msk.bf16.gmra.mrb[124].mxu0 %vm817_vm3, %v3826_v35  ;;  %v4380_v28 = vmul.f32 %v10615_v38, %v12512_v55 }
0x11d4   : > { %4197 = vadd.xlane.f32.xlu0 %v4196_v24  ;;  %9558 = vmatprep.mubr.msk.bf16.mxu0 %vm499_vm1, %v12400_v33  ;;  %v12664_v33 = vsel %vm499_vm1, %v12569_v10, 0 }
0x11d8   : > { %4200 = vadd.xlane.f32.xlu0 %v4199_v9 }
0x11d9   : > { %9557 = vmatpush3.bf16.xpose.msra.mxu0 %v12546_v15  ;;  %v12671_v15 = vpop.permute.xlu0 %4421 }
0x11da   : > { %10186 = vmatprep.subr.msk.bf16.mxu0 %vm499_vm1, %v12569_v10  ;;  %v12691_v30 = vsel %vm499_vm1, %v12671_v15, 0 }
0x11dc   : > { %4203 = vadd.xlane.f32.xlu0 %v4202_v40 }
0x11dd   : > { %v12676_v63 = vpop.permute.xlu0 %4405 }
0x11e0   : > { %4206 = vadd.xlane.f32.xlu0 %v4205_v39  ;;  %9559 = vmatmul.mubr.msk.bf16.vlgmr.msra.gmra.mrb[120].mxu0 %vm499_vm1, %v12402_v18  ;;  %v4184_v18 = vpop.permute.xlu1 %4183 }
0x11e1   : > { %9562 = vmatprep.mubr.msk.bf16.mxu0 %vm499_vm1, %v12404_v0  ;;  %9579 = vmatpush3.bf16.xpose.msra.mxu0 %v12664_v33  ;;  %v4214_v12 = vsel %vm499_vm1, %v4184_v18, 0.0  ;;  %v12682_v0 = vsel %vm499_vm1, %v12571_v11, 0  ;;  %v12706_v27 = vpop.permute.xlu0 %4409 }
0x11e2   : > { %10187 = vmatprep.subr.msk.bf16.mxu0 %vm499_vm1, %v12571_v11 }
0x11e4   : > { %4209 = vadd.xlane.f32.xlu0 %v4208_v47 }
0x11e8   : > { %4215 = vadd.xlane.f32.xlu0 %v4214_v12  ;;  %9563 = vmatmul.mubr.msk.bf16.gmra.mrb[124].mxu0 %vm499_vm1, %v12406_v57  ;;  %v10614_v57 = vld [vmem:[%s11179_s27 + $0x40] sm:$0xff] }
0x11e9   : > { %9581 = vmatpush3.bf16.xpose.msra.mxu0 %v12682_v0  ;;  %9586 = vmatprep.mubr.msk.bf16.mxu0 %vm499_vm1, %v12676_v63  ;;  %v4379_v19 = vmul.f32 %v10614_v57, %v12502_v62 }
0x11ea   : > { %10188 = vmatprep.subr.msk.bf16.mxu0 %vm499_vm1, %v12671_v15 }
0x11eb   : > { %v4398_v45 = vpack.c.bf16 %v4380_v28, %v4379_v19 }
0x11f1   : > { %9583 = vmatpush3.bf16.xpose.msra.mxu0 %v12691_v30 }
0x11f2   : > { %10189 = vmatprep.subr.msk.bf16.mxu0 %vm499_vm1, %v12573_v5 }
0x11f9   : > { %9585 = vmatpush3.bf16.xpose.msra.mxu0 %v12702_v32 }
0x11fe   : > { %5435 = vrot.lane.b32.xlu0 %v4398_v45, %s10905_s30 }
0x1200   : > { %9587 = vmatmul.mubr.msk.bf16.vlgmr.msra.gmra.mrb[128].mxu0 %vm499_vm1, %v12575_v6 }
0x1201   : > { %9590 = vmatprep.mubr.msk.bf16.mxu0 %vm499_vm1, %v12706_v27 }
0x1208   : > { %9591 = vmatmul.mubr.msk.bf16.gmra.mrb[132].mxu0 %vm499_vm1, %v12577_v36 }
0x1221   : > { %v4094_v62 = vpop.trf.xlu0 }
0x1222   : > { %9574 = vmatprep.mubr.msk.bf16.mxu1 %vm817_vm3, %v4094_v62 }
0x1225   : > { %v4095_v55 = vpop.trf.xlu0 }
0x1226   : > { %9575 = vmatmul.mubr.msk.bf16.vlgmr.msra.gmra.mrb[132].mxu1 %vm817_vm3, %v4095_v55 }
0x12b3   : > { %v12716_v29 = vpop.f32.mrb[120].mxu0 }
0x12b4   : > { %14282 = vst [vmem:[#allocation42_spill] sm:$0xff] %v12716_v29  ;;  %v12718_v14 = vpop.f32.mrb[121].mxu0 }
0x12b5   : > { %14283 = vst [vmem:[#allocation45_spill] sm:$0xff] %v12718_v14  ;;  %v12720_v35 = vpop.f32.mrb[122].mxu0 }
0x12b6   : > { %14284 = vst [vmem:[#allocation46_spill] sm:$0xff] %v12720_v35  ;;  %v12722_v60 = vpop.f32.mrb[123].mxu0  ;;  %v10637_v35 = vld [vmem:[%s11179_s27 + $0xb8] sm:$0xff] }
0x12b7   : > { %14285 = vst [vmem:[#allocation83_spill] sm:$0xff] %v12722_v60 }
0x12bb   : > { %v12724_v16 = vpop.f32.mrb[124].mxu0 }
0x12bc   : > { %14286 = vst [vmem:[#allocation84_spill] sm:$0xff] %v12724_v16  ;;  %v12726_v58 = vpop.f32.mrb[125].mxu0 }
0x12bd   : > { %14287 = vst [vmem:[#allocation85_spill] sm:$0xff] %v12726_v58  ;;  %v12728_v21 = vpop.f32.mrb[126].mxu0 }
0x12be   : > { %14288 = vst [vmem:[#allocation86_spill] sm:$0xff] %v12728_v21  ;;  %v12730_v3 = vpop.f32.mrb[127].mxu0  ;;  %v10636_v21 = vld [vmem:[%s11179_s27 + $0xa0] sm:$0xff] }
0x12bf   : > { %14289 = vst [vmem:[#allocation87_spill] sm:$0xff] %v12730_v3 }
0x12d3   : > { %v9588_v22 = vpop.f32.mrb[128].mxu0 }
0x12d4   : > { %v4516_v4 = vmul.f32 %v9588_v22, %v14239_v53  ;;  %v4483_v8 = vpop.f32.mrb[129].mxu0 }
0x12d5   : > { %v4514_v49 = vmul.f32 %v14240_v1, %v4483_v8  ;;  %v9589_v17 = vpop.f32.mrb[130].mxu0 }
0x12d6   : > { %v4517_v31 = vmul.f32 %v9589_v17, %v14241_v7  ;;  %v4486_v41 = vpop.f32.mrb[131].mxu0  ;;  %v4524_v54 = vsub.f32 0.0, %v4516_v4 }
0x12d7   : > { %v4515_v26 = vmul.f32 %v14242_v13, %v4486_v41  ;;  %v4522_v43 = vsub.f32 0.0, %v4514_v49  ;;  %v10634_v13 = vld [vmem:[%s11179_s27 + $0x70] sm:$0xff] }
0x12d8   : > { %v4525_v42 = vsub.f32 0.0, %v4517_v31  ;;  %v14290_v31 = vld [vmem:[#allocation62_spill] sm:$0xff] }
0x12d9   : > { %v4523_v23 = vsub.f32 0.0, %v4515_v26  ;;  %v12745_v8 = vadd.f32 %v14248_v20, %v4522_v43  ;;  %v12753_v41 = vadd.f32 %v14290_v31, %v4524_v54  ;;  %v14291_v26 = vld [vmem:[#allocation63_spill] sm:$0xff] }
0x12da   : > { %v4539_v46 = vpack.c.bf16 %v4525_v42, %v4524_v54  ;;  %v12748_v49 = vadd.f32 %v14249_v37, %v4525_v42  ;;  %v14292_v42 = vld [vmem:[#allocation64_spill] sm:$0xff] }
0x12db   : > { %v4538_v24 = vpack.c.bf16 %v4523_v23, %v4522_v43  ;;  %v9592_v9 = vpop.f32.mrb[132].mxu0  ;;  %v12742_v4 = vadd.f32 %v14247_v61, %v4523_v23 }
0x12dc   : > { %v4520_v40 = vmul.f32 %v9592_v9, %v14243_v44  ;;  %v4499_v39 = vpop.f32.mrb[133].mxu0  ;;  %v4624_v43 = vpack.c.bf16 %v12748_v49, %v12753_v41  ;;  %v14293_v9 = vld [vmem:[#allocation65_spill] sm:$0xff] }
0x12dd   : > { %v4518_v47 = vmul.f32 %v14244_v56, %v4499_v39  ;;  %v9593_v18 = vpop.f32.mrb[134].mxu0  ;;  %9594 = vmatprep.subr.bf16.mxu1 %v4538_v24  ;;  %9602 = vmatprep.mubr.msk.bf16.mxu1 %vm817_vm3, %v4538_v24  ;;  %v4623_v17 = vpack.c.bf16 %v12742_v4, %v12745_v8  ;;  %v14294_v39 = vld [vmem:[#allocation66_spill] sm:$0xff] }
0x12de   : > { %v4521_v12 = vmul.f32 %v9593_v18, %v14245_v2  ;;  %v4502_v57 = vpop.f32.mrb[135].mxu0  ;;  %9595 = vmatpush3.bf16.msra.mxu1 %v4538_v24  ;;  %v4528_v38 = vsub.f32 0.0, %v4520_v40 }
0x12df   : > { %v4519_v19 = vmul.f32 %v14246_v51, %v4502_v57  ;;  %9596 = vmatprep.subr.bf16.mxu1 %v4539_v46  ;;  %v4526_v45 = vsub.f32 0.0, %v4518_v47  ;;  %v10633_v51 = vld [vmem:[%s11179_s27 + $0x58] sm:$0xff] }
0x12e0   : > { %v4529_v28 = vsub.f32 0.0, %v4521_v12 }
0x12e1   : > { %v4527_v62 = vsub.f32 0.0, %v4519_v19  ;;  %v12763_v24 = vadd.f32 %v14292_v42, %v4526_v45  ;;  %v14295_v19 = vld [vmem:[#allocation80_spill] sm:$0xff] }
0x12e2   : > { %v4541_v55 = vpack.c.bf16 %v4529_v28, %v4528_v38  ;;  %9597 = vmatpush3.bf16.msra.mxu1 %v4539_v46  ;;  %v12766_v54 = vadd.f32 %v14293_v9, %v4529_v28 }
0x12e3   : > { %v4540_v22 = vpack.c.bf16 %v4527_v62, %v4526_v45  ;;  %v12756_v23 = vadd.f32 %v14291_v26, %v4527_v62 }
0x12e5   : > { %9598 = vmatprep.subr.bf16.mxu1 %v4540_v22  ;;  %v4625_v40 = vpack.c.bf16 %v12756_v23, %v12763_v24 }
0x12e6   : > { %9599 = vmatpush3.bf16.msra.mxu1 %v4540_v22 }
0x12e7   : > { %9600 = vmatprep.subr.bf16.mxu1 %v4541_v55 }
0x12ea   : > { %9601 = vmatpush3.bf16.msra.mxu1 %v4541_v55 }
0x12eb   : > { %9610 = vmatprep.subr.bf16.mxu1 %v4623_v17 }
0x12ed   : > { %9603 = vmatmul.mubr.msk.bf16.vlgmr.msra.gmra.mrb[136].mxu1 %vm817_vm3, %v4539_v46  ;;  %v12771_v46 = vadd.f32 %v14294_v39, %v4528_v38  ;;  %v14296_v38 = vld [vmem:[#allocation82_spill] sm:$0xff] }
0x12ee   : > { %9606 = vmatprep.mubr.msk.bf16.mxu1 %vm817_vm3, %v4540_v22  ;;  %9611 = vmatpush3.bf16.msra.mxu1 %v4623_v17 }
0x12ef   : > { %9612 = vmatprep.subr.bf16.mxu1 %v4624_v43  ;;  %v4626_v47 = vpack.c.bf16 %v12766_v54, %v12771_v46 }
0x12f2   : > { %9613 = vmatpush3.bf16.msra.mxu1 %v4624_v43 }
0x12f3   : > { %9614 = vmatprep.subr.bf16.mxu1 %v4625_v40 }
0x12f5   : > { %9607 = vmatmul.mubr.msk.bf16.gmra.mrb[140].mxu1 %vm817_vm3, %v4541_v55  ;;  %v14297_v55 = vld [vmem:[#allocation81_spill] sm:$0xff] }
0x12f6   : > { %9615 = vmatpush3.bf16.msra.mxu1 %v4625_v40 }
0x12f7   : > { %9616 = vmatprep.subr.bf16.mxu1 %v4626_v47 }
0x12f9   : > { %v9576_v18 = vpop.f32.mrb[132].mxu1 }
0x12fa   : > { %9617 = vmatpush3.bf16.msra.mxu1 %v4626_v47  ;;  %v4163_v12 = vadd.f32 %v9576_v18, %v12441_v25  ;;  %v4146_v57 = vpop.f32.mrb[133].mxu1 }
0x12fb   : > { %v4161_v28 = vadd.f32 %v4146_v57, %v14295_v19  ;;  %v9577_v45 = vpop.f32.mrb[134].mxu1 }
0x12fc   : > { %4167 = vst.msk [vmem:[%s11202_s3 + $0x30] sm:$0xff] %vm499_vm1, %v4163_v12  ;;  %v4164_v62 = vadd.f32 %v9577_v45, %v14296_v38  ;;  %v4149_v22 = vpop.f32.mrb[135].mxu1 }
0x12fd   : > { %4165 = vst.msk [vmem:[%s11202_s3 + $0x20] sm:$0xff] %vm499_vm1, %v4161_v28  ;;  %v4162_v17 = vadd.f32 %v4149_v22, %v14297_v55 }
0x12fe   : > { %4168 = vst.msk [vmem:[%s11202_s3 + $0x38] sm:$0xff] %vm499_vm1, %v4164_v62 }
0x12ff   : > { %4166 = vst.msk [vmem:[%s11202_s3 + $0x28] sm:$0xff] %vm499_vm1, %v4162_v17 }
0x13c0   : > { %v9604_v43 = vpop.f32.mrb[136].mxu1 }
0x13c1   : > { %v4588_v40 = vpop.f32.mrb[137].mxu1 }
0x13c2   : > { %v9605_v25 = vpop.f32.mrb[138].mxu1 }
0x13c3   : > { %v4620_v47 = vpack.c.bf16 %v9605_v25, %v9604_v43  ;;  %v4591_v18 = vpop.f32.mrb[139].mxu1 }
0x13c4   : > { %v4619_v57 = vpack.c.bf16 %v4591_v18, %v4588_v40 }
0x13c6   : > { %9618 = vmatprep.mubr.msk.bf16.mxu1 %vm817_vm3, %v4619_v57  ;;  %9626 = vmatprep.subr.bf16.mxu0 %v4619_v57 }
0x13c7   : > { %9634 = vmatprep.mubr.msk.bf16.mxu0 %vm817_vm3, %v4619_v57  ;;  %9619 = vmatmul.mubr.msk.bf16.vlgmr.msra.gmra.mrb[144].mxu1 %vm817_vm3, %v4620_v47 }
0x13c8   : > { %9627 = vmatpush3.bf16.msra.mxu0 %v4619_v57  ;;  %v9608_v12 = vpop.f32.mrb[140].mxu1 }
0x13c9   : > { %9628 = vmatprep.subr.bf16.mxu0 %v4620_v47  ;;  %v4604_v19 = vpop.f32.mrb[141].mxu1 }
0x13ca   : > { %v9609_v28 = vpop.f32.mrb[142].mxu1 }
0x13cb   : > { %v4622_v45 = vpack.c.bf16 %v9609_v28, %v9608_v12  ;;  %v4607_v38 = vpop.f32.mrb[143].mxu1 }
0x13cc   : > { %v4621_v62 = vpack.c.bf16 %v4607_v38, %v4604_v19  ;;  %9629 = vmatpush3.bf16.msra.mxu0 %v4620_v47 }
0x13ce   : > { %9622 = vmatprep.mubr.msk.bf16.mxu1 %vm817_vm3, %v4621_v62  ;;  %9630 = vmatprep.subr.bf16.mxu0 %v4621_v62 }
0x13cf   : > { %9623 = vmatmul.mubr.msk.bf16.gmra.mrb[148].mxu1 %vm817_vm3, %v4622_v45 }
0x13d0   : > { %9631 = vmatpush3.bf16.msra.mxu0 %v4621_v62 }
0x13d1   : > { %9632 = vmatprep.subr.bf16.mxu0 %v4622_v45 }
0x13d4   : > { %9633 = vmatpush3.bf16.msra.mxu0 %v4622_v45 }
0x13d7   : > { %9635 = vmatmul.mubr.msk.bf16.vlgmr.msra.gmra.mrb[136].mxu0 %vm817_vm3, %v4620_v47 }
0x13d8   : > { %9638 = vmatprep.mubr.msk.bf16.mxu0 %vm817_vm3, %v4621_v62 }
0x13df   : > { %9639 = vmatmul.mubr.msk.bf16.gmra.mrb[140].mxu0 %vm817_vm3, %v4622_v45 }
0x149a   : > { %v9620_v22 = vpop.f32.mrb[144].mxu1 }
0x149b   : > { %v4673_v55 = vpop.f32.mrb[145].mxu1  ;;  %v4706_v57 = vadd.f32 %v9620_v22, %v12753_v41 }
0x149c   : > { %v9621_v17 = vpop.f32.mrb[146].mxu1  ;;  %v4704_v40 = vadd.f32 %v4673_v55, %v12745_v8 }
0x149d   : > { %v4676_v43 = vpop.f32.mrb[147].mxu1  ;;  %v4707_v25 = vadd.f32 %v9621_v17, %v12748_v49 }
0x149e   : > { %v4705_v18 = vadd.f32 %v4676_v43, %v12742_v4 }
0x149f   : > { %v4782_v19 = vpack.c.bf16 %v4707_v25, %v4706_v57 }
0x14a0   : > { %v4781_v12 = vpack.c.bf16 %v4705_v18, %v4704_v40 }
0x14a2   : > { %v9624_v28 = vpop.f32.mrb[148].mxu1  ;;  %9642 = vmatprep.subr.bf16.mxu1 %v4781_v12 }
0x14a3   : > { %v4689_v47 = vpop.f32.mrb[149].mxu1  ;;  %9643 = vmatpush3.bf16.msra.mxu1 %v4781_v12  ;;  %v4710_v4 = vadd.f32 %v9624_v28, %v12771_v46 }
0x14a4   : > { %v9625_v38 = vpop.f32.mrb[150].mxu1  ;;  %9644 = vmatprep.subr.bf16.mxu1 %v4782_v19  ;;  %v4708_v62 = vadd.f32 %v4689_v47, %v12763_v24 }
0x14a5   : > { %v4692_v45 = vpop.f32.mrb[151].mxu1  ;;  %v4711_v16 = vadd.f32 %v9625_v38, %v12766_v54 }
0x14a6   : > { %v4709_v8 = vadd.f32 %v4692_v45, %v12756_v23 }
0x14a7   : > { %9645 = vmatpush3.bf16.msra.mxu1 %v4782_v19  ;;  %v4784_v41 = vpack.c.bf16 %v4711_v16, %v4710_v4 }
0x14a8   : > { %v4783_v49 = vpack.c.bf16 %v4709_v8, %v4708_v62 }
0x14aa   : > { %v9636_v22 = vpop.f32.mrb[136].mxu0  ;;  %9646 = vmatprep.subr.bf16.mxu1 %v4783_v49 }
0x14ab   : > { %v4746_v55 = vpop.f32.mrb[137].mxu0  ;;  %9647 = vmatpush3.bf16.msra.mxu1 %v4783_v49 }
0x14ac   : > { %v9637_v17 = vpop.f32.mrb[138].mxu0  ;;  %9648 = vmatprep.subr.bf16.mxu1 %v4784_v41 }
0x14ad   : > { %v4778_v43 = vpack.c.bf16 %v9637_v17, %v9636_v22  ;;  %v4749_v12 = vpop.f32.mrb[139].mxu0 }
0x14ae   : > { %v4777_v58 = vpack.c.bf16 %v4749_v12, %v4746_v55 }
0x14af   : > { %9649 = vmatpush3.bf16.msra.mxu1 %v4784_v41 }
0x14b0   : > { %9650 = vmatprep.mubr.msk.bf16.mxu1 %vm817_vm3, %v4777_v58  ;;  %9658 = vmatprep.subr.bf16.mxu0 %v4777_v58 }
0x14b1   : > { %9666 = vmatprep.mubr.msk.bf16.mxu0 %vm817_vm3, %v4777_v58  ;;  %9659 = vmatpush3.bf16.msra.mxu0 %v4777_v58 }
0x14b2   : > { %v9640_v23 = vpop.f32.mrb[140].mxu0  ;;  %9660 = vmatprep.subr.bf16.mxu0 %v4778_v43  ;;  %9651 = vmatmul.mubr.msk.bf16.vlgmr.msra.gmra.mrb[152].mxu1 %vm817_vm3, %v4778_v43 }
0x14b3   : > { %v4762_v24 = vpop.f32.mrb[141].mxu0 }
0x14b4   : > { %v9641_v54 = vpop.f32.mrb[142].mxu0 }
0x14b5   : > { %v4780_v46 = vpack.c.bf16 %v9641_v54, %v9640_v23  ;;  %v4765_v19 = vpop.f32.mrb[143].mxu0  ;;  %9661 = vmatpush3.bf16.msra.mxu0 %v4778_v43 }
0x14b6   : > { %v4779_v28 = vpack.c.bf16 %v4765_v19, %v4762_v24 }
0x14b8   : > { %9654 = vmatprep.mubr.msk.bf16.mxu1 %vm817_vm3, %v4779_v28  ;;  %9662 = vmatprep.subr.bf16.mxu0 %v4779_v28 }
0x14b9   : > { %9663 = vmatpush3.bf16.msra.mxu0 %v4779_v28 }
0x14ba   : > { %9664 = vmatprep.subr.bf16.mxu0 %v4780_v46  ;;  %9655 = vmatmul.mubr.msk.bf16.gmra.mrb[156].mxu1 %vm817_vm3, %v4780_v46 }
0x14bd   : > { %9665 = vmatpush3.bf16.msra.mxu0 %v4780_v46 }
0x14c0   : > { %9667 = vmatmul.mubr.msk.bf16.vlgmr.msra.gmra.mrb[144].mxu0 %vm817_vm3, %v4778_v43 }
0x14c1   : > { %9670 = vmatprep.mubr.msk.bf16.mxu0 %vm817_vm3, %v4779_v28 }
0x14c8   : > { %9671 = vmatmul.mubr.msk.bf16.gmra.mrb[148].mxu0 %vm817_vm3, %v4780_v46 }
0x1585   : > { %v9652_v58 = vpop.f32.mrb[152].mxu1 }
0x1586   : > { %v4831_v47 = vpop.f32.mrb[153].mxu1  ;;  %v4864_v55 = vadd.f32 %v9652_v58, %v4706_v57 }
0x1587   : > { %v9653_v38 = vpop.f32.mrb[154].mxu1  ;;  %v4862_v49 = vadd.f32 %v4831_v47, %v4704_v40 }
0x1588   : > { %v4834_v45 = vpop.f32.mrb[155].mxu1  ;;  %v4865_v41 = vadd.f32 %v9653_v38, %v4707_v25 }
0x1589   : > { %v4863_v22 = vadd.f32 %v4834_v45, %v4705_v18 }
0x158a   : > { %v4940_v12 = vpack.c.bf16 %v4865_v41, %v4864_v55 }
0x158b   : > { %v4939_v17 = vpack.c.bf16 %v4863_v22, %v4862_v49 }
0x158d   : > { %v9656_v23 = vpop.f32.mrb[156].mxu1  ;;  %9674 = vmatprep.subr.bf16.mxu1 %v4939_v17 }
0x158e   : > { %v4847_v24 = vpop.f32.mrb[157].mxu1  ;;  %9675 = vmatpush3.bf16.msra.mxu1 %v4939_v17  ;;  %v4868_v29 = vadd.f32 %v9656_v23, %v4710_v4 }
0x158f   : > { %v9657_v54 = vpop.f32.mrb[158].mxu1  ;;  %9676 = vmatprep.subr.bf16.mxu1 %v4940_v12  ;;  %v4866_v19 = vadd.f32 %v4847_v24, %v4708_v62 }
0x1590   : > { %v4850_v43 = vpop.f32.mrb[159].mxu1  ;;  %v4869_v28 = vadd.f32 %v9657_v54, %v4711_v16 }
0x1591   : > { %v4867_v46 = vadd.f32 %v4850_v43, %v4709_v8 }
0x1592   : > { %9677 = vmatpush3.bf16.msra.mxu1 %v4940_v12  ;;  %v4942_v25 = vpack.c.bf16 %v4869_v28, %v4868_v29 }
0x1593   : > { %v4941_v14 = vpack.c.bf16 %v4867_v46, %v4866_v19  ;;  %v9668_v39 = vpop.f32.mrb[144].mxu0 }
0x1594   : > { %v4904_v40 = vpop.f32.mrb[145].mxu0 }
0x1595   : > { %v9669_v18 = vpop.f32.mrb[146].mxu0  ;;  %9678 = vmatprep.subr.bf16.mxu1 %v4941_v14 }
0x1596   : > { %v4936_v57 = vpack.c.bf16 %v9669_v18, %v9668_v39  ;;  %v4907_v58 = vpop.f32.mrb[147].mxu0  ;;  %9679 = vmatpush3.bf16.msra.mxu1 %v4941_v14 }
0x1597   : > { %v4935_v47 = vpack.c.bf16 %v4907_v58, %v4904_v40  ;;  %9680 = vmatprep.subr.bf16.mxu1 %v4942_v25 }
0x1599   : > { %9682 = vmatprep.mubr.msk.bf16.mxu1 %vm817_vm3, %v4935_v47  ;;  %9690 = vmatprep.subr.bf16.mxu0 %v4935_v47 }
0x159a   : > { %9698 = vmatprep.mubr.msk.bf16.mxu0 %vm817_vm3, %v4935_v47  ;;  %9691 = vmatpush3.bf16.msra.mxu0 %v4935_v47 }
0x159b   : > { %v9672_v16 = vpop.f32.mrb[148].mxu0  ;;  %9681 = vmatpush3.bf16.msra.mxu1 %v4942_v25  ;;  %9692 = vmatprep.subr.bf16.mxu0 %v4936_v57 }
0x159c   : > { %v4920_v62 = vpop.f32.mrb[149].mxu0 }
0x159d   : > { %v9673_v8 = vpop.f32.mrb[150].mxu0 }
0x159e   : > { %v4938_v4 = vpack.c.bf16 %v9673_v8, %v9672_v16  ;;  %v4923_v38 = vpop.f32.mrb[151].mxu0  ;;  %9683 = vmatmul.mubr.msk.bf16.vlgmr.msra.gmra.mrb[160].mxu1 %vm817_vm3, %v4936_v57  ;;  %9693 = vmatpush3.bf16.msra.mxu0 %v4936_v57 }
0x159f   : > { %v4937_v39 = vpack.c.bf16 %v4923_v38, %v4920_v62 }
0x15a1   : > { %9686 = vmatprep.mubr.msk.bf16.mxu1 %vm817_vm3, %v4937_v39  ;;  %9694 = vmatprep.subr.bf16.mxu0 %v4937_v39 }
0x15a2   : > { %9695 = vmatpush3.bf16.msra.mxu0 %v4937_v39 }
0x15a3   : > { %9696 = vmatprep.subr.bf16.mxu0 %v4938_v4 }
0x15a6   : > { %9687 = vmatmul.mubr.msk.bf16.gmra.mrb[164].mxu1 %vm817_vm3, %v4938_v4  ;;  %9697 = vmatpush3.bf16.msra.mxu0 %v4938_v4 }
0x15a9   : > { %9699 = vmatmul.mubr.msk.bf16.vlgmr.msra.gmra.mrb[152].mxu0 %vm817_vm3, %v4936_v57 }
0x15aa   : > { %9702 = vmatprep.mubr.msk.bf16.mxu0 %vm817_vm3, %v4937_v39 }
0x15b1   : > { %9703 = vmatmul.mubr.msk.bf16.gmra.mrb[156].mxu0 %vm817_vm3, %v4938_v4 }
0x1671   : > { %v9684_v14 = vpop.f32.mrb[160].mxu1 }
0x1672   : > { %v4989_v45 = vpop.f32.mrb[161].mxu1  ;;  %v12826_v43 = vadd.f32 %v9684_v14, %v4864_v55 }
0x1673   : > { %v9685_v17 = vpop.f32.mrb[162].mxu1  ;;  %v12820_v23 = vadd.f32 %v4989_v45, %v4862_v49 }
0x1674   : > { %v4992_v12 = vpop.f32.mrb[163].mxu1  ;;  %v12822_v24 = vadd.f32 %v9685_v17, %v4865_v41 }
0x1675   : > { %v12824_v54 = vadd.f32 %v4992_v12, %v4863_v22 }
0x1676   : > { %v5098_v25 = vpack.c.bf16 %v12822_v24, %v12826_v43 }
0x1677   : > { %v5097_v40 = vpack.c.bf16 %v12824_v54, %v12820_v23 }
0x1679   : > { %v9688_v18 = vpop.f32.mrb[164].mxu1  ;;  %9706 = vmatprep.subr.bf16.mxu1 %v5097_v40 }
0x167a   : > { %v5005_v57 = vpop.f32.mrb[165].mxu1  ;;  %9707 = vmatpush3.bf16.msra.mxu1 %v5097_v40  ;;  %v12840_v39 = vadd.f32 %v9688_v18, %v4868_v29  ;;  %v4198_v40 = vpop.xlane.xlu0 %4197 }
0x167b   : > { %v9689_v58 = vpop.f32.mrb[166].mxu1  ;;  %9708 = vmatprep.subr.bf16.mxu1 %v5098_v25  ;;  %v12832_v41 = vadd.f32 %v5005_v57, %v4866_v19  ;;  %v4195_v57 = vpop.xlane.xlu1 %4194  ;;  %vm4266_vm11 = vcmp.gt.f32.partialorder %v4198_v40, 0.0 }
0x167c   : > { %v5008_v49 = vpop.f32.mrb[167].mxu1  ;;  %v9700_v47 = vpop.f32.mrb[152].mxu0  ;;  %v12836_v16 = vadd.f32 %v9689_v58, %v4869_v28  ;;  %10472 = vrsqrt.f32 %v4195_v57  ;;  %vm4265_vm10 = vcmp.gt.f32.partialorder %v4195_v57, 0.0 }
0x167d   : > { %v12834_v22 = vadd.f32 %v5008_v49, %v4867_v46  ;;  %v5062_v55 = vpop.f32.mrb[153].mxu0 }
0x167e   : > { %v9701_v62 = vpop.f32.mrb[154].mxu0  ;;  %9709 = vmatpush3.bf16.msra.mxu1 %v5098_v25  ;;  %v5100_v19 = vpack.c.bf16 %v12836_v16, %v12840_v39  ;;  %v4201_v25 = vpop.xlane.xlu0 %4200 }
0x167f   : > { %v5099_v8 = vpack.c.bf16 %v12834_v22, %v12832_v41  ;;  %v5094_v4 = vpack.c.bf16 %v9701_v62, %v9700_v47  ;;  %v5065_v38 = vpop.f32.mrb[155].mxu0  ;;  %vm4267_vm12 = vcmp.gt.f32.partialorder %v4201_v25, 0.0 }
0x1680   : > { %v5093_v14 = vpack.c.bf16 %v5065_v38, %v5062_v55 }
0x1681   : > { %9710 = vmatprep.subr.bf16.mxu1 %v5099_v8 }
0x1682   : > { %9711 = vmatpush3.bf16.msra.mxu1 %v5099_v8  ;;  %9714 = vmatprep.mubr.msk.bf16.mxu1 %vm817_vm3, %v5093_v14  ;;  %v4204_v18 = vpop.xlane.xlu0 %4203 }
0x1683   : > { %9722 = vmatprep.subr.bf16.mxu0 %v5093_v14  ;;  %9730 = vmatprep.mubr.msk.bf16.mxu0 %vm817_vm3, %v5093_v14  ;;  %vm4268_vm13 = vcmp.gt.f32.partialorder %v4204_v18, 0.0 }
0x1684   : > { %9712 = vmatprep.subr.bf16.mxu1 %v5100_v19  ;;  %9723 = vmatpush3.bf16.msra.mxu0 %v5093_v14  ;;  %v9704_v28 = vpop.f32.mrb[156].mxu0 }
0x1685   : > { %9724 = vmatprep.subr.bf16.mxu0 %v5094_v4  ;;  %v5078_v46 = vpop.f32.mrb[157].mxu0 }
0x1686   : > { %v9705_v45 = vpop.f32.mrb[158].mxu0  ;;  %9713 = vmatpush3.bf16.msra.mxu1 %v5100_v19  ;;  %v4207_v58 = vpop.xlane.xlu0 %4206 }
0x1687   : > { %v5096_v29 = vpack.c.bf16 %v9705_v45, %v9704_v28  ;;  %v5081_v17 = vpop.f32.mrb[159].mxu0  ;;  %vm4269_vm15 = vcmp.gt.f32.partialorder %v4207_v58, 0.0 }
0x1688   : > { %v5095_v12 = vpack.c.bf16 %v5081_v17, %v5078_v46  ;;  %9725 = vmatpush3.bf16.msra.mxu0 %v5094_v4 }
0x1689   : > { %9715 = vmatmul.mubr.msk.bf16.vlgmr.msra.gmra.mrb[168].mxu1 %vm817_vm3, %v5094_v4 }
0x168a   : > { %9718 = vmatprep.mubr.msk.bf16.mxu1 %vm817_vm3, %v5095_v12  ;;  %9726 = vmatprep.subr.bf16.mxu0 %v5095_v12  ;;  %v4210_v49 = vpop.xlane.xlu0 %4209 }
0x168b   : > { %vm4270_vm0 = vcmp.gt.f32.partialorder %v4210_v49, 0.0 }
0x168c   : > { %9727 = vmatpush3.bf16.msra.mxu0 %v5095_v12 }
0x168d   : > { %9728 = vmatprep.subr.bf16.mxu0 %v5096_v29 }
0x1690   : > { %9729 = vmatpush3.bf16.msra.mxu0 %v5096_v29 }
0x1691   : > { %9754 = vmatprep.subr.bf16.mxu0 %v12676_v63  ;;  %9719 = vmatmul.mubr.msk.bf16.gmra.mrb[172].mxu1 %vm817_vm3, %v5096_v29 }
0x1693   : > { %9731 = vmatmul.mubr.msk.bf16.vlgmr.msra.gmra.mrb[160].mxu0 %vm817_vm3, %v5094_v4 }
0x1694   : > { %9734 = vmatprep.mubr.msk.bf16.mxu0 %vm817_vm3, %v5095_v12  ;;  %9755 = vmatpush3.bf16.msra.mxu0 %v12676_v63  ;;  %v4213_v63 = vpop.xlane.xlu1 %4212 }
0x1695   : > { %9756 = vmatprep.subr.bf16.mxu0 %v12575_v6  ;;  %10474 = vrsqrt.f32 %v4213_v63  ;;  %vm4271_vm14 = vcmp.gt.f32.partialorder %v4213_v63, 0.0 }
0x1696   : > { %10476 = vrsqrt.f32 %v4198_v40 }
0x1697   : > { %10478 = vrsqrt.f32 %v4201_v25 }
0x1698   : > { %9757 = vmatpush3.bf16.msra.mxu0 %v12575_v6  ;;  %10480 = vrsqrt.f32 %v4204_v18  ;;  %v4216_v6 = vpop.xlane.xlu0 %4215  ;;  %v12865_v18 = vld [vmem:[%s11179_s27 + $0x18] sm:$0xff] }
0x1699   : > { %9758 = vmatprep.subr.bf16.mxu0 %v12706_v27  ;;  %10482 = vrsqrt.f32 %v4207_v58  ;;  %vm4272_vm2 = vcmp.gt.f32.partialorder %v4216_v6, 0.0  ;;  %v12869_v58 = vld [vmem:[%s11179_s27 + $0x30] sm:$0xff] }
0x169a   : > { %10484 = vrsqrt.f32 %v4210_v49  ;;  %v12873_v49 = vld [vmem:[%s11179_s27 + $0x48] sm:$0xff] }
0x169b   : > { %9735 = vmatmul.mubr.msk.bf16.gmra.mrb[164].mxu0 %vm817_vm3, %v5096_v29  ;;  %10486 = vrsqrt.f32 %v4216_v6  ;;  %v12861_v29 = vld [vmem:[%s11179_s27] sm:$0xff] }
0x169c   : > { %9759 = vmatpush3.bf16.msra.mxu0 %v12706_v27  ;;  %v10473_v27 = vpop.eup %10472 }
0x169d   : > { %9760 = vmatprep.subr.bf16.mxu0 %v12577_v36  ;;  %v4281_v14 = vsel %vm4265_vm10, %v10473_v27, 0.0  ;;  %v12877_v27 = vld [vmem:[%s11179_s27 + $0x90] sm:$0xff] }
0x169e   : > { %v4289_v17 = vmul.f32 %v12861_v29, %v4281_v14 }
0x169f   : > { %v10475_v47 = vpop.eup %10474 }
0x16a0   : > { %9761 = vmatpush3.bf16.msra.mxu0 %v12577_v36  ;;  %v10477_v55 = vpop.eup %10476  ;;  %v4287_v45 = vsel %vm4271_vm14, %v10475_v47, 0.0  ;;  %v4297_v14 = vmul.f32 0.17677669, %v4289_v17  ;;  %v14298_v17 = vld [vmem:[#allocation27_spill] sm:$0xff] }
0x16a1   : > { %v10479_v36 = vpop.eup %10478  ;;  %v4282_v19 = vsel %vm4266_vm11, %v10477_v55, 0.0  ;;  %v4295_v47 = vmul.f32 %v12877_v27, %v4287_v45  ;;  %v12881_v55 = vld [vmem:[%s11179_s27 + $0x60] sm:$0xff] }
0x16a2   : > { %v10481_v62 = vpop.eup %10480  ;;  %v4283_v28 = vsel %vm4267_vm12, %v10479_v36, 0.0  ;;  %v4290_v57 = vmul.f32 %v12865_v18, %v4282_v19 }
0x16a3   : > { %v10483_v8 = vpop.eup %10482  ;;  %v4284_v46 = vsel %vm4268_vm13, %v10481_v62, 0.0  ;;  %v4291_v63 = vmul.f32 %v12869_v58, %v4283_v28  ;;  %v12885_v62 = vld [vmem:[%s11179_s27 + $0x78] sm:$0xff]  ;;  %v4303_v9 = vmul.f32 0.17677669, %v4295_v47 }
0x16a4   : > { %v10485_v4 = vpop.eup %10484  ;;  %v4285_v12 = vsel %vm4269_vm15, %v10483_v8, 0.0  ;;  %v4292_v6 = vmul.f32 %v12873_v49, %v4284_v46  ;;  %v4298_v19 = vmul.f32 0.17677669, %v4290_v57  ;;  %v14300_v57 = vld [vmem:[#allocation26_spill] sm:$0xff] }
0x16a5   : > { %v10487_v38 = vpop.eup %10486  ;;  %v4286_v40 = vsel %vm4270_vm0, %v10485_v4, 0.0  ;;  %v4293_v36 = vmul.f32 %v12881_v55, %v4285_v12  ;;  %v12889_v4 = vld [vmem:[%s11179_s27 + $0xa8] sm:$0xff]  ;;  %v4299_v28 = vmul.f32 0.17677669, %v4291_v63 }
0x16a6   : > { %v4288_v25 = vsel %vm4272_vm2, %v10487_v38, 0.0  ;;  %v4294_v8 = vmul.f32 %v12885_v62, %v4286_v40  ;;  %v4300_v46 = vmul.f32 0.17677669, %v4292_v6  ;;  %v4385_v31 = vpack.c.bf16 %v4298_v19, %v4297_v14 }
0x16a7   : > { %v4296_v38 = vmul.f32 %v12889_v4, %v4288_v25  ;;  %v4301_v42 = vmul.f32 0.17677669, %v4293_v36  ;;  %v14299_v25 = vld [vmem:[#allocation29_spill] sm:$0xff] }
0x16a8   : > { %v4302_v26 = vmul.f32 0.17677669, %v4294_v8  ;;  %v4386_v37 = vpack.c.bf16 %v4300_v46, %v4299_v28  ;;  %5615 = vrot.lane.b32.xlu0 %v4385_v31, %s10905_s30  ;;  %v14301_v31 = vld [vmem:[#allocation28_spill] sm:$0xff] }
0x16a9   : > { %v4304_v45 = vmul.f32 0.17677669, %v4296_v38 }
0x16aa   : > { %5617 = vrot.lane.b32.xlu1 %v4386_v37, %s10905_s30  ;;  %v4387_v12 = vpack.c.bf16 %v4302_v26, %v4301_v42  ;;  %v14302_v37 = vld [vmem:[#allocation31_spill] sm:$0xff]  ;;  %v14303_v26 = vld [vmem:[#allocation30_spill] sm:$0xff]  ;;  %v14304_v42 = vld [vmem:[#allocation33_spill] sm:$0xff] }
0x16ab   : > { %v4388_v40 = vpack.c.bf16 %v4304_v45, %v4303_v9  ;;  %v14305_v9 = vld [vmem:[#allocation32_spill] sm:$0xff] }
0x16ac   : > { %5619 = vrot.lane.b32.xlu0 %v4387_v12, %s10905_s30 }
0x16ae   : > { %5621 = vrot.lane.b32.xlu1 %v4388_v40, %s10905_s30 }
0x16b0   : > { %6102 = vrot.lane.b32.xlu0 %v14298_v17, %s10907_s20 }
0x16b2   : > { %6104 = vrot.lane.b32.xlu1 %v14299_v25, %s10907_s20 }
0x16b4   : > { %6106 = vrot.lane.b32.xlu0 %v14300_v57, %s10907_s20 }
0x16b6   : > { %6108 = vrot.lane.b32.xlu1 %v14301_v31, %s10907_s20 }
0x16b8   : > { %6110 = vrot.lane.b32.xlu0 %v14302_v37, %s10907_s20 }
0x16ba   : > { %6112 = vrot.lane.b32.xlu1 %v14303_v26, %s10907_s20 }
0x16bc   : > { %6114 = vrot.lane.b32.xlu0 %v14304_v42, %s10907_s20 }
0x16be   : > { %6116 = vrot.lane.b32.xlu1 %v14305_v9, %s10907_s20 }
0x175c   : > { %v9716_v63 = vpop.f32.mrb[168].mxu1 }
0x175d   : > { %v5147_v6 = vpop.f32.mrb[169].mxu1  ;;  %v12922_v19 = vadd.f32 %v9716_v63, %v12826_v43 }
0x175e   : > { %v9717_v47 = vpop.f32.mrb[170].mxu1  ;;  %v12913_v8 = vadd.f32 %v5147_v6, %v12820_v23  ;;  %v5434_v6 = vpop.permute.xlu1 %5433 }
0x175f   : > { %v5150_v36 = vpop.f32.mrb[171].mxu1  ;;  %v12916_v38 = vadd.f32 %v9717_v47, %v12822_v24 }
0x1760   : > { %v12919_v14 = vadd.f32 %v5150_v36, %v12824_v54 }
0x1761   : > { %v5256_v46 = vpack.c.bf16 %v12916_v38, %v12922_v19 }
0x1762   : > { %v5255_v28 = vpack.c.bf16 %v12919_v14, %v12913_v8 }
0x1764   : > { %v9720_v45 = vpop.f32.mrb[172].mxu1  ;;  %9738 = vmatprep.subr.bf16.mxu1 %v5255_v28 }
0x1765   : > { %v5163_v12 = vpop.f32.mrb[173].mxu1  ;;  %9739 = vmatpush3.bf16.msra.mxu1 %v5255_v28  ;;  %v12938_v26 = vadd.f32 %v9720_v45, %v12840_v39  ;;  %v5436_v28 = vpop.permute.xlu0 %5435 }
0x1766   : > { %v9732_v23 = vpop.f32.mrb[160].mxu0  ;;  %v9721_v40 = vpop.f32.mrb[174].mxu1  ;;  %9740 = vmatprep.subr.bf16.mxu1 %v5256_v46  ;;  %v12929_v54 = vadd.f32 %v5163_v12, %v12832_v41 }
0x1767   : > { %v5220_v24 = vpop.f32.mrb[161].mxu0  ;;  %v5166_v17 = vpop.f32.mrb[175].mxu1  ;;  %v12932_v43 = vadd.f32 %v9721_v40, %v12836_v16 }
0x1768   : > { %v12935_v25 = vadd.f32 %v5166_v17, %v12834_v22  ;;  %v9733_v57 = vpop.f32.mrb[162].mxu0 }
0x1769   : > { %v5252_v31 = vpack.c.bf16 %v9733_v57, %v9732_v23  ;;  %v5223_v37 = vpop.f32.mrb[163].mxu0  ;;  %9741 = vmatpush3.bf16.msra.mxu1 %v5256_v46  ;;  %v5258_v41 = vpack.c.bf16 %v12932_v43, %v12938_v26  ;;  %v5438_v46 = vpop.permute.xlu1 %5437 }
0x176a   : > { %v5257_v42 = vpack.c.bf16 %v12935_v25, %v12929_v54  ;;  %v5251_v9 = vpack.c.bf16 %v5223_v37, %v5220_v24  ;;  %v12950_v12 = vpop.permute.xlu0 %5615 }
0x176c   : > { %9746 = vmatprep.mubr.msk.bf16.mxu1 %vm817_vm3, %v5251_v9  ;;  %9742 = vmatprep.subr.bf16.mxu1 %v5257_v42 }
0x176d   : > { %9743 = vmatpush3.bf16.msra.mxu1 %v5257_v42  ;;  %v5440_v45 = vpop.permute.xlu1 %5439 }
0x176e   : > { %v9736_v22 = vpop.f32.mrb[164].mxu0  ;;  %9744 = vmatprep.subr.bf16.mxu1 %v5258_v41  ;;  %v12954_v40 = vpop.permute.xlu0 %5619 }
0x176f   : > { %v5236_v16 = vpop.f32.mrb[165].mxu0 }
0x1770   : > { %v9737_v63 = vpop.f32.mrb[166].mxu0 }
0x1771   : > { %v5254_v47 = vpack.c.bf16 %v9737_v63, %v9736_v22  ;;  %v5239_v36 = vpop.f32.mrb[167].mxu0  ;;  %9745 = vmatpush3.bf16.msra.mxu1 %v5258_v41  ;;  %v12952_v23 = vpop.permute.xlu1 %5617 }
0x1772   : > { %v5253_v39 = vpack.c.bf16 %v5239_v36, %v5236_v16  ;;  %9770 = vmatprep.subr.bf16.mxu1 %v5434_v6  ;;  %v6103_v17 = vpop.permute.xlu0 %6102 }
0x1773   : > { %v6126_v37 = vsel %vm499_vm1, %v6103_v17, 0.0  ;;  %v14306_v17 = vld [vmem:[#allocation36_spill] sm:$0xff] }
0x1774   : > { %9747 = vmatmul.mubr.msk.bf16.vlgmr.msra.gmra.mrb[176].mxu1 %vm817_vm3, %v5252_v31  ;;  %6127 = vadd.xlane.f32.xlu0 %v6126_v37  ;;  %v14309_v37 = vld [vmem:[#allocation38_spill] sm:$0xff] }
0x1775   : > { %9750 = vmatprep.mubr.msk.bf16.mxu1 %vm817_vm3, %v5253_v39  ;;  %9771 = vmatpush3.bf16.msra.mxu1 %v5434_v6  ;;  %v12956_v24 = vpop.permute.xlu1 %5621 }
0x1776   : > { %9772 = vmatprep.subr.bf16.mxu1 %v5436_v28  ;;  %v6107_v31 = vpop.permute.xlu0 %6106 }
0x1777   : > { %v6132_v22 = vsel %vm499_vm1, %v6107_v31, 0.0  ;;  %v14308_v31 = vld [vmem:[#allocation37_spill] sm:$0xff] }
0x1778   : > { %6133 = vadd.xlane.f32.xlu0 %v6132_v22  ;;  %v14313_v22 = vld [vmem:[#allocation41_spill] sm:$0xff] }
0x1779   : > { %9773 = vmatpush3.bf16.msra.mxu1 %v5436_v28  ;;  %v6105_v57 = vpop.permute.xlu1 %6104 }
0x177a   : > { %9774 = vmatprep.subr.bf16.mxu1 %v5438_v46  ;;  %v6129_v42 = vsel %vm499_vm1, %v6105_v57, 0.0  ;;  %v6111_v9 = vpop.permute.xlu0 %6110  ;;  %v14307_v57 = vld [vmem:[#allocation35_spill] sm:$0xff] }
0x177b   : > { %6130 = vadd.xlane.f32.xlu1 %v6129_v42  ;;  %v6138_v41 = vsel %vm499_vm1, %v6111_v9, 0.0  ;;  %v14310_v42 = vld [vmem:[#allocation34_spill] sm:$0xff]  ;;  %v14311_v9 = vld [vmem:[#allocation39_spill] sm:$0xff] }
0x177c   : > { %9751 = vmatmul.mubr.msk.bf16.gmra.mrb[180].mxu1 %vm817_vm3, %v5254_v47 }
0x177d   : > { %9775 = vmatpush3.bf16.msra.mxu1 %v5438_v46  ;;  %v6109_v16 = vpop.permute.xlu1 %6108 }
0x177e   : > { %9776 = vmatprep.subr.bf16.mxu1 %v5440_v45  ;;  %v6135_v63 = vsel %vm499_vm1, %v6109_v16, 0.0  ;;  %v6115_v6 = vpop.permute.xlu0 %6114  ;;  %v12975_v16 = vld [vmem:[%s11202_s3 + $0x40] sm:$0xff] }
0x177f   : > { %6139 = vadd.xlane.f32.xlu1 %v6138_v41  ;;  %v6144_v47 = vsel %vm499_vm1, %v6115_v6, 0.0  ;;  %6136 = vadd.xlane.f32.xlu0 %v6135_v63  ;;  %v14312_v41 = vld [vmem:[#allocation40_spill] sm:$0xff]  ;;  %14314 = vst [vmem:[#allocation80_spill] sm:$0xff] %v12975_v16  ;;  %v12978_v63 = vld [vmem:[%s11202_s3 + $0x48] sm:$0xff] }
0x1780   : > { %14315 = vst [vmem:[#allocation82_spill] sm:$0xff] %v12978_v63  ;;  %v12982_v6 = vpack.c.bf16 %v12978_v63, %v12975_v16 }
0x1781   : > { %9777 = vmatpush3.bf16.msra.mxu1 %v5440_v45  ;;  %v6113_v36 = vpop.permute.xlu1 %6112  ;;  %v10908_v45 = vmov 3  }
0x1782   : > { %10192 = vmatprep.subr.msk.bf16.mxu1 %vm499_vm1, %v12569_v10  ;;  %v6141_v39 = vsel %vm499_vm1, %v6113_v36, 0.0  ;;  %10358 = vset.pattern.permute.xlu1 %v10908_v45 }
0x1783   : > { %6145 = vadd.xlane.f32.xlu1 %v6144_v47  ;;  %6142 = vadd.xlane.f32.xlu0 %v6141_v39 }
0x1784   : > { %10359 = vset.pattern.permute.xlu0 %v10908_v45  ;;  %10190 = vmatprep.subr.msk.bf16.mxu0 %vm499_vm1, %v12982_v6 }
0x1785   : > { %v6117_v28 = vpop.permute.xlu1 %6116 }
0x1786   : > { %v6147_v46 = vsel %vm499_vm1, %v6117_v28, 0.0 }
0x1787   : > { %6148 = vadd.xlane.f32.xlu0 %v6147_v46 }
0x1794   : > { %6223 = vperm.xlu1 %10358, %v14306_v17  }
0x1798   : > { %6231 = vperm.xlu1 %10358, %v14307_v57  }
0x179c   : > { %6235 = vperm.xlu1 %10358, %v14308_v31   ;;  %v12991_v31 = vld [vmem:[%s11202_s3 + $0x50] sm:$0xff] }
0x179d   : > { %6227 = vperm.xlu0 %10359, %v14310_v42   ;;  %14316 = vst [vmem:[#allocation81_spill] sm:$0xff] %v12991_v31 }
0x17a0   : > { %6239 = vperm.xlu1 %10358, %v14309_v37   ;;  %v12994_v37 = vld [vmem:[%s11202_s3 + $0x58] sm:$0xff] }
0x17a1   : > { %14317 = vst [vmem:[#allocation27_spill] sm:$0xff] %v12994_v37 }
0x17a4   : > { %6243 = vperm.xlu1 %10358, %v14311_v9  }
0x17a8   : > { %6247 = vperm.xlu1 %10358, %v14312_v41   ;;  %v12998_v41 = vsel %vm499_vm1, %v12982_v6, 0 }
0x17ac   : > { %6251 = vperm.xlu1 %10358, %v14313_v22  }
0x1847   : > { %v9748_v47 = vpop.f32.mrb[176].mxu1 }
0x1848   : > { %v5305_v36 = vpop.f32.mrb[177].mxu1  ;;  %v5338_v28 = vadd.f32 %v9748_v47, %v12922_v19  ;;  %v13002_v19 = vpack.c.bf16 %v12994_v37, %v12991_v31 }
0x1849   : > { %v9749_v39 = vpop.f32.mrb[178].mxu1  ;;  %v5336_v17 = vadd.f32 %v5305_v36, %v12913_v8 }
0x184a   : > { %v5339_v46 = vadd.f32 %v9749_v39, %v12916_v38  ;;  %v5308_v45 = vpop.f32.mrb[179].mxu1 }
0x184b   : > { %v5337_v57 = vadd.f32 %v5308_v45, %v12919_v14 }
0x184c   : > { %v5345_v42 = vpack.c.bf16 %v5339_v46, %v5338_v28 }
0x184d   : > { %v5344_v9 = vpack.c.bf16 %v5337_v57, %v5336_v17 }
0x184f   : > { %v9752_v38 = vpop.f32.mrb[180].mxu1  ;;  %9762 = vmatprep.mubr.msk.bf16.mxu0 %vm817_vm3, %v5344_v9  ;;  %9778 = vmatprep.mubr.msk.bf16.mxu1 %vm817_vm3, %v5344_v9  ;;  %v10624_v9 = vld [vmem:[%s11179_s27 + $0x8] sm:$0xff] }
0x1850   : > { %v5321_v8 = vpop.f32.mrb[181].mxu1  ;;  %9763 = vmatmul.mubr.msk.bf16.vlgmr.msra.gmra.mrb[168].mxu0 %vm817_vm3, %v5345_v42  ;;  %9779 = vmatmul.mubr.msk.bf16.vlgmr.msra.gmra.mrb[184].mxu1 %vm817_vm3, %v5345_v42  ;;  %v5342_v22 = vadd.f32 %v9752_v38, %v12938_v26 }
0x1851   : > { %9799 = vmatpush3.bf16.xpose.msra.mxu1 %v12664_v33  ;;  %v9753_v14 = vpop.f32.mrb[182].mxu1  ;;  %9787 = vmatpush3.bf16.xpose.msra.mxu0 %v12998_v41  ;;  %v5340_v39 = vadd.f32 %v5321_v8, %v12929_v54  ;;  %v6128_v54 = vpop.xlane.xlu0 %6127 }
0x1852   : > { %v5343_v47 = vadd.f32 %v9753_v14, %v12932_v43  ;;  %10193 = vmatprep.subr.msk.bf16.mxu1 %vm499_vm1, %v12571_v11  ;;  %v5324_v36 = vpop.f32.mrb[183].mxu1  ;;  %10191 = vmatprep.subr.msk.bf16.mxu0 %vm499_vm1, %v13002_v19  ;;  %v6131_v43 = vpop.xlane.xlu1 %6130  ;;  %10488 = vrsqrt.f32 %v6128_v54  ;;  %vm6190_vm4 = vcmp.gt.f32.partialorder %v6128_v54, 0.0  ;;  %v10625_v14 = vld [vmem:[%s11179_s27 + $0x20] sm:$0xff] }
0x1853   : > { %v5341_v28 = vadd.f32 %v5324_v36, %v12935_v25  ;;  %10490 = vrsqrt.f32 %v6131_v43  ;;  %vm6191_vm5 = vcmp.gt.f32.partialorder %v6131_v43, 0.0 }
0x1854   : > { %v5347_v46 = vpack.c.bf16 %v5343_v47, %v5342_v22 }
0x1855   : > { %v5346_v33 = vpack.c.bf16 %v5341_v28, %v5340_v39  ;;  %v6134_v26 = vpop.xlane.xlu0 %6133 }
0x1856   : > { %v13030_v25 = vpop.xlane.xlu1 %6139  ;;  %10492 = vrsqrt.f32 %v6134_v26  ;;  %vm6192_vm6 = vcmp.gt.f32.partialorder %v6134_v26, 0.0 }
0x1857   : > { %9766 = vmatprep.mubr.msk.bf16.mxu0 %vm817_vm3, %v5346_v33  ;;  %9782 = vmatprep.mubr.msk.bf16.mxu1 %vm817_vm3, %v5346_v33  ;;  %v10626_v33 = vld [vmem:[%s11179_s27 + $0x38] sm:$0xff]  ;;  %vm6194_vm10 = vcmp.gt.f32.partialorder %v13030_v25, 0.0 }
0x1858   : > { %9767 = vmatmul.mubr.msk.bf16.gmra.mrb[172].mxu0 %vm817_vm3, %v5347_v46  ;;  %9783 = vmatmul.mubr.msk.bf16.gmra.mrb[188].mxu1 %vm817_vm3, %v5347_v46 }
0x1859   : > { %9801 = vmatpush3.bf16.xpose.msra.mxu1 %v12682_v0  ;;  %9806 = vmatprep.mubr.msk.bf16.mxu1 %vm499_vm1, %v12950_v12 }
0x185a   : > { %10194 = vmatprep.subr.msk.bf16.mxu1 %vm499_vm1, %v12671_v15  ;;  %v6146_v0 = vpop.xlane.xlu1 %6145 }
0x185b   : > { %vm6196_vm8 = vcmp.gt.f32.partialorder %v6146_v0, 0.0 }
0x185c   : > { %v10489_v45 = vpop.eup %10488 }
0x185d   : > { %v10491_v17 = vpop.eup %10490  ;;  %v6206_v57 = vsel %vm6190_vm4, %v10489_v45, 0.0  ;;  %v10627_v45 = vld [vmem:[%s11179_s27 + $0x50] sm:$0xff] }
0x185e   : > { %v6207_v42 = vsel %vm6191_vm5, %v10491_v17, 0.0  ;;  %v13037_v38 = vmul.f32 %v10624_v9, %v6206_v57 }
0x185f   : > { %v13045_v22 = vmul.f32 %v10625_v14, %v6207_v42  ;;  %v10628_v14 = vld [vmem:[%s11179_s27 + $0x98] sm:$0xff] }
0x1860   : > { %v10493_v36 = vpop.eup %10492 }
0x1861   : > { %9803 = vmatpush3.bf16.xpose.msra.mxu1 %v12691_v30  ;;  %v6137_v30 = vpop.xlane.xlu0 %6136  ;;  %v6274_v47 = vpack.c.bf16 %v13045_v22, %v13037_v38 }
0x1862   : > { %10195 = vmatprep.subr.msk.bf16.mxu1 %vm499_vm1, %v12573_v5  ;;  %10494 = vrsqrt.f32 %v6137_v30  ;;  %vm6193_vm7 = vcmp.gt.f32.partialorder %v6137_v30, 0.0 }
0x1863   : > { %10496 = vrsqrt.f32 %v6146_v0  ;;  %6302 = vrot.lane.b32.xlu1 %v6274_v47, %s10907_s20 }
0x1865   : > { %v13041_v8 = vpop.xlane.xlu0 %6142 }
0x1866   : > { %vm6195_vm11 = vcmp.gt.f32.partialorder %v13041_v8, 0.0 }
0x1869   : > { %9805 = vmatpush3.bf16.xpose.msra.mxu1 %v12702_v32  ;;  %v13039_v32 = vpop.permute.xlu1 %6223  ;;  %v6149_v28 = vpop.xlane.xlu0 %6148 }
0x186a   : > { %9842 = vmatprep.subr.bf16.mxu1 %v12569_v10  ;;  %10498 = vrsqrt.f32 %v6149_v28  ;;  %vm6197_vm9 = vcmp.gt.f32.partialorder %v6149_v28, 0.0 }
0x186b   : > { %10500 = vrsqrt.f32 %v13030_v25 }
0x186c   : > { %v10495_v46 = vpop.eup %10494  ;;  %10502 = vrsqrt.f32 %v13041_v8 }
0x186d   : > { %v13052_v39 = vpop.permute.xlu1 %6231  ;;  %v10497_v26 = vpop.eup %10496 }
0x186e   : > { %v6212_v30 = vsel %vm6196_vm8, %v10497_v26, 0.0 }
0x186f   : > { %v6220_v47 = vmul.f32 %v10628_v14, %v6212_v30  ;;  %v14321_v14 = vld [vmem:[#allocation70_spill] sm:$0xff] }
0x1870   : > { %9807 = vmatmul.mubr.msk.bf16.vlgmr.msra.gmra.mrb[192].mxu1 %vm499_vm1, %v12952_v23 }
0x1871   : > { %9843 = vmatpush3.bf16.msra.mxu1 %v12569_v10  ;;  %9810 = vmatprep.mubr.msk.bf16.mxu1 %vm499_vm1, %v12954_v40  ;;  %v6208_v10 = vsel %vm6192_vm6, %v10493_v36, 0.0  ;;  %v13058_v43 = vpop.permute.xlu1 %6235 }
0x1872   : > { %9844 = vmatprep.subr.bf16.mxu1 %v12571_v11  ;;  %v6216_v54 = vmul.f32 %v10626_v33, %v6208_v10  ;;  %v10629_v10 = vld [vmem:[%s11179_s27 + $0xb0] sm:$0xff]  ;;  %v6265_v2 = vmul.f32 %v10633_v51, %v13058_v43 }
0x1874   : > { %v10499_v9 = vpop.eup %10498  ;;  %v6256_v36 = vmul.f32 %v13052_v39, %v6216_v54 }
0x1875   : > { %9845 = vmatpush3.bf16.msra.mxu1 %v12571_v11  ;;  %v6209_v11 = vsel %vm6193_vm7, %v10495_v46, 0.0  ;;  %v13065_v42 = vpop.permute.xlu1 %6239 }
0x1876   : > { %9846 = vmatprep.subr.bf16.mxu1 %v12671_v15  ;;  %v6217_v17 = vmul.f32 %v10627_v45, %v6209_v11 }
0x1878   : > { %9811 = vmatmul.mubr.msk.bf16.gmra.mrb[196].mxu1 %vm499_vm1, %v12956_v24  ;;  %v6275_v57 = vpack.c.bf16 %v6217_v17, %v6216_v54  ;;  %v6257_v33 = vmul.f32 %v13058_v43, %v6217_v17  ;;  %v14318_v54 = vld [vmem:[#allocation69_spill] sm:$0xff]  ;;  %v14319_v17 = vld [vmem:[#allocation67_spill] sm:$0xff] }
0x1879   : > { %9847 = vmatpush3.bf16.msra.mxu1 %v12671_v15  ;;  %v6213_v15 = vsel %vm6197_vm9, %v10499_v9, 0.0  ;;  %v13070_v0 = vpop.permute.xlu1 %6243  ;;  %v14320_v9 = vld [vmem:[#allocation68_spill] sm:$0xff] }
0x187a   : > { %9848 = vmatprep.subr.bf16.mxu1 %v12573_v5  ;;  %6304 = vrot.lane.b32.xlu1 %v6275_v57, %s10907_s20  ;;  %v6221_v46 = vmul.f32 %v10629_v10, %v6213_v15  ;;  %v6279_v45 = vpack.c.bf16 %v6257_v33, %v6256_v36  ;;  %v13098_v15 = vsel %vm499_vm1, %v13002_v19, 0  ;;  %v14323_v36 = vld [vmem:[#allocation72_spill] sm:$0xff]  ;;  %v10501_v10 = vpop.eup %10500  ;;  %v14324_v33 = vld [vmem:[#allocation73_spill] sm:$0xff] }
0x187b   : > { %9789 = vmatpush3.bf16.xpose.msra.mxu0 %v13098_v15 }
0x187c   : > { %v6277_v26 = vpack.c.bf16 %v6221_v46, %v6220_v47 }
0x187d   : > { %9849 = vmatpush3.bf16.msra.mxu1 %v12573_v5  ;;  %v13075_v11 = vpop.permute.xlu1 %6247 }
0x187e   : > { %6308 = vrot.lane.b32.xlu1 %v6277_v26, %s10907_s20  ;;  %v6260_v5 = vmul.f32 %v13075_v11, %v6220_v47  ;;  %v14322_v47 = vld [vmem:[#allocation71_spill] sm:$0xff]  ;;  %v6210_v26 = vsel %vm6194_vm10, %v10501_v10, 0.0  ;;  %v6268_v3 = vmul.f32 %v10636_v21, %v13075_v11  ;;  %v14327_v21 = vld [vmem:[#allocation44_spill] sm:$0xff] }
0x1881   : > { %v13079_v28 = vpop.permute.xlu1 %6251 }
0x1882   : > { %v6261_v30 = vmul.f32 %v13079_v28, %v6221_v46  ;;  %6292 = vrot.lane.b32.xlu1 %v6279_v45, %s10907_s20  ;;  %v10503_v46 = vpop.eup %10502  ;;  %v6269_v60 = vmul.f32 %v10637_v35, %v13079_v28 }
0x1883   : > { %v6211_v45 = vsel %vm6195_vm11, %v10503_v46, 0.0 }
0x1884   : > { %v6281_v57 = vpack.c.bf16 %v6261_v30, %v6260_v5  ;;  %v14325_v5 = vld [vmem:[#allocation74_spill] sm:$0xff] }
0x1885   : > { %v10630_v30 = vld [vmem:[%s11179_s27 + $0x80] sm:$0xff] }
0x1886   : > { %6296 = vrot.lane.b32.xlu1 %v6281_v57, %s10907_s20  ;;  %v6219_v57 = vmul.f32 %v10630_v30, %v6211_v45 }
0x188a   : > { %6054 = vrot.lane.b32.xlu1 %v14318_v54, %s10907_s20  ;;  %v10631_v54 = vld [vmem:[%s11179_s27 + $0x68] sm:$0xff] }
0x188e   : > { %6056 = vrot.lane.b32.xlu1 %v14319_v17, %s10907_s20  ;;  %v6218_v17 = vmul.f32 %v10631_v54, %v6210_v26 }
0x1890   : > { %v6276_v25 = vpack.c.bf16 %v6219_v57, %v6218_v17 }
0x1892   : > { %6058 = vrot.lane.b32.xlu1 %v14320_v9, %s10907_s20  ;;  %v6254_v9 = vmul.f32 %v13039_v32, %v13037_v38  ;;  %6306 = vrot.lane.b32.xlu0 %v6276_v25, %s10907_s20 }
0x1896   : > { %6060 = vrot.lane.b32.xlu1 %v14321_v14, %s10907_s20  ;;  %v13113_v14 = vpop.permute.xlu0 %6227 }
0x1897   : > { %v6255_v8 = vmul.f32 %v13113_v14, %v13045_v22 }
0x1899   : > { %v6278_v10 = vpack.c.bf16 %v6255_v8, %v6254_v9 }
0x189a   : > { %6062 = vrot.lane.b32.xlu1 %v14322_v47, %s10907_s20  ;;  %v6258_v47 = vmul.f32 %v13065_v42, %v6218_v17 }
0x189b   : > { %6290 = vrot.lane.b32.xlu0 %v6278_v10, %s10907_s20 }
0x189e   : > { %6064 = vrot.lane.b32.xlu1 %v14323_v36, %s10907_s20  ;;  %v6259_v36 = vmul.f32 %v13070_v0, %v6219_v57 }
0x18a0   : > { %v6280_v46 = vpack.c.bf16 %v6259_v36, %v6258_v47 }
0x18a2   : > { %6066 = vrot.lane.b32.xlu1 %v14324_v33, %s10907_s20  ;;  %6294 = vrot.lane.b32.xlu0 %v6280_v46, %s10907_s20 }
0x18a6   : > { %6068 = vrot.lane.b32.xlu1 %v14325_v5, %s10907_s20 }
0x18d5   : > { %v13122_v33 = vpop.permute.xlu1 %6302 }
0x18ec   : > { %v13124_v38 = vpop.permute.xlu1 %6304 }
0x18f0   : > { %v13126_v26 = vpop.permute.xlu1 %6308 }
0x18f4   : > { %v13128_v45 = vpop.permute.xlu1 %6292 }
0x18f8   : > { %v13130_v22 = vpop.permute.xlu1 %6296 }
0x18fc   : > { %v6055_v5 = vpop.permute.xlu1 %6054 }
0x18fd   : > { %v6078_v30 = vsel %vm499_vm1, %v6055_v5, 0.0 }
0x18fe   : > { %6079 = vadd.xlane.f32.xlu1 %v6078_v30 }
0x1900   : > { %v13133_v57 = vpop.permute.xlu1 %6056 }
0x1904   : > { %v13135_v54 = vpop.permute.xlu1 %6058 }
0x1908   : > { %v13137_v17 = vpop.permute.xlu1 %6060 }
0x190c   : > { %v13139_v9 = vpop.permute.xlu1 %6062 }
0x1910   : > { %v13141_v25 = vpop.permute.xlu1 %6064 }
0x1914   : > { %v13143_v8 = vpop.permute.xlu1 %6066 }
0x1918   : > { %v6069_v47 = vpop.permute.xlu1 %6068 }
0x1919   : > { %v6099_v36 = vsel %vm499_vm1, %v6069_v47, 0.0  ;;  %v10632_v47 = vld [vmem:[%s11179_s27 + $0x40] sm:$0xff] }
0x191a   : > { %6100 = vadd.xlane.f32.xlu1 %v6099_v36  ;;  %v6264_v36 = vmul.f32 %v10632_v47, %v13052_v39  ;;  %v6266_v39 = vmul.f32 %v10634_v13, %v13065_v42  ;;  %v10635_v47 = vld [vmem:[%s11179_s27 + $0x88] sm:$0xff]  ;;  %v6285_v13 = vpack.c.bf16 %v6269_v60, %v6268_v3 }
0x191b   : > { %v6267_v51 = vmul.f32 %v10635_v47, %v13070_v0  ;;  %v14326_v42 = vld [vmem:[#allocation43_spill] sm:$0xff] }
0x191d   : > { %v6284_v53 = vpack.c.bf16 %v6267_v51, %v6266_v39 }
0x1923   : > { %v9764_v10 = vpop.f32.mrb[168].mxu0  ;;  %v13146_v46 = vpop.f32.mrb[184].mxu1 }
0x1924   : > { %v5398_v5 = vpop.f32.mrb[169].mxu0  ;;  %v13148_v30 = vpop.f32.mrb[185].mxu1 }
0x1925   : > { %v9765_v63 = vpop.f32.mrb[170].mxu0  ;;  %v13150_v37 = vpop.f32.mrb[186].mxu1 }
0x1926   : > { %v5517_v16 = vpack.c.bf16 %v9765_v63, %v9764_v10  ;;  %v5401_v31 = vpop.f32.mrb[171].mxu0  ;;  %v13152_v20 = vpop.f32.mrb[187].mxu1 }
0x1927   : > { %v5516_v61 = vpack.c.bf16 %v5401_v31, %v5398_v5 }
0x1929   : > { %9790 = vmatprep.mubr.msk.bf16.mxu0 %vm499_vm1, %v5516_v61  ;;  %v6283_v61 = vpack.c.bf16 %v6265_v2, %v6264_v36 }
0x192a   : > { %9791 = vmatmul.mubr.msk.bf16.vlgmr.msra.gmra.mrb[176].mxu0 %vm499_vm1, %v5517_v16 }
0x192b   : > { %v9768_v56 = vpop.f32.mrb[172].mxu0  ;;  %v13160_v44 = vpop.f32.mrb[188].mxu1  ;;  %7320 = vrot.lane.b32.xlu1 %v6283_v61, %s10907_s20  ;;  %v14328_v61 = vld [vmem:[#allocation49_spill] sm:$0xff] }
0x192c   : > { %v5414_v63 = vpop.f32.mrb[173].mxu0  ;;  %v13162_v10 = vpop.f32.mrb[189].mxu1 }
0x192d   : > { %v9769_v31 = vpop.f32.mrb[174].mxu0  ;;  %v13164_v5 = vpop.f32.mrb[190].mxu1 }
0x192e   : > { %v5519_v43 = vpack.c.bf16 %v9769_v31, %v9768_v56  ;;  %v5417_v16 = vpop.f32.mrb[175].mxu0  ;;  %v5498_v7 = vpop.f32.mrb[191].mxu1 }
0x192f   : > { %v5518_v1 = vpack.c.bf16 %v5417_v16, %v5414_v63  ;;  %7322 = vrot.lane.b32.xlu1 %v6284_v53, %s10907_s20 }
0x1931   : > { %9794 = vmatprep.mubr.msk.bf16.mxu0 %vm499_vm1, %v5518_v1 }
0x1932   : > { %9795 = vmatmul.mubr.msk.bf16.gmra.mrb[180].mxu0 %vm499_vm1, %v5519_v43 }
0x1933   : > { %7324 = vrot.lane.b32.xlu1 %v6285_v13, %s10907_s20 }
0x1943   : > { %v9808_v56 = vpop.f32.mrb[192].mxu1 }
0x1944   : > { %v5702_v2 = vmul.f32 %v9808_v56, %v14276_v50  ;;  %v5669_v1 = vpop.f32.mrb[193].mxu1 }
0x1945   : > { %v5700_v0 = vmul.f32 %v14326_v42, %v5669_v1  ;;  %v9809_v36 = vpop.f32.mrb[194].mxu1 }
0x1946   : > { %v5703_v11 = vmul.f32 %v9809_v36, %v14327_v21  ;;  %v5672_v63 = vpop.f32.mrb[195].mxu1 }
0x1947   : > { %v5701_v35 = vmul.f32 %v14279_v48, %v5672_v63 }
0x1948   : > { %v5709_v28 = vpack.c.bf16 %v5703_v11, %v5702_v2 }
0x1949   : > { %v5708_v31 = vpack.c.bf16 %v5701_v35, %v5700_v0 }
0x194b   : > { %9822 = vmatprep.mubr.msk.bf16.mxu0 %vm817_vm3, %v5708_v31  ;;  %v9812_v60 = vpop.f32.mrb[196].mxu1 }
0x194c   : > { %v5706_v53 = vmul.f32 %v9812_v60, %v14280_v34  ;;  %v5685_v3 = vpop.f32.mrb[197].mxu1 }
0x194d   : > { %v5704_v39 = vmul.f32 %v14328_v61, %v5685_v3  ;;  %v9813_v47 = vpop.f32.mrb[198].mxu1 }
0x194e   : > { %v5707_v51 = vmul.f32 %v9813_v47, %v12087_v52  ;;  %v5688_v43 = vpop.f32.mrb[199].mxu1 }
0x194f   : > { %v5705_v16 = vmul.f32 %v12091_v59, %v5688_v43 }
0x1950   : > { %v5711_v13 = vpack.c.bf16 %v5707_v51, %v5706_v53 }
0x1951   : > { %v5710_v56 = vpack.c.bf16 %v5705_v16, %v5704_v39 }
0x19fd   : > { %v9792_v1 = vpop.f32.mrb[176].mxu0 }
0x19fe   : > { %v5605_v2 = vsub.f32 %v13146_v46, %v9792_v1  ;;  %v5572_v0 = vpop.f32.mrb[177].mxu0 }
0x19ff   : > { %v5603_v36 = vsub.f32 %v13148_v30, %v5572_v0  ;;  %v9793_v11 = vpop.f32.mrb[178].mxu0 }
0x1a00   : > { %v5606_v63 = vsub.f32 %v13150_v37, %v9793_v11  ;;  %v5575_v35 = vpop.f32.mrb[179].mxu0 }
0x1a01   : > { %v5604_v31 = vsub.f32 %v13152_v20, %v5575_v35 }
0x1a02   : > { %v5713_v60 = vpack.c.bf16 %v5606_v63, %v5605_v2 }
0x1a03   : > { %v5712_v3 = vpack.c.bf16 %v5604_v31, %v5603_v36 }
0x1a05   : > { %5971 = vxpose.xlu0.c.b16.start [1/4] (short) (narrow) %v5712_v3, 32  ;;  %v9796_v47 = vpop.f32.mrb[180].mxu0  ;;  %9814 = vmatprep.subr.bf16.mxu0 %v5712_v3 }
0x1a06   : > { %v5609_v53 = vsub.f32 %v13160_v44, %v9796_v47  ;;  %v5588_v39 = vpop.f32.mrb[181].mxu0  ;;  %9815 = vmatpush3.bf16.msra.mxu0 %v5712_v3  ;;  %v6084_v44 = vsel %vm499_vm1, %v13135_v54, 0.0 }
0x1a07   : > { %v5607_v46 = vsub.f32 %v13162_v10, %v5588_v39  ;;  %v9797_v51 = vpop.f32.mrb[182].mxu0  ;;  %9816 = vmatprep.subr.bf16.mxu0 %v5713_v60 }
0x1a08   : > { %v5610_v30 = vsub.f32 %v13164_v5, %v9797_v51  ;;  %v5591_v43 = vpop.f32.mrb[183].mxu0 }
0x1a09   : > { %v5608_v37 = vsub.f32 %v5498_v7, %v5591_v43  ;;  %5972 = vxpose.xlu0.c.b16.cont [2/4] (short) (narrow) %v5713_v60, 32  ;;  %v6081_v7 = vsel %vm499_vm1, %v13133_v57, 0.0 }
0x1a0a   : > { %v5715_v16 = vpack.c.bf16 %v5610_v30, %v5609_v53  ;;  %9817 = vmatpush3.bf16.msra.mxu0 %v5713_v60 }
0x1a0b   : > { %v5714_v20 = vpack.c.bf16 %v5608_v37, %v5607_v46 }
0x1a0d   : > { %5973 = vxpose.xlu0.c.b16.cont [3/4] (short) (narrow) %v5714_v20, 32  ;;  %9818 = vmatprep.subr.bf16.mxu0 %v5714_v20 }
0x1a0e   : > { %9819 = vmatpush3.bf16.msra.mxu0 %v5714_v20 }
0x1a0f   : > { %9820 = vmatprep.subr.bf16.mxu0 %v5715_v16 }
0x1a11   : > { %5974 = vxpose.xlu0.c.b16.end [4/4] (short) (narrow) %v5715_v16, 32 }
0x1a12   : > { %9821 = vmatpush3.bf16.msra.mxu0 %v5715_v16 }
0x1a13   : > { %10196 = vmatprep.subr.msk.bf16.mxu0 %vm499_vm1, %v12982_v6  ;;  %v6087_v6 = vsel %vm499_vm1, %v13137_v17, 0.0 }
0x1a15   : > { %9823 = vmatmul.mubr.msk.bf16.vlgmr.msra.gmra.mrb[184].mxu0 %vm817_vm3, %v5709_v28  ;;  %v6080_v28 = vpop.xlane.xlu1 %6079 }
0x1a16   : > { %9826 = vmatprep.mubr.msk.bf16.mxu0 %vm817_vm3, %v5710_v56  ;;  %10504 = vrsqrt.f32 %v6080_v28  ;;  %vm6150_vm12 = vcmp.gt.f32.partialorder %v6080_v28, 0.0 }
0x1a19   : > { %v6101_v63 = vpop.xlane.xlu1 %6100 }
0x1a1a   : > { %vm6157_vm2 = vcmp.gt.f32.partialorder %v6101_v63, 0.0 }
0x1a1b   : > { %9831 = vmatpush3.bf16.xpose.msra.mxu0 %v12998_v41  ;;  %v6090_v41 = vsel %vm499_vm1, %v13139_v9, 0.0  ;;  %v10639_v9 = vld [vmem:[%s11179_s27 + $0x28] sm:$0xff] }
0x1a1c   : > { %10197 = vmatprep.subr.msk.bf16.mxu0 %vm499_vm1, %v13002_v19  ;;  %v6093_v19 = vsel %vm499_vm1, %v13141_v25, 0.0  ;;  %v6263_v25 = vmul.f32 %v10639_v9, %v13113_v14 }
0x1a1d   : > { %9827 = vmatmul.mubr.msk.bf16.gmra.mrb[188].mxu0 %vm817_vm3, %v5711_v13 }
0x1a1e   : > { %6082 = vadd.xlane.f32.xlu0 %v6081_v7  ;;  %9834 = vmatprep.mubr.msk.bf16.mxu0 %vm499_vm1, %v12950_v12  ;;  %v13220_v12 = vsel %vm499_vm1, %v13122_v33, 0 }
0x1a20   : > { %v10505_v56 = vpop.eup %10504 }
0x1a21   : > { %v6166_v2 = vsel %vm6150_vm12, %v10505_v56, 0.0 }
0x1a22   : > { %6085 = vadd.xlane.f32.xlu0 %v6084_v44  ;;  %v6174_v36 = vmul.f32 %v12861_v29, %v6166_v2  ;;  %v14330_v2 = vld [vmem:[#allocation75_spill] sm:$0xff] }
0x1a23   : > { %9833 = vmatpush3.bf16.xpose.msra.mxu0 %v13098_v15  ;;  %v13227_v15 = vpop.permute.xlu0 %6306 }
0x1a24   : > { %10198 = vmatprep.subr.msk.bf16.mxu0 %vm499_vm1, %v13122_v33  ;;  %v13248_v54 = vsel %vm499_vm1, %v13227_v15, 0  ;;  %v6182_v60 = vmul.f32 0.17677669, %v6174_v36  ;;  %v14331_v36 = vld [vmem:[#allocation54_spill] sm:$0xff] }
0x1a26   : > { %6088 = vadd.xlane.f32.xlu0 %v6087_v6 }
0x1a27   : > { %v13233_v57 = vpop.permute.xlu0 %6290 }
0x1a2a   : > { %6091 = vadd.xlane.f32.xlu0 %v6090_v41  ;;  %9835 = vmatmul.mubr.msk.bf16.vlgmr.msra.gmra.mrb[184].mxu0 %vm499_vm1, %v12952_v23  ;;  %v6096_v23 = vsel %vm499_vm1, %v13143_v8, 0.0  ;;  %v13259_v8 = vsel %vm499_vm1, %v13126_v26, 0 }
0x1a2b   : > { %9838 = vmatprep.mubr.msk.bf16.mxu0 %vm499_vm1, %v12954_v40  ;;  %9855 = vmatpush3.bf16.xpose.msra.mxu0 %v13220_v12  ;;  %v13239_v40 = vsel %vm499_vm1, %v13124_v38, 0  ;;  %v13263_v5 = vpop.permute.xlu0 %6294 }
0x1a2c   : > { %10199 = vmatprep.subr.msk.bf16.mxu0 %vm499_vm1, %v13124_v38 }
0x1a2e   : > { %6094 = vadd.xlane.f32.xlu0 %v6093_v19 }
0x1a32   : > { %6097 = vadd.xlane.f32.xlu0 %v6096_v23  ;;  %9839 = vmatmul.mubr.msk.bf16.gmra.mrb[188].mxu0 %vm499_vm1, %v12956_v24  ;;  %v10638_v24 = vld [vmem:[%s11179_s27 + $0x10] sm:$0xff]  ;;  %s10909_s27 = smov [#allocation9]  }
0x1a33   : > { %9857 = vmatpush3.bf16.xpose.msra.mxu0 %v13239_v40  ;;  %9862 = vmatprep.mubr.msk.bf16.mxu0 %vm499_vm1, %v13233_v57  ;;  %v6262_v17 = vmul.f32 %v10638_v24, %v13039_v32  ;;  %s10733_s10 = sshll.u32 %s10909_s27, 4  ;;  %s10734_s10 = int_to_ptr.vmem [resolvable:$false] %s10733_s10 }
0x1a34   : > { %10200 = vmatprep.subr.msk.bf16.mxu0 %vm499_vm1, %v13227_v15  ;;  %s10735_s14 = scalar_lea.vmem %s10734_s10, 4096  ;;  %p10736_p13 = scmp.lt.s32.totalorder %s13811_s29, %s10734_s10 }
0x1a35   : > { %v6282_v10 = vpack.c.bf16 %v6263_v25, %v6262_v17  ;;  %p10737_p8 = scmp.lt.s32.totalorder %s10735_s14, %s10729_s7 }
0x1a37   : > { %p10738_p5 = por %p10737_p8, %p10736_p13 }
0x1a39   : > { %p10739_p2 = pnand %p10738_p5, %p10732_p12 }
0x1a3b   : > { %9859 = vmatpush3.bf16.xpose.msra.mxu0 %v13248_v54 }
0x1a3c   : > { %10201 = vmatprep.subr.msk.bf16.mxu0 %vm499_vm1, %v13126_v26 }
0x1a43   : > { %9861 = vmatpush3.bf16.xpose.msra.mxu0 %v13259_v8 }
0x1a48   : > { %7318 = vrot.lane.b32.xlu0 %v6282_v10, %s10907_s20 }
0x1a4a   : > { %9863 = vmatmul.mubr.msk.bf16.vlgmr.msra.gmra.mrb[192].mxu0 %vm499_vm1, %v13128_v45 }
0x1a4b   : > { %9866 = vmatprep.mubr.msk.bf16.mxu0 %vm499_vm1, %v13263_v5 }
0x1a52   : > { %9867 = vmatmul.mubr.msk.bf16.gmra.mrb[196].mxu0 %vm499_vm1, %v13130_v22 }
0x1a6b   : > { %v5979_v32 = vpop.trf.xlu0 }
0x1a6c   : > { %9850 = vmatprep.mubr.msk.bf16.mxu1 %vm817_vm3, %v5979_v32 }
0x1a6f   : > { %v5980_v14 = vpop.trf.xlu0 }
0x1a70   : > { %9851 = vmatmul.mubr.msk.bf16.vlgmr.msra.gmra.mrb[200].mxu1 %vm817_vm3, %v5980_v14 }
0x1aab   : > { %v6083_v13 = vpop.xlane.xlu0 %6082 }
0x1aac   : > { %10506 = vrsqrt.f32 %v6083_v13  ;;  %vm6151_vm13 = vcmp.gt.f32.partialorder %v6083_v13, 0.0 }
0x1aaf   : > { %v6086_v1 = vpop.xlane.xlu0 %6085 }
0x1ab0   : > { %10508 = vrsqrt.f32 %v6086_v1  ;;  %vm6152_vm14 = vcmp.gt.f32.partialorder %v6086_v1, 0.0  ;;  %v14329_v1 = vld [vmem:[#allocation53_spill] sm:$0xff] }
0x1ab3   : > { %v6089_v0 = vpop.xlane.xlu0 %6088 }
0x1ab4   : > { %10510 = vrsqrt.f32 %v6089_v0  ;;  %vm6153_vm15 = vcmp.gt.f32.partialorder %v6089_v0, 0.0 }
0x1ab5   : > { %10512 = vrsqrt.f32 %v6101_v63  ;;  %v14332_v63 = vld [vmem:[#allocation77_spill] sm:$0xff] }
0x1ab6   : > { %v10507_v11 = vpop.eup %10506 }
0x1ab7   : > { %v6167_v35 = vsel %vm6151_vm13, %v10507_v11, 0.0  ;;  %v6092_v31 = vpop.xlane.xlu0 %6091  ;;  %v2105_v11 = vmul.f32 %v14331_v36, %v14331_v36 }
0x1ab8   : > { %v6175_v3 = vmul.f32 %v12865_v18, %v6167_v35  ;;  %10514 = vrsqrt.f32 %v6092_v31  ;;  %vm6154_vm0 = vcmp.gt.f32.partialorder %v6092_v31, 0.0  ;;  %v2106_v35 = vmul.f32 %v14332_v63, %v14332_v63 }
0x1aba   : > { %v10509_v47 = vpop.eup %10508  ;;  %v6183_v53 = vmul.f32 0.17677669, %v6175_v3 }
0x1abb   : > { %v6168_v39 = vsel %vm6152_vm14, %v10509_v47, 0.0  ;;  %v6095_v46 = vpop.xlane.xlu0 %6094 }
0x1abc   : > { %v6270_v51 = vpack.c.bf16 %v6183_v53, %v6182_v60  ;;  %v6176_v30 = vmul.f32 %v12869_v58, %v6168_v39  ;;  %10516 = vrsqrt.f32 %v6095_v46  ;;  %vm6155_vm4 = vcmp.gt.f32.partialorder %v6095_v46, 0.0  ;;  %v14333_v39 = vld [vmem:[#allocation79_spill] sm:$0xff] }
0x1abd   : > { %v2119_v60 = vsel %vm499_vm1, %v2105_v11, 0.0  ;;  %v2107_v46 = vmul.f32 %v14333_v39, %v14333_v39 }
0x1abe   : > { %v10511_v29 = vpop.eup %10510  ;;  %7500 = vrot.lane.b32.xlu0 %v6270_v51, %s10907_s20  ;;  %v6184_v16 = vmul.f32 0.17677669, %v6176_v30  ;;  %v2122_v51 = vsel %vm499_vm1, %v2106_v35, 0.0  ;;  %v14334_v30 = vld [vmem:[#allocation78_spill] sm:$0xff] }
0x1abf   : > { %v6169_v43 = vsel %vm6153_vm15, %v10511_v29, 0.0  ;;  %v6098_v37 = vpop.xlane.xlu0 %6097  ;;  %v10513_v18 = vpop.eup %10512  ;;  %v2109_v29 = vmul.f32 %v14334_v30, %v14334_v30 }
0x1ac0   : > { %v6177_v20 = vmul.f32 %v12873_v49, %v6169_v43  ;;  %10518 = vrsqrt.f32 %v6098_v37  ;;  %v6173_v19 = vsel %vm6157_vm2, %v10513_v18, 0.0  ;;  %vm6156_vm5 = vcmp.gt.f32.partialorder %v6098_v37, 0.0 }
0x1ac1   : > { %v6181_v17 = vmul.f32 %v12889_v4, %v6173_v19  ;;  %v2102_v4 = vmul.f32 %v14329_v1, %v14329_v1  ;;  %v2125_v37 = vsel %vm499_vm1, %v2107_v46, 0.0 }
0x1ac2   : > { %v10515_v7 = vpop.eup %10514  ;;  %v6185_v44 = vmul.f32 0.17677669, %v6177_v20 }
0x1ac3   : > { %v6170_v6 = vsel %vm6154_vm0, %v10515_v7, 0.0  ;;  %v6189_v14 = vmul.f32 0.17677669, %v6181_v17  ;;  %v2110_v0 = vsel %vm499_vm1, %v2102_v4, 0.0  ;;  %v14337_v7 = vld [vmem:[#allocation83_spill] sm:$0xff] }
0x1ac4   : > { %v6271_v41 = vpack.c.bf16 %v6185_v44, %v6184_v16  ;;  %v6178_v58 = vmul.f32 %v12881_v55, %v6170_v6  ;;  %v3974_v44 = vmul.f32 %v14337_v7, %v14337_v7  ;;  %v2131_v6 = vsel %vm499_vm1, %v2109_v29, 0.0 }
0x1ac6   : > { %v10517_v23 = vpop.eup %10516  ;;  %7502 = vrot.lane.b32.xlu1 %v6271_v41, %s10907_s20  ;;  %v6186_v9 = vmul.f32 0.17677669, %v6178_v58  ;;  %v14338_v41 = vld [vmem:[#allocation46_spill] sm:$0xff]  ;;  %v3984_v19 = vsel %vm499_vm1, %v3974_v44, 0.0 }
0x1ac7   : > { %v6171_v24 = vsel %vm6155_vm4, %v10517_v23, 0.0  ;;  %v3976_v58 = vmul.f32 %v14338_v41, %v14338_v41  ;;  %v14339_v23 = vld [vmem:[#allocation87_spill] sm:$0xff] }
0x1ac8   : > { %v6179_v49 = vmul.f32 %v12885_v62, %v6171_v24  ;;  %v2103_v62 = vmul.f32 %v14330_v2, %v14330_v2  ;;  %v3978_v24 = vmul.f32 %v14339_v23, %v14339_v23 }
0x1ac9   : > { %v3990_v17 = vsel %vm499_vm1, %v3976_v58, 0.0 }
0x1aca   : > { %v10519_v25 = vpop.eup %10518  ;;  %v6187_v10 = vmul.f32 0.17677669, %v6179_v49 }
0x1acb   : > { %v6172_v32 = vsel %vm6156_vm5, %v10519_v25, 0.0  ;;  %v3996_v25 = vsel %vm499_vm1, %v3978_v24, 0.0 }
0x1acc   : > { %v6272_v28 = vpack.c.bf16 %v6187_v10, %v6186_v9  ;;  %v6180_v13 = vmul.f32 %v12877_v27, %v6172_v32  ;;  %v2113_v27 = vsel %vm499_vm1, %v2103_v62, 0.0  ;;  %v14340_v9 = vld [vmem:[#allocation86_spill] sm:$0xff]  ;;  %v14342_v62 = vld [vmem:[#allocation48_spill] sm:$0xff] }
0x1acd   : > { %v3980_v49 = vmul.f32 %v14340_v9, %v14340_v9 }
0x1ace   : > { %v6188_v55 = vmul.f32 0.17677669, %v6180_v13  ;;  %7504 = vrot.lane.b32.xlu0 %v6272_v28, %s10907_s20 }
0x1acf   : > { %v4002_v32 = vsel %vm499_vm1, %v3980_v49, 0.0 }
0x1ad0   : > { %v6273_v56 = vpack.c.bf16 %v6189_v14, %v6188_v55  ;;  %v14341_v55 = vld [vmem:[#allocation47_spill] sm:$0xff] }
0x1ad2   : > { %7506 = vrot.lane.b32.xlu1 %v6273_v56, %s10907_s20 }
0x1af6   : > { %2111 = vadd.xlane.f32.xlu1 %v2110_v0 }
0x1afa   : > { %2114 = vadd.xlane.f32.xlu1 %v2113_v27  ;;  %v14343_v27 = vld [vmem:[#allocation50_spill] sm:$0xff] }
0x1afd   : > { %v13295_v31 = vpop.f32.mrb[184].mxu0 }
0x1afe   : > { %2120 = vadd.xlane.f32.xlu1 %v2119_v60  ;;  %v13298_v3 = vpop.f32.mrb[185].mxu0 }
0x1aff   : > { %v13300_v47 = vpop.f32.mrb[186].mxu0 }
0x1b00   : > { %v13302_v53 = vpop.f32.mrb[187].mxu0  ;;  %v5861_v14 = vmul.f32 %v13300_v47, %v13300_v47 }
0x1b01   : > { %v5859_v10 = vmul.f32 %v13302_v53, %v13302_v53 }
0x1b02   : > { %2123 = vadd.xlane.f32.xlu1 %v2122_v51  ;;  %v14344_v51 = vld [vmem:[#allocation52_spill] sm:$0xff] }
0x1b03   : > { %v5869_v13 = vsel %vm499_vm1, %v5859_v10, 0.0 }
0x1b05   : > { %v13309_v43 = vpop.f32.mrb[188].mxu0 }
0x1b06   : > { %v13312_v16 = vpop.f32.mrb[189].mxu0  ;;  %2126 = vadd.xlane.f32.xlu1 %v2125_v37  ;;  %v5875_v37 = vsel %vm499_vm1, %v5861_v14, 0.0 }
0x1b07   : > { %v13314_v20 = vpop.f32.mrb[190].mxu0 }
0x1b08   : > { %14335 = vst [vmem:[#allocation29_spill] sm:$0xff] %v13314_v20  ;;  %v13316_v18 = vpop.f32.mrb[191].mxu0 }
0x1b09   : > { %14336 = vst [vmem:[#allocation26_spill] sm:$0xff] %v13316_v18  ;;  %v5863_v46 = vmul.f32 %v13316_v18, %v13316_v18 }
0x1b0a   : > { %2132 = vadd.xlane.f32.xlu1 %v2131_v6 }
0x1b0b   : > { %v5881_v10 = vsel %vm499_vm1, %v5863_v46, 0.0 }
0x1b0e   : > { %3985 = vadd.xlane.f32.xlu1 %v3984_v19 }
0x1b12   : > { %3991 = vadd.xlane.f32.xlu1 %v3990_v17  ;;  %v5865_v17 = vmul.f32 %v13314_v20, %v13314_v20  ;;  %v13409_v20 = vld [vmem:[#allocation7] ss:$0 sm:$0xff] }
0x1b16   : > { %3997 = vadd.xlane.f32.xlu1 %v3996_v25 }
0x1b1a   : > { %4003 = vadd.xlane.f32.xlu1 %v4002_v32  ;;  %v14345_v32 = vld [vmem:[#allocation55_spill] sm:$0xff] }
0x1b1d   : > { %v9864_v28 = vpop.f32.mrb[192].mxu0 }
0x1b1e   : > { %v6401_v56 = vmul.f32 %v9864_v28, %v14341_v55  ;;  %v6368_v4 = vpop.f32.mrb[193].mxu0  ;;  %5870 = vadd.xlane.f32.xlu1 %v5869_v13  ;;  %v14346_v55 = vld [vmem:[#allocation56_spill] sm:$0xff] }
0x1b1f   : > { %v6399_v0 = vmul.f32 %v14342_v62, %v6368_v4  ;;  %v9865_v11 = vpop.f32.mrb[194].mxu0 }
0x1b20   : > { %v6402_v35 = vmul.f32 %v9865_v11, %v14343_v27  ;;  %v6371_v60 = vpop.f32.mrb[195].mxu0  ;;  %v6409_v44 = vsub.f32 0.0, %v6401_v56  ;;  %v14347_v56 = vld [vmem:[#allocation57_spill] sm:$0xff]  ;;  %v14348_v11 = vld [vmem:[#allocation58_spill] sm:$0xff] }
0x1b21   : > { %v6400_v29 = vmul.f32 %v14344_v51, %v6371_v60  ;;  %v6407_v58 = vsub.f32 0.0, %v6399_v0 }
0x1b22   : > { %v6410_v6 = vsub.f32 0.0, %v6402_v35  ;;  %5876 = vadd.xlane.f32.xlu1 %v5875_v37  ;;  %v5887_v35 = vsel %vm499_vm1, %v5865_v17, 0.0 }
0x1b23   : > { %v6408_v19 = vsub.f32 0.0, %v6400_v29 }
0x1b24   : > { %v6424_v24 = vpack.c.bf16 %v6410_v6, %v6409_v44 }
0x1b25   : > { %v6423_v49 = vpack.c.bf16 %v6408_v19, %v6407_v58  ;;  %v9868_v25 = vpop.f32.mrb[196].mxu0 }
0x1b26   : > { %v6405_v28 = vmul.f32 %v9868_v25, %v14345_v32  ;;  %v6384_v13 = vpop.f32.mrb[197].mxu0  ;;  %5882 = vadd.xlane.f32.xlu1 %v5881_v10  ;;  %v14349_v10 = vld [vmem:[#allocation59_spill] sm:$0xff] }
0x1b27   : > { %v6403_v4 = vmul.f32 %v14346_v55, %v6384_v13  ;;  %v9869_v14 = vpop.f32.mrb[198].mxu0  ;;  %9870 = vmatprep.subr.bf16.mxu1 %v6423_v49  ;;  %9878 = vmatprep.mubr.msk.bf16.mxu1 %vm817_vm3, %v6423_v49  ;;  %v13353_v32 = vadd.f32 %v14349_v10, %v6408_v19  ;;  %v14350_v13 = vld [vmem:[#allocation60_spill] sm:$0xff]  ;;  %v14351_v55 = vld [vmem:[#allocation61_spill] sm:$0xff] }
0x1b28   : > { %v6406_v62 = vmul.f32 %v9869_v14, %v14347_v56  ;;  %v6387_v0 = vpop.f32.mrb[199].mxu0  ;;  %9871 = vmatpush3.bf16.msra.mxu1 %v6423_v49  ;;  %v6413_v60 = vsub.f32 0.0, %v6405_v28  ;;  %v13356_v49 = vadd.f32 %v14350_v13, %v6407_v58  ;;  %v13359_v14 = vadd.f32 %v14351_v55, %v6410_v6  ;;  %v14352_v28 = vld [vmem:[#allocation62_spill] sm:$0xff]  ;;  %v14353_v56 = vld [vmem:[#allocation63_spill] sm:$0xff]  ;;  %v14354_v6 = vld [vmem:[#allocation64_spill] sm:$0xff] }
0x1b29   : > { %v6404_v27 = vmul.f32 %v14348_v11, %v6387_v0  ;;  %9872 = vmatprep.subr.bf16.mxu1 %v6424_v24  ;;  %v6411_v51 = vsub.f32 0.0, %v6403_v4  ;;  %v13364_v4 = vadd.f32 %v14352_v28, %v6409_v44  ;;  %v14355_v0 = vld [vmem:[#allocation65_spill] sm:$0xff]  ;;  %v14358_v10 = vld [vmem:[#allocation80_spill] sm:$0xff] }
0x1b2a   : > { %v6414_v46 = vsub.f32 0.0, %v6406_v62  ;;  %5888 = vadd.xlane.f32.xlu1 %v5887_v35  ;;  %v6508_v17 = vpack.c.bf16 %v13353_v32, %v13356_v49 }
0x1b2b   : > { %v6412_v29 = vsub.f32 0.0, %v6404_v27  ;;  %v6509_v58 = vpack.c.bf16 %v13359_v14, %v13364_v4  ;;  %v13374_v62 = vadd.f32 %v14354_v6, %v6411_v51  ;;  %v14356_v27 = vld [vmem:[#allocation66_spill] sm:$0xff] }
0x1b2c   : > { %v6426_v37 = vpack.c.bf16 %v6414_v46, %v6413_v60  ;;  %9873 = vmatpush3.bf16.msra.mxu1 %v6424_v24  ;;  %v13377_v44 = vadd.f32 %v14355_v0, %v6414_v46 }
0x1b2d   : > { %v6425_v25 = vpack.c.bf16 %v6412_v29, %v6411_v51  ;;  %v13367_v19 = vadd.f32 %v14353_v56, %v6412_v29  ;;  %v14357_v51 = vld [vmem:[#allocation81_spill] sm:$0xff] }
0x1b2f   : > { %9874 = vmatprep.subr.bf16.mxu1 %v6425_v25  ;;  %v6510_v11 = vpack.c.bf16 %v13367_v19, %v13374_v62 }
0x1b30   : > { %9875 = vmatpush3.bf16.msra.mxu1 %v6425_v25 }
0x1b31   : > { %9876 = vmatprep.subr.bf16.mxu1 %v6426_v37 }
0x1b34   : > { %9877 = vmatpush3.bf16.msra.mxu1 %v6426_v37 }
0x1b35   : > { %9886 = vmatprep.subr.bf16.mxu1 %v6508_v17 }
0x1b37   : > { %9879 = vmatmul.mubr.msk.bf16.vlgmr.msra.gmra.mrb[204].mxu1 %vm817_vm3, %v6424_v24  ;;  %v13382_v24 = vadd.f32 %v14356_v27, %v6413_v60  ;;  %v14359_v60 = vld [vmem:[#allocation27_spill] sm:$0xff] }
0x1b38   : > { %9882 = vmatprep.mubr.msk.bf16.mxu1 %vm817_vm3, %v6425_v25  ;;  %9887 = vmatpush3.bf16.msra.mxu1 %v6508_v17 }
0x1b39   : > { %9888 = vmatprep.subr.bf16.mxu1 %v6509_v58  ;;  %v6511_v35 = vpack.c.bf16 %v13377_v44, %v13382_v24 }
0x1b3c   : > { %9889 = vmatpush3.bf16.msra.mxu1 %v6509_v58  ;;  %v13399_v58 = vpop.permute.xlu1 %7320 }
0x1b3d   : > { %9890 = vmatprep.subr.bf16.mxu1 %v6510_v11 }
0x1b3f   : > { %9883 = vmatmul.mubr.msk.bf16.gmra.mrb[208].mxu1 %vm817_vm3, %v6426_v37  ;;  %v14360_v37 = vld [vmem:[#allocation82_spill] sm:$0xff] }
0x1b40   : > { %9891 = vmatpush3.bf16.msra.mxu1 %v6510_v11  ;;  %v13401_v6 = vpop.permute.xlu1 %7322 }
0x1b41   : > { %9892 = vmatprep.subr.bf16.mxu1 %v6511_v35 }
0x1b43   : > { %v9852_v46 = vpop.f32.mrb[200].mxu1 }
0x1b44   : > { %9893 = vmatpush3.bf16.msra.mxu1 %v6511_v35  ;;  %v6048_v29 = vadd.f32 %v9852_v46, %v14357_v51  ;;  %v6031_v25 = vpop.f32.mrb[201].mxu1  ;;  %v13403_v0 = vpop.permute.xlu1 %7324 }
0x1b45   : > { %v6046_v13 = vadd.f32 %v6031_v25, %v14358_v10  ;;  %v9853_v55 = vpop.f32.mrb[202].mxu1 }
0x1b46   : > { %6052 = vst.msk [vmem:[%s11202_s3 + $0x50] sm:$0xff] %vm499_vm1, %v6048_v29  ;;  %v6049_v17 = vadd.f32 %v9853_v55, %v14359_v60  ;;  %v6034_v28 = vpop.f32.mrb[203].mxu1 }
0x1b47   : > { %6050 = vst.msk [vmem:[%s11202_s3 + $0x40] sm:$0xff] %vm499_vm1, %v6046_v13  ;;  %v6047_v56 = vadd.f32 %v6034_v28, %v14360_v37 }
0x1b48   : > { %6053 = vst.msk [vmem:[%s11202_s3 + $0x58] sm:$0xff] %vm499_vm1, %v6049_v17  ;;  %v13405_v11 = vpop.permute.xlu1 %7502 }
0x1b49   : > { %6051 = vst.msk [vmem:[%s11202_s3 + $0x48] sm:$0xff] %vm499_vm1, %v6047_v56 }
0x1b4c   : > { %v13407_v27 = vpop.permute.xlu1 %7506 }
0x1b83   : > { %v2112_v35 = vpop.xlane.xlu1 %2111 }
0x1b84   : > { %v2135_v46 = vmul.f32 0.03125, %v2112_v35 }
0x1b86   : > { %v2143_v51 = vadd.f32 1e-05, %v2135_v46 }
0x1b87   : > { %v2115_v29 = vpop.xlane.xlu1 %2114 }
0x1b88   : > { %10520 = vrsqrt.f32 %v2143_v51  ;;  %v2136_v25 = vmul.f32 0.03125, %v2115_v29 }
0x1b8a   : > { %v2144_v10 = vadd.f32 1e-05, %v2136_v25 }
0x1b8b   : > { %v2121_v13 = vpop.xlane.xlu1 %2120 }
0x1b8c   : > { %10522 = vrsqrt.f32 %v2144_v10  ;;  %v2138_v55 = vmul.f32 0.03125, %v2121_v13 }
0x1b8e   : > { %v2146_v60 = vadd.f32 1e-05, %v2138_v55 }
0x1b8f   : > { %v2124_v17 = vpop.xlane.xlu1 %2123 }
0x1b90   : > { %10524 = vrsqrt.f32 %v2146_v60  ;;  %v2139_v28 = vmul.f32 0.03125, %v2124_v17 }
0x1b92   : > { %v10521_v37 = vpop.eup %10520  ;;  %v2147_v56 = vadd.f32 1e-05, %v2139_v28 }
0x1b93   : > { %v2127_v18 = vpop.xlane.xlu1 %2126  ;;  %v2159_v35 = vmul.f32 %v10521_v37, %v14329_v1 }
0x1b94   : > { %10526 = vrsqrt.f32 %v2147_v56  ;;  %v2140_v46 = vmul.f32 0.03125, %v2127_v18 }
0x1b95   : > { %v2173_v51 = vmul.f32 %v13409_v20, %v2159_v35 }
0x1b96   : > { %v10523_v29 = vpop.eup %10522  ;;  %v2148_v25 = vadd.f32 1e-05, %v2140_v46 }
0x1b97   : > { %v2133_v10 = vpop.xlane.xlu1 %2132  ;;  %2181 = vst.msk [vmem:[%s11200_s9] sm:$0xff] %vm499_vm1, %v2173_v51  ;;  %v2160_v13 = vmul.f32 %v10523_v29, %v14330_v2 }
0x1b98   : > { %10528 = vrsqrt.f32 %v2148_v25  ;;  %v2142_v55 = vmul.f32 0.03125, %v2133_v10 }
0x1b99   : > { %v2174_v60 = vmul.f32 %v13409_v20, %v2160_v13 }
0x1b9a   : > { %v10525_v17 = vpop.eup %10524  ;;  %v2150_v1 = vadd.f32 1e-05, %v2142_v55 }
0x1b9b   : > { %2182 = vst.msk [vmem:[%s11200_s9 + $0x8] sm:$0xff] %vm499_vm1, %v2174_v60  ;;  %v2162_v18 = vmul.f32 %v10525_v17, %v14331_v36 }
0x1b9c   : > { %10530 = vrsqrt.f32 %v2150_v1 }
0x1b9d   : > { %v2176_v28 = vmul.f32 %v13409_v20, %v2162_v18 }
0x1b9e   : > { %v10527_v37 = vpop.eup %10526 }
0x1b9f   : > { %v2163_v56 = vmul.f32 %v10527_v37, %v14332_v63  ;;  %2184 = vst.msk [vmem:[%s11200_s9 + $0x18] sm:$0xff] %vm499_vm1, %v2176_v28 }
0x1ba1   : > { %v2177_v2 = vmul.f32 %v13409_v20, %v2163_v56 }
0x1ba2   : > { %v10529_v35 = vpop.eup %10528 }
0x1ba3   : > { %2185 = vst.msk [vmem:[%s11200_s9 + $0x20] sm:$0xff] %vm499_vm1, %v2177_v2  ;;  %v2164_v46 = vmul.f32 %v10529_v35, %v14333_v39 }
0x1ba5   : > { %v2178_v51 = vmul.f32 %v13409_v20, %v2164_v46 }
0x1ba6   : > { %v10531_v29 = vpop.eup %10530 }
0x1ba7   : > { %2186 = vst.msk [vmem:[%s11200_s9 + $0x28] sm:$0xff] %vm499_vm1, %v2178_v51  ;;  %v2166_v36 = vmul.f32 %v10531_v29, %v14334_v30 }
0x1ba9   : > { %v2180_v25 = vmul.f32 %v13409_v20, %v2166_v36 }
0x1bab   : > { %2188 = vst.msk [vmem:[%s11200_s9 + $0x38] sm:$0xff] %vm499_vm1, %v2180_v25 }
0x1c0a   : > { %v9880_v63 = vpop.f32.mrb[204].mxu1 }
0x1c0b   : > { %v6473_v10 = vpop.f32.mrb[205].mxu1 }
0x1c0c   : > { %v9881_v13 = vpop.f32.mrb[206].mxu1 }
0x1c0d   : > { %v6505_v55 = vpack.c.bf16 %v9881_v13, %v9880_v63  ;;  %v6476_v60 = vpop.f32.mrb[207].mxu1 }
0x1c0e   : > { %v6504_v17 = vpack.c.bf16 %v6476_v60, %v6473_v10 }
0x1c10   : > { %9894 = vmatprep.mubr.msk.bf16.mxu1 %vm817_vm3, %v6504_v17  ;;  %9902 = vmatprep.subr.bf16.mxu0 %v6504_v17 }
0x1c11   : > { %9910 = vmatprep.mubr.msk.bf16.mxu0 %vm817_vm3, %v6504_v17  ;;  %9895 = vmatmul.mubr.msk.bf16.vlgmr.msra.gmra.mrb[212].mxu1 %vm817_vm3, %v6505_v55 }
0x1c12   : > { %9903 = vmatpush3.bf16.msra.mxu0 %v6504_v17  ;;  %v9884_v39 = vpop.f32.mrb[208].mxu1 }
0x1c13   : > { %9904 = vmatprep.subr.bf16.mxu0 %v6505_v55  ;;  %v6489_v30 = vpop.f32.mrb[209].mxu1 }
0x1c14   : > { %v9885_v1 = vpop.f32.mrb[210].mxu1 }
0x1c15   : > { %v6507_v18 = vpack.c.bf16 %v9885_v1, %v9884_v39  ;;  %v6492_v28 = vpop.f32.mrb[211].mxu1 }
0x1c16   : > { %v6506_v37 = vpack.c.bf16 %v6492_v28, %v6489_v30  ;;  %9905 = vmatpush3.bf16.msra.mxu0 %v6505_v55 }
0x1c18   : > { %9898 = vmatprep.mubr.msk.bf16.mxu1 %vm817_vm3, %v6506_v37  ;;  %9906 = vmatprep.subr.bf16.mxu0 %v6506_v37 }
0x1c19   : > { %9899 = vmatmul.mubr.msk.bf16.gmra.mrb[216].mxu1 %vm817_vm3, %v6507_v18 }
0x1c1a   : > { %9907 = vmatpush3.bf16.msra.mxu0 %v6506_v37 }
0x1c1b   : > { %9908 = vmatprep.subr.bf16.mxu0 %v6507_v18 }
0x1c1e   : > { %9909 = vmatpush3.bf16.msra.mxu0 %v6507_v18 }
0x1c21   : > { %9911 = vmatmul.mubr.msk.bf16.vlgmr.msra.gmra.mrb[200].mxu0 %vm817_vm3, %v6505_v55 }
0x1c22   : > { %9914 = vmatprep.mubr.msk.bf16.mxu0 %vm817_vm3, %v6506_v37 }
0x1c29   : > { %9915 = vmatmul.mubr.msk.bf16.gmra.mrb[204].mxu0 %vm817_vm3, %v6507_v18 }
0x1ce4   : > { %v9896_v56 = vpop.f32.mrb[212].mxu1 }
0x1ce5   : > { %v6558_v2 = vpop.f32.mrb[213].mxu1  ;;  %v6591_v25 = vadd.f32 %v9896_v56, %v13364_v4 }
0x1ce6   : > { %v9897_v35 = vpop.f32.mrb[214].mxu1  ;;  %v6589_v51 = vadd.f32 %v6558_v2, %v13356_v49 }
0x1ce7   : > { %v6561_v46 = vpop.f32.mrb[215].mxu1  ;;  %v6592_v29 = vadd.f32 %v9897_v35, %v13359_v14 }
0x1ce8   : > { %v6590_v36 = vadd.f32 %v6561_v46, %v13353_v32 }
0x1ce9   : > { %v6667_v10 = vpack.c.bf16 %v6592_v29, %v6591_v25 }
0x1cea   : > { %v6666_v63 = vpack.c.bf16 %v6590_v36, %v6589_v51 }
0x1cec   : > { %v9900_v13 = vpop.f32.mrb[216].mxu1  ;;  %9918 = vmatprep.subr.bf16.mxu1 %v6666_v63 }
0x1ced   : > { %v6574_v55 = vpop.f32.mrb[217].mxu1  ;;  %9919 = vmatpush3.bf16.msra.mxu1 %v6666_v63  ;;  %v6595_v32 = vadd.f32 %v9900_v13, %v13382_v24 }
0x1cee   : > { %v9901_v60 = vpop.f32.mrb[218].mxu1  ;;  %9920 = vmatprep.subr.bf16.mxu1 %v6667_v10  ;;  %v6593_v39 = vadd.f32 %v6574_v55, %v13374_v62 }
0x1cef   : > { %v6577_v17 = vpop.f32.mrb[219].mxu1  ;;  %v6596_v30 = vadd.f32 %v9901_v60, %v13377_v44 }
0x1cf0   : > { %v6594_v49 = vadd.f32 %v6577_v17, %v13367_v19 }
0x1cf1   : > { %9921 = vmatpush3.bf16.msra.mxu1 %v6667_v10  ;;  %v6669_v4 = vpack.c.bf16 %v6596_v30, %v6595_v32 }
0x1cf2   : > { %v6668_v14 = vpack.c.bf16 %v6594_v49, %v6593_v39 }
0x1cf4   : > { %v9912_v1 = vpop.f32.mrb[200].mxu0  ;;  %9922 = vmatprep.subr.bf16.mxu1 %v6668_v14 }
0x1cf5   : > { %v6631_v18 = vpop.f32.mrb[201].mxu0  ;;  %9923 = vmatpush3.bf16.msra.mxu1 %v6668_v14 }
0x1cf6   : > { %v9913_v28 = vpop.f32.mrb[202].mxu0  ;;  %9924 = vmatprep.subr.bf16.mxu1 %v6669_v4 }
0x1cf7   : > { %v6663_v37 = vpack.c.bf16 %v9913_v28, %v9912_v1  ;;  %v6634_v56 = vpop.f32.mrb[203].mxu0 }
0x1cf8   : > { %v6662_v2 = vpack.c.bf16 %v6634_v56, %v6631_v18 }
0x1cf9   : > { %9925 = vmatpush3.bf16.msra.mxu1 %v6669_v4 }
0x1cfa   : > { %9926 = vmatprep.mubr.msk.bf16.mxu1 %vm817_vm3, %v6662_v2  ;;  %9934 = vmatprep.subr.bf16.mxu0 %v6662_v2 }
0x1cfb   : > { %9942 = vmatprep.mubr.msk.bf16.mxu0 %vm817_vm3, %v6662_v2  ;;  %9935 = vmatpush3.bf16.msra.mxu0 %v6662_v2 }
0x1cfc   : > { %v9916_v19 = vpop.f32.mrb[204].mxu0  ;;  %9936 = vmatprep.subr.bf16.mxu0 %v6663_v37  ;;  %9927 = vmatmul.mubr.msk.bf16.vlgmr.msra.gmra.mrb[220].mxu1 %vm817_vm3, %v6663_v37 }
0x1cfd   : > { %v6647_v62 = vpop.f32.mrb[205].mxu0 }
0x1cfe   : > { %v9917_v44 = vpop.f32.mrb[206].mxu0 }
0x1cff   : > { %v6665_v24 = vpack.c.bf16 %v9917_v44, %v9916_v19  ;;  %v6650_v35 = vpop.f32.mrb[207].mxu0  ;;  %9937 = vmatpush3.bf16.msra.mxu0 %v6663_v37 }
0x1d00   : > { %v6664_v46 = vpack.c.bf16 %v6650_v35, %v6647_v62 }
0x1d02   : > { %9930 = vmatprep.mubr.msk.bf16.mxu1 %vm817_vm3, %v6664_v46  ;;  %9938 = vmatprep.subr.bf16.mxu0 %v6664_v46 }
0x1d03   : > { %9939 = vmatpush3.bf16.msra.mxu0 %v6664_v46 }
0x1d04   : > { %9940 = vmatprep.subr.bf16.mxu0 %v6665_v24  ;;  %9931 = vmatmul.mubr.msk.bf16.gmra.mrb[224].mxu1 %vm817_vm3, %v6665_v24 }
0x1d07   : > { %9941 = vmatpush3.bf16.msra.mxu0 %v6665_v24 }
0x1d0a   : > { %9943 = vmatmul.mubr.msk.bf16.vlgmr.msra.gmra.mrb[208].mxu0 %vm817_vm3, %v6663_v37 }
0x1d0b   : > { %9946 = vmatprep.mubr.msk.bf16.mxu0 %vm817_vm3, %v6664_v46 }
0x1d12   : > { %9947 = vmatmul.mubr.msk.bf16.gmra.mrb[212].mxu0 %vm817_vm3, %v6665_v24 }
0x1dcf   : > { %v9928_v63 = vpop.f32.mrb[220].mxu1 }
0x1dd0   : > { %v6716_v10 = vpop.f32.mrb[221].mxu1  ;;  %v6749_v4 = vadd.f32 %v9928_v63, %v6591_v25 }
0x1dd1   : > { %v9929_v13 = vpop.f32.mrb[222].mxu1  ;;  %v6747_v60 = vadd.f32 %v6716_v10, %v6589_v51 }
0x1dd2   : > { %v6719_v55 = vpop.f32.mrb[223].mxu1  ;;  %v6750_v17 = vadd.f32 %v9929_v13, %v6592_v29 }
0x1dd3   : > { %v6748_v14 = vadd.f32 %v6719_v55, %v6590_v36 }
0x1dd4   : > { %v6825_v18 = vpack.c.bf16 %v6750_v17, %v6749_v4 }
0x1dd5   : > { %v6824_v1 = vpack.c.bf16 %v6748_v14, %v6747_v60 }
0x1dd7   : > { %v9932_v28 = vpop.f32.mrb[224].mxu1  ;;  %9950 = vmatprep.subr.bf16.mxu1 %v6824_v1 }
0x1dd8   : > { %v6732_v56 = vpop.f32.mrb[225].mxu1  ;;  %9951 = vmatpush3.bf16.msra.mxu1 %v6824_v1  ;;  %v6753_v24 = vadd.f32 %v9932_v28, %v6595_v32 }
0x1dd9   : > { %v9933_v2 = vpop.f32.mrb[226].mxu1  ;;  %9952 = vmatprep.subr.bf16.mxu1 %v6825_v18  ;;  %v6751_v19 = vadd.f32 %v6732_v56, %v6593_v39 }
0x1dda   : > { %v6735_v37 = vpop.f32.mrb[227].mxu1  ;;  %v6754_v62 = vadd.f32 %v9933_v2, %v6596_v30 }
0x1ddb   : > { %v6752_v44 = vadd.f32 %v6735_v37, %v6594_v49 }
0x1ddc   : > { %9953 = vmatpush3.bf16.msra.mxu1 %v6825_v18  ;;  %v6827_v29 = vpack.c.bf16 %v6754_v62, %v6753_v24 }
0x1ddd   : > { %v6826_v35 = vpack.c.bf16 %v6752_v44, %v6751_v19  ;;  %v9944_v46 = vpop.f32.mrb[208].mxu0 }
0x1dde   : > { %v6789_v51 = vpop.f32.mrb[209].mxu0 }
0x1ddf   : > { %v9945_v36 = vpop.f32.mrb[210].mxu0  ;;  %9954 = vmatprep.subr.bf16.mxu1 %v6826_v35 }
0x1de0   : > { %v6821_v25 = vpack.c.bf16 %v9945_v36, %v9944_v46  ;;  %v6792_v63 = vpop.f32.mrb[211].mxu0  ;;  %9955 = vmatpush3.bf16.msra.mxu1 %v6826_v35 }
0x1de1   : > { %v6820_v10 = vpack.c.bf16 %v6792_v63, %v6789_v51  ;;  %9956 = vmatprep.subr.bf16.mxu1 %v6827_v29 }
0x1de3   : > { %9958 = vmatprep.mubr.msk.bf16.mxu1 %vm817_vm3, %v6820_v10  ;;  %9966 = vmatprep.subr.bf16.mxu0 %v6820_v10 }
0x1de4   : > { %9974 = vmatprep.mubr.msk.bf16.mxu0 %vm817_vm3, %v6820_v10  ;;  %9967 = vmatpush3.bf16.msra.mxu0 %v6820_v10 }
0x1de5   : > { %v9948_v39 = vpop.f32.mrb[212].mxu0  ;;  %9957 = vmatpush3.bf16.msra.mxu1 %v6827_v29  ;;  %9968 = vmatprep.subr.bf16.mxu0 %v6821_v25 }
0x1de6   : > { %v6805_v30 = vpop.f32.mrb[213].mxu0 }
0x1de7   : > { %v9949_v49 = vpop.f32.mrb[214].mxu0 }
0x1de8   : > { %v6823_v32 = vpack.c.bf16 %v9949_v49, %v9948_v39  ;;  %v6808_v13 = vpop.f32.mrb[215].mxu0  ;;  %9959 = vmatmul.mubr.msk.bf16.vlgmr.msra.gmra.mrb[228].mxu1 %vm817_vm3, %v6821_v25  ;;  %9969 = vmatpush3.bf16.msra.mxu0 %v6821_v25 }
0x1de9   : > { %v6822_v55 = vpack.c.bf16 %v6808_v13, %v6805_v30 }
0x1deb   : > { %9962 = vmatprep.mubr.msk.bf16.mxu1 %vm817_vm3, %v6822_v55  ;;  %9970 = vmatprep.subr.bf16.mxu0 %v6822_v55 }
0x1dec   : > { %9971 = vmatpush3.bf16.msra.mxu0 %v6822_v55 }
0x1ded   : > { %9972 = vmatprep.subr.bf16.mxu0 %v6823_v32 }
0x1df0   : > { %9963 = vmatmul.mubr.msk.bf16.gmra.mrb[232].mxu1 %vm817_vm3, %v6823_v32  ;;  %9973 = vmatpush3.bf16.msra.mxu0 %v6823_v32 }
0x1df3   : > { %9975 = vmatmul.mubr.msk.bf16.vlgmr.msra.gmra.mrb[216].mxu0 %vm817_vm3, %v6821_v25 }
0x1df4   : > { %9978 = vmatprep.mubr.msk.bf16.mxu0 %vm817_vm3, %v6822_v55 }
0x1dfb   : > { %9979 = vmatmul.mubr.msk.bf16.gmra.mrb[220].mxu0 %vm817_vm3, %v6823_v32 }
0x1ebb   : > { %v9960_v1 = vpop.f32.mrb[228].mxu1 }
0x1ebc   : > { %v6874_v18 = vpop.f32.mrb[229].mxu1  ;;  %v13473_v46 = vadd.f32 %v9960_v1, %v6749_v4 }
0x1ebd   : > { %v9961_v28 = vpop.f32.mrb[230].mxu1  ;;  %v13467_v2 = vadd.f32 %v6874_v18, %v6747_v60 }
0x1ebe   : > { %v6877_v56 = vpop.f32.mrb[231].mxu1  ;;  %v13469_v37 = vadd.f32 %v9961_v28, %v6750_v17 }
0x1ebf   : > { %v13471_v35 = vadd.f32 %v6877_v56, %v6748_v14 }
0x1ec0   : > { %v6983_v29 = vpack.c.bf16 %v13469_v37, %v13473_v46 }
0x1ec1   : > { %v6982_v51 = vpack.c.bf16 %v13471_v35, %v13467_v2 }
0x1ec3   : > { %v9964_v36 = vpop.f32.mrb[232].mxu1  ;;  %9982 = vmatprep.subr.bf16.mxu1 %v6982_v51 }
0x1ec4   : > { %v6890_v25 = vpop.f32.mrb[233].mxu1  ;;  %9983 = vmatpush3.bf16.msra.mxu1 %v6982_v51  ;;  %v13487_v55 = vadd.f32 %v9964_v36, %v6753_v24 }
0x1ec5   : > { %v9965_v63 = vpop.f32.mrb[234].mxu1  ;;  %9984 = vmatprep.subr.bf16.mxu1 %v6983_v29  ;;  %v13479_v17 = vadd.f32 %v6890_v25, %v6751_v19 }
0x1ec6   : > { %v6893_v60 = vpop.f32.mrb[235].mxu1  ;;  %v9976_v10 = vpop.f32.mrb[216].mxu0  ;;  %v13483_v39 = vadd.f32 %v9965_v63, %v6754_v62 }
0x1ec7   : > { %v13481_v14 = vadd.f32 %v6893_v60, %v6752_v44  ;;  %v6947_v4 = vpop.f32.mrb[217].mxu0 }
0x1ec8   : > { %v9977_v30 = vpop.f32.mrb[218].mxu0  ;;  %9985 = vmatpush3.bf16.msra.mxu1 %v6983_v29  ;;  %v6985_v19 = vpack.c.bf16 %v13483_v39, %v13487_v55 }
0x1ec9   : > { %v6984_v49 = vpack.c.bf16 %v13481_v14, %v13479_v17  ;;  %v6979_v32 = vpack.c.bf16 %v9977_v30, %v9976_v10  ;;  %v6950_v13 = vpop.f32.mrb[219].mxu0 }
0x1eca   : > { %v6978_v1 = vpack.c.bf16 %v6950_v13, %v6947_v4 }
0x1ecb   : > { %9986 = vmatprep.subr.bf16.mxu1 %v6984_v49 }
0x1ecc   : > { %9987 = vmatpush3.bf16.msra.mxu1 %v6984_v49  ;;  %9990 = vmatprep.mubr.msk.bf16.mxu1 %vm817_vm3, %v6978_v1 }
0x1ecd   : > { %9998 = vmatprep.subr.bf16.mxu0 %v6978_v1  ;;  %10006 = vmatprep.mubr.msk.bf16.mxu0 %vm817_vm3, %v6978_v1 }
0x1ece   : > { %9988 = vmatprep.subr.bf16.mxu1 %v6985_v19  ;;  %9999 = vmatpush3.bf16.msra.mxu0 %v6978_v1  ;;  %v9980_v62 = vpop.f32.mrb[220].mxu0 }
0x1ecf   : > { %10000 = vmatprep.subr.bf16.mxu0 %v6979_v32  ;;  %v6963_v44 = vpop.f32.mrb[221].mxu0 }
0x1ed0   : > { %v9981_v18 = vpop.f32.mrb[222].mxu0  ;;  %9989 = vmatpush3.bf16.msra.mxu1 %v6985_v19 }
0x1ed1   : > { %v6981_v24 = vpack.c.bf16 %v9981_v18, %v9980_v62  ;;  %v6966_v28 = vpop.f32.mrb[223].mxu0 }
0x1ed2   : > { %v6980_v56 = vpack.c.bf16 %v6966_v28, %v6963_v44  ;;  %10001 = vmatpush3.bf16.msra.mxu0 %v6979_v32  ;;  %v7319_v28 = vpop.permute.xlu0 %7318 }
0x1ed3   : > { %9991 = vmatmul.mubr.msk.bf16.vlgmr.msra.gmra.mrb[236].mxu1 %vm817_vm3, %v6979_v32 }
0x1ed4   : > { %9994 = vmatprep.mubr.msk.bf16.mxu1 %vm817_vm3, %v6980_v56  ;;  %10002 = vmatprep.subr.bf16.mxu0 %v6980_v56 }
0x1ed6   : > { %10003 = vmatpush3.bf16.msra.mxu0 %v6980_v56 }
0x1ed7   : > { %10004 = vmatprep.subr.bf16.mxu0 %v6981_v24 }
0x1eda   : > { %10005 = vmatpush3.bf16.msra.mxu0 %v6981_v24 }
0x1edb   : > { %10030 = vmatprep.subr.bf16.mxu0 %v13233_v57  ;;  %9995 = vmatmul.mubr.msk.bf16.gmra.mrb[240].mxu1 %vm817_vm3, %v6981_v24 }
0x1edd   : > { %10007 = vmatmul.mubr.msk.bf16.vlgmr.msra.gmra.mrb[224].mxu0 %vm817_vm3, %v6979_v32 }
0x1ede   : > { %10010 = vmatprep.mubr.msk.bf16.mxu0 %vm817_vm3, %v6980_v56  ;;  %10031 = vmatpush3.bf16.msra.mxu0 %v13233_v57 }
0x1edf   : > { %10032 = vmatprep.subr.bf16.mxu0 %v13128_v45 }
0x1ee2   : > { %10033 = vmatpush3.bf16.msra.mxu0 %v13128_v45 }
0x1ee3   : > { %10034 = vmatprep.subr.bf16.mxu0 %v13263_v5 }
0x1ee5   : > { %10011 = vmatmul.mubr.msk.bf16.gmra.mrb[228].mxu0 %vm817_vm3, %v6981_v24 }
0x1ee6   : > { %10035 = vmatpush3.bf16.msra.mxu0 %v13263_v5 }
0x1ee7   : > { %10036 = vmatprep.subr.bf16.mxu0 %v13130_v22 }
0x1eea   : > { %10037 = vmatpush3.bf16.msra.mxu0 %v13130_v22 }
0x1fa6   : > { %v9992_v51 = vpop.f32.mrb[236].mxu1 }
0x1fa7   : > { %v7032_v29 = vpop.f32.mrb[237].mxu1  ;;  %v7065_v60 = vadd.f32 %v9992_v51, %v13473_v46 }
0x1fa8   : > { %v9993_v36 = vpop.f32.mrb[238].mxu1  ;;  %v7063_v57 = vadd.f32 %v7032_v29, %v13467_v2  ;;  %v13534_v29 = vld [vmem:[%s11202_s3 + $0x60] sm:$0xff] }
0x1fa9   : > { %v7035_v25 = vpop.f32.mrb[239].mxu1  ;;  %v7066_v63 = vadd.f32 %v9993_v36, %v13469_v37  ;;  %v13537_v36 = vld [vmem:[%s11202_s3 + $0x68] sm:$0xff] }
0x1faa   : > { %v7064_v45 = vadd.f32 %v7035_v25, %v13471_v35 }
0x1fab   : > { %v7141_v4 = vpack.c.bf16 %v7066_v63, %v7065_v60 }
0x1fac   : > { %v7140_v10 = vpack.c.bf16 %v7064_v45, %v7063_v57 }
0x1fae   : > { %v9996_v30 = vpop.f32.mrb[240].mxu1  ;;  %10014 = vmatprep.subr.bf16.mxu1 %v7140_v10 }
0x1faf   : > { %v7048_v5 = vpop.f32.mrb[241].mxu1  ;;  %10015 = vmatpush3.bf16.msra.mxu1 %v7140_v10  ;;  %v7069_v62 = vadd.f32 %v9996_v30, %v13487_v55 }
0x1fb0   : > { %v10008_v49 = vpop.f32.mrb[224].mxu0  ;;  %v9997_v22 = vpop.f32.mrb[242].mxu1  ;;  %10016 = vmatprep.subr.bf16.mxu1 %v7141_v4  ;;  %v13512_v1 = vadd.f32 %v7048_v5, %v13479_v17 }
0x1fb1   : > { %v7105_v32 = vpop.f32.mrb[225].mxu0  ;;  %v7051_v13 = vpop.f32.mrb[243].mxu1  ;;  %v7070_v2 = vadd.f32 %v9997_v22, %v13483_v39  ;;  %v13546_v22 = vld [vmem:[%s11202_s3 + $0x70] sm:$0xff] }
0x1fb2   : > { %v13516_v37 = vadd.f32 %v7051_v13, %v13481_v14  ;;  %v10009_v35 = vpop.f32.mrb[226].mxu0 }
0x1fb3   : > { %v7137_v46 = vpack.c.bf16 %v10009_v35, %v10008_v49  ;;  %v7108_v19 = vpop.f32.mrb[227].mxu0  ;;  %10017 = vmatpush3.bf16.msra.mxu1 %v7141_v4  ;;  %v7143_v24 = vpack.c.bf16 %v7070_v2, %v7069_v62 }
0x1fb4   : > { %v7142_v44 = vpack.c.bf16 %v13516_v37, %v13512_v1  ;;  %v7136_v18 = vpack.c.bf16 %v7108_v19, %v7105_v32  ;;  %v13549_v32 = vld [vmem:[%s11202_s3 + $0x78] sm:$0xff] }
0x1fb5   : > { %v13557_v19 = vpack.c.bf16 %v13549_v32, %v13546_v22 }
0x1fb6   : > { %10022 = vmatprep.mubr.msk.bf16.mxu1 %vm817_vm3, %v7136_v18  ;;  %10018 = vmatprep.subr.bf16.mxu1 %v7142_v44 }
0x1fb7   : > { %10019 = vmatpush3.bf16.msra.mxu1 %v7142_v44 }
0x1fb8   : > { %v10012_v17 = vpop.f32.mrb[228].mxu0  ;;  %10020 = vmatprep.subr.bf16.mxu1 %v7143_v24 }
0x1fb9   : > { %v7121_v39 = vpop.f32.mrb[229].mxu0 }
0x1fba   : > { %v10013_v14 = vpop.f32.mrb[230].mxu0 }
0x1fbb   : > { %v7139_v56 = vpack.c.bf16 %v10013_v14, %v10012_v17  ;;  %v7124_v51 = vpop.f32.mrb[231].mxu0  ;;  %10021 = vmatpush3.bf16.msra.mxu1 %v7143_v24 }
0x1fbc   : > { %v7138_v55 = vpack.c.bf16 %v7124_v51, %v7121_v39  ;;  %10046 = vmatprep.subr.bf16.mxu1 %v7319_v28 }
0x1fbe   : > { %10023 = vmatmul.mubr.msk.bf16.vlgmr.msra.gmra.mrb[244].mxu1 %vm817_vm3, %v7137_v46 }
0x1fbf   : > { %10026 = vmatprep.mubr.msk.bf16.mxu1 %vm817_vm3, %v7138_v55  ;;  %10047 = vmatpush3.bf16.msra.mxu1 %v7319_v28  ;;  %v13571_v28 = vpop.permute.xlu0 %7500 }
0x1fc0   : > { %10048 = vmatprep.subr.bf16.mxu1 %v13399_v58 }
0x1fc3   : > { %10049 = vmatpush3.bf16.msra.mxu1 %v13399_v58  ;;  %v13541_v58 = vpack.c.bf16 %v13537_v36, %v13534_v29 }
0x1fc4   : > { %10050 = vmatprep.subr.bf16.mxu1 %v13401_v6 }
0x1fc5   : > { %10202 = vmatprep.subr.msk.bf16.mxu0 %vm499_vm1, %v13541_v58  ;;  %v13553_v46 = vsel %vm499_vm1, %v13541_v58, 0 }
0x1fc6   : > { %10027 = vmatmul.mubr.msk.bf16.gmra.mrb[248].mxu1 %vm817_vm3, %v7139_v56 }
0x1fc7   : > { %10051 = vmatpush3.bf16.msra.mxu1 %v13401_v6 }
0x1fc8   : > { %10052 = vmatprep.subr.bf16.mxu1 %v13403_v0 }
0x1fcb   : > { %10053 = vmatpush3.bf16.msra.mxu1 %v13403_v0 }
0x1fcc   : > { %10204 = vmatprep.subr.msk.bf16.mxu1 %vm499_vm1, %v13122_v33 }
0x2091   : > { %v10024_v6 = vpop.f32.mrb[244].mxu1 }
0x2092   : > { %v7190_v25 = vpop.f32.mrb[245].mxu1  ;;  %v7223_v4 = vadd.f32 %v10024_v6, %v7065_v60 }
0x2093   : > { %v10025_v10 = vpop.f32.mrb[246].mxu1  ;;  %v7221_v5 = vadd.f32 %v7190_v25, %v7063_v57 }
0x2094   : > { %v7224_v30 = vadd.f32 %v10025_v10, %v7066_v63  ;;  %v7193_v0 = vpop.f32.mrb[247].mxu1 }
0x2095   : > { %v7222_v49 = vadd.f32 %v7193_v0, %v7064_v45 }
0x2096   : > { %v7230_v13 = vpack.c.bf16 %v7224_v30, %v7223_v4 }
0x2097   : > { %v7229_v35 = vpack.c.bf16 %v7222_v49, %v7221_v5 }
0x2099   : > { %v10028_v44 = vpop.f32.mrb[248].mxu1  ;;  %10038 = vmatprep.mubr.msk.bf16.mxu0 %vm817_vm3, %v7229_v35  ;;  %10054 = vmatprep.mubr.msk.bf16.mxu1 %vm817_vm3, %v7229_v35 }
0x209a   : > { %v7206_v57 = vpop.f32.mrb[249].mxu1  ;;  %10039 = vmatmul.mubr.msk.bf16.vlgmr.msra.gmra.mrb[232].mxu0 %vm817_vm3, %v7230_v13  ;;  %10055 = vmatmul.mubr.msk.bf16.vlgmr.msra.gmra.mrb[252].mxu1 %vm817_vm3, %v7230_v13  ;;  %v7227_v45 = vadd.f32 %v10028_v44, %v7069_v62 }
0x209b   : > { %10075 = vmatpush3.bf16.xpose.msra.mxu1 %v13220_v12  ;;  %v10029_v63 = vpop.f32.mrb[250].mxu1  ;;  %10063 = vmatpush3.bf16.xpose.msra.mxu0 %v13553_v46  ;;  %v7225_v24 = vadd.f32 %v7206_v57, %v13512_v1  ;;  %v13598_v12 = vsel %vm499_vm1, %v13557_v19, 0 }
0x209c   : > { %v7228_v60 = vadd.f32 %v10029_v63, %v7070_v2  ;;  %10205 = vmatprep.subr.msk.bf16.mxu1 %vm499_vm1, %v13124_v38  ;;  %v7209_v18 = vpop.f32.mrb[251].mxu1  ;;  %10203 = vmatprep.subr.msk.bf16.mxu0 %vm499_vm1, %v13557_v19 }
0x209d   : > { %v7226_v17 = vadd.f32 %v7209_v18, %v13516_v37 }
0x209e   : > { %v7232_v39 = vpack.c.bf16 %v7228_v60, %v7227_v45 }
0x209f   : > { %v7231_v14 = vpack.c.bf16 %v7226_v17, %v7225_v24 }
0x20a1   : > { %10042 = vmatprep.mubr.msk.bf16.mxu0 %vm817_vm3, %v7231_v14  ;;  %10058 = vmatprep.mubr.msk.bf16.mxu1 %vm817_vm3, %v7231_v14 }
0x20a2   : > { %10043 = vmatmul.mubr.msk.bf16.gmra.mrb[236].mxu0 %vm817_vm3, %v7232_v39  ;;  %10059 = vmatmul.mubr.msk.bf16.gmra.mrb[0].mxu1 %vm817_vm3, %v7232_v39 }
0x20a3   : > { %10077 = vmatpush3.bf16.xpose.msra.mxu1 %v13239_v40  ;;  %10082 = vmatprep.mubr.msk.bf16.mxu1 %vm499_vm1, %v13571_v28  ;;  %v13601_v40 = vpop.permute.xlu0 %7504 }
0x20a4   : > { %10206 = vmatprep.subr.msk.bf16.mxu1 %vm499_vm1, %v13227_v15  ;;  %10065 = vmatpush3.bf16.xpose.msra.mxu0 %v13598_v12 }
0x20ab   : > { %10079 = vmatpush3.bf16.xpose.msra.mxu1 %v13248_v54 }
0x20ac   : > { %10207 = vmatprep.subr.msk.bf16.mxu1 %vm499_vm1, %v13126_v26 }
0x20b3   : > { %10081 = vmatpush3.bf16.xpose.msra.mxu1 %v13259_v8 }
0x20b4   : > { %10118 = vmatprep.subr.bf16.mxu1 %v13122_v33 }
0x20ba   : > { %10083 = vmatmul.mubr.msk.bf16.vlgmr.msra.gmra.mrb[4].mxu1 %vm499_vm1, %v13405_v11 }
0x20bb   : > { %10119 = vmatpush3.bf16.msra.mxu1 %v13122_v33  ;;  %10086 = vmatprep.mubr.msk.bf16.mxu1 %vm499_vm1, %v13601_v40 }
0x20bc   : > { %10120 = vmatprep.subr.bf16.mxu1 %v13124_v38 }
0x20bf   : > { %10121 = vmatpush3.bf16.msra.mxu1 %v13124_v38 }
0x20c0   : > { %10122 = vmatprep.subr.bf16.mxu1 %v13227_v15 }
0x20c2   : > { %10087 = vmatmul.mubr.msk.bf16.gmra.mrb[8].mxu1 %vm499_vm1, %v13407_v27 }
0x20c3   : > { %10123 = vmatpush3.bf16.msra.mxu1 %v13227_v15 }
0x20c4   : > { %10124 = vmatprep.subr.bf16.mxu1 %v13126_v26 }
0x20c7   : > { %10125 = vmatpush3.bf16.msra.mxu1 %v13126_v26 }
0x216d   : > { %v10040_v33 = vpop.f32.mrb[232].mxu0  ;;  %v10056_v38 = vpop.f32.mrb[252].mxu1 }
0x216e   : > { %v7283_v15 = vpop.f32.mrb[233].mxu0  ;;  %v7364_v54 = vpop.f32.mrb[253].mxu1 }
0x216f   : > { %v10041_v8 = vpop.f32.mrb[234].mxu0  ;;  %v10057_v26 = vpop.f32.mrb[254].mxu1 }
0x2170   : > { %v7402_v1 = vpack.c.bf16 %v10041_v8, %v10040_v33  ;;  %v7286_v2 = vpop.f32.mrb[235].mxu0  ;;  %v7367_v37 = vpop.f32.mrb[255].mxu1 }
0x2171   : > { %v7401_v62 = vpack.c.bf16 %v7286_v2, %v7283_v15 }
0x2173   : > { %10066 = vmatprep.mubr.msk.bf16.mxu0 %vm499_vm1, %v7401_v62 }
0x2174   : > { %10067 = vmatmul.mubr.msk.bf16.vlgmr.msra.gmra.mrb[240].mxu0 %vm499_vm1, %v7402_v1 }
0x2175   : > { %v10044_v56 = vpop.f32.mrb[236].mxu0  ;;  %v10060_v51 = vpop.f32.mrb[0].mxu1 }
0x2176   : > { %v7299_v55 = vpop.f32.mrb[237].mxu0  ;;  %v7380_v6 = vpop.f32.mrb[1].mxu1 }
0x2177   : > { %v10045_v25 = vpop.f32.mrb[238].mxu0  ;;  %v10061_v10 = vpop.f32.mrb[2].mxu1 }
0x2178   : > { %v7404_v4 = vpack.c.bf16 %v10045_v25, %v10044_v56  ;;  %v7302_v30 = vpop.f32.mrb[239].mxu0  ;;  %v7383_v0 = vpop.f32.mrb[3].mxu1 }
0x2179   : > { %v7403_v5 = vpack.c.bf16 %v7302_v30, %v7299_v55 }
0x217b   : > { %10070 = vmatprep.mubr.msk.bf16.mxu0 %vm499_vm1, %v7403_v5 }
0x217c   : > { %10071 = vmatmul.mubr.msk.bf16.gmra.mrb[244].mxu0 %vm499_vm1, %v7404_v4 }
0x218d   : > { %v10084_v49 = vpop.f32.mrb[4].mxu1 }
0x218e   : > { %v7587_v13 = vmul.f32 %v10084_v49, %v14276_v50  ;;  %v7554_v35 = vpop.f32.mrb[5].mxu1 }
0x218f   : > { %v7585_v44 = vmul.f32 %v14326_v42, %v7554_v35  ;;  %v10085_v57 = vpop.f32.mrb[6].mxu1 }
0x2190   : > { %v7588_v63 = vmul.f32 %v10085_v57, %v14327_v21  ;;  %v7557_v45 = vpop.f32.mrb[7].mxu1 }
0x2191   : > { %v7586_v60 = vmul.f32 %v14279_v48, %v7557_v45 }
0x2192   : > { %v7594_v18 = vpack.c.bf16 %v7588_v63, %v7587_v13 }
0x2193   : > { %v7593_v24 = vpack.c.bf16 %v7586_v60, %v7585_v44  ;;  %v14365_v60 = vld [vmem:[#allocation85_spill] sm:$0xff] }
0x2195   : > { %10098 = vmatprep.mubr.msk.bf16.mxu0 %vm817_vm3, %v7593_v24  ;;  %v10088_v17 = vpop.f32.mrb[8].mxu1 }
0x2196   : > { %v7570_v39 = vpop.f32.mrb[9].mxu1  ;;  %v7591_v14 = vmul.f32 %v10088_v17, %v14280_v34 }
0x2197   : > { %v7589_v33 = vmul.f32 %v14328_v61, %v7570_v39  ;;  %v10089_v50 = vpop.f32.mrb[10].mxu1  ;;  %v5858_v39 = vmul.f32 %v13298_v3, %v13298_v3 }
0x2198   : > { %v7592_v15 = vmul.f32 %v10089_v50, %v12087_v52  ;;  %v7573_v42 = vpop.f32.mrb[11].mxu1 }
0x2199   : > { %v7590_v8 = vmul.f32 %v12091_v59, %v7573_v42 }
0x219a   : > { %v7596_v21 = vpack.c.bf16 %v7592_v15, %v7591_v14  ;;  %v5864_v15 = vmul.f32 %v13309_v43, %v13309_v43 }
0x219b   : > { %v7595_v1 = vpack.c.bf16 %v7590_v8, %v7589_v33  ;;  %v5862_v33 = vmul.f32 %v13312_v16, %v13312_v16 }
0x219d   : > { %v5878_v42 = vsel %vm499_vm1, %v5862_v33, 0.0 }
0x2247   : > { %v10068_v2 = vpop.f32.mrb[240].mxu0 }
0x2248   : > { %v7490_v48 = vsub.f32 %v10056_v38, %v10068_v2  ;;  %v7457_v62 = vpop.f32.mrb[241].mxu0 }
0x2249   : > { %v7488_v56 = vsub.f32 %v7364_v54, %v7457_v62  ;;  %v10069_v55 = vpop.f32.mrb[242].mxu0 }
0x224a   : > { %v7491_v25 = vsub.f32 %v10057_v26, %v10069_v55  ;;  %v7460_v4 = vpop.f32.mrb[243].mxu0 }
0x224b   : > { %v7489_v30 = vsub.f32 %v7367_v37, %v7460_v4  ;;  %v14361_v37 = vld [vmem:[#allocation51_spill] sm:$0xff] }
0x224c   : > { %v7598_v5 = vpack.c.bf16 %v7491_v25, %v7490_v48 }
0x224d   : > { %v7597_v34 = vpack.c.bf16 %v7489_v30, %v7488_v56 }
0x224f   : > { %7856 = vxpose.xlu0.c.b16.start [1/4] (short) (narrow) %v7597_v34, 32  ;;  %v10072_v61 = vpop.f32.mrb[244].mxu0  ;;  %10090 = vmatprep.subr.bf16.mxu0 %v7597_v34 }
0x2250   : > { %v7494_v49 = vsub.f32 %v10060_v51, %v10072_v61  ;;  %v7473_v52 = vpop.f32.mrb[245].mxu0  ;;  %10091 = vmatpush3.bf16.msra.mxu0 %v7597_v34  ;;  %v2104_v51 = vmul.f32 %v14361_v37, %v14361_v37 }
0x2251   : > { %v7492_v13 = vsub.f32 %v7380_v6, %v7473_v52  ;;  %v10073_v59 = vpop.f32.mrb[246].mxu0  ;;  %10092 = vmatprep.subr.bf16.mxu0 %v7598_v5  ;;  %v14362_v6 = vld [vmem:[#allocation76_spill] sm:$0xff]  ;;  %v3986_v52 = vpop.xlane.xlu1 %3985 }
0x2252   : > { %v7495_v35 = vsub.f32 %v10061_v10, %v10073_v59  ;;  %v7476_v44 = vpop.f32.mrb[247].mxu0  ;;  %v2108_v10 = vmul.f32 %v14362_v6, %v14362_v6 }
0x2253   : > { %v7493_v38 = vsub.f32 %v7383_v0, %v7476_v44  ;;  %7857 = vxpose.xlu0.c.b16.cont [2/4] (short) (narrow) %v7598_v5, 32  ;;  %v2116_v0 = vsel %vm499_vm1, %v2104_v51, 0.0 }
0x2254   : > { %v7600_v54 = vpack.c.bf16 %v7495_v35, %v7494_v49  ;;  %10093 = vmatpush3.bf16.msra.mxu0 %v7598_v5  ;;  %v2128_v63 = vsel %vm499_vm1, %v2108_v10, 0.0 }
0x2255   : > { %v7599_v26 = vpack.c.bf16 %v7493_v38, %v7492_v13  ;;  %v3992_v38 = vpop.xlane.xlu1 %3991 }
0x2257   : > { %7858 = vxpose.xlu0.c.b16.cont [3/4] (short) (narrow) %v7599_v26, 32  ;;  %10094 = vmatprep.subr.bf16.mxu0 %v7599_v26 }
0x2258   : > { %10095 = vmatpush3.bf16.msra.mxu0 %v7599_v26 }
0x2259   : > { %10096 = vmatprep.subr.bf16.mxu0 %v7600_v54 }
0x225b   : > { %7859 = vxpose.xlu0.c.b16.end [4/4] (short) (narrow) %v7600_v54, 32 }
0x225c   : > { %10097 = vmatpush3.bf16.msra.mxu0 %v7600_v54 }
0x225d   : > { %10208 = vmatprep.subr.msk.bf16.mxu0 %vm499_vm1, %v13541_v58  ;;  %v14363_v58 = vld [vmem:[#allocation45_spill] sm:$0xff] }
0x225e   : > { %v3973_v57 = vmul.f32 %v14363_v58, %v14363_v58 }
0x225f   : > { %10099 = vmatmul.mubr.msk.bf16.vlgmr.msra.gmra.mrb[248].mxu0 %vm817_vm3, %v7594_v18  ;;  %v3977_v18 = vmul.f32 %v14365_v60, %v14365_v60 }
0x2260   : > { %10102 = vmatprep.mubr.msk.bf16.mxu0 %vm817_vm3, %v7595_v1  ;;  %v3981_v45 = vsel %vm499_vm1, %v3973_v57, 0.0 }
0x2261   : > { %v3993_v17 = vsel %vm499_vm1, %v3977_v18, 0.0 }
0x2265   : > { %10107 = vmatpush3.bf16.xpose.msra.mxu0 %v13553_v46  ;;  %v14364_v46 = vld [vmem:[#allocation42_spill] sm:$0xff] }
0x2266   : > { %10209 = vmatprep.subr.msk.bf16.mxu0 %vm499_vm1, %v13557_v19  ;;  %v3975_v19 = vmul.f32 %v14364_v46, %v14364_v46 }
0x2267   : > { %10103 = vmatmul.mubr.msk.bf16.gmra.mrb[252].mxu0 %vm817_vm3, %v7596_v21 }
0x2268   : > { %2117 = vadd.xlane.f32.xlu0 %v2116_v0  ;;  %10110 = vmatprep.mubr.msk.bf16.mxu0 %vm499_vm1, %v13571_v28  ;;  %v3987_v24 = vsel %vm499_vm1, %v3975_v19, 0.0  ;;  %v14366_v28 = vld [vmem:[#allocation84_spill] sm:$0xff] }
0x226c   : > { %2129 = vadd.xlane.f32.xlu0 %v2128_v63  ;;  %v3998_v63 = vpop.xlane.xlu1 %3997 }
0x226d   : > { %10109 = vmatpush3.bf16.xpose.msra.mxu0 %v13598_v12  ;;  %v3979_v12 = vmul.f32 %v14366_v28, %v14366_v28 }
0x226f   : > { %v3999_v14 = vsel %vm499_vm1, %v3979_v12, 0.0 }
0x2270   : > { %3982 = vadd.xlane.f32.xlu0 %v3981_v45  ;;  %v4006_v45 = vmul.f32 0.03125, %v3986_v52 }
0x2274   : > { %3988 = vadd.xlane.f32.xlu0 %v3987_v24  ;;  %10111 = vmatmul.mubr.msk.bf16.vlgmr.msra.gmra.mrb[248].mxu0 %vm499_vm1, %v13405_v11  ;;  %v5860_v11 = vmul.f32 %v13295_v31, %v13295_v31 }
0x2275   : > { %10114 = vmatprep.mubr.msk.bf16.mxu0 %vm499_vm1, %v13601_v40  ;;  %v5866_v40 = vsel %vm499_vm1, %v5858_v39, 0.0 }
0x2276   : > { %v5872_v50 = vsel %vm499_vm1, %v5860_v11, 0.0 }
0x2278   : > { %3994 = vadd.xlane.f32.xlu0 %v3993_v17 }
0x227c   : > { %4000 = vadd.xlane.f32.xlu0 %v3999_v14  ;;  %10115 = vmatmul.mubr.msk.bf16.gmra.mrb[252].mxu0 %vm499_vm1, %v13407_v27  ;;  %v5884_v27 = vsel %vm499_vm1, %v5864_v15, 0.0  ;;  %v4014_v15 = vadd.f32 1e-05, %v4006_v45 }
0x2280   : > { %5867 = vadd.xlane.f32.xlu0 %v5866_v40 }
0x2284   : > { %5873 = vadd.xlane.f32.xlu0 %v5872_v50 }
0x2288   : > { %5879 = vadd.xlane.f32.xlu0 %v5878_v42 }
0x228c   : > { %5885 = vadd.xlane.f32.xlu0 %v5884_v27  ;;  %v4004_v27 = vpop.xlane.xlu1 %4003 }
0x22b5   : > { %v7864_v8 = vpop.trf.xlu0 }
0x22b6   : > { %10126 = vmatprep.mubr.msk.bf16.mxu1 %vm817_vm3, %v7864_v8 }
0x22b9   : > { %v7865_v21 = vpop.trf.xlu0 }
0x22ba   : > { %10127 = vmatmul.mubr.msk.bf16.vlgmr.msra.gmra.mrb[12].mxu1 %vm817_vm3, %v7865_v21  ;;  %vm4077_vm3 = vcmask 523520  }
0x22f5   : > { %v2118_v1 = vpop.xlane.xlu0 %2117 }
0x22f6   : > { %v2137_v2 = vmul.f32 0.03125, %v2118_v1 }
0x22f8   : > { %v2145_v48 = vadd.f32 1e-05, %v2137_v2 }
0x22f9   : > { %v2130_v62 = vpop.xlane.xlu0 %2129 }
0x22fa   : > { %10532 = vrsqrt.f32 %v2145_v48  ;;  %v2141_v56 = vmul.f32 0.03125, %v2130_v62 }
0x22fc   : > { %v2149_v55 = vadd.f32 1e-05, %v2141_v56  ;;  %v4008_v56 = vmul.f32 0.03125, %v3992_v38 }
0x22fd   : > { %v3983_v49 = vpop.xlane.xlu0 %3982 }
0x22fe   : > { %10534 = vrsqrt.f32 %v2149_v55  ;;  %v4005_v11 = vmul.f32 0.03125, %v3983_v49 }
0x22ff   : > { %10536 = vrsqrt.f32 %v4014_v15 }
0x2300   : > { %v4013_v2 = vadd.f32 1e-05, %v4005_v11 }
0x2301   : > { %v3989_v13 = vpop.xlane.xlu0 %3988 }
0x2302   : > { %v4007_v42 = vmul.f32 0.03125, %v3989_v13  ;;  %10538 = vrsqrt.f32 %v4013_v2 }
0x2304   : > { %v10533_v25 = vpop.eup %10532  ;;  %v4015_v55 = vadd.f32 1e-05, %v4007_v42 }
0x2305   : > { %v2161_v4 = vmul.f32 %v10533_v25, %v14361_v37  ;;  %v3995_v26 = vpop.xlane.xlu0 %3994 }
0x2306   : > { %v4009_v48 = vmul.f32 0.03125, %v3995_v26  ;;  %10540 = vrsqrt.f32 %v4015_v55  ;;  %v4012_v26 = vmul.f32 0.03125, %v4004_v27  ;;  %v13719_v27 = vld [vmem:[#allocation7] ss:$0 sm:$0xff] }
0x2307   : > { %v2175_v30 = vmul.f32 %v13409_v20, %v2161_v4  ;;  %v5871_v4 = vpop.xlane.xlu1 %5870 }
0x2308   : > { %v10535_v5 = vpop.eup %10534 }
0x2309   : > { %2183 = vst.msk [vmem:[%s11200_s9 + $0x10] sm:$0xff] %vm499_vm1, %v2175_v30  ;;  %v2165_v34 = vmul.f32 %v10535_v5, %v14362_v6  ;;  %v4001_v18 = vpop.xlane.xlu0 %4000  ;;  %v4017_v30 = vadd.f32 1e-05, %v4009_v48 }
0x230a   : > { %v4011_v5 = vmul.f32 0.03125, %v4001_v18 }
0x230b   : > { %v2179_v61 = vmul.f32 %v13409_v20, %v2165_v34  ;;  %v4016_v34 = vadd.f32 1e-05, %v4008_v56  ;;  %10542 = vrsqrt.f32 %v4017_v30  ;;  %v5877_v38 = vpop.xlane.xlu1 %5876 }
0x230c   : > { %v4019_v52 = vadd.f32 1e-05, %v4011_v5 }
0x230d   : > { %2187 = vst.msk [vmem:[%s11200_s9 + $0x30] sm:$0xff] %vm499_vm1, %v2179_v61  ;;  %v5868_v1 = vpop.xlane.xlu0 %5867  ;;  %v4010_v61 = vmul.f32 0.03125, %v3998_v63  ;;  %10544 = vrsqrt.f32 %v4016_v34 }
0x230e   : > { %v5890_v13 = vmul.f32 0.03125, %v5868_v1  ;;  %10546 = vrsqrt.f32 %v4019_v52 }
0x2311   : > { %v5874_v49 = vpop.xlane.xlu0 %5873 }
0x2347   : > { %v13677_v59 = vpop.f32.mrb[248].mxu0 }
0x2348   : > { %v7745_v35 = vmul.f32 %v13677_v59, %v13677_v59  ;;  %v13681_v44 = vpop.f32.mrb[249].mxu0 }
0x2349   : > { %v13683_v54 = vpop.f32.mrb[250].mxu0  ;;  %v7743_v37 = vmul.f32 %v13681_v44, %v13681_v44 }
0x234a   : > { %v7746_v20 = vmul.f32 %v13683_v54, %v13683_v54  ;;  %v13689_v51 = vpop.f32.mrb[251].mxu0  ;;  %v7757_v6 = vsel %vm499_vm1, %v7745_v35, 0.0  ;;  %v4018_v35 = vadd.f32 1e-05, %v4010_v61 }
0x234b   : > { %7758 = vadd.xlane.f32.xlu0 %v7757_v6  ;;  %v7744_v10 = vmul.f32 %v13689_v51, %v13689_v51  ;;  %v7751_v57 = vsel %vm499_vm1, %v7743_v37, 0.0  ;;  %v10537_v37 = vpop.eup %10536  ;;  %v5898_v6 = vadd.f32 1e-05, %v5890_v13 }
0x234c   : > { %v7760_v0 = vsel %vm499_vm1, %v7746_v20, 0.0  ;;  %v5880_v20 = vpop.xlane.xlu0 %5879  ;;  %10548 = vrsqrt.f32 %v4018_v35  ;;  %v10539_v45 = vpop.eup %10538  ;;  %v4030_v63 = vmul.f32 %v10537_v37, %v14337_v7 }
0x234d   : > { %7761 = vadd.xlane.f32.xlu1 %v7760_v0  ;;  %v7754_v12 = vsel %vm499_vm1, %v7744_v10, 0.0  ;;  %v5892_v10 = vmul.f32 0.03125, %v5874_v49  ;;  %v4020_v0 = vadd.f32 1e-05, %v4012_v26  ;;  %v10541_v18 = vpop.eup %10540  ;;  %10550 = vrsqrt.f32 %v5898_v6 }
0x234e   : > { %v4029_v15 = vmul.f32 %v10539_v45, %v14363_v58  ;;  %v10543_v42 = vpop.eup %10542 }
0x234f   : > { %7752 = vadd.xlane.f32.xlu0 %v7751_v57  ;;  %v13696_v19 = vpop.f32.mrb[252].mxu0  ;;  %v5891_v57 = vmul.f32 0.03125, %v5871_v4  ;;  %v5900_v11 = vadd.f32 1e-05, %v5892_v10  ;;  %10552 = vrsqrt.f32 %v4020_v0  ;;  %v10545_v1 = vpop.eup %10544  ;;  %v4033_v58 = vmul.f32 %v10543_v42, %v14365_v60 }
0x2350   : > { %v13698_v24 = vpop.f32.mrb[253].mxu0  ;;  %v7749_v40 = vmul.f32 %v13696_v19, %v13696_v19  ;;  %v4037_v56 = vmul.f32 %v13719_v27, %v4029_v15  ;;  %v10547_v55 = vpop.eup %10546  ;;  %v4032_v30 = vmul.f32 %v10545_v1, %v14338_v41 }
0x2351   : > { %v7747_v17 = vmul.f32 %v13698_v24, %v13698_v24  ;;  %v13703_v39 = vpop.f32.mrb[254].mxu0  ;;  %7755 = vadd.xlane.f32.xlu1 %v7754_v12  ;;  %v5893_v12 = vmul.f32 0.03125, %v5877_v38  ;;  %10554 = vrsqrt.f32 %v5900_v11  ;;  %v4041_v49 = vmul.f32 %v13719_v27, %v4033_v58 }
0x2352   : > { %v13705_v14 = vpop.f32.mrb[255].mxu0  ;;  %v7750_v8 = vmul.f32 %v13703_v39, %v13703_v39  ;;  %v7769_v62 = vsel %vm499_vm1, %v7749_v40, 0.0  ;;  %v5894_v40 = vmul.f32 0.03125, %v5880_v20  ;;  %v4035_v60 = vmul.f32 %v10547_v55, %v14366_v28 }
0x2353   : > { %v7748_v33 = vmul.f32 %v13705_v14, %v13705_v14  ;;  %v7763_v50 = vsel %vm499_vm1, %v7747_v17, 0.0  ;;  %v5883_v17 = vpop.xlane.xlu1 %5882  ;;  %v5901_v7 = vadd.f32 1e-05, %v5893_v12  ;;  %v4040_v13 = vmul.f32 %v13719_v27, %v4032_v30 }
0x2354   : > { %7764 = vadd.xlane.f32.xlu0 %v7763_v50  ;;  %v7772_v25 = vsel %vm499_vm1, %v7750_v8, 0.0  ;;  %v5886_v50 = vpop.xlane.xlu0 %5885  ;;  %v4038_v8 = vmul.f32 %v13719_v27, %v4030_v63  ;;  %v5902_v2 = vadd.f32 1e-05, %v5894_v40  ;;  %v4043_v38 = vmul.f32 %v13719_v27, %v4035_v60 }
0x2355   : > { %v7766_v21 = vsel %vm499_vm1, %v7748_v33, 0.0  ;;  %v5899_v33 = vadd.f32 1e-05, %v5891_v57  ;;  %v5896_v48 = vmul.f32 0.03125, %v5886_v50  ;;  %v14367_v50 = vld [vmem:[#allocation26_spill] sm:$0xff] }
0x2356   : > { %7767 = vadd.xlane.f32.xlu1 %v7766_v21  ;;  %v4031_v21 = vmul.f32 %v10541_v18, %v14364_v46  ;;  %v10549_v46 = vpop.eup %10548 }
0x2357   : > { %10556 = vrsqrt.f32 %v5899_v33  ;;  %v5904_v5 = vadd.f32 1e-05, %v5896_v48  ;;  %v10551_v52 = vpop.eup %10550  ;;  %v4034_v35 = vmul.f32 %v10549_v46, %v14339_v23 }
0x2358   : > { %7770 = vadd.xlane.f32.xlu0 %v7769_v62  ;;  %v5895_v62 = vmul.f32 0.03125, %v5883_v17  ;;  %v4039_v4 = vmul.f32 %v13719_v27, %v4031_v21  ;;  %10558 = vrsqrt.f32 %v5901_v7  ;;  %v5914_v37 = vmul.f32 %v10551_v52, %v13298_v3 }
0x2359   : > { %10560 = vrsqrt.f32 %v5902_v2  ;;  %v10553_v41 = vpop.eup %10552  ;;  %v4042_v28 = vmul.f32 %v13719_v27, %v4034_v35 }
0x235a   : > { %7773 = vadd.xlane.f32.xlu1 %v7772_v25  ;;  %v5889_v25 = vpop.xlane.xlu1 %5888  ;;  %v5903_v34 = vadd.f32 1e-05, %v5895_v62  ;;  %10562 = vrsqrt.f32 %v5904_v5  ;;  %v4036_v6 = vmul.f32 %v10553_v41, %v14340_v9  ;;  %v5922_v0 = vmul.f32 %v13719_v27, %v5914_v37 }
0x235b   : > { %v5897_v61 = vmul.f32 0.03125, %v5889_v25  ;;  %v10555_v20 = vpop.eup %10554 }
0x235c   : > { %10564 = vrsqrt.f32 %v5903_v34  ;;  %v5916_v57 = vmul.f32 %v10555_v20, %v13295_v31  ;;  %v4044_v63 = vmul.f32 %v13719_v27, %v4036_v6 }
0x235d   : > { %v5905_v26 = vadd.f32 1e-05, %v5897_v61 }
0x235e   : > { %v5924_v9 = vmul.f32 %v13719_v27, %v5916_v57 }
0x235f   : > { %10566 = vrsqrt.f32 %v5905_v26 }
0x2361   : > { %v10557_v10 = vpop.eup %10556 }
0x2362   : > { %v10559_v23 = vpop.eup %10558  ;;  %v5915_v3 = vmul.f32 %v10557_v10, %v13302_v53 }
0x2363   : > { %v10561_v45 = vpop.eup %10560  ;;  %v5917_v11 = vmul.f32 %v10559_v23, %v13300_v47 }
0x2364   : > { %v5918_v18 = vmul.f32 %v10561_v45, %v13312_v16  ;;  %v10563_v12 = vpop.eup %10562  ;;  %v5923_v17 = vmul.f32 %v13719_v27, %v5915_v3 }
0x2365   : > { %v5920_v53 = vmul.f32 %v10563_v12, %v13309_v43  ;;  %v5925_v33 = vmul.f32 %v13719_v27, %v5917_v11 }
0x2366   : > { %v10565_v40 = vpop.eup %10564  ;;  %v5926_v31 = vmul.f32 %v13719_v27, %v5918_v18 }
0x2367   : > { %v5919_v15 = vmul.f32 %v10565_v40, %v14367_v50  ;;  %v5928_v47 = vmul.f32 %v13719_v27, %v5920_v53 }
0x2369   : > { %v10567_v42 = vpop.eup %10566  ;;  %v5927_v16 = vmul.f32 %v13719_v27, %v5919_v15 }
0x236b   : > { %4055 = vrot.lane.b32.xlu1 %v4038_v8, %s10907_s20  ;;  %v14368_v8 = vld [vmem:[#allocation29_spill] sm:$0xff] }
0x236c   : > { %v5921_v21 = vmul.f32 %v10567_v42, %v14368_v8 }
0x236e   : > { %4053 = vrot.lane.b32.xlu0 %v4037_v56, %s10907_s20  ;;  %v5929_v43 = vmul.f32 %v13719_v27, %v5921_v21 }
0x236f   : > { %4057 = vrot.lane.b32.xlu1 %v4039_v4, %s10907_s20 }
0x2372   : > { %4061 = vrot.lane.b32.xlu0 %v4041_v49, %s10907_s20 }
0x2373   : > { %4059 = vrot.lane.b32.xlu1 %v4040_v13, %s10907_s20 }
0x2376   : > { %4065 = vrot.lane.b32.xlu0 %v4043_v38, %s10907_s20 }
0x2377   : > { %4063 = vrot.lane.b32.xlu1 %v4042_v28, %s10907_s20 }
0x237a   : > { %5938 = vrot.lane.b32.xlu0 %v5922_v0, %s10905_s30 }
0x237b   : > { %4067 = vrot.lane.b32.xlu1 %v4044_v63, %s10907_s20 }
0x237e   : > { %5942 = vrot.lane.b32.xlu0 %v5924_v9, %s10905_s30 }
0x237f   : > { %5940 = vrot.lane.b32.xlu1 %v5923_v17, %s10905_s30 }
0x2382   : > { %5946 = vrot.lane.b32.xlu0 %v5926_v31, %s10905_s30 }
0x2383   : > { %5944 = vrot.lane.b32.xlu1 %v5925_v33, %s10905_s30 }
0x2386   : > { %5950 = vrot.lane.b32.xlu0 %v5928_v47, %s10905_s30 }
0x2387   : > { %5948 = vrot.lane.b32.xlu1 %v5927_v16, %s10905_s30 }
0x238b   : > { %5952 = vrot.lane.b32.xlu1 %v5929_v43, %s10905_s30 }
0x238d   : > { %v10128_v13 = vpop.f32.mrb[12].mxu1 }
0x238e   : > { %v7933_v26 = vadd.f32 %v10128_v13, %v13546_v22  ;;  %v7916_v38 = vpop.f32.mrb[13].mxu1 }
0x238f   : > { %v7931_v28 = vadd.f32 %v7916_v38, %v13534_v29  ;;  %v10129_v0 = vpop.f32.mrb[14].mxu1 }
0x2390   : > { %7937 = vst.msk [vmem:[%s11202_s3 + $0x70] sm:$0xff] %vm499_vm1, %v7933_v26  ;;  %v7934_v22 = vadd.f32 %v10129_v0, %v13549_v32  ;;  %v7919_v63 = vpop.f32.mrb[15].mxu1 }
0x2391   : > { %7935 = vst.msk [vmem:[%s11202_s3 + $0x60] sm:$0xff] %vm499_vm1, %v7931_v28  ;;  %v7932_v12 = vadd.f32 %v7919_v63, %v13537_v36 }
0x2392   : > { %7938 = vst.msk [vmem:[%s11202_s3 + $0x78] sm:$0xff] %vm499_vm1, %v7934_v22 }
0x2393   : > { %7936 = vst.msk [vmem:[%s11202_s3 + $0x68] sm:$0xff] %vm499_vm1, %v7932_v12  ;;  %vm5962_vm1 = vcmask 785920  }
0x23d8   : > { %v7759_v1 = vpop.xlane.xlu0 %7758 }
0x23d9   : > { %v7777_v7 = vmul.f32 0.03125, %v7759_v1 }
0x23da   : > { %v7762_v2 = vpop.xlane.xlu1 %7761 }
0x23db   : > { %v7785_v48 = vadd.f32 1e-05, %v7777_v7  ;;  %v7778_v62 = vmul.f32 0.03125, %v7762_v2 }
0x23dc   : > { %v7753_v56 = vpop.xlane.xlu0 %7752 }
0x23dd   : > { %10568 = vrsqrt.f32 %v7785_v48  ;;  %v7786_v58 = vadd.f32 1e-05, %v7778_v62  ;;  %v7775_v55 = vmul.f32 0.03125, %v7753_v56 }
0x23de   : > { %v7756_v25 = vpop.xlane.xlu1 %7755 }
0x23df   : > { %10570 = vrsqrt.f32 %v7786_v58  ;;  %v7783_v4 = vadd.f32 1e-05, %v7775_v55  ;;  %v7776_v30 = vmul.f32 0.03125, %v7756_v25 }
0x23e1   : > { %10572 = vrsqrt.f32 %v7783_v4  ;;  %v7784_v46 = vadd.f32 1e-05, %v7776_v30  ;;  %v7765_v5 = vpop.xlane.xlu0 %7764 }
0x23e2   : > { %v7779_v34 = vmul.f32 0.03125, %v7765_v5 }
0x23e3   : > { %10574 = vrsqrt.f32 %v7784_v46  ;;  %v7768_v61 = vpop.xlane.xlu1 %7767 }
0x23e4   : > { %v7787_v49 = vadd.f32 1e-05, %v7779_v34  ;;  %v7780_v60 = vmul.f32 0.03125, %v7768_v61 }
0x23e5   : > { %v7771_v52 = vpop.xlane.xlu0 %7770 }
0x23e6   : > { %10576 = vrsqrt.f32 %v7787_v49  ;;  %v7788_v35 = vadd.f32 1e-05, %v7780_v60  ;;  %v7781_v41 = vmul.f32 0.03125, %v7771_v52 }
0x23e7   : > { %v10569_v37 = vpop.eup %10568  ;;  %v7774_v20 = vpop.xlane.xlu1 %7773 }
0x23e8   : > { %10578 = vrsqrt.f32 %v7788_v35  ;;  %v7789_v6 = vadd.f32 1e-05, %v7781_v41  ;;  %v7782_v10 = vmul.f32 0.03125, %v7774_v20  ;;  %v7801_v23 = vmul.f32 %v10569_v37, %v13677_v59 }
0x23e9   : > { %v10571_v57 = vpop.eup %10570  ;;  %v4054_v45 = vpop.permute.xlu0 %4053 }
0x23ea   : > { %10580 = vrsqrt.f32 %v7789_v6  ;;  %v7790_v29 = vadd.f32 1e-05, %v7782_v10  ;;  %4078 = vst.msk [vmem:[%s11200_s9] sm:$0xff] %vm4077_vm3, %v4054_v45  ;;  %v7809_v3 = vmul.f32 %v13719_v27, %v7801_v23  ;;  %v7802_v59 = vmul.f32 %v10571_v57, %v13683_v54 }
0x23eb   : > { %v10573_v9 = vpop.eup %10572  ;;  %v4056_v18 = vpop.permute.xlu1 %4055 }
0x23ec   : > { %10582 = vrsqrt.f32 %v7790_v29  ;;  %4079 = vst.msk [vmem:[%s11200_s9 + $0x8] sm:$0xff] %vm4077_vm3, %v4056_v18  ;;  %7827 = vrot.lane.b32.xlu0 %v7809_v3, %s10903_s26  ;;  %v7810_v32 = vmul.f32 %v13719_v27, %v7802_v59  ;;  %v7799_v17 = vmul.f32 %v10573_v9, %v13681_v44 }
0x23ed   : > { %v10575_v11 = vpop.eup %10574  ;;  %v4062_v40 = vpop.permute.xlu0 %4061 }
0x23ee   : > { %4082 = vst.msk [vmem:[%s11200_s9 + $0x20] sm:$0xff] %vm4077_vm3, %v4062_v40  ;;  %7829 = vrot.lane.b32.xlu1 %v7810_v32, %s10903_s26  ;;  %v7807_v36 = vmul.f32 %v13719_v27, %v7799_v17  ;;  %v7800_v54 = vmul.f32 %v10575_v11, %v13689_v51 }
0x23ef   : > { %v4058_v31 = vpop.permute.xlu1 %4057 }
0x23f0   : > { %v10577_v53 = vpop.eup %10576  ;;  %4080 = vst.msk [vmem:[%s11200_s9 + $0x10] sm:$0xff] %vm4077_vm3, %v4058_v31  ;;  %7823 = vrot.lane.b32.xlu0 %v7807_v36, %s10903_s26  ;;  %v7808_v44 = vmul.f32 %v13719_v27, %v7800_v54 }
0x23f1   : > { %v4066_v33 = vpop.permute.xlu0 %4065  ;;  %v7803_v50 = vmul.f32 %v10577_v53, %v13698_v24 }
0x23f2   : > { %v10579_v15 = vpop.eup %10578  ;;  %4084 = vst.msk [vmem:[%s11200_s9 + $0x30] sm:$0xff] %vm4077_vm3, %v4066_v33  ;;  %7825 = vrot.lane.b32.xlu1 %v7808_v44, %s10903_s26 }
0x23f3   : > { %v4060_v51 = vpop.permute.xlu1 %4059  ;;  %v7811_v42 = vmul.f32 %v13719_v27, %v7803_v50  ;;  %v7804_v47 = vmul.f32 %v10579_v15, %v13705_v14 }
0x23f4   : > { %v10581_v24 = vpop.eup %10580  ;;  %4081 = vst.msk [vmem:[%s11200_s9 + $0x18] sm:$0xff] %vm4077_vm3, %v4060_v51 }
0x23f5   : > { %10742 = shalt.err (!%p10739_p2)
}
0x23f6   : > { %s10743_s28 = scalar_lea.hbm %s13809_s13, 2048  ;;  %s10747_s15 = scalar_lea.hbm %s14369_s6, 4096 }
0x23f7   : > { %p10744_p10 = scmp.ne.s32.totalorder %s13809_s13, %s10743_s28  ;;  %p10748_p4 = scmp.lt.u32.totalorder %s13809_s13, %s14369_s6 }
0x23f8   : > { %p10749_p3 = scmp.lt.u32.totalorder %s10747_s15, %s10743_s28  ;;  %p10751_p1 = scmp.lt.u32.totalorder %s10743_s28, %s13809_s13 }
0x23f9   : > { %p10745_p6 = pnand %p10744_p10, %p14370_p0 }
0x23fa   : > { %p10750_p7 = por %p10749_p3, %p10748_p4 }
0x23fb   : > { %p10746_p9 = pneg %p10745_p6 }
0x23fc   : > { %p10752_p11 = por %p10751_p1, %p10750_p7 }
0x23fe   : > { %p10753_p12 = pnand %p10752_p11, %p10746_p9 }
0x2400   : > { %10756 = shalt.err (!%p10753_p12)
}
0x2401   : > { %s10910_s20 = smov 128   ;;  %s10911_s0 = smov 8   ;;  %7831 = vrot.lane.b32.xlu0 %v7811_v42, %s10903_s26  ;;  %v5939_v14 = vpop.permute.xlu0 %5938  ;;  %v7812_v16 = vmul.f32 %v13719_v27, %v7804_v47  ;;  %v7805_v8 = vmul.f32 %v10581_v24, %v13696_v19  ;;  %v10583_v21 = vpop.eup %10582  ;;  %vm7847_vm6 = vcmask 1048320  }
0x2402   : > { %10223 = dma.vmem_to_hbm [thread:$0]  (%p14370_p0), %s13811_s29, 2048, %s13809_s13, %s13817_s12, %s10910_s20, %s10910_s20, %s10911_s0   ;;  %v4064_v43 = vpop.permute.xlu1 %4063  ;;  %v7806_v7 = vmul.f32 %v10583_v21, %v13703_v39 }
0x2403   : > { %5963 = vst.msk [vmem:[%s11200_s9] sm:$0xff] %vm5962_vm1, %v5939_v14  ;;  %7833 = vrot.lane.b32.xlu1 %v7812_v16, %s10903_s26  ;;  %v7813_v1 = vmul.f32 %v13719_v27, %v7805_v8  ;;  %s8466_s8 = sshll.u32 %s10875_s21, 3  ;;  %s14371_s18 = sld [smem:[#allocation19_spill]] }
0x2404   : > { %4083 = vst.msk [vmem:[%s11200_s9 + $0x28] sm:$0xff] %vm4077_vm3, %v4064_v43  ;;  %v7814_v2 = vmul.f32 %v13719_v27, %v7806_v7  ;;  %s7960_s13 = sshll.u32 %s11200_s9, 4  ;;  %s7940_s10 = scalar_lea.sflag [#allocation4], %s11175_s11  ;;  %s13895_s13 = int_to_ptr.vmem [resolvable:$true] %s7960_s13 }
0x2405   : > { %7835 = vrot.lane.b32.xlu0 %v7813_v1, %s10903_s26  ;;  %v5943_v19 = vpop.permute.xlu0 %5942  ;;  %s10757_s14 = scalar_lea.vmem %s13895_s13, 1024  ;;  %s10912_s28 = smov [#allocation8]  }
0x2406   : > { %5965 = vst.msk [vmem:[%s11200_s9 + $0x10] sm:$0xff] %vm5962_vm1, %v5943_v19  ;;  %v4068_v48 = vpop.permute.xlu1 %4067  ;;  %p10758_p0 = scmp.ne.s32.totalorder %s13895_s13, %s10757_s14  ;;  %s10761_s2 = sshll.u32 %s10912_s28, 4  ;;  %s10762_s2 = int_to_ptr.vmem [resolvable:$false] %s10761_s2 }
0x2407   : > { %7837 = vrot.lane.b32.xlu1 %v7814_v2, %s10903_s26  ;;  %4085 = vst.msk [vmem:[%s11200_s9 + $0x38] sm:$0xff] %vm4077_vm3, %v4068_v48  ;;  %s8467_s26 = sshll.u32 %s10879_s22, 4  ;;  %s14372_s22 = sld [smem:[#allocation90_spill]] }
0x2408   : > { %s7957_s29 = sadd.s32 %s8467_s26, %s8466_s8  ;;  %s10763_s4 = scalar_lea.vmem %s10762_s2, 2048 }
0x2409   : > { %v5947_v62 = vpop.permute.xlu0 %5946  ;;  %s8468_s5 = sshll.u32 %s7957_s29, 7  ;;  %p14374_p13 = scmp.ne.s32.totalorder %s14371_s18, 0 }
0x240a   : > { %5967 = vst.msk [vmem:[%s11200_s9 + $0x20] sm:$0xff] %vm5962_vm1, %v5947_v62  ;;  %v5941_v39 = vpop.permute.xlu1 %5940  ;;  %p10764_p2 = scmp.lt.s32.totalorder %s13895_s13, %s10762_s2  ;;  %p10765_p10 = scmp.lt.s32.totalorder %s10763_s4, %s10757_s14 }
0x240b   : > { %5964 = vst.msk [vmem:[%s11200_s9 + $0x8] sm:$0xff] %vm5962_vm1, %v5941_v39  ;;  %p10759_p8 = pnand %p10758_p0, %p14374_p13 }
0x240c   : > { %p10766_p6 = por %p10765_p10, %p10764_p2 }
0x240d   : > { %v5951_v56 = vpop.permute.xlu0 %5950  ;;  %s14373_s7 = smov %s14372_s22  ;;  %s13893_s27 = scalar_lea.hbm %s14372_s22, %s8468_s5 }
0x240e   : > { %5969 = vst.msk [vmem:[%s11200_s9 + $0x30] sm:$0xff] %vm5962_vm1, %v5951_v56  ;;  %v5945_v27 = vpop.permute.xlu1 %5944  ;;  %p10760_p5 = pneg %p10759_p8 }
0x240f   : > { %5966 = vst.msk [vmem:[%s11200_s9 + $0x18] sm:$0xff] %vm5962_vm1, %v5945_v27 }
0x2410   : > { %p10767_p9 = pnand %p10766_p6, %p10760_p5 }
0x2412   : > { %v5949_v58 = vpop.permute.xlu1 %5948 }
0x2413   : > { %5968 = vst.msk [vmem:[%s11200_s9 + $0x28] sm:$0xff] %vm5962_vm1, %v5949_v58 }
0x2416   : > { %v5953_v55 = vpop.permute.xlu1 %5952 }
0x2417   : > { %5970 = vst.msk [vmem:[%s11200_s9 + $0x38] sm:$0xff] %vm5962_vm1, %v5953_v55 }
0x245e   : > { %v7828_v25 = vpop.permute.xlu0 %7827 }
0x245f   : > { %7850 = vst.msk [vmem:[%s11200_s9 + $0x10] sm:$0xff] %vm7847_vm6, %v7828_v25 }
0x2460   : > { %v7830_v4 = vpop.permute.xlu1 %7829 }
0x2461   : > { %7851 = vst.msk [vmem:[%s11200_s9 + $0x18] sm:$0xff] %vm7847_vm6, %v7830_v4 }
0x2462   : > { %v7824_v30 = vpop.permute.xlu0 %7823 }
0x2463   : > { %7848 = vst.msk [vmem:[%s11200_s9] sm:$0xff] %vm7847_vm6, %v7824_v30 }
0x2464   : > { %v7826_v46 = vpop.permute.xlu1 %7825 }
0x2465   : > { %7849 = vst.msk [vmem:[%s11200_s9 + $0x8] sm:$0xff] %vm7847_vm6, %v7826_v46 }
0x2473   : > { %v7832_v5 = vpop.permute.xlu0 %7831 }
0x2474   : > { %7852 = vst.msk [vmem:[%s11200_s9 + $0x20] sm:$0xff] %vm7847_vm6, %v7832_v5 }
0x2475   : > { %v7834_v34 = vpop.permute.xlu1 %7833 }
0x2476   : > { %7853 = vst.msk [vmem:[%s11200_s9 + $0x28] sm:$0xff] %vm7847_vm6, %v7834_v34 }
0x2477   : > { %v7836_v61 = vpop.permute.xlu0 %7835 }
0x2478   : > { %7854 = vst.msk [vmem:[%s11200_s9 + $0x30] sm:$0xff] %vm7847_vm6, %v7836_v61 }
0x2479   : > { %v7838_v49 = vpop.permute.xlu1 %7837 }
0x247a   : > { %7855 = vst.msk [vmem:[%s11200_s9 + $0x38] sm:$0xff] %vm7847_vm6, %v7838_v49 }
0x247b   : > { %10770 = shalt.err (!%p10767_p9)
}
0x247c   : > { %s10771_s9 = scalar_lea.hbm %s13893_s27, 1024  ;;  %s10775_s30 = scalar_lea.hbm %s14373_s7, 4096 }
0x247d   : > { %p10772_p4 = scmp.ne.s32.totalorder %s13893_s27, %s10771_s9  ;;  %p10776_p1 = scmp.lt.u32.totalorder %s13893_s27, %s14373_s7 }
0x247e   : > { %p10777_p11 = scmp.lt.u32.totalorder %s10775_s30, %s10771_s9  ;;  %p10779_p0 = scmp.lt.u32.totalorder %s10771_s9, %s13893_s27 }
0x247f   : > { %p10773_p3 = pnand %p10772_p4, %p14374_p13 }
0x2480   : > { %p10778_p12 = por %p10777_p11, %p10776_p1 }
0x2481   : > { %p10774_p7 = pneg %p10773_p3 }
0x2482   : > { %p10780_p8 = por %p10779_p0, %p10778_p12 }
0x2484   : > { %p10781_p5 = pnand %p10780_p8, %p10774_p7 }
0x2486   : > { %10784 = shalt.err (!%p10781_p5)
}
0x2487   : > { %10222 = dma.vmem_to_hbm [thread:$0]  (%p14374_p13), %s13895_s13, 1024, %s13893_s27, %s7940_s10, %s10910_s20, %s10910_s20, %s10911_s0  }
0x2488 PF: > { %s14375_s29 = sld [smem:[#allocation17_spill]]  ;;  %s14376_s5 = sld [smem:[#allocation20_spill]] }
0x2489   : > { %p10247_p2 = scmp.ge.s32.totalorder %s10891_s25, 2 }
0x248e   : > { %s7991_s21 = sand.u32 1, %s14375_s29   ;;  %p14377_p10 = scmp.ne.s32.totalorder %s14376_s5, 0 }
0x248f   : > { %s7992_s12 = scalar_lea.sflag [#allocation4], %s7991_s21 }
0x2490   : > { %p10238_p6 = pnand %p10247_p2, %p14377_p10 }
0x2492   : > { %10842 = dma.done.wait (!%p10238_p6), %s7992_s12, 1024  }
0x2493   : > { %10844 = vsyncadd (!%p10238_p6), %s7992_s12, 4294966272  ;;  %s14378_s18 = sld [smem:[#allocation16_spill]]  ;;  %s14379_s22 = sld [smem:[#allocation21_spill]] }
0x2499   : > { %s8000_s14 = sand.u32 1, %s14378_s18   ;;  %p14380_p9 = scmp.ne.s32.totalorder %s14379_s22, 0 }
0x249a   : > { %s8001_s11 = scalar_lea.sflag [#allocation10], %s8000_s14 }
0x249b   : > { %p10241_p4 = pnand %p10247_p2, %p14380_p9 }
0x249d   : > { %10846 = dma.done.wait (!%p10241_p4), %s8001_s11, 2048  }
0x249e   : > { %10848 = vsyncadd (!%p10241_p4), %s8001_s11, 4294965248  ;;  %s27_s25 = sadd.s32 1, %s10891_s25   ;;  %s14381_s20 = sld [smem:[#allocation24_spill]] }
0x249f   : > { %p24_p13 = scmp.ge.s32.totalorder %s27_s25, 6   ;;  %s14382_s0 = sld [smem:[#allocation18_spill]] }
0x24a0   : > { %s14383_s13 = sld [smem:[#allocation25_spill]]  ;;  %s14384_s27 = sld [smem:[#allocation22_spill]] }
0x24a1   : > { %s14385_s10 = sld [smem:[#allocation23_spill]]  ;;  %s14386_s15 = smov %s10855_s16 }
0x24a2   : > { %s14387_s16 = smov %s10859_s17  ;;  %s14389_s18 = smov %s10867_s19 }
0x24a3   : > { %s14392_s21 = smov %s10883_s23  ;;  %s14393_s22 = smov %s10887_s24 }
0x24a4   : > { %s14388_s17 = smov %s14381_s20  ;;  %26 = sbr.rel (!%p24_p13) target bundleno = 18 (0x12), region = 115 }
0x24a5   : > { %s14390_s19 = smov %s14382_s0 }
0x24a6   : > { %s14391_s20 = smov %s14383_s13  ;;  %s14394_s23 = smov %s14384_s27 }
0x24a7   : > { %s14395_s24 = smov %s14385_s10 }
0x24ab   :  { %8006 = vsyncpa [#allocation3], 1 }
0x24ac   :  { %8008 = vsyncpa [#allocation3 + $0x1], 1 }
0x24ad   :  { %8009 = vsyncpa [#allocation6], 1 }
0x24ae   :  { %8011 = vsyncpa [#allocation6 + $0x1], 1 }
0x24af   :  { %8012 = vsyncpa [#allocation4], 1 }
0x24b0   :  { %8014 = vsyncpa [#allocation4 + $0x1], 1 }
0x24b1   :  { %8015 = vsyncpa [#allocation10], 1 }
0x24b2   :  { %8017 = vsyncpa [#allocation10 + $0x1], 1 }

</bundles_post_ra>
